<compile_context>
chip_gen: v7x
topology: tpu7x:2x2x1
jax: 0.10.0
libtpu: 0.0.40
codegen_flags: <defaults>
</compile_context>

<pallas_src>
import functools

import jax
import jax.numpy as jnp
from jax import lax
from jax.experimental import pallas as pl
from jax.experimental.pallas import tpu as pltpu


def _attention_fusion_kernel(x_ref, w1t_ref, b1w2_ref, b2_ref, o_ref, *, total_b):
    # x_ref   : (BB, D, T)   native layout (D on sublanes, T on lanes)
    # w1t_ref : (64, D)      first Linear weight, pre-transposed
    # b1w2_ref: (64, 2)      column 0 = b1, column 1 = w2
    # b2_ref  : (1, 1) SMEM  scalar bias of the second Linear
    # o_ref   : (BB, D)
    BB, D, T = x_ref.shape

    # ---- Linear(D, 64): hT[b, k, t] = sum_d w1[d, k] * x[b, d, t] -----------
    # Batched MXU matmul contracting x's native sublane axis (D): no transpose
    # of the x tile, and T stays on the lane axis end-to-end.
    w1t_b = jnp.broadcast_to(w1t_ref[...], (BB, 64, D))
    hT = lax.dot_general(
        w1t_b, x_ref[...],
        dimension_numbers=(((2,), (1,)), ((0,), (0,))),
        preferred_element_type=jnp.float32)                      # (BB, 64, T) f32

    b1 = b1w2_ref[:, 0:1]                                        # (64, 1) f32
    w2 = b1w2_ref[:, 1:2]                                        # (64, 1) f32
    hT = jnp.maximum(hT + b1[None, :, :], 0.0)                   # bias + ReLU

    # ---- Linear(64, 1): VPU multiply + sublane reduce ------------------------
    # (avoids a degenerate N=1 MXU matmul; scores come out with T on lanes)
    s = jnp.sum(hT * w2[None, :, :], axis=1) + b2_ref[0, 0]      # (BB, T)

    # Ragged batch tail: rows past the true batch size hold garbage; keep them
    # finite so exp() cannot emit inf/NaN noise (their outputs are dropped by
    # the masked writeback anyway).  Traced only when B % BB != 0.
    if total_b % BB != 0:
        row = pl.program_id(0) * BB + lax.broadcasted_iota(jnp.int32, (BB, 1), 0)
        s = jnp.where(row < total_b, s, 0.0)

    # ---- numerically-stable softmax over T (lane axis), exact f32 divide ----
    s = s - jnp.max(s, axis=-1, keepdims=True)
    e = jnp.exp(s)                                               # EUP
    inv = 1.0 / jnp.sum(e, axis=-1, keepdims=True)               # (BB, 1), exact
    wgt = e * inv                                                # (BB, T)

    # ---- weighted sum over T: out[b, d] = sum_t wgt[b, t] * x[b, d, t] ------
    # Re-read x from the already-resident VMEM ref (bounds the live range).
    xw = x_ref[...].astype(jnp.float32) * wgt[:, None, :]        # (BB, D, T) f32
    o_ref[...] = jnp.sum(xw, axis=-1).astype(o_ref.dtype)        # (BB, D)


def _round_up(n, m):
    return -(-n // m) * m


def _default_vmem_limit_bytes():
    """Per-generation scoped-VMEM budget: half of physical, capped at 100 MiB.

    v5e/v6e (128 MiB physical) -> 64 MiB, v7x (64 MiB physical) -> 32 MiB."""
    cap = 64 * 1024 * 1024  # conservative fallback (v7x physical VMEM)
    try:
        cap = int(getattr(pltpu.get_tpu_info(), "vmem_capacity_bytes", cap))
    except Exception:
        pass
    return max(32 * 1024 * 1024, min(cap // 2, 100 * 1024 * 1024))


def _pick_block_b(B, D, T, x_itemsize, vmem_limit_bytes):
    """Largest batch block whose working set fits the VMEM budget, kept a
    multiple of 8 (sublanes) and to >= 2 grid blocks (v7x megacore)."""
    rT = _round_up(T, 128)          # lane padding of T-minor tiles
    rD = _round_up(D, 128)          # lane padding of D-minor tiles
    per_row = (
        2 * D * rT * x_itemsize     # double-buffered x tile
        + D * rT * 4                # f32 view of x for the weighted sum
        + 64 * rT * 4               # hT (f32)
        + 64 * rT * 4               # ReLU / temporaries headroom
        + 64 * rD * x_itemsize      # broadcast w1^T matmul operand
        + 2 * rD * 4                # double-buffered output tile
        + 8 * rT * 4                # scores / exp / weights
    )
    fixed = 2 * 64 * rD * x_itemsize + 4 * 128 * 4  # small weight blocks
    budget = int(vmem_limit_bytes * 0.6) - fixed    # pipelining headroom
    bb = max(8, budget // per_row)
    if B > 8:
        # Keep at least two grid blocks so ("parallel",) can shard batch
        # blocks across both v7x TensorCores (one extra ~0.35us step at most).
        bb = min(bb, _round_up(pl.cdiv(B, 2), 8))
    if bb >= B:
        return B
    return max(8, (bb // 8) * 8)


def attention_fusion(x, w1, b1, w2, b2, *, block_b=None, vmem_limit_bytes=None):
    """AttentionFusion forward.

    x: (B, D, T) float32/bfloat16, w1: (D, 64), b1: (64,), w2: (64, 1), b2: (1,).
    Returns (B, D) float32.
    """
    B, D, T = x.shape
    if vmem_limit_bytes is None:
        vmem_limit_bytes = _default_vmem_limit_bytes()
    x_itemsize = jnp.dtype(x.dtype).itemsize
    BB = block_b if block_b is not None else _pick_block_b(
        B, D, T, x_itemsize, vmem_limit_bytes)
    BB = min(BB, B)
    nb = pl.cdiv(B, BB)

    # Tiny parameter massaging (a few KiB, done once outside the kernel):
    #  * w1 pre-transposed to (64, D) so the in-kernel matmul contracts x's
    #    native sublane axis without any tile transpose,
    #  * b1 / w2 fused into one (64, 2) block, b2 as a (1, 1) SMEM scalar.
    w1t = jnp.asarray(w1, dtype=x.dtype).T                                   # (64, D)
    b1w2 = jnp.stack([jnp.asarray(b1, jnp.float32).reshape(64),
                      jnp.asarray(w2, jnp.float32).reshape(64)], axis=1)     # (64, 2)
    b2_sc = jnp.asarray(b2, jnp.float32).reshape(1, 1)

    kernel = functools.partial(_attention_fusion_kernel, total_b=B)

    out = pl.pallas_call(
        kernel,
        out_shape=jax.ShapeDtypeStruct((B, D), jnp.float32),
        grid=(nb,),
        in_specs=[
            pl.BlockSpec((BB, D, T), lambda b: (b, 0, 0)),        # native (B, D, T)
            pl.BlockSpec((64, D), lambda b: (0, 0)),              # w1^T (constant)
            pl.BlockSpec((64, 2), lambda b: (0, 0)),              # [b1 | w2] (constant)
            pl.BlockSpec(memory_space=pltpu.MemorySpace.SMEM),    # b2 scalar
        ],
        out_specs=pl.BlockSpec((BB, D), lambda b: (b, 0)),
        compiler_params=pltpu.CompilerParams(
            dimension_semantics=("parallel",),                    # batch blocks
            vmem_limit_bytes=int(vmem_limit_bytes),
        ),
    )(x, w1t, b1w2, b2_sc)
    return out


def _reference(x, w1, b1, w2, b2):
    """Pure-JAX f32 reference (matmul at HIGHEST precision)."""
    xt = jnp.transpose(x.astype(jnp.float32), (0, 2, 1))                     # (B, T, D)
    w1f = jnp.asarray(w1, jnp.float32)
    h = jnp.einsum("btd,dk->btk", xt, w1f, precision=lax.Precision.HIGHEST)
    h = jnp.maximum(h + jnp.asarray(b1, jnp.float32), 0.0)                   # (B, T, 64)
    s = jnp.sum(h * jnp.asarray(w2, jnp.float32).reshape(1, 1, 64), axis=-1)
    s = s + jnp.asarray(b2, jnp.float32)[0]                                  # (B, T)
    w = jax.nn.softmax(s, axis=-1)                                           # (B, T)
    return jnp.sum(w[:, :, None] * xt, axis=1)                               # (B, D)


if __name__ == "__main__":
    # Small but lane-dense shapes (minor axes multiples of 128 so VMEM tiles,
    # VPU/XLU ops and output stores run at full lane occupancy).
    # B=48 -> two parallel batch blocks of 24 (exercises the multi-block grid).
    B, D, T = 48, 128, 128

    key = jax.random.PRNGKey(0)
    kx, k1, k2, k3, k4 = jax.random.split(key, 5)

    # x and w1 stored in bfloat16 (halves HBM traffic); biases stay f32.
    x = jax.random.normal(kx, (B, D, T), dtype=jnp.float32).astype(jnp.bfloat16)
    w1 = (jax.random.normal(k1, (D, 64), dtype=jnp.float32) * 0.1).astype(jnp.bfloat16)
    b1 = jax.random.normal(k2, (64,), dtype=jnp.float32) * 0.1
    w2 = jax.random.normal(k3, (64, 1), dtype=jnp.float32) * 0.1
    b2 = jax.random.normal(k4, (1,), dtype=jnp.float32) * 0.1

    out = attention_fusion(x, w1, b1, w2, b2)
    out = jax.block_until_ready(out)

    ref = _reference(x, w1, b1, w2, b2)
    assert out.shape == (B, D)
    assert jnp.allclose(out, ref, atol=2e-3, rtol=2e-3), (
        "mismatch vs reference: max abs err = %g"
        % float(jnp.max(jnp.abs(out - ref))))

    print("KERNEL_OK")
</pallas_src>

<mosaic_0001>
module attributes {stable_mosaic.version = 11 : i64} {
  func.func @_attention_fusion_kernel(%arg0: i32, %arg1: memref<24x128x128xbf16, #tpu.memory_space<vmem>>, %arg2: memref<64x128xbf16, #tpu.memory_space<vmem>>, %arg3: memref<64x2xf32, #tpu.memory_space<vmem>>, %arg4: memref<1x1xf32, #tpu.memory_space<smem>>, %arg5: memref<24x128xf32, #tpu.memory_space<vmem>>) attributes {dimension_semantics = [#tpu.dimension_semantics<parallel>], iteration_bounds = array<i64: 2>, scalar_prefetch = 0 : i64, scratch_operands = 0 : i64, tpu.core_type = #tpu.core_type<tc>, window_params = [{transform_indices = @transform_0, window_bounds = array<i64: 24, 128, 128>}, {pipeline_mode = #tpu.pipeline_mode<synchronous>, transform_indices = @transform_1, window_bounds = array<i64: 64, 128>}, {pipeline_mode = #tpu.pipeline_mode<synchronous>, transform_indices = @transform_2, window_bounds = array<i64: 64, 2>}, {transform_indices = @transform_3, window_bounds = array<i64: 1, 1>}, {transform_indices = @transform_4, window_bounds = array<i64: 24, 128>}]} {
    %c0 = arith.constant 0 : index
    %c0_0 = arith.constant 0 : index
    %0 = vector.load %arg2[%c0, %c0_0] : memref<64x128xbf16, #tpu.memory_space<vmem>>, vector<64x128xbf16>
    %1 = vector.shape_cast %0 : vector<64x128xbf16> to vector<1x64x128xbf16>
    %2 = vector.broadcast %1 : vector<1x64x128xbf16> to vector<24x64x128xbf16>
    %c0_1 = arith.constant 0 : index
    %c0_2 = arith.constant 0 : index
    %c0_3 = arith.constant 0 : index
    %3 = vector.load %arg1[%c0_1, %c0_2, %c0_3] : memref<24x128x128xbf16, #tpu.memory_space<vmem>>, vector<24x128x128xbf16>
    %cst = arith.constant dense<0.000000e+00> : vector<24x64x128xf32>
    %4 = tpu.matmul %2, %3, %cst {dimension_numbers = #tpu.dot_dimension_numbers<[2], [1], [1], [2], [0, 0, 0, 1, 1, 2], [0], [0]>} : vector<24x64x128xbf16>, vector<24x128x128xbf16>, vector<24x64x128xf32> -> vector<24x64x128xf32>
    %c0_4 = arith.constant 0 : index
    %c0_5 = arith.constant 0 : index
    %5 = vector.load %arg3[%c0_4, %c0_5] : memref<64x2xf32, #tpu.memory_space<vmem>>, vector<64x1xf32>
    %c0_6 = arith.constant 0 : index
    %c1 = arith.constant 1 : index
    %6 = vector.load %arg3[%c0_6, %c1] : memref<64x2xf32, #tpu.memory_space<vmem>>, vector<64x1xf32>
    %7 = vector.shape_cast %5 : vector<64x1xf32> to vector<1x64x1xf32>
    %8 = vector.broadcast %7 : vector<1x64x1xf32> to vector<24x64x128xf32>
    %9 = arith.addf %4, %8 : vector<24x64x128xf32>
    %cst_7 = arith.constant 0.000000e+00 : f32
    %10 = vector.broadcast %cst_7 : f32 to vector<24x64x128xf32>
    %11 = arith.maximumf %9, %10 : vector<24x64x128xf32>
    %12 = vector.shape_cast %6 : vector<64x1xf32> to vector<1x64x1xf32>
    %13 = vector.broadcast %12 : vector<1x64x1xf32> to vector<24x64x128xf32>
    %14 = arith.mulf %11, %13 : vector<24x64x128xf32>
    %cst_8 = arith.constant dense<0.000000e+00> : vector<24x128xf32>
    %15 = vector.multi_reduction <add>, %14, %cst_8 [1] : vector<24x64x128xf32> to vector<24x128xf32>
    %c0_9 = arith.constant 0 : index
    %c0_10 = arith.constant 0 : index
    %16 = memref.load %arg4[%c0_9, %c0_10] : memref<1x1xf32, #tpu.memory_space<smem>>
    %17 = vector.broadcast %16 : f32 to vector<24x128xf32>
    %18 = arith.addf %15, %17 : vector<24x128xf32>
    %cst_11 = arith.constant dense<0xFF800000> : vector<24xf32>
    %19 = vector.multi_reduction <maximumf>, %18, %cst_11 [1] : vector<24x128xf32> to vector<24xf32>
    %20 = vector.shape_cast %19 : vector<24xf32> to vector<24x1xf32>
    %21 = vector.broadcast %20 : vector<24x1xf32> to vector<24x128xf32>
    %22 = arith.subf %18, %21 : vector<24x128xf32>
    %23 = math.exp %22 : vector<24x128xf32>
    %cst_12 = arith.constant dense<0.000000e+00> : vector<24xf32>
    %24 = vector.multi_reduction <add>, %23, %cst_12 [1] : vector<24x128xf32> to vector<24xf32>
    %25 = vector.shape_cast %24 : vector<24xf32> to vector<24x1xf32>
    %cst_13 = arith.constant 1.000000e+00 : f32
    %26 = vector.broadcast %cst_13 : f32 to vector<24x1xf32>
    %27 = arith.divf %26, %25 : vector<24x1xf32>
    %28 = vector.broadcast %27 : vector<24x1xf32> to vector<24x128xf32>
    %29 = arith.mulf %23, %28 : vector<24x128xf32>
    %c0_14 = arith.constant 0 : index
    %c0_15 = arith.constant 0 : index
    %c0_16 = arith.constant 0 : index
    %30 = vector.load %arg1[%c0_14, %c0_15, %c0_16] : memref<24x128x128xbf16, #tpu.memory_space<vmem>>, vector<24x128x128xbf16>
    %31 = arith.extf %30 : vector<24x128x128xbf16> to vector<24x128x128xf32>
    %32 = vector.shape_cast %29 : vector<24x128xf32> to vector<24x1x128xf32>
    %33 = vector.broadcast %32 : vector<24x1x128xf32> to vector<24x128x128xf32>
    %34 = arith.mulf %31, %33 : vector<24x128x128xf32>
    %cst_17 = arith.constant dense<0.000000e+00> : vector<24x128xf32>
    %35 = vector.multi_reduction <add>, %34, %cst_17 [2] : vector<24x128x128xf32> to vector<24x128xf32>
    %c0_18 = arith.constant 0 : index
    %c0_19 = arith.constant 0 : index
    %36 = vector.load %arg5[%c0_18, %c0_19] : memref<24x128xf32, #tpu.memory_space<vmem>>, vector<24x128xf32>
    tpu.vector_store %arg5[%c0_18, %c0_19], %35 {strides = array<i32>} : memref<24x128xf32, #tpu.memory_space<vmem>>, vector<24x128xf32>,
    return
  }
  func.func @transform_0(%arg0: i32) -> (i32, i32, i32) {
    %c0_i32 = arith.constant 0 : i32
    %c0_i32_0 = arith.constant 0 : i32
    %c0_i32_1 = arith.constant 0 : i32
    return %arg0, %c0_i32, %c0_i32_0 : i32, i32, i32
  }
  func.func @transform_1(%arg0: i32) -> (i32, i32) {
    %c0_i32 = arith.constant 0 : i32
    %c0_i32_0 = arith.constant 0 : i32
    %c0_i32_1 = arith.constant 0 : i32
    return %c0_i32, %c0_i32_0 : i32, i32
  }
  func.func @transform_2(%arg0: i32) -> (i32, i32) {
    %c0_i32 = arith.constant 0 : i32
    %c0_i32_0 = arith.constant 0 : i32
    %c0_i32_1 = arith.constant 0 : i32
    return %c0_i32, %c0_i32_0 : i32, i32
  }
  func.func @transform_3(%arg0: i32) -> (i32, i32) {
    %c0_i32 = arith.constant 0 : i32
    %c0_i32_0 = arith.constant 0 : i32
    %c0_i32_1 = arith.constant 0 : i32
    return %c0_i32, %c0_i32_0 : i32, i32
  }
  func.func @transform_4(%arg0: i32) -> (i32, i32) {
    %c0_i32 = arith.constant 0 : i32
    %c0_i32_0 = arith.constant 0 : i32
    return %arg0, %c0_i32 : i32, i32
  }
}

</mosaic_0001>

<bundles_post_ra>
// kernel: tpu_custom_call.1
= control target key start
LH: loop header
LB: loop body
LE: loop exit
PB: predicated region body
PF: predicated region fallthrough
CT: control target
= control target key end

     0   :  { %s13577_s0 = inlined_call_operand.hbm [shape: bf16[48,128,128], index: 0, kind: input, shape index: {}]   ;;  %s13578_s1 = inlined_call_operand.hbm [shape: bf16[64,128], index: 1, kind: input, shape index: {}]   ;;  %s13579_s2 = inlined_call_operand.vmem [shape: f32[64,2], index: 2, kind: input, shape index: {}]   ;;  %s13580_s3 = inlined_call_operand.<no memory space> [shape: f32[1,1], index: 3, kind: input, shape index: {}]   ;;  %s13581_s4 = inlined_call_operand.hbm [shape: f32[48,128], index: 4, kind: output, shape index: {}]  }
   0x1   :  { %9 = sst [smem:[#allocation2]] %s13580_s3 }
   0x2   :  { %10 = vsyncpa [#allocation4], 0 }
   0x3   :  { %12 = vsyncpa [#allocation4 + $0x1], 0 }
   0x4   :  { %13 = vsyncpa [#allocation7], 0 }
   0x5   :  { %14 = vsyncpa [#allocation5], 0 }
   0x6   :  { %16 = vsyncpa [#allocation5 + $0x1], 0  ;;  %s10522_s17 = smov 0   ;;  %s10524_s18 = smov 0  }
   0x7   :  { %s10526_s19 = smov 0   ;;  %s10528_s20 = smov 0  }
   0x8 LB: > { %s10543_s3 = sadd.s32 4294967295, %s10483_s20   ;;  %s8568_s21 = sadd.s32 4294967294, %s10483_s20   ;;  %s10483_s20 = sphi %s10528_s20, %s13679_s20   ;;  %s10479_s19 = sphi %s10526_s19, %s13678_s19   ;;  %s10475_s18 = sphi %s10524_s18, %s13677_s18   ;;  %s10471_s17 = sphi %s10522_s17, %s13676_s17  }
   0x9   : > { %p42_p0 = scmp.ne.s32.totalorder %s10475_s18, %s10471_s17  ;;  %p13582_p1 = scmp.eq.s32.totalorder %s10543_s3, 0 }
   0xa   : > { %p135_p3 = scmp.eq.s32.totalorder %s8568_s21, 1  ;;  %p8569_p5 = scmp.ge.s32.totalorder %s10483_s20, 1 }
   0xb   : > { %p10552_p4 = por %p13582_p1, %p42_p0  ;;  %p142_p7 = scmp.lt.s32.totalorder %s10483_s20, 3 }
   0xc   : > { %p10557_p6 = por %p135_p3, %p42_p0  ;;  %s10485_s25 = smov [#allocation6]  }
   0xd   : > { %s13599_s22 = scalar_select %p10552_p4, 1, 0 }
   0xe   : > { %s13600_s23 = scalar_select %p10557_p6, 1, 0 }
   0xf   : > { %p10562_p8 = pnand %p8569_p5, %p142_p7  ;;  %s154_s26 = sshll.u32 %s10485_s25, 4  ;;  %s10566_s26 = int_to_ptr.vmem [resolvable:$true] %s154_s26 }
  0x10   : > { %s10578_s28 = sadd.s32 1, %s10483_s20   ;;  %s29_s29 = sadd.s32 1, %s10479_s19 }
  0x11   : > { %s13601_s24 = scalar_select %p10562_p8, 1, 0 }
  0x12   : > { %p9654_p9 = pneg %p10562_p8  ;;  %s26_s30 = ssub.s32 %s10483_s20, %s10578_s28 }
  0x13   : > { %s10355_s7 = scalar_lea.hbm %s13578_s1, 512 }
  0x14   : > { %p10573_p11 = pnand %p9654_p9, %p13582_p1  ;;  %p10356_p12 = scmp.ne.s32.totalorder %s13578_s1, %s10355_s7 }
  0x15   : > { %p10362_p5 = scmp.lt.u32.totalorder %s10355_s7, %s13578_s1 }
  0x16   : > { %p10357_p13 = pneg %p10573_p11 }
  0x18   : > { %p10358_p0 = pnand %p10357_p13, %p10356_p12 }
  0x1a   : > { %p10359_p3 = pneg %p10358_p0 }
  0x1c   : > { %p10364_p7 = pnand %p10362_p5, %p10359_p3 }
  0x1e   : > { %10367 = shalt.err (!%p10364_p7)
}
  0x1f   : > { %s10368_s12 = scalar_lea.vmem %s10566_s26, 512  ;;  %p10376_p2 = scmp.lt.s32.totalorder %s10566_s26, %s10566_s26 }
  0x20   : > { %p10369_p9 = scmp.ne.s32.totalorder %s10566_s26, %s10368_s12  ;;  %p10377_p6 = scmp.lt.s32.totalorder %s10368_s12, %s10368_s12 }
  0x22   : > { %p10371_p10 = pnand %p10369_p9, %p10357_p13  ;;  %p10378_p4 = por %p10377_p6, %p10376_p2 }
  0x24   : > { %p10372_p1 = pneg %p10371_p10 }
  0x26   : > { %p10379_p8 = pnand %p10378_p4, %p10372_p1 }
  0x28   : > { %10382 = shalt.err (!%p10379_p8)
}
  0x29   : > { %s10486_s13 = smov 64   ;;  %s10487_s14 = smov 4  }
  0x2a   : > { %9657 = dma.hbm_to_vmem [thread:$0]  (!%p10573_p11), %s13578_s1, 512, %s10566_s26, [#allocation7], %s10486_s13, %s10486_s13, %s10487_s14  }
  0x2b   : > { %p27_p1 = scmp.eq.s32.totalorder %s26_s30, 0  ;;  %p36_p2 = scmp.ne.s32.totalorder %s10479_s19, %s10475_s18 }
  0x2c   : > { %p37_p4 = scmp.eq.s32.totalorder %s10483_s20, 0  ;;  %p9667_p6 = scmp.lt.s32.totalorder %s10483_s20, 2 }
  0x2d   : > { %s10612_s21 = scalar_select %p27_p1, %s10479_s19, %s29_s29  }
  0x2e   : > { %p38_p8 = por %p37_p4, %p36_p2  ;;  %p13603_p10 = scmp.eq.s32.totalorder %s10543_s3, 1 }
  0x2f   : > { %s174_s27 = sand.u32 1, %s10479_s19   ;;  %s8778_s5 = smul.u32 24576, %s10483_s20 }
  0x30   : > { %p10616_p12 = por %p13603_p10, %p36_p2  ;;  %s9643_s6 = smul.u32 1536, %s174_s27 }
  0x31   : > { %p10622_p13 = pnand %p9667_p6, %p38_p8  ;;  %s10629_s29 = scalar_lea.hbm %s13577_s0, %s8778_s5 }
  0x32   : > { %s178_s8 = scalar_lea.vmem [#allocation3], %s9643_s6  ;;  %s10633_s10 = scalar_lea.sflag [#allocation4], %s174_s27 }
  0x33   : > { %s186_s9 = sshll.u32 %s178_s8, 4  ;;  %s10383_s11 = scalar_lea.hbm %s10629_s29, 24576  ;;  %s10631_s9 = int_to_ptr.vmem [resolvable:$true] %s186_s9 }
  0x34   : > { %p10384_p11 = scmp.ne.s32.totalorder %s10629_s29, %s10383_s11  ;;  %p10385_p0 = pneg %p10622_p13 }
  0x35   : > { %s10388_s16 = scalar_lea.hbm %s13577_s0, 49152  ;;  %p10389_p7 = scmp.lt.u32.totalorder %s10629_s29, %s13577_s0 }
  0x36   : > { %p10386_p3 = pnand %p10385_p0, %p10384_p11  ;;  %p10390_p9 = scmp.lt.u32.totalorder %s10388_s16, %s10383_s11 }
  0x37   : > { %p10392_p2 = scmp.lt.u32.totalorder %s10383_s11, %s10629_s29 }
  0x38   : > { %p10387_p5 = pneg %p10386_p3  ;;  %p10391_p1 = por %p10390_p9, %p10389_p7 }
  0x3a   : > { %p10393_p4 = por %p10392_p2, %p10391_p1 }
  0x3c   : > { %p10394_p6 = pnand %p10393_p4, %p10387_p5 }
  0x3e   : > { %10397 = shalt.err (!%p10394_p6)
}
  0x3f   : > { %s10398_s27 = scalar_lea.vmem %s10631_s9, 24576  ;;  %s10488_s6 = smov [#allocation3]  }
  0x40   : > { %p10399_p8 = scmp.ne.s32.totalorder %s10631_s9, %s10398_s27  ;;  %s10403_s30 = sshll.u32 %s10488_s6, 4  ;;  %s10404_s30 = int_to_ptr.vmem [resolvable:$false] %s10403_s30 }
  0x41   : > { %s10405_s8 = scalar_lea.vmem %s10404_s30, 49152  ;;  %p10406_p3 = scmp.lt.s32.totalorder %s10631_s9, %s10404_s30 }
  0x42   : > { %p10401_p10 = pnand %p10399_p8, %p10385_p0  ;;  %p10407_p7 = scmp.lt.s32.totalorder %s10405_s8, %s10398_s27 }
  0x44   : > { %p10402_p11 = pneg %p10401_p10  ;;  %p10408_p9 = por %p10407_p7, %p10406_p3 }
  0x46   : > { %p10409_p1 = pnand %p10408_p9, %p10402_p11 }
  0x48   : > { %10412 = shalt.err (!%p10409_p1)
}
  0x49   : > { %9661 = dma.hbm_to_vmem [thread:$0]  (!%p10622_p13), %s10629_s29, 24576, %s10631_s9, %s10633_s10, %s10486_s13, %s10486_s13, %s10487_s14  }
  0x4a   : > { %p13606_p0 = scmp.ne.s32.totalorder %s13601_s24, 0 }
  0x4c   : > { %198 = sbr.rel (%p13606_p0) target bundleno = 1746 (0x6d2), region = 36 }
  0x53   : > { %s10667_s11 = sand.u32 1, %s10475_s18   ;;  %p13607_p5 = scmp.ne.s32.totalorder %s13599_s22, 0 }
  0x54   : > { %s9644_s12 = smul.u32 1536, %s10667_s11  ;;  %s201_s15 = scalar_lea.sflag [#allocation4], %s10667_s11 }
  0x56   : > { %s10671_s16 = scalar_lea.vmem [#allocation3], %s9644_s12 }
  0x57   : > { %10458 = dma.done.wait (%p13607_p5), %s201_s15, 24576  }
  0x58   : > { %10460 = vsyncadd (%p13607_p5), %s201_s15, 4294942720  ;;  %p13608_p13 = scmp.eq.s32.totalorder %s10543_s3, 0 }
  0x5a   : > { %10462 = dma.done.wait (%p13608_p13), [#allocation7], 512   ;;  %p13609_p2 = pmov %p13608_p13 }
  0x5b   : > { %v10489_v0 = vmov 0   ;;  %v244_v1 = vld [vmem:[%s10671_s16] sm:$0xff]   ;;  %v246_v3 = vld [vmem:[%s10671_s16 + $0x8] sm:$0xff]   ;;  %v248_v5 = vld [vmem:[%s10671_s16 + $0x10] sm:$0xff]   ;;  %v10490_v37 = vmov 1   ;;  %s11241_s22 = sld [smem:[#allocation2]] }
  0x5c   : > { %10464 = vsyncadd (%p13609_p2), [#allocation7], 4294966784  ;;  %9710 = vset.pattern.permute.xlu1 %v10489_v0  ;;  %9709 = vset.pattern.permute.xlu0 %v10489_v0  ;;  %v260_v2 = vld [vmem:[%s10671_s16 + $0x40] sm:$0xff]   ;;  %v262_v4 = vld [vmem:[%s10671_s16 + $0x48] sm:$0xff]   ;;  %vm13595_vm0 = vcmask 1041409   ;;  %vm13592_vm1 = vcmask 1042434  }
  0x5d   : > { %v264_v6 = vld [vmem:[%s10671_s16 + $0x50] sm:$0xff]   ;;  %9067 = vmatprep.subr.bf16.mxu0 %v244_v1  ;;  %9091 = vmatprep.subr.bf16.mxu1 %v260_v2  ;;  %v250_v7 = vld [vmem:[%s10671_s16 + $0x18] sm:$0xff]   ;;  %v10689_v9 = vld [vmem:[#allocation6] sm:$0xff]   ;;  %vm13591_vm2 = vcmask 1043459   ;;  %vm13590_vm3 = vcmask 1044484   ;;  %vm13589_vm4 = vcmask 1045509  }
  0x5e   : > { %9068 = vmatpush3.bf16.msra.mxu0 %v244_v1  ;;  %9092 = vmatpush3.bf16.msra.mxu1 %v260_v2  ;;  %v266_v8 = vld [vmem:[%s10671_s16 + $0x58] sm:$0xff]   ;;  %v252_v10 = vld [vmem:[%s10671_s16 + $0x20] sm:$0xff]   ;;  %v254_v12 = vld [vmem:[%s10671_s16 + $0x28] sm:$0xff]   ;;  %vm13588_vm5 = vcmask 1046534   ;;  %vm13587_vm6 = vcmask 1047559   ;;  %vm6527_vm7 = vcmask 130112  }
  0x5f   : > { %9069 = vmatprep.subr.bf16.mxu0 %v246_v3  ;;  %9093 = vmatprep.subr.bf16.mxu1 %v262_v4  ;;  %v268_v11 = vld [vmem:[%s10671_s16 + $0x60] sm:$0xff]   ;;  %v270_v13 = vld [vmem:[%s10671_s16 + $0x68] sm:$0xff]   ;;  %v256_v14 = vld [vmem:[%s10671_s16 + $0x30] sm:$0xff]   ;;  %vm6534_vm8 = vcmask 195712   ;;  %vm6541_vm9 = vcmask 261312   ;;  %vm6548_vm10 = vcmask 326912  }
  0x60   : > { %9083 = vmatprep.mubr.bf16.mxu0 %v10689_v9  ;;  %9107 = vmatprep.mubr.bf16.mxu1 %v10689_v9  ;;  %v272_v15 = vld [vmem:[%s10671_s16 + $0x70] sm:$0xff]   ;;  %v628_v17 = vld [vmem:[%s13579_s2] sm:$0xff]  ;;  %v258_v18 = vld [vmem:[%s10671_s16 + $0x38] sm:$0xff]   ;;  %vm6555_vm11 = vcmask 392512   ;;  %vm6562_vm12 = vcmask 458112   ;;  %vm6569_vm13 = vcmask 523712  }
  0x61   : > { %v10702_v16 = vld [vmem:[%s13579_s2 + $0x10] sm:$0xff]  ;;  %v274_v19 = vld [vmem:[%s10671_s16 + $0x78] sm:$0xff]   ;;  %638 = vperm.xlu0 %9709, %v628_v17   ;;  %v629_v21 = vld [vmem:[%s13579_s2 + $0x8] sm:$0xff]  ;;  %vm6576_vm14 = vcmask 589312   ;;  %vm6583_vm15 = vcmask 654912   ;;  %s9645_s24 = smul.u32 24, %s10667_s11 }
  0x62   : > { %9070 = vmatpush3.bf16.msra.mxu0 %v246_v3  ;;  %9094 = vmatpush3.bf16.msra.mxu1 %v262_v4  ;;  %v10713_v20 = vld [vmem:[%s13579_s2 + $0x18] sm:$0xff]  ;;  %v276_v22 = vld [vmem:[%s10671_s16 + $0x80] sm:$0xff]   ;;  %v633_v24 = vld [vmem:[%s13579_s2 + $0x28] sm:$0xff]  ;;  %s8472_s9 = scalar_lea.sflag [#allocation5], %s10667_s11  ;;  %s10491_s5 = smov [#allocation8]  }
  0x63   : > { %9071 = vmatprep.subr.bf16.mxu0 %v248_v5  ;;  %9095 = vmatprep.subr.bf16.mxu1 %v264_v6  ;;  %v292_v23 = vld [vmem:[%s10671_s16 + $0xc0] sm:$0xff]   ;;  %v278_v26 = vld [vmem:[%s10671_s16 + $0x88] sm:$0xff]   ;;  %v635_v29 = vld [vmem:[%s13579_s2 + $0x38] sm:$0xff]  ;;  %s12560_s13 = scalar_lea.vmem [#allocation8], %s9645_s24  ;;  %s10417_s26 = sshll.u32 %s10491_s5, 4  ;;  %s10418_s26 = int_to_ptr.vmem [resolvable:$false] %s10417_s26 }
  0x64   : > { %648 = vperm.xlu1 %9710, %v10702_v16   ;;  %v632_v25 = vld [vmem:[%s13579_s2 + $0x20] sm:$0xff]  ;;  %v294_v27 = vld [vmem:[%s10671_s16 + $0xc8] sm:$0xff]   ;;  %v634_v30 = vld [vmem:[%s13579_s2 + $0x30] sm:$0xff]  ;;  %s8485_s14 = sshll.u32 %s12560_s13, 4  ;;  %s10419_s27 = scalar_lea.vmem %s10418_s26, 768  ;;  %s13531_s14 = int_to_ptr.vmem [resolvable:$true] %s8485_s14 }
  0x65   : > { %643 = vperm.xlu0 %9709, %v629_v21   ;;  %v10729_v28 = vld [vmem:[#allocation6 + $0x8] sm:$0xff]   ;;  %v10737_v31 = vld [vmem:[#allocation6 + $0x10] sm:$0xff]   ;;  %v282_v34 = vld [vmem:[%s10671_s16 + $0x98] sm:$0xff]   ;;  %s10413_s10 = scalar_lea.vmem %s13531_s14, 384  ;;  %p10420_p10 = scmp.lt.s32.totalorder %s13531_s14, %s10418_s26 }
  0x66   : > { %9072 = vmatpush3.bf16.msra.mxu0 %v248_v5  ;;  %9096 = vmatpush3.bf16.msra.mxu1 %v264_v6  ;;  %v280_v32 = vld [vmem:[%s10671_s16 + $0x90] sm:$0xff]   ;;  %v298_v35 = vld [vmem:[%s10671_s16 + $0xd8] sm:$0xff]   ;;  %v284_v38 = vld [vmem:[%s10671_s16 + $0xa0] sm:$0xff]   ;;  %p10414_p4 = scmp.ne.s32.totalorder %s13531_s14, %s10413_s10  ;;  %p10421_p11 = scmp.lt.s32.totalorder %s10419_s27, %s10413_s10 }
  0x67   : > { %9073 = vmatprep.subr.bf16.mxu0 %v250_v7  ;;  %9097 = vmatprep.subr.bf16.mxu1 %v266_v8  ;;  %v296_v33 = vld [vmem:[%s10671_s16 + $0xd0] sm:$0xff]   ;;  %v10747_v36 = vld [vmem:[#allocation6 + $0x18] sm:$0xff]   ;;  %v300_v39 = vld [vmem:[%s10671_s16 + $0xe0] sm:$0xff]  }
  0x68   : > { %653 = vperm.xlu1 %9710, %v10713_v20   ;;  %v286_v40 = vld [vmem:[%s10671_s16 + $0xa8] sm:$0xff]   ;;  %v288_v42 = vld [vmem:[%s10671_s16 + $0xb0] sm:$0xff]   ;;  %v290_v44 = vld [vmem:[%s10671_s16 + $0xb8] sm:$0xff]   ;;  %p10415_p6 = pnand %p10414_p4, %p10616_p12  ;;  %p10422_p3 = por %p10421_p11, %p10420_p10 }
  0x69   : > { %658 = vperm.xlu0 %9709, %v632_v25   ;;  %v302_v41 = vld [vmem:[%s10671_s16 + $0xe8] sm:$0xff]   ;;  %v304_v43 = vld [vmem:[%s10671_s16 + $0xf0] sm:$0xff]   ;;  %v306_v45 = vld [vmem:[%s10671_s16 + $0xf8] sm:$0xff]  }
  0x6a   : > { %9074 = vmatpush3.bf16.msra.mxu0 %v250_v7  ;;  %9098 = vmatpush3.bf16.msra.mxu1 %v266_v8  ;;  %v308_v46 = vld [vmem:[%s10671_s16 + $0x100] sm:$0xff]   ;;  %v310_v48 = vld [vmem:[%s10671_s16 + $0x108] sm:$0xff]   ;;  %v312_v50 = vld [vmem:[%s10671_s16 + $0x110] sm:$0xff]   ;;  %p10416_p8 = pneg %p10415_p6 }
  0x6b   : > { %9075 = vmatprep.subr.bf16.mxu0 %v252_v10  ;;  %9099 = vmatprep.subr.bf16.mxu1 %v268_v11  ;;  %v324_v47 = vld [vmem:[%s10671_s16 + $0x140] sm:$0xff]   ;;  %v326_v49 = vld [vmem:[%s10671_s16 + $0x148] sm:$0xff]   ;;  %v328_v51 = vld [vmem:[%s10671_s16 + $0x150] sm:$0xff]  }
  0x6c   : > { %663 = vperm.xlu1 %9710, %v633_v24   ;;  %v314_v52 = vld [vmem:[%s10671_s16 + $0x118] sm:$0xff]   ;;  %v316_v54 = vld [vmem:[%s10671_s16 + $0x120] sm:$0xff]   ;;  %v318_v56 = vld [vmem:[%s10671_s16 + $0x128] sm:$0xff]   ;;  %p10423_p7 = pnand %p10422_p3, %p10416_p8 }
  0x6d   : > { %668 = vperm.xlu0 %9709, %v634_v30   ;;  %v330_v53 = vld [vmem:[%s10671_s16 + $0x158] sm:$0xff]   ;;  %v332_v55 = vld [vmem:[%s10671_s16 + $0x160] sm:$0xff]   ;;  %v334_v57 = vld [vmem:[%s10671_s16 + $0x168] sm:$0xff]  }
  0x6e   : > { %9076 = vmatpush3.bf16.msra.mxu0 %v252_v10  ;;  %9100 = vmatpush3.bf16.msra.mxu1 %v268_v11  ;;  %v320_v58 = vld [vmem:[%s10671_s16 + $0x130] sm:$0xff]   ;;  %v322_v60 = vld [vmem:[%s10671_s16 + $0x138] sm:$0xff]   ;;  %v340_v62 = vld [vmem:[%s10671_s16 + $0x180] sm:$0xff]  }
  0x6f   : > { %9077 = vmatprep.subr.bf16.mxu0 %v254_v12  ;;  %9101 = vmatprep.subr.bf16.mxu1 %v270_v13  ;;  %v336_v59 = vld [vmem:[%s10671_s16 + $0x170] sm:$0xff]   ;;  %v338_v61 = vld [vmem:[%s10671_s16 + $0x178] sm:$0xff]   ;;  %v356_v63 = vld [vmem:[%s10671_s16 + $0x1c0] sm:$0xff]  }
  0x70   : > { %673 = vperm.xlu1 %9710, %v635_v29   ;;  %v342_v0 = vld [vmem:[%s10671_s16 + $0x188] sm:$0xff]   ;;  %v344_v2 = vld [vmem:[%s10671_s16 + $0x190] sm:$0xff]   ;;  %v346_v4 = vld [vmem:[%s10671_s16 + $0x198] sm:$0xff]  }
  0x71   : > { %9711 = vset.pattern.permute.xlu0 %v10490_v37  ;;  %v358_v1 = vld [vmem:[%s10671_s16 + $0x1c8] sm:$0xff]   ;;  %v360_v3 = vld [vmem:[%s10671_s16 + $0x1d0] sm:$0xff]   ;;  %v362_v5 = vld [vmem:[%s10671_s16 + $0x1d8] sm:$0xff]  }
  0x72   : > { %9078 = vmatpush3.bf16.msra.mxu0 %v254_v12  ;;  %9102 = vmatpush3.bf16.msra.mxu1 %v270_v13  ;;  %v348_v6 = vld [vmem:[%s10671_s16 + $0x1a0] sm:$0xff]   ;;  %v350_v8 = vld [vmem:[%s10671_s16 + $0x1a8] sm:$0xff]   ;;  %v352_v11 = vld [vmem:[%s10671_s16 + $0x1b0] sm:$0xff]  }
  0x73   : > { %9079 = vmatprep.subr.bf16.mxu0 %v256_v14  ;;  %9103 = vmatprep.subr.bf16.mxu1 %v272_v15  ;;  %v364_v7 = vld [vmem:[%s10671_s16 + $0x1e0] sm:$0xff]   ;;  %v366_v10 = vld [vmem:[%s10671_s16 + $0x1e8] sm:$0xff]   ;;  %v368_v12 = vld [vmem:[%s10671_s16 + $0x1f0] sm:$0xff]  }
  0x74   : > { %9712 = vset.pattern.permute.xlu1 %v10490_v37  ;;  %3605 = vperm.xlu0 %9711, %v628_v17   ;;  %v354_v13 = vld [vmem:[%s10671_s16 + $0x1b8] sm:$0xff]   ;;  %v374_v17 = vld [vmem:[%s10671_s16 + $0x208] sm:$0xff]  }
  0x75   : > { %3609 = vperm.xlu1 %9712, %v629_v21   ;;  %v378_v21 = vld [vmem:[%s10671_s16 + $0x218] sm:$0xff]   ;;  %v422_v37 = vld [vmem:[%s10671_s16 + $0x2c8] sm:$0xff]  }
  0x76   : > { %9080 = vmatpush3.bf16.msra.mxu0 %v256_v14  ;;  %9104 = vmatpush3.bf16.msra.mxu1 %v272_v15  ;;  %v370_v14 = vld [vmem:[%s10671_s16 + $0x1f8] sm:$0xff]   ;;  %v372_v15 = vld [vmem:[%s10671_s16 + $0x200] sm:$0xff]  }
  0x77   : > { %9081 = vmatprep.subr.bf16.mxu0 %v258_v18  ;;  %9105 = vmatprep.subr.bf16.mxu1 %v274_v19 }
  0x78   : > { %3617 = vperm.xlu0 %9711, %v10713_v20   ;;  %v392_v20 = vld [vmem:[%s10671_s16 + $0x250] sm:$0xff]  }
  0x79   : > { %3613 = vperm.xlu1 %9712, %v10702_v16   ;;  %v388_v16 = vld [vmem:[%s10671_s16 + $0x240] sm:$0xff]  }
  0x7a   : > { %9082 = vmatpush3.bf16.msra.mxu0 %v258_v18  ;;  %9106 = vmatpush3.bf16.msra.mxu1 %v274_v19  ;;  %v390_v18 = vld [vmem:[%s10671_s16 + $0x248] sm:$0xff]   ;;  %v376_v19 = vld [vmem:[%s10671_s16 + $0x210] sm:$0xff]  }
  0x7b   : > { %9115 = vmatprep.subr.bf16.mxu0 %v276_v22  ;;  %9139 = vmatprep.subr.bf16.mxu1 %v292_v23 }
  0x7c   : > { %3625 = vperm.xlu0 %9711, %v633_v24   ;;  %v396_v24 = vld [vmem:[%s10671_s16 + $0x260] sm:$0xff]  }
  0x7d   : > { %9084 = vmatmul.mubr.bf16.vlgmr.msra.gmra.mrb[0].mxu0 %v10729_v28  ;;  %9108 = vmatmul.mubr.bf16.vlgmr.msra.gmra.mrb[0].mxu1 %v10729_v28 }
  0x7e   : > { %9116 = vmatpush3.bf16.msra.mxu0 %v276_v22  ;;  %9140 = vmatpush3.bf16.msra.mxu1 %v292_v23  ;;  %v394_v22 = vld [vmem:[%s10671_s16 + $0x258] sm:$0xff]   ;;  %v380_v23 = vld [vmem:[%s10671_s16 + $0x220] sm:$0xff]  }
  0x7f   : > { %9117 = vmatprep.subr.bf16.mxu0 %v278_v26  ;;  %9141 = vmatprep.subr.bf16.mxu1 %v294_v27 }
  0x80   : > { %9087 = vmatprep.mubr.bf16.mxu0 %v10737_v31  ;;  %9111 = vmatprep.mubr.bf16.mxu1 %v10737_v31 }
  0x81   : > { %3621 = vperm.xlu1 %9712, %v632_v25   ;;  %3633 = vperm.xlu0 %9711, %v635_v29   ;;  %v382_v25 = vld [vmem:[%s10671_s16 + $0x228] sm:$0xff]   ;;  %v400_v29 = vld [vmem:[%s10671_s16 + $0x270] sm:$0xff]  }
  0x82   : > { %9118 = vmatpush3.bf16.msra.mxu0 %v278_v26  ;;  %9142 = vmatpush3.bf16.msra.mxu1 %v294_v27  ;;  %v398_v26 = vld [vmem:[%s10671_s16 + $0x268] sm:$0xff]   ;;  %v384_v27 = vld [vmem:[%s10671_s16 + $0x230] sm:$0xff]  }
  0x83   : > { %9119 = vmatprep.subr.bf16.mxu0 %v280_v32  ;;  %9143 = vmatprep.subr.bf16.mxu1 %v296_v33 }
  0x85   : > { %9088 = vmatmul.mubr.bf16.gmra.mrb[4].mxu0 %v10747_v36  ;;  %9112 = vmatmul.mubr.bf16.gmra.mrb[4].mxu1 %v10747_v36 }
  0x86   : > { %9120 = vmatpush3.bf16.msra.mxu0 %v280_v32  ;;  %9144 = vmatpush3.bf16.msra.mxu1 %v296_v33  ;;  %v402_v32 = vld [vmem:[%s10671_s16 + $0x278] sm:$0xff]   ;;  %v404_v33 = vld [vmem:[%s10671_s16 + $0x280] sm:$0xff]  }
  0x87   : > { %9121 = vmatprep.subr.bf16.mxu0 %v282_v34  ;;  %9145 = vmatprep.subr.bf16.mxu1 %v298_v35 }
  0x88   : > { %9131 = vmatprep.mubr.bf16.mxu0 %v10689_v9  ;;  %9155 = vmatprep.mubr.bf16.mxu1 %v10689_v9 }
  0x89   : > { %3629 = vperm.xlu1 %9712, %v634_v30   ;;  %v386_v30 = vld [vmem:[%s10671_s16 + $0x238] sm:$0xff]  }
  0x8a   : > { %9122 = vmatpush3.bf16.msra.mxu0 %v282_v34  ;;  %9146 = vmatpush3.bf16.msra.mxu1 %v298_v35  ;;  %v420_v34 = vld [vmem:[%s10671_s16 + $0x2c0] sm:$0xff]   ;;  %v406_v35 = vld [vmem:[%s10671_s16 + $0x288] sm:$0xff]  }
  0x8b   : > { %9123 = vmatprep.subr.bf16.mxu0 %v284_v38  ;;  %9147 = vmatprep.subr.bf16.mxu1 %v300_v39 }
  0x8e   : > { %9124 = vmatpush3.bf16.msra.mxu0 %v284_v38  ;;  %9148 = vmatpush3.bf16.msra.mxu1 %v300_v39  ;;  %v408_v38 = vld [vmem:[%s10671_s16 + $0x290] sm:$0xff]  }
  0x8f   : > { %9125 = vmatprep.subr.bf16.mxu0 %v286_v40  ;;  %9149 = vmatprep.subr.bf16.mxu1 %v302_v41  ;;  %v424_v39 = vld [vmem:[%s10671_s16 + $0x2d0] sm:$0xff]  }
  0x92   : > { %9126 = vmatpush3.bf16.msra.mxu0 %v286_v40  ;;  %9150 = vmatpush3.bf16.msra.mxu1 %v302_v41  ;;  %v410_v40 = vld [vmem:[%s10671_s16 + $0x298] sm:$0xff]  }
  0x93   : > { %9127 = vmatprep.subr.bf16.mxu0 %v288_v42  ;;  %9151 = vmatprep.subr.bf16.mxu1 %v304_v43  ;;  %v426_v41 = vld [vmem:[%s10671_s16 + $0x2d8] sm:$0xff]  }
  0x96   : > { %9128 = vmatpush3.bf16.msra.mxu0 %v288_v42  ;;  %9152 = vmatpush3.bf16.msra.mxu1 %v304_v43  ;;  %v412_v42 = vld [vmem:[%s10671_s16 + $0x2a0] sm:$0xff]  }
  0x97   : > { %9129 = vmatprep.subr.bf16.mxu0 %v290_v44  ;;  %9153 = vmatprep.subr.bf16.mxu1 %v306_v45  ;;  %v428_v43 = vld [vmem:[%s10671_s16 + $0x2e0] sm:$0xff]  }
  0x9a   : > { %9130 = vmatpush3.bf16.msra.mxu0 %v290_v44  ;;  %9154 = vmatpush3.bf16.msra.mxu1 %v306_v45  ;;  %v414_v44 = vld [vmem:[%s10671_s16 + $0x2a8] sm:$0xff]  }
  0x9b   : > { %9163 = vmatprep.subr.bf16.mxu0 %v308_v46  ;;  %9187 = vmatprep.subr.bf16.mxu1 %v324_v47  ;;  %v430_v45 = vld [vmem:[%s10671_s16 + $0x2e8] sm:$0xff]  }
  0x9d   : > { %9132 = vmatmul.mubr.bf16.vlgmr.msra.gmra.mrb[8].mxu0 %v10729_v28  ;;  %9156 = vmatmul.mubr.bf16.vlgmr.msra.gmra.mrb[8].mxu1 %v10729_v28 }
  0x9e   : > { %9164 = vmatpush3.bf16.msra.mxu0 %v308_v46  ;;  %9188 = vmatpush3.bf16.msra.mxu1 %v324_v47  ;;  %v416_v46 = vld [vmem:[%s10671_s16 + $0x2b0] sm:$0xff]  }
  0x9f   : > { %9165 = vmatprep.subr.bf16.mxu0 %v310_v48  ;;  %9189 = vmatprep.subr.bf16.mxu1 %v326_v49  ;;  %v432_v47 = vld [vmem:[%s10671_s16 + $0x2f0] sm:$0xff]  }
  0xa0   : > { %9135 = vmatprep.mubr.bf16.mxu0 %v10737_v31  ;;  %9159 = vmatprep.mubr.bf16.mxu1 %v10737_v31 }
  0xa2   : > { %9166 = vmatpush3.bf16.msra.mxu0 %v310_v48  ;;  %9190 = vmatpush3.bf16.msra.mxu1 %v326_v49  ;;  %v418_v48 = vld [vmem:[%s10671_s16 + $0x2b8] sm:$0xff]  }
  0xa3   : > { %9167 = vmatprep.subr.bf16.mxu0 %v312_v50  ;;  %9191 = vmatprep.subr.bf16.mxu1 %v328_v51  ;;  %v434_v49 = vld [vmem:[%s10671_s16 + $0x2f8] sm:$0xff]  }
  0xa5   : > { %9136 = vmatmul.mubr.bf16.gmra.mrb[12].mxu0 %v10747_v36  ;;  %9160 = vmatmul.mubr.bf16.gmra.mrb[12].mxu1 %v10747_v36 }
  0xa6   : > { %9168 = vmatpush3.bf16.msra.mxu0 %v312_v50  ;;  %9192 = vmatpush3.bf16.msra.mxu1 %v328_v51  ;;  %v436_v50 = vld [vmem:[%s10671_s16 + $0x300] sm:$0xff]  }
  0xa7   : > { %9169 = vmatprep.subr.bf16.mxu0 %v314_v52  ;;  %9193 = vmatprep.subr.bf16.mxu1 %v330_v53  ;;  %v452_v51 = vld [vmem:[%s10671_s16 + $0x340] sm:$0xff]  }
  0xa8   : > { %9179 = vmatprep.mubr.bf16.mxu0 %v10689_v9  ;;  %9203 = vmatprep.mubr.bf16.mxu1 %v10689_v9 }
  0xaa   : > { %9170 = vmatpush3.bf16.msra.mxu0 %v314_v52  ;;  %9194 = vmatpush3.bf16.msra.mxu1 %v330_v53  ;;  %v438_v52 = vld [vmem:[%s10671_s16 + $0x308] sm:$0xff]  }
  0xab   : > { %9171 = vmatprep.subr.bf16.mxu0 %v316_v54  ;;  %9195 = vmatprep.subr.bf16.mxu1 %v332_v55  ;;  %v454_v53 = vld [vmem:[%s10671_s16 + $0x348] sm:$0xff]  }
  0xae   : > { %9172 = vmatpush3.bf16.msra.mxu0 %v316_v54  ;;  %9196 = vmatpush3.bf16.msra.mxu1 %v332_v55  ;;  %v440_v54 = vld [vmem:[%s10671_s16 + $0x310] sm:$0xff]  }
  0xaf   : > { %9173 = vmatprep.subr.bf16.mxu0 %v318_v56  ;;  %9197 = vmatprep.subr.bf16.mxu1 %v334_v57  ;;  %v456_v55 = vld [vmem:[%s10671_s16 + $0x350] sm:$0xff]  }
  0xb2   : > { %9174 = vmatpush3.bf16.msra.mxu0 %v318_v56  ;;  %9198 = vmatpush3.bf16.msra.mxu1 %v334_v57  ;;  %v442_v56 = vld [vmem:[%s10671_s16 + $0x318] sm:$0xff]  }
  0xb3   : > { %9175 = vmatprep.subr.bf16.mxu0 %v320_v58  ;;  %9199 = vmatprep.subr.bf16.mxu1 %v336_v59  ;;  %v458_v57 = vld [vmem:[%s10671_s16 + $0x358] sm:$0xff]  }
  0xb6   : > { %9176 = vmatpush3.bf16.msra.mxu0 %v320_v58  ;;  %9200 = vmatpush3.bf16.msra.mxu1 %v336_v59  ;;  %v444_v58 = vld [vmem:[%s10671_s16 + $0x320] sm:$0xff]  }
  0xb7   : > { %9177 = vmatprep.subr.bf16.mxu0 %v322_v60  ;;  %9201 = vmatprep.subr.bf16.mxu1 %v338_v61  ;;  %v460_v59 = vld [vmem:[%s10671_s16 + $0x360] sm:$0xff]  }
  0xba   : > { %9178 = vmatpush3.bf16.msra.mxu0 %v322_v60  ;;  %9202 = vmatpush3.bf16.msra.mxu1 %v338_v61  ;;  %v446_v60 = vld [vmem:[%s10671_s16 + $0x328] sm:$0xff]  }
  0xbb   : > { %9211 = vmatprep.subr.bf16.mxu0 %v340_v62  ;;  %9235 = vmatprep.subr.bf16.mxu1 %v356_v63  ;;  %v462_v61 = vld [vmem:[%s10671_s16 + $0x368] sm:$0xff]  }
  0xbd   : > { %9180 = vmatmul.mubr.bf16.vlgmr.msra.gmra.mrb[16].mxu0 %v10729_v28  ;;  %9204 = vmatmul.mubr.bf16.vlgmr.msra.gmra.mrb[16].mxu1 %v10729_v28 }
  0xbe   : > { %9212 = vmatpush3.bf16.msra.mxu0 %v340_v62  ;;  %9236 = vmatpush3.bf16.msra.mxu1 %v356_v63  ;;  %v448_v62 = vld [vmem:[%s10671_s16 + $0x330] sm:$0xff]  }
  0xbf   : > { %9213 = vmatprep.subr.bf16.mxu0 %v342_v0  ;;  %9237 = vmatprep.subr.bf16.mxu1 %v358_v1  ;;  %v464_v63 = vld [vmem:[%s10671_s16 + $0x370] sm:$0xff]  }
  0xc0   : > { %9183 = vmatprep.mubr.bf16.mxu0 %v10737_v31  ;;  %9207 = vmatprep.mubr.bf16.mxu1 %v10737_v31 }
  0xc2   : > { %9214 = vmatpush3.bf16.msra.mxu0 %v342_v0  ;;  %9238 = vmatpush3.bf16.msra.mxu1 %v358_v1  ;;  %v450_v0 = vld [vmem:[%s10671_s16 + $0x338] sm:$0xff]  }
  0xc3   : > { %9215 = vmatprep.subr.bf16.mxu0 %v344_v2  ;;  %9239 = vmatprep.subr.bf16.mxu1 %v360_v3  ;;  %v466_v1 = vld [vmem:[%s10671_s16 + $0x378] sm:$0xff]  }
  0xc5   : > { %9184 = vmatmul.mubr.bf16.gmra.mrb[20].mxu0 %v10747_v36  ;;  %9208 = vmatmul.mubr.bf16.gmra.mrb[20].mxu1 %v10747_v36 }
  0xc6   : > { %9216 = vmatpush3.bf16.msra.mxu0 %v344_v2  ;;  %9240 = vmatpush3.bf16.msra.mxu1 %v360_v3  ;;  %v484_v3 = vld [vmem:[%s10671_s16 + $0x3c0] sm:$0xff]  }
  0xc7   : > { %9217 = vmatprep.subr.bf16.mxu0 %v346_v4  ;;  %9241 = vmatprep.subr.bf16.mxu1 %v362_v5 }
  0xc8   : > { %9227 = vmatprep.mubr.bf16.mxu0 %v10689_v9  ;;  %9251 = vmatprep.mubr.bf16.mxu1 %v10689_v9 }
  0xca   : > { %9218 = vmatpush3.bf16.msra.mxu0 %v346_v4  ;;  %9242 = vmatpush3.bf16.msra.mxu1 %v362_v5 }
  0xcb   : > { %9219 = vmatprep.subr.bf16.mxu0 %v348_v6  ;;  %9243 = vmatprep.subr.bf16.mxu1 %v364_v7 }
  0xce   : > { %9220 = vmatpush3.bf16.msra.mxu0 %v348_v6  ;;  %9244 = vmatpush3.bf16.msra.mxu1 %v364_v7  ;;  %v470_v6 = vld [vmem:[%s10671_s16 + $0x388] sm:$0xff]  }
  0xcf   : > { %9221 = vmatprep.subr.bf16.mxu0 %v350_v8  ;;  %9245 = vmatprep.subr.bf16.mxu1 %v366_v10  ;;  %v486_v7 = vld [vmem:[%s10671_s16 + $0x3c8] sm:$0xff]  }
  0xd2   : > { %9222 = vmatpush3.bf16.msra.mxu0 %v350_v8  ;;  %9246 = vmatpush3.bf16.msra.mxu1 %v366_v10  ;;  %v472_v8 = vld [vmem:[%s10671_s16 + $0x390] sm:$0xff]  }
  0xd3   : > { %9223 = vmatprep.subr.bf16.mxu0 %v352_v11  ;;  %9247 = vmatprep.subr.bf16.mxu1 %v368_v12  ;;  %v488_v10 = vld [vmem:[%s10671_s16 + $0x3d0] sm:$0xff]  }
  0xd6   : > { %9224 = vmatpush3.bf16.msra.mxu0 %v352_v11  ;;  %9248 = vmatpush3.bf16.msra.mxu1 %v368_v12 }
  0xd7   : > { %9225 = vmatprep.subr.bf16.mxu0 %v354_v13  ;;  %9249 = vmatprep.subr.bf16.mxu1 %v370_v14 }
  0xda   : > { %9226 = vmatpush3.bf16.msra.mxu0 %v354_v13  ;;  %9250 = vmatpush3.bf16.msra.mxu1 %v370_v14  ;;  %v474_v13 = vld [vmem:[%s10671_s16 + $0x398] sm:$0xff]  }
  0xdb   : > { %9259 = vmatprep.subr.bf16.mxu0 %v372_v15  ;;  %9283 = vmatprep.subr.bf16.mxu1 %v388_v16  ;;  %v490_v14 = vld [vmem:[%s10671_s16 + $0x3d8] sm:$0xff]  }
  0xdd   : > { %9228 = vmatmul.mubr.bf16.vlgmr.msra.gmra.mrb[24].mxu0 %v10729_v28  ;;  %9252 = vmatmul.mubr.bf16.vlgmr.msra.gmra.mrb[24].mxu1 %v10729_v28 }
  0xde   : > { %9260 = vmatpush3.bf16.msra.mxu0 %v372_v15  ;;  %9284 = vmatpush3.bf16.msra.mxu1 %v388_v16  ;;  %v476_v16 = vld [vmem:[%s10671_s16 + $0x3a0] sm:$0xff]  }
  0xdf   : > { %9261 = vmatprep.subr.bf16.mxu0 %v374_v17  ;;  %9285 = vmatprep.subr.bf16.mxu1 %v390_v18 }
  0xe0   : > { %9231 = vmatprep.mubr.bf16.mxu0 %v10737_v31  ;;  %9255 = vmatprep.mubr.bf16.mxu1 %v10737_v31  ;;  %v10887_v4 = vpop.permute.xlu0 %638 }
  0xe2   : > { %9262 = vmatpush3.bf16.msra.mxu0 %v374_v17  ;;  %9286 = vmatpush3.bf16.msra.mxu1 %v390_v18  ;;  %v492_v17 = vld [vmem:[%s10671_s16 + $0x3e0] sm:$0xff]   ;;  %v494_v18 = vld [vmem:[%s10671_s16 + $0x3e8] sm:$0xff]  }
  0xe3   : > { %9263 = vmatprep.subr.bf16.mxu0 %v376_v19  ;;  %9287 = vmatprep.subr.bf16.mxu1 %v392_v20  ;;  %v10883_v2 = vpop.permute.xlu1 %648 }
  0xe4   : > { %v10897_v11 = vpop.permute.xlu0 %643 }
  0xe5   : > { %9232 = vmatmul.mubr.bf16.gmra.mrb[28].mxu0 %v10747_v36  ;;  %9256 = vmatmul.mubr.bf16.gmra.mrb[28].mxu1 %v10747_v36 }
  0xe6   : > { %9264 = vmatpush3.bf16.msra.mxu0 %v376_v19  ;;  %9288 = vmatpush3.bf16.msra.mxu1 %v392_v20  ;;  %v10915_v19 = vld [vmem:[#allocation6] sm:$0xff]  }
  0xe7   : > { %9265 = vmatprep.subr.bf16.mxu0 %v378_v21  ;;  %9289 = vmatprep.subr.bf16.mxu1 %v394_v22  ;;  %v10889_v5 = vpop.permute.xlu1 %653 }
  0xe8   : > { %9275 = vmatprep.mubr.bf16.mxu0 %v10689_v9  ;;  %9299 = vmatprep.mubr.bf16.mxu1 %v10689_v9 }
  0xea   : > { %9266 = vmatpush3.bf16.msra.mxu0 %v378_v21  ;;  %9290 = vmatpush3.bf16.msra.mxu1 %v394_v22  ;;  %v496_v22 = vld [vmem:[%s10671_s16 + $0x3f0] sm:$0xff]  }
  0xeb   : > { %9267 = vmatprep.subr.bf16.mxu0 %v380_v23  ;;  %9291 = vmatprep.subr.bf16.mxu1 %v396_v24  ;;  %v10899_v12 = vpop.permute.xlu1 %663 }
  0xee   : > { %9268 = vmatpush3.bf16.msra.mxu0 %v380_v23  ;;  %9292 = vmatpush3.bf16.msra.mxu1 %v396_v24 }
  0xef   : > { %9269 = vmatprep.subr.bf16.mxu0 %v382_v25  ;;  %9293 = vmatprep.subr.bf16.mxu1 %v398_v26  ;;  %v10907_v15 = vpop.permute.xlu1 %673 }
  0xf2   : > { %9270 = vmatpush3.bf16.msra.mxu0 %v382_v25  ;;  %9294 = vmatpush3.bf16.msra.mxu1 %v398_v26 }
  0xf3   : > { %9271 = vmatprep.subr.bf16.mxu0 %v384_v27  ;;  %9295 = vmatprep.subr.bf16.mxu1 %v400_v29 }
  0xf4   : > { %v10921_v21 = vpop.permute.xlu1 %3609 }
  0xf6   : > { %9272 = vmatpush3.bf16.msra.mxu0 %v384_v27  ;;  %9296 = vmatpush3.bf16.msra.mxu1 %v400_v29  ;;  %v482_v27 = vld [vmem:[%s10671_s16 + $0x3b8] sm:$0xff]  }
  0xf7   : > { %9273 = vmatprep.subr.bf16.mxu0 %v386_v30  ;;  %9297 = vmatprep.subr.bf16.mxu1 %v402_v32  ;;  %v498_v29 = vld [vmem:[%s10671_s16 + $0x3f8] sm:$0xff]  }
  0xf8   : > { %v10927_v24 = vpop.permute.xlu1 %3613 }
  0xfa   : > { %9274 = vmatpush3.bf16.msra.mxu0 %v386_v30  ;;  %9298 = vmatpush3.bf16.msra.mxu1 %v402_v32 }
  0xfb   : > { %9307 = vmatprep.subr.bf16.mxu0 %v404_v33  ;;  %9331 = vmatprep.subr.bf16.mxu1 %v420_v34 }
  0xfd   : > { %9276 = vmatmul.mubr.bf16.vlgmr.msra.gmra.mrb[32].mxu0 %v10729_v28  ;;  %9300 = vmatmul.mubr.bf16.vlgmr.msra.gmra.mrb[32].mxu1 %v10729_v28 }
  0xfe   : > { %9308 = vmatpush3.bf16.msra.mxu0 %v404_v33  ;;  %9332 = vmatpush3.bf16.msra.mxu1 %v420_v34 }
  0xff   : > { %9309 = vmatprep.subr.bf16.mxu0 %v406_v35  ;;  %9333 = vmatprep.subr.bf16.mxu1 %v422_v37 }
 0x100   : > { %9279 = vmatprep.mubr.bf16.mxu0 %v10737_v31  ;;  %9303 = vmatprep.mubr.bf16.mxu1 %v10737_v31 }
 0x102   : > { %9310 = vmatpush3.bf16.msra.mxu0 %v406_v35  ;;  %9334 = vmatpush3.bf16.msra.mxu1 %v422_v37 }
 0x103   : > { %9311 = vmatprep.subr.bf16.mxu0 %v408_v38  ;;  %9335 = vmatprep.subr.bf16.mxu1 %v424_v39 }
 0x105   : > { %9280 = vmatmul.mubr.bf16.gmra.mrb[36].mxu0 %v10747_v36  ;;  %9304 = vmatmul.mubr.bf16.gmra.mrb[36].mxu1 %v10747_v36 }
 0x106   : > { %9312 = vmatpush3.bf16.msra.mxu0 %v408_v38  ;;  %9336 = vmatpush3.bf16.msra.mxu1 %v424_v39 }
 0x107   : > { %9313 = vmatprep.subr.bf16.mxu0 %v410_v40  ;;  %9337 = vmatprep.subr.bf16.mxu1 %v426_v41 }
 0x108   : > { %9323 = vmatprep.mubr.bf16.mxu0 %v10689_v9  ;;  %9347 = vmatprep.mubr.bf16.mxu1 %v10689_v9 }
 0x10a   : > { %9314 = vmatpush3.bf16.msra.mxu0 %v410_v40  ;;  %9338 = vmatpush3.bf16.msra.mxu1 %v426_v41 }
 0x10b   : > { %9315 = vmatprep.subr.bf16.mxu0 %v412_v42  ;;  %9339 = vmatprep.subr.bf16.mxu1 %v428_v43 }
 0x10e   : > { %9316 = vmatpush3.bf16.msra.mxu0 %v412_v42  ;;  %9340 = vmatpush3.bf16.msra.mxu1 %v428_v43 }
 0x10f   : > { %9317 = vmatprep.subr.bf16.mxu0 %v414_v44  ;;  %9341 = vmatprep.subr.bf16.mxu1 %v430_v45 }
 0x112   : > { %9318 = vmatpush3.bf16.msra.mxu0 %v414_v44  ;;  %9342 = vmatpush3.bf16.msra.mxu1 %v430_v45  ;;  %v500_v44 = vld [vmem:[%s10671_s16 + $0x400] sm:$0xff]  }
 0x113   : > { %9319 = vmatprep.subr.bf16.mxu0 %v416_v46  ;;  %9343 = vmatprep.subr.bf16.mxu1 %v432_v47 }
 0x116   : > { %9320 = vmatpush3.bf16.msra.mxu0 %v416_v46  ;;  %9344 = vmatpush3.bf16.msra.mxu1 %v432_v47  ;;  %v516_v47 = vld [vmem:[%s10671_s16 + $0x440] sm:$0xff]  }
 0x117   : > { %9321 = vmatprep.subr.bf16.mxu0 %v418_v48  ;;  %9345 = vmatprep.subr.bf16.mxu1 %v434_v49 }
 0x11a   : > { %9322 = vmatpush3.bf16.msra.mxu0 %v418_v48  ;;  %9346 = vmatpush3.bf16.msra.mxu1 %v434_v49 }
 0x11b   : > { %9355 = vmatprep.subr.bf16.mxu0 %v436_v50  ;;  %9379 = vmatprep.subr.bf16.mxu1 %v452_v51 }
 0x11d   : > { %9324 = vmatmul.mubr.bf16.vlgmr.msra.gmra.mrb[40].mxu0 %v10729_v28  ;;  %9348 = vmatmul.mubr.bf16.vlgmr.msra.gmra.mrb[40].mxu1 %v10729_v28 }
 0x11e   : > { %9356 = vmatpush3.bf16.msra.mxu0 %v436_v50  ;;  %9380 = vmatpush3.bf16.msra.mxu1 %v452_v51  ;;  %v10941_v51 = vld [vmem:[%s10671_s16 + $0x408] sm:$0xff]  }
 0x11f   : > { %9357 = vmatprep.subr.bf16.mxu0 %v438_v52  ;;  %9381 = vmatprep.subr.bf16.mxu1 %v454_v53 }
 0x120   : > { %9327 = vmatprep.mubr.bf16.mxu0 %v10737_v31  ;;  %9351 = vmatprep.mubr.bf16.mxu1 %v10737_v31 }
 0x122   : > { %9358 = vmatpush3.bf16.msra.mxu0 %v438_v52  ;;  %9382 = vmatpush3.bf16.msra.mxu1 %v454_v53  ;;  %v10944_v52 = vld [vmem:[%s10671_s16 + $0x448] sm:$0xff]  }
 0x123   : > { %9359 = vmatprep.subr.bf16.mxu0 %v440_v54  ;;  %9383 = vmatprep.subr.bf16.mxu1 %v456_v55 }
 0x125   : > { %9328 = vmatmul.mubr.bf16.gmra.mrb[44].mxu0 %v10747_v36  ;;  %9352 = vmatmul.mubr.bf16.gmra.mrb[44].mxu1 %v10747_v36 }
 0x126   : > { %9360 = vmatpush3.bf16.msra.mxu0 %v440_v54  ;;  %9384 = vmatpush3.bf16.msra.mxu1 %v456_v55 }
 0x127   : > { %9361 = vmatprep.subr.bf16.mxu0 %v442_v56  ;;  %9385 = vmatprep.subr.bf16.mxu1 %v458_v57 }
 0x128   : > { %9371 = vmatprep.mubr.bf16.mxu0 %v10689_v9  ;;  %9395 = vmatprep.mubr.bf16.mxu1 %v10689_v9  ;;  %v468_v9 = vld [vmem:[%s10671_s16 + $0x380] sm:$0xff]  }
 0x12a   : > { %9362 = vmatpush3.bf16.msra.mxu0 %v442_v56  ;;  %9386 = vmatpush3.bf16.msra.mxu1 %v458_v57  ;;  %v10950_v56 = vpop.permute.xlu1 %3621 }
 0x12b   : > { %9363 = vmatprep.subr.bf16.mxu0 %v444_v58  ;;  %9387 = vmatprep.subr.bf16.mxu1 %v460_v59 }
 0x12e   : > { %9364 = vmatpush3.bf16.msra.mxu0 %v444_v58  ;;  %9388 = vmatpush3.bf16.msra.mxu1 %v460_v59 }
 0x12f   : > { %9365 = vmatprep.subr.bf16.mxu0 %v446_v60  ;;  %9389 = vmatprep.subr.bf16.mxu1 %v462_v61 }
 0x132   : > { %9366 = vmatpush3.bf16.msra.mxu0 %v446_v60  ;;  %9390 = vmatpush3.bf16.msra.mxu1 %v462_v61 }
 0x133   : > { %9367 = vmatprep.subr.bf16.mxu0 %v448_v62  ;;  %9391 = vmatprep.subr.bf16.mxu1 %v464_v63 }
 0x136   : > { %9368 = vmatpush3.bf16.msra.mxu0 %v448_v62  ;;  %9392 = vmatpush3.bf16.msra.mxu1 %v464_v63 }
 0x137   : > { %9369 = vmatprep.subr.bf16.mxu0 %v450_v0  ;;  %9393 = vmatprep.subr.bf16.mxu1 %v466_v1 }
 0x13a   : > { %9370 = vmatpush3.bf16.msra.mxu0 %v450_v0  ;;  %9394 = vmatpush3.bf16.msra.mxu1 %v466_v1 }
 0x13b   : > { %9403 = vmatprep.subr.bf16.mxu0 %v468_v9  ;;  %9427 = vmatprep.subr.bf16.mxu1 %v484_v3 }
 0x13d   : > { %9372 = vmatmul.mubr.bf16.vlgmr.msra.gmra.mrb[48].mxu0 %v10729_v28  ;;  %9396 = vmatmul.mubr.bf16.vlgmr.msra.gmra.mrb[48].mxu1 %v10729_v28  ;;  %v10905_v28 = vpop.permute.xlu0 %658 }
 0x13e   : > { %9404 = vmatpush3.bf16.msra.mxu0 %v468_v9  ;;  %9428 = vmatpush3.bf16.msra.mxu1 %v484_v3 }
 0x13f   : > { %9405 = vmatprep.subr.bf16.mxu0 %v470_v6  ;;  %9429 = vmatprep.subr.bf16.mxu1 %v486_v7 }
 0x140   : > { %9375 = vmatprep.mubr.bf16.mxu0 %v10737_v31  ;;  %9399 = vmatprep.mubr.bf16.mxu1 %v10737_v31  ;;  %v478_v31 = vld [vmem:[%s10671_s16 + $0x3a8] sm:$0xff]  }
 0x141   : > { %v10919_v20 = vpop.permute.xlu0 %668 }
 0x142   : > { %9406 = vmatpush3.bf16.msra.mxu0 %v470_v6  ;;  %9430 = vmatpush3.bf16.msra.mxu1 %v486_v7 }
 0x143   : > { %9407 = vmatprep.subr.bf16.mxu0 %v472_v8  ;;  %9431 = vmatprep.subr.bf16.mxu1 %v488_v10 }
 0x145   : > { %9376 = vmatmul.mubr.bf16.gmra.mrb[52].mxu0 %v10747_v36  ;;  %9400 = vmatmul.mubr.bf16.gmra.mrb[52].mxu1 %v10747_v36  ;;  %v480_v36 = vld [vmem:[%s10671_s16 + $0x3b0] sm:$0xff]   ;;  %v10925_v23 = vpop.permute.xlu0 %3605 }
 0x146   : > { %9408 = vmatpush3.bf16.msra.mxu0 %v472_v8  ;;  %9432 = vmatpush3.bf16.msra.mxu1 %v488_v10 }
 0x147   : > { %9409 = vmatprep.subr.bf16.mxu0 %v474_v13  ;;  %9433 = vmatprep.subr.bf16.mxu1 %v490_v14 }
 0x148   : > { %9419 = vmatprep.mubr.bf16.mxu0 %v10915_v19  ;;  %9443 = vmatprep.mubr.bf16.mxu1 %v10915_v19 }
 0x149   : > { %v10948_v55 = vpop.permute.xlu0 %3617 }
 0x14a   : > { %9410 = vmatpush3.bf16.msra.mxu0 %v474_v13  ;;  %9434 = vmatpush3.bf16.msra.mxu1 %v490_v14  ;;  %v10958_v13 = vld [vmem:[%s10671_s16 + $0x410] sm:$0xff]  }
 0x14b   : > { %9411 = vmatprep.subr.bf16.mxu0 %v476_v16  ;;  %9435 = vmatprep.subr.bf16.mxu1 %v492_v17  ;;  %v10961_v14 = vld [vmem:[%s10671_s16 + $0x450] sm:$0xff]  }
 0x14e   : > { %9412 = vmatpush3.bf16.msra.mxu0 %v476_v16  ;;  %9436 = vmatpush3.bf16.msra.mxu1 %v492_v17 }
 0x14f   : > { %9413 = vmatprep.subr.bf16.mxu0 %v478_v31  ;;  %9437 = vmatprep.subr.bf16.mxu1 %v494_v18 }
 0x150   : > { %v9085_v25 = vpop.f32.mrb[0].mxu0  ;;  %v9109_v26 = vpop.f32.mrb[0].mxu1 }
 0x151   : > { %v782_v30 = vpop.f32.mrb[1].mxu0  ;;  %v895_v32 = vpop.f32.mrb[1].mxu1  ;;  %v791_v45 = vadd.f32 %v9085_v25, %v10883_v2  ;;  %v904_v46 = vadd.f32 %v9109_v26, %v10883_v2 }
 0x152   : > { %v783_v33 = vadd.f32 %v782_v30, %v10887_v4  ;;  %v896_v34 = vadd.f32 %v895_v32, %v10887_v4  ;;  %v9086_v35 = vpop.f32.mrb[2].mxu0  ;;  %v9110_v37 = vpop.f32.mrb[2].mxu1  ;;  %9414 = vmatpush3.bf16.msra.mxu0 %v478_v31  ;;  %9438 = vmatpush3.bf16.msra.mxu1 %v494_v18 }
 0x153   : > { %v785_v38 = vpop.f32.mrb[3].mxu0  ;;  %v898_v39 = vpop.f32.mrb[3].mxu1  ;;  %9415 = vmatprep.subr.bf16.mxu0 %v480_v36  ;;  %9439 = vmatprep.subr.bf16.mxu1 %v496_v22  ;;  %v794_v53 = vadd.f32 %v9086_v35, %v10889_v5  ;;  %v907_v54 = vadd.f32 %v9110_v37, %v10889_v5  ;;  %v3414_v62 = vmax.f32 %v791_v45, 0.0  ;;  %v3422_v63 = vmax.f32 %v904_v46, 0.0 }
 0x154   : > { %v3412_v40 = vmax.f32 %v783_v33, 0.0  ;;  %v3420_v41 = vmax.f32 %v896_v34, 0.0  ;;  %v786_v42 = vadd.f32 %v785_v38, %v10897_v11  ;;  %v899_v43 = vadd.f32 %v898_v39, %v10897_v11  ;;  %v10967_v32 = vpop.permute.xlu0 %3625  ;;  %v10970_v34 = vld [vmem:[#allocation6 + $0x8] sm:$0xff]   ;;  %v10980_v46 = vpop.permute.xlu1 %3629 }
 0x155   : > { %v3415_v16 = vmax.f32 %v794_v53, 0.0  ;;  %v3423_v17 = vmax.f32 %v907_v54, 0.0  ;;  %v3646_v39 = vmul.f32 %v10927_v24, %v3422_v63  ;;  %v522_v54 = vld [vmem:[%s10671_s16 + $0x458] sm:$0xff]  }
 0x156   : > { %v3413_v48 = vmax.f32 %v786_v42, 0.0  ;;  %v3421_v49 = vmax.f32 %v899_v43, 0.0  ;;  %v3644_v50 = vmul.f32 %v10925_v23, %v3420_v41  ;;  %9416 = vmatpush3.bf16.msra.mxu0 %v480_v36  ;;  %9440 = vmatpush3.bf16.msra.mxu1 %v496_v22  ;;  %v3636_v57 = vmul.f32 %v10925_v23, %v3412_v40 }
 0x157   : > { %9417 = vmatprep.subr.bf16.mxu0 %v482_v27  ;;  %9441 = vmatprep.subr.bf16.mxu1 %v498_v29  ;;  %v3639_v41 = vmul.f32 %v10948_v55, %v3415_v16 }
 0x158   : > { %v3637_v58 = vmul.f32 %v10921_v21, %v3413_v48  ;;  %v3645_v59 = vmul.f32 %v10921_v21, %v3421_v49  ;;  %v9089_v60 = vpop.f32.mrb[4].mxu0  ;;  %v9113_v61 = vpop.f32.mrb[4].mxu1  ;;  %v10983_v48 = vld [vmem:[#allocation6 + $0x10] sm:$0xff]  }
 0x159   : > { %v798_v0 = vpop.f32.mrb[5].mxu0  ;;  %v911_v1 = vpop.f32.mrb[5].mxu1  ;;  %v807_v31 = vadd.f32 %v9089_v60, %v10919_v20  ;;  %v920_v18 = vadd.f32 %v9113_v61, %v10919_v20 }
 0x15a   : > { %v3828_v9 = vadd.f32 %v3637_v58, %v3636_v57  ;;  %v3841_v3 = vadd.f32 %v3645_v59, %v3644_v50  ;;  %v799_v6 = vadd.f32 %v798_v0, %v10905_v28  ;;  %v912_v7 = vadd.f32 %v911_v1, %v10905_v28  ;;  %v9090_v8 = vpop.f32.mrb[6].mxu0  ;;  %v9114_v10 = vpop.f32.mrb[6].mxu1  ;;  %9418 = vmatpush3.bf16.msra.mxu0 %v482_v27  ;;  %v508_v1 = vld [vmem:[%s10671_s16 + $0x420] sm:$0xff]  }
 0x15b   : > { %9442 = vmatpush3.bf16.msra.mxu1 %v498_v29  ;;  %v801_v36 = vpop.f32.mrb[7].mxu0  ;;  %v914_v22 = vpop.f32.mrb[7].mxu1  ;;  %9451 = vmatprep.subr.bf16.mxu0 %v500_v44  ;;  %v810_v33 = vadd.f32 %v9090_v8, %v10907_v15  ;;  %v3638_v29 = vmul.f32 %v10927_v24, %v3414_v62  ;;  %v923_v35 = vadd.f32 %v9114_v10, %v10907_v15  ;;  %v3418_v40 = vmax.f32 %v807_v31, 0.0 }
 0x15c   : > { %v3416_v25 = vmax.f32 %v799_v6, 0.0  ;;  %v3424_v26 = vmax.f32 %v912_v7, 0.0  ;;  %v802_v30 = vadd.f32 %v801_v36, %v10899_v12  ;;  %v915_v27 = vadd.f32 %v914_v22, %v10899_v12  ;;  %9475 = vmatprep.subr.bf16.mxu1 %v516_v47  ;;  %v10993_v60 = vpop.permute.xlu0 %3633  ;;  %v524_v6 = vld [vmem:[%s10671_s16 + $0x460] sm:$0xff]   ;;  %v528_v22 = vld [vmem:[%s10671_s16 + $0x470] sm:$0xff]  }
 0x15d   : > { %9420 = vmatmul.mubr.bf16.vlgmr.msra.gmra.mrb[56].mxu0 %v10970_v34  ;;  %v3829_v43 = vadd.f32 %v3828_v9, %v3638_v29  ;;  %v3426_v45 = vmax.f32 %v920_v18, 0.0  ;;  %v3842_v50 = vadd.f32 %v3841_v3, %v3646_v39  ;;  %v3419_v53 = vmax.f32 %v810_v33, 0.0  ;;  %v526_v18 = vld [vmem:[%s10671_s16 + $0x468] sm:$0xff]  }
 0x15e   : > { %v3417_v37 = vmax.f32 %v802_v30, 0.0  ;;  %v3425_v38 = vmax.f32 %v915_v27, 0.0  ;;  %9444 = vmatmul.mubr.bf16.vlgmr.msra.gmra.mrb[56].mxu1 %v10970_v34  ;;  %9452 = vmatpush3.bf16.msra.mxu0 %v500_v44  ;;  %v3640_v42 = vmul.f32 %v10950_v56, %v3416_v25  ;;  %v506_v44 = vld [vmem:[%s10671_s16 + $0x418] sm:$0xff]   ;;  %v3648_v49 = vmul.f32 %v10950_v56, %v3424_v26 }
 0x15f   : > { %9476 = vmatpush3.bf16.msra.mxu1 %v516_v47  ;;  %9453 = vmatprep.subr.bf16.mxu0 %v10941_v51  ;;  %v3647_v47 = vmul.f32 %v10948_v55, %v3423_v17  ;;  %v3830_v58 = vadd.f32 %v3829_v43, %v3639_v41  ;;  %v3427_v59 = vmax.f32 %v923_v35, 0.0  ;;  %v3642_v63 = vmul.f32 %v10980_v46, %v3418_v40  ;;  %v510_v17 = vld [vmem:[%s10671_s16 + $0x428] sm:$0xff]   ;;  %v514_v30 = vld [vmem:[%s10671_s16 + $0x438] sm:$0xff]  }
 0x160   : > { %9477 = vmatprep.subr.bf16.mxu1 %v10944_v52  ;;  %9423 = vmatprep.mubr.bf16.mxu0 %v10983_v48  ;;  %v3641_v57 = vmul.f32 %v10967_v32, %v3417_v37  ;;  %v3649_v61 = vmul.f32 %v10967_v32, %v3425_v38  ;;  %v3650_v9 = vmul.f32 %v10980_v46, %v3426_v45  ;;  %v530_v27 = vld [vmem:[%s10671_s16 + $0x478] sm:$0xff]  }
 0x161   : > { %9447 = vmatprep.mubr.bf16.mxu1 %v10983_v48  ;;  %v3843_v62 = vadd.f32 %v3842_v50, %v3647_v47  ;;  %v3831_v0 = vadd.f32 %v3830_v58, %v3640_v42  ;;  %v3651_v8 = vmul.f32 %v10993_v60, %v3427_v59 }
 0x162   : > { %9454 = vmatpush3.bf16.msra.mxu0 %v10941_v51  ;;  %v11002_v51 = vld [vmem:[#allocation6 + $0x18] sm:$0xff]  }
 0x163   : > { %9478 = vmatpush3.bf16.msra.mxu1 %v10944_v52  ;;  %9455 = vmatprep.subr.bf16.mxu0 %v10958_v13  ;;  %v3844_v3 = vadd.f32 %v3843_v62, %v3648_v49  ;;  %v3643_v52 = vmul.f32 %v10993_v60, %v3419_v53  ;;  %v3832_v7 = vadd.f32 %v3831_v0, %v3641_v57  ;;  %v548_v62 = vld [vmem:[%s10671_s16 + $0x4c0] sm:$0xff]  }
 0x164   : > { %9479 = vmatprep.subr.bf16.mxu1 %v10961_v14 }
 0x165   : > { %9424 = vmatmul.mubr.bf16.gmra.mrb[60].mxu0 %v11002_v51  ;;  %v3845_v10 = vadd.f32 %v3844_v3, %v3649_v61  ;;  %v3833_v16 = vadd.f32 %v3832_v7, %v3642_v63 }
 0x166   : > { %9448 = vmatmul.mubr.bf16.gmra.mrb[60].mxu1 %v11002_v51  ;;  %9456 = vmatpush3.bf16.msra.mxu0 %v10958_v13 }
 0x167   : > { %9480 = vmatpush3.bf16.msra.mxu1 %v10961_v14  ;;  %9457 = vmatprep.subr.bf16.mxu0 %v506_v44  ;;  %v3846_v31 = vadd.f32 %v3845_v10, %v3650_v9  ;;  %v11015_v13 = vadd.f32 %v3833_v16, %v3643_v52  ;;  %v512_v14 = vld [vmem:[%s10671_s16 + $0x430] sm:$0xff]  }
 0x168   : > { %9481 = vmatprep.subr.bf16.mxu1 %v522_v54  ;;  %9467 = vmatprep.mubr.bf16.mxu0 %v10915_v19 }
 0x169   : > { %9491 = vmatprep.mubr.bf16.mxu1 %v10915_v19  ;;  %v11017_v36 = vadd.f32 %v3846_v31, %v3651_v8  ;;  %v534_v8 = vld [vmem:[%s10671_s16 + $0x488] sm:$0xff]  }
 0x16a   : > { %9458 = vmatpush3.bf16.msra.mxu0 %v506_v44 }
 0x16b   : > { %9482 = vmatpush3.bf16.msra.mxu1 %v522_v54  ;;  %9459 = vmatprep.subr.bf16.mxu0 %v508_v1  ;;  %v532_v54 = vld [vmem:[%s10671_s16 + $0x480] sm:$0xff]  }
 0x16c   : > { %9483 = vmatprep.subr.bf16.mxu1 %v524_v6 }
 0x16e   : > { %9460 = vmatpush3.bf16.msra.mxu0 %v508_v1 }
 0x16f   : > { %9484 = vmatpush3.bf16.msra.mxu1 %v524_v6  ;;  %9461 = vmatprep.subr.bf16.mxu0 %v510_v17 }
 0x170   : > { %v9133_v25 = vpop.f32.mrb[8].mxu0  ;;  %v9157_v26 = vpop.f32.mrb[8].mxu1  ;;  %9485 = vmatprep.subr.bf16.mxu1 %v526_v18 }
 0x171   : > { %v1017_v33 = vadd.f32 %v9133_v25, %v10883_v2  ;;  %v1130_v29 = vadd.f32 %v9157_v26, %v10883_v2  ;;  %v1008_v35 = vpop.f32.mrb[9].mxu0  ;;  %v1121_v37 = vpop.f32.mrb[9].mxu1 }
 0x172   : > { %v1009_v38 = vadd.f32 %v1008_v35, %v10887_v4  ;;  %v1122_v39 = vadd.f32 %v1121_v37, %v10887_v4  ;;  %v9134_v40 = vpop.f32.mrb[10].mxu0  ;;  %v9158_v41 = vpop.f32.mrb[10].mxu1  ;;  %9462 = vmatpush3.bf16.msra.mxu0 %v510_v17  ;;  %v550_v37 = vld [vmem:[%s10671_s16 + $0x4c8] sm:$0xff]  }
 0x173   : > { %v1020_v42 = vadd.f32 %v9134_v40, %v10889_v5  ;;  %v1133_v43 = vadd.f32 %v9158_v41, %v10889_v5  ;;  %9486 = vmatpush3.bf16.msra.mxu1 %v526_v18  ;;  %v1011_v45 = vpop.f32.mrb[11].mxu0  ;;  %v1124_v44 = vpop.f32.mrb[11].mxu1  ;;  %9463 = vmatprep.subr.bf16.mxu0 %v512_v14  ;;  %v3430_v57 = vmax.f32 %v1017_v33, 0.0  ;;  %v3438_v58 = vmax.f32 %v1130_v29, 0.0 }
 0x174   : > { %v3428_v47 = vmax.f32 %v1009_v38, 0.0  ;;  %v3436_v49 = vmax.f32 %v1122_v39, 0.0  ;;  %v1012_v50 = vadd.f32 %v1011_v45, %v10897_v11  ;;  %v1125_v53 = vadd.f32 %v1124_v44, %v10897_v11  ;;  %9487 = vmatprep.subr.bf16.mxu1 %v528_v22 }
 0x175   : > { %v3431_v59 = vmax.f32 %v1020_v42, 0.0  ;;  %v3439_v61 = vmax.f32 %v1133_v43, 0.0  ;;  %v3654_v10 = vmul.f32 %v10927_v24, %v3430_v57  ;;  %v3662_v16 = vmul.f32 %v10927_v24, %v3438_v58  ;;  %v552_v58 = vld [vmem:[%s10671_s16 + $0x4d0] sm:$0xff]  }
 0x176   : > { %v3660_v63 = vmul.f32 %v10925_v23, %v3436_v49  ;;  %v3429_v0 = vmax.f32 %v1012_v50, 0.0  ;;  %v3437_v1 = vmax.f32 %v1125_v53, 0.0  ;;  %9464 = vmatpush3.bf16.msra.mxu0 %v512_v14  ;;  %v3652_v9 = vmul.f32 %v10925_v23, %v3428_v47  ;;  %v536_v49 = vld [vmem:[%s10671_s16 + $0x490] sm:$0xff]  }
 0x177   : > { %9488 = vmatpush3.bf16.msra.mxu1 %v528_v22  ;;  %9465 = vmatprep.subr.bf16.mxu0 %v514_v30  ;;  %v3655_v17 = vmul.f32 %v10948_v55, %v3431_v59  ;;  %v3663_v31 = vmul.f32 %v10948_v55, %v3439_v61 }
 0x178   : > { %v3653_v3 = vmul.f32 %v10921_v21, %v3429_v0  ;;  %v3661_v6 = vmul.f32 %v10921_v21, %v3437_v1  ;;  %v9137_v52 = vpop.f32.mrb[12].mxu0  ;;  %v9161_v7 = vpop.f32.mrb[12].mxu1  ;;  %9489 = vmatprep.subr.bf16.mxu1 %v530_v27 }
 0x179   : > { %v1024_v18 = vpop.f32.mrb[13].mxu0  ;;  %v1137_v14 = vpop.f32.mrb[13].mxu1  ;;  %v1033_v38 = vadd.f32 %v9137_v52, %v10919_v20  ;;  %v1146_v39 = vadd.f32 %v9161_v7, %v10919_v20 }
 0x17a   : > { %v3854_v22 = vadd.f32 %v3653_v3, %v3652_v9  ;;  %v3867_v25 = vadd.f32 %v3661_v6, %v3660_v63  ;;  %v1025_v26 = vadd.f32 %v1024_v18, %v10905_v28  ;;  %v1138_v33 = vadd.f32 %v1137_v14, %v10905_v28  ;;  %v9138_v29 = vpop.f32.mrb[14].mxu0  ;;  %v9162_v35 = vpop.f32.mrb[14].mxu1  ;;  %9466 = vmatpush3.bf16.msra.mxu0 %v514_v30 }
 0x17b   : > { %v1036_v40 = vadd.f32 %v9138_v29, %v10907_v15  ;;  %9490 = vmatpush3.bf16.msra.mxu1 %v530_v27  ;;  %v1027_v41 = vpop.f32.mrb[15].mxu0  ;;  %v1140_v42 = vpop.f32.mrb[15].mxu1  ;;  %9499 = vmatprep.subr.bf16.mxu0 %v532_v54  ;;  %v1149_v30 = vadd.f32 %v9162_v35, %v10907_v15  ;;  %v3434_v59 = vmax.f32 %v1033_v38, 0.0  ;;  %v3442_v61 = vmax.f32 %v1146_v39, 0.0  ;;  %v542_v38 = vld [vmem:[%s10671_s16 + $0x4a8] sm:$0xff]  }
 0x17c   : > { %v3855_v43 = vadd.f32 %v3854_v22, %v3654_v10  ;;  %v3868_v45 = vadd.f32 %v3867_v25, %v3662_v16  ;;  %v3432_v44 = vmax.f32 %v1025_v26, 0.0  ;;  %v3440_v47 = vmax.f32 %v1138_v33, 0.0  ;;  %9523 = vmatprep.subr.bf16.mxu1 %v548_v62  ;;  %v538_v10 = vld [vmem:[%s10671_s16 + $0x498] sm:$0xff]   ;;  %v540_v26 = vld [vmem:[%s10671_s16 + $0x4a0] sm:$0xff]   ;;  %v558_v39 = vld [vmem:[%s10671_s16 + $0x4e8] sm:$0xff]  }
 0x17d   : > { %9468 = vmatmul.mubr.bf16.vlgmr.msra.gmra.mrb[64].mxu0 %v10970_v34  ;;  %v1028_v63 = vadd.f32 %v1027_v41, %v10899_v12  ;;  %v1141_v0 = vadd.f32 %v1140_v42, %v10899_v12  ;;  %v3435_v3 = vmax.f32 %v1036_v40, 0.0  ;;  %v3443_v6 = vmax.f32 %v1149_v30, 0.0  ;;  %v554_v16 = vld [vmem:[%s10671_s16 + $0x4d8] sm:$0xff]   ;;  %v556_v33 = vld [vmem:[%s10671_s16 + $0x4e0] sm:$0xff]   ;;  %v544_v40 = vld [vmem:[%s10671_s16 + $0x4b0] sm:$0xff]  }
 0x17e   : > { %v3656_v50 = vmul.f32 %v10950_v56, %v3432_v44  ;;  %v3856_v53 = vadd.f32 %v3855_v43, %v3655_v17  ;;  %v3664_v57 = vmul.f32 %v10950_v56, %v3440_v47  ;;  %v3869_v27 = vadd.f32 %v3868_v45, %v3663_v31  ;;  %9492 = vmatmul.mubr.bf16.vlgmr.msra.gmra.mrb[64].mxu1 %v10970_v34  ;;  %v560_v41 = vld [vmem:[%s10671_s16 + $0x4f0] sm:$0xff]   ;;  %v546_v30 = vld [vmem:[%s10671_s16 + $0x4b8] sm:$0xff]  }
 0x17f   : > { %9500 = vmatpush3.bf16.msra.mxu0 %v532_v54  ;;  %9524 = vmatpush3.bf16.msra.mxu1 %v548_v62  ;;  %v3433_v52 = vmax.f32 %v1028_v63, 0.0  ;;  %v3441_v7 = vmax.f32 %v1141_v0, 0.0  ;;  %v3658_v17 = vmul.f32 %v10980_v46, %v3434_v59  ;;  %v3666_v54 = vmul.f32 %v10980_v46, %v3442_v61  ;;  %v11088_v63 = vld [vmem:[%s10671_s16 + $0x500] sm:$0xff]  }
 0x180   : > { %v3857_v1 = vadd.f32 %v3856_v53, %v3656_v50  ;;  %v3870_v9 = vadd.f32 %v3869_v27, %v3664_v57  ;;  %9501 = vmatprep.subr.bf16.mxu0 %v534_v8  ;;  %9525 = vmatprep.subr.bf16.mxu1 %v550_v37  ;;  %v3659_v18 = vmul.f32 %v10993_v60, %v3435_v3  ;;  %v562_v57 = vld [vmem:[%s10671_s16 + $0x4f8] sm:$0xff]   ;;  %v11091_v0 = vld [vmem:[%s10671_s16 + $0x540] sm:$0xff]  }
 0x181   : > { %9471 = vmatprep.mubr.bf16.mxu0 %v10983_v48  ;;  %9495 = vmatprep.mubr.bf16.mxu1 %v10983_v48  ;;  %v3657_v31 = vmul.f32 %v10967_v32, %v3433_v52  ;;  %v3665_v62 = vmul.f32 %v10967_v32, %v3441_v7  ;;  %v3667_v14 = vmul.f32 %v10993_v60, %v3443_v6  ;;  %v11096_v52 = vld [vmem:[%s10671_s16 + $0x508] sm:$0xff]  }
 0x182   : > { %v11099_v7 = vld [vmem:[%s10671_s16 + $0x548] sm:$0xff]  }
 0x183   : > { %9502 = vmatpush3.bf16.msra.mxu0 %v534_v8  ;;  %9526 = vmatpush3.bf16.msra.mxu1 %v550_v37  ;;  %v3858_v22 = vadd.f32 %v3857_v1, %v3657_v31  ;;  %v3871_v25 = vadd.f32 %v3870_v9, %v3665_v62 }
 0x184   : > { %9503 = vmatprep.subr.bf16.mxu0 %v536_v49  ;;  %9527 = vmatprep.subr.bf16.mxu1 %v552_v58 }
 0x185   : > { %9472 = vmatmul.mubr.bf16.gmra.mrb[68].mxu0 %v11002_v51  ;;  %v3859_v8 = vadd.f32 %v3858_v22, %v3658_v17  ;;  %v3872_v29 = vadd.f32 %v3871_v25, %v3666_v54 }
 0x186   : > { %9496 = vmatmul.mubr.bf16.gmra.mrb[68].mxu1 %v11002_v51  ;;  %9515 = vmatprep.mubr.bf16.mxu0 %v10915_v19 }
 0x187   : > { %9504 = vmatpush3.bf16.msra.mxu0 %v536_v49  ;;  %9539 = vmatprep.mubr.bf16.mxu1 %v10915_v19  ;;  %v11073_v35 = vadd.f32 %v3859_v8, %v3659_v18  ;;  %v11075_v37 = vadd.f32 %v3872_v29, %v3667_v14 }
 0x188   : > { %9528 = vmatpush3.bf16.msra.mxu1 %v552_v58  ;;  %9505 = vmatprep.subr.bf16.mxu0 %v538_v10 }
 0x189   : > { %9529 = vmatprep.subr.bf16.mxu1 %v554_v16 }
 0x18b   : > { %9506 = vmatpush3.bf16.msra.mxu0 %v538_v10 }
 0x18c   : > { %9530 = vmatpush3.bf16.msra.mxu1 %v554_v16  ;;  %9507 = vmatprep.subr.bf16.mxu0 %v540_v26 }
 0x18d   : > { %9531 = vmatprep.subr.bf16.mxu1 %v556_v33 }
 0x18f   : > { %9508 = vmatpush3.bf16.msra.mxu0 %v540_v26 }
 0x190   : > { %9532 = vmatpush3.bf16.msra.mxu1 %v556_v33  ;;  %v9181_v42 = vpop.f32.mrb[16].mxu0  ;;  %v9205_v43 = vpop.f32.mrb[16].mxu1  ;;  %9509 = vmatprep.subr.bf16.mxu0 %v542_v38 }
 0x191   : > { %v1243_v45 = vadd.f32 %v9181_v42, %v10883_v2  ;;  %v1234_v44 = vpop.f32.mrb[17].mxu0  ;;  %v1347_v47 = vpop.f32.mrb[17].mxu1  ;;  %9533 = vmatprep.subr.bf16.mxu1 %v558_v39  ;;  %v1356_v27 = vadd.f32 %v9205_v43, %v10883_v2 }
 0x192   : > { %v1348_v49 = vadd.f32 %v1347_v47, %v10887_v4  ;;  %v9182_v50 = vpop.f32.mrb[18].mxu0  ;;  %v9206_v53 = vpop.f32.mrb[18].mxu1  ;;  %v1235_v58 = vadd.f32 %v1234_v44, %v10887_v4 }
 0x193   : > { %9510 = vmatpush3.bf16.msra.mxu0 %v542_v38  ;;  %v1237_v59 = vpop.f32.mrb[19].mxu0  ;;  %v1350_v61 = vpop.f32.mrb[19].mxu1  ;;  %v3446_v1 = vmax.f32 %v1243_v45, 0.0  ;;  %v1246_v3 = vadd.f32 %v9182_v50, %v10889_v5  ;;  %v1359_v6 = vadd.f32 %v9206_v53, %v10889_v5  ;;  %v3454_v10 = vmax.f32 %v1356_v27, 0.0 }
 0x194   : > { %v3452_v9 = vmax.f32 %v1348_v49, 0.0  ;;  %9534 = vmatpush3.bf16.msra.mxu1 %v558_v39  ;;  %9511 = vmatprep.subr.bf16.mxu0 %v544_v40  ;;  %v3444_v16 = vmax.f32 %v1235_v58, 0.0  ;;  %v1238_v17 = vadd.f32 %v1237_v59, %v10897_v11  ;;  %v1351_v54 = vadd.f32 %v1350_v61, %v10897_v11 }
 0x195   : > { %9535 = vmatprep.subr.bf16.mxu1 %v560_v41  ;;  %v3670_v31 = vmul.f32 %v10927_v24, %v3446_v1  ;;  %v3447_v22 = vmax.f32 %v1246_v3, 0.0  ;;  %v3455_v25 = vmax.f32 %v1359_v6, 0.0  ;;  %v3678_v45 = vmul.f32 %v10927_v24, %v3454_v10  ;;  %v584_v10 = vld [vmem:[%s10671_s16 + $0x550] sm:$0xff]  }
 0x196   : > { %v3676_v62 = vmul.f32 %v10925_v23, %v3452_v9  ;;  %v3445_v26 = vmax.f32 %v1238_v17, 0.0  ;;  %v3453_v33 = vmax.f32 %v1351_v54, 0.0  ;;  %v3668_v44 = vmul.f32 %v10925_v23, %v3444_v16 }
 0x197   : > { %9512 = vmatpush3.bf16.msra.mxu0 %v544_v40  ;;  %v3671_v1 = vmul.f32 %v10948_v55, %v3447_v22  ;;  %v3679_v9 = vmul.f32 %v10948_v55, %v3455_v25 }
 0x198   : > { %9536 = vmatpush3.bf16.msra.mxu1 %v560_v41  ;;  %v9185_v18 = vpop.f32.mrb[20].mxu0  ;;  %v9209_v14 = vpop.f32.mrb[20].mxu1  ;;  %9513 = vmatprep.subr.bf16.mxu0 %v546_v30  ;;  %v3669_v47 = vmul.f32 %v10921_v21, %v3445_v26  ;;  %v3677_v49 = vmul.f32 %v10921_v21, %v3453_v33 }
 0x199   : > { %v1250_v8 = vpop.f32.mrb[21].mxu0  ;;  %v1363_v29 = vpop.f32.mrb[21].mxu1  ;;  %9537 = vmatprep.subr.bf16.mxu1 %v562_v57  ;;  %v1259_v38 = vadd.f32 %v9185_v18, %v10919_v20  ;;  %v1372_v39 = vadd.f32 %v9209_v14, %v10919_v20 }
 0x19a   : > { %v1251_v40 = vadd.f32 %v1250_v8, %v10905_v28  ;;  %v1364_v42 = vadd.f32 %v1363_v29, %v10905_v28  ;;  %v9186_v43 = vpop.f32.mrb[22].mxu0  ;;  %v9210_v41 = vpop.f32.mrb[22].mxu1  ;;  %v3880_v3 = vadd.f32 %v3669_v47, %v3668_v44  ;;  %v3893_v6 = vadd.f32 %v3677_v49, %v3676_v62 }
 0x19b   : > { %9514 = vmatpush3.bf16.msra.mxu0 %v546_v30  ;;  %v1253_v50 = vpop.f32.mrb[23].mxu0  ;;  %v1366_v53 = vpop.f32.mrb[23].mxu1  ;;  %v1262_v59 = vadd.f32 %v9186_v43, %v10907_v15  ;;  %v1375_v61 = vadd.f32 %v9210_v41, %v10907_v15  ;;  %v568_v30 = vld [vmem:[%s10671_s16 + $0x510] sm:$0xff]   ;;  %v3450_v16 = vmax.f32 %v1259_v38, 0.0  ;;  %v3458_v17 = vmax.f32 %v1372_v39, 0.0 }
 0x19c   : > { %v3448_v27 = vmax.f32 %v1251_v40, 0.0  ;;  %v3456_v58 = vmax.f32 %v1364_v42, 0.0  ;;  %9538 = vmatpush3.bf16.msra.mxu1 %v562_v57  ;;  %9547 = vmatprep.subr.bf16.mxu0 %v11088_v63  ;;  %v3881_v57 = vadd.f32 %v3880_v3, %v3670_v31  ;;  %v3894_v14 = vadd.f32 %v3893_v6, %v3678_v45  ;;  %v570_v31 = vld [vmem:[%s10671_s16 + $0x518] sm:$0xff]   ;;  %v576_v3 = vld [vmem:[%s10671_s16 + $0x530] sm:$0xff]  }
 0x19d   : > { %9571 = vmatprep.subr.bf16.mxu1 %v11091_v0  ;;  %v1254_v22 = vadd.f32 %v1253_v50, %v10899_v12  ;;  %v1367_v25 = vadd.f32 %v1366_v53, %v10899_v12  ;;  %v3451_v62 = vmax.f32 %v1262_v59, 0.0  ;;  %v3459_v26 = vmax.f32 %v1375_v61, 0.0  ;;  %v572_v50 = vld [vmem:[%s10671_s16 + $0x520] sm:$0xff]   ;;  %v574_v61 = vld [vmem:[%s10671_s16 + $0x528] sm:$0xff]   ;;  %v592_v6 = vld [vmem:[%s10671_s16 + $0x570] sm:$0xff]  }
 0x19e   : > { %v3672_v54 = vmul.f32 %v10950_v56, %v3448_v27  ;;  %v3680_v18 = vmul.f32 %v10950_v56, %v3456_v58  ;;  %9516 = vmatmul.mubr.bf16.vlgmr.msra.gmra.mrb[72].mxu0 %v10970_v34  ;;  %v3882_v33 = vadd.f32 %v3881_v57, %v3671_v1  ;;  %v3895_v8 = vadd.f32 %v3894_v14, %v3679_v9  ;;  %v588_v53 = vld [vmem:[%s10671_s16 + $0x560] sm:$0xff]   ;;  %v590_v9 = vld [vmem:[%s10671_s16 + $0x568] sm:$0xff]  }
 0x19f   : > { %9540 = vmatmul.mubr.bf16.vlgmr.msra.gmra.mrb[72].mxu1 %v10970_v34  ;;  %9548 = vmatpush3.bf16.msra.mxu0 %v11088_v63  ;;  %v3449_v29 = vmax.f32 %v1254_v22, 0.0  ;;  %v3457_v38 = vmax.f32 %v1367_v25, 0.0  ;;  %v3674_v39 = vmul.f32 %v10980_v46, %v3450_v16  ;;  %v3682_v40 = vmul.f32 %v10980_v46, %v3458_v17  ;;  %v586_v63 = vld [vmem:[%s10671_s16 + $0x558] sm:$0xff]   ;;  %v11167_v17 = vld [vmem:[%s10671_s16 + $0x580] sm:$0xff]   ;;  %v11174_v14 = vld [vmem:[%s10671_s16 + $0x588] sm:$0xff]  }
 0x1a0   : > { %9572 = vmatpush3.bf16.msra.mxu1 %v11091_v0  ;;  %9549 = vmatprep.subr.bf16.mxu0 %v11096_v52  ;;  %v3883_v0 = vadd.f32 %v3882_v33, %v3672_v54  ;;  %v3896_v42 = vadd.f32 %v3895_v8, %v3680_v18  ;;  %v3675_v45 = vmul.f32 %v10993_v60, %v3451_v62  ;;  %v3835_v59 = vrot.slane %v11015_v13, 4  ;;  %v11164_v16 = vld [vmem:[%s10671_s16 + $0x578] sm:$0xff]   ;;  %v11171_v57 = vld [vmem:[%s10671_s16 + $0x5c0] sm:$0xff]  }
 0x1a1   : > { %9573 = vmatprep.subr.bf16.mxu1 %v11099_v7  ;;  %9519 = vmatprep.mubr.bf16.mxu0 %v10983_v48  ;;  %v3673_v43 = vmul.f32 %v10967_v32, %v3449_v29  ;;  %v3681_v41 = vmul.f32 %v10967_v32, %v3457_v38  ;;  %v3683_v44 = vmul.f32 %v10993_v60, %v3459_v26  ;;  %v3848_v1 = vrot.slane %v11017_v36, 4 }
 0x1a2   : > { %9543 = vmatprep.mubr.bf16.mxu1 %v10983_v48  ;;  %v3861_v22 = vrot.slane %v11073_v35, 4 }
 0x1a3   : > { %9550 = vmatpush3.bf16.msra.mxu0 %v11096_v52  ;;  %v3884_v47 = vadd.f32 %v3883_v0, %v3673_v43  ;;  %v3897_v49 = vadd.f32 %v3896_v42, %v3681_v41  ;;  %v3874_v42 = vrot.slane %v11075_v37, 4 }
 0x1a4   : > { %9574 = vmatpush3.bf16.msra.mxu1 %v11099_v7  ;;  %9551 = vmatprep.subr.bf16.mxu0 %v568_v30 }
 0x1a5   : > { %9575 = vmatprep.subr.bf16.mxu1 %v584_v10  ;;  %v3885_v27 = vadd.f32 %v3884_v47, %v3674_v39  ;;  %v3898_v58 = vadd.f32 %v3897_v49, %v3682_v40 }
 0x1a6   : > { %9520 = vmatmul.mubr.bf16.gmra.mrb[76].mxu0 %v11002_v51 }
 0x1a7   : > { %9544 = vmatmul.mubr.bf16.gmra.mrb[76].mxu1 %v11002_v51  ;;  %9563 = vmatprep.mubr.bf16.mxu0 %v10915_v19  ;;  %v11148_v52 = vadd.f32 %v3885_v27, %v3675_v45  ;;  %v11150_v7 = vadd.f32 %v3898_v58, %v3683_v44  ;;  %v11188_v45 = vadd.f32 %v3861_v22, %v11073_v35 }
 0x1a8   : > { %9552 = vmatpush3.bf16.msra.mxu0 %v568_v30  ;;  %9576 = vmatpush3.bf16.msra.mxu1 %v584_v10  ;;  %v11160_v30 = vld [vmem:[%s10671_s16 + $0x538] sm:$0xff]   ;;  %v3836_v10 = vadd.f32 %v3835_v59, %v11015_v13  ;;  %v11178_v13 = vld [vmem:[%s10671_s16 + $0x5c8] sm:$0xff]  }
 0x1a9   : > { %9553 = vmatprep.subr.bf16.mxu0 %v570_v31  ;;  %9577 = vmatprep.subr.bf16.mxu1 %v586_v63 }
 0x1aa   : > { %9587 = vmatprep.mubr.bf16.mxu1 %v10915_v19  ;;  %v3849_v19 = vadd.f32 %v3848_v1, %v11017_v36  ;;  %v3837_v26 = vrot.slane %v3836_v10, 2 }
 0x1ac   : > { %9554 = vmatpush3.bf16.msra.mxu0 %v570_v31  ;;  %9578 = vmatpush3.bf16.msra.mxu1 %v586_v63  ;;  %v3850_v31 = vrot.slane %v3849_v19, 2  ;;  %v11195_v58 = vadd.f32 %v3837_v26, %v3836_v10  ;;  %v3863_v10 = vrot.slane %v11188_v45, 2 }
 0x1ad   : > { %9555 = vmatprep.subr.bf16.mxu0 %v572_v50  ;;  %9579 = vmatprep.subr.bf16.mxu1 %v588_v53 }
 0x1ae   : > { %v11197_v59 = vadd.f32 %v3850_v31, %v3849_v19 }
 0x1b0   : > { %9556 = vmatpush3.bf16.msra.mxu0 %v572_v50  ;;  %9580 = vmatpush3.bf16.msra.mxu1 %v588_v53  ;;  %v9229_v54 = vpop.f32.mrb[24].mxu0  ;;  %v9253_v18 = vpop.f32.mrb[24].mxu1  ;;  %v11193_v50 = vld [vmem:[%s10671_s16 + $0x590] sm:$0xff]  }
 0x1b1   : > { %v1460_v25 = vpop.f32.mrb[25].mxu0  ;;  %v1573_v62 = vpop.f32.mrb[25].mxu1  ;;  %9557 = vmatprep.subr.bf16.mxu0 %v574_v61  ;;  %v1469_v33 = vadd.f32 %v9229_v54, %v10883_v2  ;;  %9581 = vmatprep.subr.bf16.mxu1 %v590_v9  ;;  %v1582_v39 = vadd.f32 %v9253_v18, %v10883_v2  ;;  %v11201_v54 = vadd.f32 %v3874_v42, %v11075_v37 }
 0x1b2   : > { %v1461_v36 = vadd.f32 %v1460_v25, %v10887_v4  ;;  %v1574_v8 = vadd.f32 %v1573_v62, %v10887_v4  ;;  %v9230_v29 = vpop.f32.mrb[26].mxu0  ;;  %v9254_v38 = vpop.f32.mrb[26].mxu1 }
 0x1b3   : > { %v1472_v40 = vadd.f32 %v9230_v29, %v10889_v5  ;;  %v1463_v63 = vpop.f32.mrb[27].mxu0  ;;  %v1576_v0 = vpop.f32.mrb[27].mxu1  ;;  %v1585_v47 = vadd.f32 %v9254_v38, %v10889_v5  ;;  %v3462_v53 = vmax.f32 %v1469_v33, 0.0  ;;  %v3470_v1 = vmax.f32 %v1582_v39, 0.0 }
 0x1b4   : > { %v3460_v43 = vmax.f32 %v1461_v36, 0.0  ;;  %9558 = vmatpush3.bf16.msra.mxu0 %v574_v61  ;;  %9582 = vmatpush3.bf16.msra.mxu1 %v590_v9  ;;  %v1464_v41 = vadd.f32 %v1463_v63, %v10897_v11  ;;  %v3468_v44 = vmax.f32 %v1574_v8, 0.0  ;;  %v1577_v49 = vadd.f32 %v1576_v0, %v10897_v11 }
 0x1b5   : > { %9559 = vmatprep.subr.bf16.mxu0 %v576_v3  ;;  %9583 = vmatprep.subr.bf16.mxu1 %v592_v6  ;;  %v3887_v61 = vrot.slane %v11148_v52, 4  ;;  %v3463_v35 = vmax.f32 %v1472_v40, 0.0  ;;  %v3471_v26 = vmax.f32 %v1585_v47, 0.0  ;;  %v3686_v37 = vmul.f32 %v10927_v24, %v3462_v53 }
 0x1b6   : > { %v3461_v27 = vmax.f32 %v1464_v41, 0.0  ;;  %v3469_v9 = vmax.f32 %v1577_v49, 0.0  ;;  %v3684_v18 = vmul.f32 %v10925_v23, %v3460_v43  ;;  %v3692_v19 = vmul.f32 %v10925_v23, %v3468_v44 }
 0x1b7   : > { %v11214_v39 = vadd.f32 %v3887_v61, %v11148_v52  ;;  %v3694_v40 = vmul.f32 %v10927_v24, %v3470_v1  ;;  %v3687_v63 = vmul.f32 %v10948_v55, %v3463_v35  ;;  %v3900_v52 = vrot.slane %v11150_v7, 4 }
 0x1b8   : > { %v3685_v22 = vmul.f32 %v10921_v21, %v3461_v27  ;;  %9560 = vmatpush3.bf16.msra.mxu0 %v576_v3  ;;  %9584 = vmatpush3.bf16.msra.mxu1 %v592_v6  ;;  %v9233_v25 = vpop.f32.mrb[28].mxu0  ;;  %v9257_v62 = vpop.f32.mrb[28].mxu1  ;;  %v3693_v33 = vmul.f32 %v10921_v21, %v3469_v9  ;;  %v3695_v53 = vmul.f32 %v10948_v55, %v3471_v26 }
 0x1b9   : > { %v1476_v36 = vpop.f32.mrb[29].mxu0  ;;  %v1589_v8 = vpop.f32.mrb[29].mxu1  ;;  %9561 = vmatprep.subr.bf16.mxu0 %v11160_v30  ;;  %9585 = vmatprep.subr.bf16.mxu1 %v11164_v16  ;;  %v1485_v44 = vadd.f32 %v9233_v25, %v10919_v20  ;;  %v1598_v61 = vadd.f32 %v9257_v62, %v10919_v20  ;;  %v616_v62 = vld [vmem:[%s10671_s16 + $0x5d0] sm:$0xff]   ;;  %v3864_v26 = vadd.f32 %v3863_v10, %v11188_v45  ;;  %v3889_v45 = vrot.slane %v11214_v39, 2 }
 0x1ba   : > { %v3906_v29 = vadd.f32 %v3685_v22, %v3684_v18  ;;  %v1477_v3 = vadd.f32 %v1476_v36, %v10905_v28  ;;  %v1590_v6 = vadd.f32 %v1589_v8, %v10905_v28  ;;  %v9234_v38 = vpop.f32.mrb[30].mxu0  ;;  %v9258_v31 = vpop.f32.mrb[30].mxu1  ;;  %v3919_v0 = vadd.f32 %v3693_v33, %v3692_v19  ;;  %v11235_v19 = vld [vmem:[%s10671_s16 + $0x598] sm:$0xff]  }
 0x1bb   : > { %v1479_v42 = vpop.f32.mrb[31].mxu0  ;;  %v1592_v43 = vpop.f32.mrb[31].mxu1  ;;  %v1601_v18 = vadd.f32 %v9258_v31, %v10907_v15  ;;  %v3876_v33 = vrot.slane %v11201_v54, 2  ;;  %v3466_v36 = vmax.f32 %v1485_v44, 0.0  ;;  %v3901_v10 = vadd.f32 %v3900_v52, %v11150_v7 }
 0x1bc   : > { %v3907_v41 = vadd.f32 %v3906_v29, %v3686_v37  ;;  %v3464_v47 = vmax.f32 %v1477_v3, 0.0  ;;  %v3472_v49 = vmax.f32 %v1590_v6, 0.0  ;;  %9562 = vmatpush3.bf16.msra.mxu0 %v11160_v30  ;;  %9586 = vmatpush3.bf16.msra.mxu1 %v11164_v16  ;;  %v3920_v27 = vadd.f32 %v3919_v0, %v3694_v40 }
 0x1bd   : > { %9595 = vmatprep.subr.bf16.mxu0 %v11167_v17  ;;  %9619 = vmatprep.subr.bf16.mxu1 %v11171_v57  ;;  %v1488_v16 = vadd.f32 %v9234_v38, %v10907_v15  ;;  %v1480_v22 = vadd.f32 %v1479_v42, %v10899_v12  ;;  %v1593_v25 = vadd.f32 %v1592_v43, %v10899_v12  ;;  %v3474_v37 = vmax.f32 %v1598_v61, 0.0 }
 0x1be   : > { %v3688_v1 = vmul.f32 %v10950_v56, %v3464_v47  ;;  %v3908_v35 = vadd.f32 %v3907_v41, %v3687_v63  ;;  %v3696_v30 = vmul.f32 %v10950_v56, %v3472_v49  ;;  %v3921_v9 = vadd.f32 %v3920_v27, %v3695_v53  ;;  %v620_v27 = vld [vmem:[%s10671_s16 + $0x5e0] sm:$0xff]  }
 0x1bf   : > { %9564 = vmatmul.mubr.bf16.vlgmr.msra.gmra.mrb[80].mxu0 %v10970_v34  ;;  %9588 = vmatmul.mubr.bf16.vlgmr.msra.gmra.mrb[80].mxu1 %v10970_v34  ;;  %v3465_v3 = vmax.f32 %v1480_v22, 0.0  ;;  %v3473_v6 = vmax.f32 %v1593_v25, 0.0  ;;  %v3467_v34 = vmax.f32 %v1488_v16, 0.0  ;;  %v3877_v40 = vadd.f32 %v3876_v33, %v11201_v54  ;;  %v622_v25 = vld [vmem:[%s10671_s16 + $0x5e8] sm:$0xff]  }
 0x1c0   : > { %v3909_v8 = vadd.f32 %v3908_v35, %v3688_v1  ;;  %9596 = vmatpush3.bf16.msra.mxu0 %v11167_v17  ;;  %v3922_v29 = vadd.f32 %v3921_v9, %v3696_v30  ;;  %9620 = vmatpush3.bf16.msra.mxu1 %v11171_v57  ;;  %v3475_v17 = vmax.f32 %v1601_v18, 0.0  ;;  %v618_v57 = vld [vmem:[%s10671_s16 + $0x5d8] sm:$0xff]   ;;  %v3690_v63 = vmul.f32 %v10980_v46, %v3466_v36  ;;  %v11285_v36 = vld [vmem:[%s10671_s16 + $0x5b0] sm:$0xff]  }
 0x1c1   : > { %9597 = vmatprep.subr.bf16.mxu0 %v11174_v14  ;;  %9621 = vmatprep.subr.bf16.mxu1 %v11178_v13  ;;  %v3689_v38 = vmul.f32 %v10967_v32, %v3465_v3  ;;  %v3697_v31 = vmul.f32 %v10967_v32, %v3473_v6  ;;  %v3839_v7 = vrot.slane %v11195_v58, 1  ;;  %v3852_v0 = vrot.slane %v11197_v59, 1  ;;  %v11294_v6 = vld [vmem:[%s10671_s16 + $0x5b8] sm:$0xff]  }
 0x1c2   : > { %9567 = vmatprep.mubr.bf16.mxu0 %v10983_v48  ;;  %9591 = vmatprep.mubr.bf16.mxu1 %v10983_v48  ;;  %v3865_v42 = vrot.slane %v3864_v26, 1  ;;  %v3698_v43 = vmul.f32 %v10980_v46, %v3474_v37  ;;  %v3890_v48 = vadd.f32 %v3889_v45, %v11214_v39  ;;  %v3902_v54 = vrot.slane %v3901_v10, 2 }
 0x1c3   : > { %v3910_v41 = vadd.f32 %v3909_v8, %v3689_v38  ;;  %v3923_v44 = vadd.f32 %v3922_v29, %v3697_v31  ;;  %v3691_v47 = vmul.f32 %v10993_v60, %v3467_v34  ;;  %v3699_v49 = vmul.f32 %v10993_v60, %v3475_v17  ;;  %v11288_v8 = vld [vmem:[%s10671_s16 + $0x5f0] sm:$0xff]  }
 0x1c4   : > { %9598 = vmatpush3.bf16.msra.mxu0 %v11174_v14  ;;  %9622 = vmatpush3.bf16.msra.mxu1 %v11178_v13  ;;  %v604_v14 = vld [vmem:[%s10671_s16 + $0x5a0] sm:$0xff]   ;;  %v3878_v61 = vrot.slane %v3877_v40, 1  ;;  %v3840_v13 = vadd.f32 %v3839_v7, %v11195_v58  ;;  %v3853_v39 = vadd.f32 %v3852_v0, %v11197_v59  ;;  %v11272_v1 = vstv %s11241_s22 }
 0x1c5   : > { %9599 = vmatprep.subr.bf16.mxu0 %v11193_v50  ;;  %9623 = vmatprep.subr.bf16.mxu1 %v616_v62  ;;  %v3911_v52 = vadd.f32 %v3910_v41, %v3690_v63  ;;  %v3924_v53 = vadd.f32 %v3923_v44, %v3698_v43  ;;  %v3866_v35 = vadd.f32 %v3865_v42, %v3864_v26  ;;  %v3891_v9 = vrot.slane %v3890_v48, 1 }
 0x1c6   : > { %v3903_v18 = vadd.f32 %v3902_v54, %v3901_v10  ;;  %v3879_v59 = vadd.f32 %v3878_v61, %v3877_v40  ;;  %v11282_v26 = vadd.f32 %v11272_v1, %v3853_v39 }
 0x1c7   : > { %9568 = vmatmul.mubr.bf16.gmra.mrb[84].mxu0 %v11002_v51  ;;  %9592 = vmatmul.mubr.bf16.gmra.mrb[84].mxu1 %v11002_v51  ;;  %v3912_v30 = vadd.f32 %v3911_v52, %v3691_v47  ;;  %v3925_v16 = vadd.f32 %v3924_v53, %v3699_v49  ;;  %v606_v51 = vld [vmem:[%s10671_s16 + $0x5a8] sm:$0xff]   ;;  %v11291_v29 = vadd.f32 %v11272_v1, %v3866_v35 }
 0x1c8   : > { %9600 = vmatpush3.bf16.msra.mxu0 %v11193_v50  ;;  %9624 = vmatpush3.bf16.msra.mxu1 %v616_v62  ;;  %v10159_v50 = vld [vmem:[#allocation6] sm:$0xff]   ;;  %v11279_v62 = vadd.f32 %v11272_v1, %v3840_v13  ;;  %v3904_v3 = vrot.slane %v3903_v18, 1  ;;  %v11297_v38 = vadd.f32 %v11272_v1, %v3879_v59 }
 0x1c9   : > { %9601 = vmatprep.subr.bf16.mxu0 %v11235_v19  ;;  %9625 = vmatprep.subr.bf16.mxu1 %v618_v57  ;;  %v3913_v58 = vrot.slane %v3912_v30, 4  ;;  %v3926_v22 = vrot.slane %v3925_v16, 4 }
 0x1ca   : > { %9611 = vmatprep.mubr.bf16.mxu0 %v10159_v50  ;;  %9635 = vmatprep.mubr.bf16.mxu1 %v10159_v50  ;;  %v4191_v31 = vsel %vm13595_vm0, %v11282_v26, %v11279_v62 }
 0x1cb   : > { %v3914_v33 = vadd.f32 %v3913_v58, %v3912_v30  ;;  %v3927_v37 = vadd.f32 %v3926_v22, %v3925_v16  ;;  %v4193_v0 = vsel %vm13592_vm1, %v11291_v29, %v4191_v31 }
 0x1cc   : > { %9602 = vmatpush3.bf16.msra.mxu0 %v11235_v19  ;;  %9626 = vmatpush3.bf16.msra.mxu1 %v618_v57  ;;  %v3892_v19 = vadd.f32 %v3891_v9, %v3890_v48  ;;  %v3905_v48 = vadd.f32 %v3904_v3, %v3903_v18  ;;  %v4195_v18 = vsel %vm13591_vm2, %v11297_v38, %v4193_v0 }
 0x1cd   : > { %9603 = vmatprep.subr.bf16.mxu0 %v604_v14  ;;  %9627 = vmatprep.subr.bf16.mxu1 %v620_v27  ;;  %v3915_v45 = vrot.slane %v3914_v33, 2  ;;  %v3928_v10 = vrot.slane %v3927_v37, 2 }
 0x1ce   : > { %v11309_v54 = vadd.f32 %v11272_v1, %v3892_v19  ;;  %v11323_v22 = vadd.f32 %v11272_v1, %v3905_v48 }
 0x1cf   : > { %v3929_v61 = vadd.f32 %v3928_v10, %v3927_v37 }
 0x1d0   : > { %9604 = vmatpush3.bf16.msra.mxu0 %v604_v14  ;;  %v9277_v34 = vpop.f32.mrb[32].mxu0  ;;  %v9301_v17 = vpop.f32.mrb[32].mxu1  ;;  %9628 = vmatpush3.bf16.msra.mxu1 %v620_v27  ;;  %v11312_v14 = vld [vmem:[%s10671_s16 + $0x5f8] sm:$0xff]   ;;  %v3916_v27 = vadd.f32 %v3915_v45, %v3914_v33 }
 0x1d1   : > { %v1695_v57 = vadd.f32 %v9277_v34, %v10883_v2  ;;  %v1808_v40 = vadd.f32 %v9301_v17, %v10883_v2  ;;  %v1686_v63 = vpop.f32.mrb[33].mxu0  ;;  %v1799_v7 = vpop.f32.mrb[33].mxu1  ;;  %9605 = vmatprep.subr.bf16.mxu0 %v606_v51  ;;  %9629 = vmatprep.subr.bf16.mxu1 %v622_v25 }
 0x1d2   : > { %v1687_v42 = vadd.f32 %v1686_v63, %v10887_v4  ;;  %v1800_v43 = vadd.f32 %v1799_v7, %v10887_v4  ;;  %v9278_v41 = vpop.f32.mrb[34].mxu0  ;;  %v9302_v44 = vpop.f32.mrb[34].mxu1  ;;  %v3917_v37 = vrot.slane %v3916_v27, 1 }
 0x1d3   : > { %v3478_v47 = vmax.f32 %v1695_v57, 0.0  ;;  %v1698_v49 = vadd.f32 %v9278_v41, %v10889_v5  ;;  %v1689_v52 = vpop.f32.mrb[35].mxu0  ;;  %v1802_v53 = vpop.f32.mrb[35].mxu1  ;;  %v3486_v16 = vmax.f32 %v1808_v40, 0.0  ;;  %v1811_v9 = vadd.f32 %v9302_v44, %v10889_v5 }
 0x1d4   : > { %v3476_v13 = vmax.f32 %v1687_v42, 0.0  ;;  %v3484_v39 = vmax.f32 %v1800_v43, 0.0  ;;  %9606 = vmatpush3.bf16.msra.mxu0 %v606_v51  ;;  %v1690_v35 = vadd.f32 %v1689_v52, %v10897_v11  ;;  %v1803_v30 = vadd.f32 %v1802_v53, %v10897_v11  ;;  %9630 = vmatpush3.bf16.msra.mxu1 %v622_v25 }
 0x1d5   : > { %9607 = vmatprep.subr.bf16.mxu0 %v11285_v36  ;;  %9631 = vmatprep.subr.bf16.mxu1 %v11288_v8  ;;  %v4197_v51 = vsel %vm13590_vm3, %v11309_v54, %v4195_v18  ;;  %v3702_v59 = vmul.f32 %v10927_v24, %v3478_v47  ;;  %v3479_v33 = vmax.f32 %v1698_v49, 0.0  ;;  %v3930_v25 = vrot.slane %v3929_v61, 1 }
 0x1d6   : > { %v3477_v50 = vmax.f32 %v1690_v35, 0.0  ;;  %v3485_v58 = vmax.f32 %v1803_v30, 0.0  ;;  %v3700_v19 = vmul.f32 %v10925_v23, %v3476_v13  ;;  %v3708_v3 = vmul.f32 %v10925_v23, %v3484_v39 }
 0x1d7   : > { %v3710_v31 = vmul.f32 %v10927_v24, %v3486_v16  ;;  %v3487_v57 = vmax.f32 %v1811_v9, 0.0  ;;  %v3918_v40 = vadd.f32 %v3917_v37, %v3916_v27  ;;  %v3931_v63 = vadd.f32 %v3930_v25, %v3929_v61  ;;  %v10160_v25 = vld [vmem:[#allocation6 + $0x8] sm:$0xff]  }
 0x1d8   : > { %v3701_v45 = vmul.f32 %v10921_v21, %v3477_v50  ;;  %v3709_v10 = vmul.f32 %v10921_v21, %v3485_v58  ;;  %9608 = vmatpush3.bf16.msra.mxu0 %v11285_v36  ;;  %v9281_v34 = vpop.f32.mrb[36].mxu0  ;;  %v9305_v17 = vpop.f32.mrb[36].mxu1  ;;  %9632 = vmatpush3.bf16.msra.mxu1 %v11288_v8  ;;  %v3703_v47 = vmul.f32 %v10948_v55, %v3479_v33 }
 0x1d9   : > { %v1702_v7 = vpop.f32.mrb[37].mxu0  ;;  %v1815_v0 = vpop.f32.mrb[37].mxu1  ;;  %9609 = vmatprep.subr.bf16.mxu0 %v11294_v6  ;;  %v11340_v49 = vadd.f32 %v11272_v1, %v3918_v40  ;;  %v11343_v8 = vadd.f32 %v11272_v1, %v3931_v63  ;;  %v4199_v52 = vsel %vm13589_vm4, %v11323_v22, %v4197_v51  ;;  %9633 = vmatprep.subr.bf16.mxu1 %v11312_v14 }
 0x1da   : > { %v3932_v42 = vadd.f32 %v3701_v45, %v3700_v19  ;;  %v3945_v43 = vadd.f32 %v3709_v10, %v3708_v3  ;;  %v1703_v41 = vadd.f32 %v1702_v7, %v10905_v28  ;;  %v1816_v44 = vadd.f32 %v1815_v0, %v10905_v28  ;;  %v9282_v36 = vpop.f32.mrb[38].mxu0  ;;  %v9306_v48 = vpop.f32.mrb[38].mxu1  ;;  %v10161_v45 = vld [vmem:[#allocation6 + $0x10] sm:$0xff]  }
 0x1db   : > { %v1705_v53 = vpop.f32.mrb[39].mxu0  ;;  %v1818_v27 = vpop.f32.mrb[39].mxu1  ;;  %v3711_v30 = vmul.f32 %v10948_v55, %v3487_v57  ;;  %v1711_v16 = vadd.f32 %v9281_v34, %v10919_v20  ;;  %v1824_v9 = vadd.f32 %v9305_v17, %v10919_v20  ;;  %v4201_v18 = vsel %vm13588_vm5, %v11340_v49, %v4199_v52 }
 0x1dc   : > { %v3933_v61 = vadd.f32 %v3932_v42, %v3702_v59  ;;  %v3946_v13 = vadd.f32 %v3945_v43, %v3710_v31  ;;  %v3480_v39 = vmax.f32 %v1703_v41, 0.0  ;;  %v3488_v35 = vmax.f32 %v1816_v44, 0.0  ;;  %9610 = vmatpush3.bf16.msra.mxu0 %v11294_v6  ;;  %9634 = vmatpush3.bf16.msra.mxu1 %v11312_v14 }
 0x1dd   : > { %v4203_v50 = vsel %vm13587_vm6, %v11343_v8, %v4201_v18  ;;  %v1714_v33 = vadd.f32 %v9282_v36, %v10907_v15  ;;  %v1706_v37 = vadd.f32 %v1705_v53, %v10899_v12  ;;  %v1827_v3 = vadd.f32 %v9306_v48, %v10907_v15 }
 0x1de   : > { %v3704_v58 = vmul.f32 %v10950_v56, %v3480_v39  ;;  %v3934_v51 = vadd.f32 %v3933_v61, %v3703_v47  ;;  %v3712_v59 = vmul.f32 %v10950_v56, %v3488_v35  ;;  %4221 = vmax.xlane.f32.xlu1 %v4203_v50  ;;  %v3947_v6 = vadd.f32 %v3946_v13, %v3711_v30  ;;  %v10162_v47 = vld [vmem:[#allocation6 + $0x18] sm:$0xff]  }
 0x1df   : > { %9612 = vmatmul.mubr.bf16.vlgmr.msra.gmra.mrb[88].mxu0 %v10160_v25  ;;  %v1819_v14 = vadd.f32 %v1818_v27, %v10899_v12  ;;  %9636 = vmatmul.mubr.bf16.vlgmr.msra.gmra.mrb[88].mxu1 %v10160_v25  ;;  %v3482_v10 = vmax.f32 %v1711_v16, 0.0  ;;  %v3481_v17 = vmax.f32 %v1706_v37, 0.0  ;;  %v3490_v31 = vmax.f32 %v1824_v9, 0.0 }
 0x1e0   : > { %v3935_v19 = vadd.f32 %v3934_v51, %v3704_v58  ;;  %9615 = vmatprep.mubr.bf16.mxu0 %v10161_v45  ;;  %v3948_v34 = vadd.f32 %v3947_v6, %v3712_v59  ;;  %9639 = vmatprep.mubr.bf16.mxu1 %v10161_v45  ;;  %v3483_v40 = vmax.f32 %v1714_v33, 0.0  ;;  %v3491_v7 = vmax.f32 %v1827_v3, 0.0 }
 0x1e1   : > { %v3489_v57 = vmax.f32 %v1819_v14, 0.0  ;;  %v3705_v63 = vmul.f32 %v10967_v32, %v3481_v17  ;;  %v3706_v42 = vmul.f32 %v10980_v46, %v3482_v10  ;;  %v3714_v41 = vmul.f32 %v10980_v46, %v3490_v31 }
 0x1e2   : > { %v3707_v36 = vmul.f32 %v10993_v60, %v3483_v40  ;;  %v3715_v52 = vmul.f32 %v10993_v60, %v3491_v7 }
 0x1e3   : > { %v3713_v0 = vmul.f32 %v10967_v32, %v3489_v57  ;;  %v3936_v43 = vadd.f32 %v3935_v19, %v3705_v63 }
 0x1e5   : > { %v3949_v44 = vadd.f32 %v3948_v34, %v3713_v0  ;;  %v3937_v48 = vadd.f32 %v3936_v43, %v3706_v42 }
 0x1e7   : > { %9616 = vmatmul.mubr.bf16.gmra.mrb[92].mxu0 %v10162_v47  ;;  %v3950_v53 = vadd.f32 %v3949_v44, %v3714_v41  ;;  %9640 = vmatmul.mubr.bf16.gmra.mrb[92].mxu1 %v10162_v47  ;;  %v11369_v27 = vadd.f32 %v3937_v48, %v3707_v36 }
 0x1e9   : > { %v11371_v61 = vadd.f32 %v3950_v53, %v3715_v52 }
 0x1f0   : > { %v9325_v13 = vpop.f32.mrb[40].mxu0  ;;  %v9349_v39 = vpop.f32.mrb[40].mxu1 }
 0x1f1   : > { %v1912_v35 = vpop.f32.mrb[41].mxu0  ;;  %v2025_v30 = vpop.f32.mrb[41].mxu1  ;;  %v1921_v16 = vadd.f32 %v9325_v13, %v10883_v2  ;;  %v2034_v9 = vadd.f32 %v9349_v39, %v10883_v2 }
 0x1f2   : > { %v9326_v18 = vpop.f32.mrb[42].mxu0  ;;  %v9350_v50 = vpop.f32.mrb[42].mxu1  ;;  %v1913_v58 = vadd.f32 %v1912_v35, %v10887_v4  ;;  %v2026_v51 = vadd.f32 %v2025_v30, %v10887_v4 }
 0x1f3   : > { %v1915_v59 = vpop.f32.mrb[43].mxu0  ;;  %v2028_v6 = vpop.f32.mrb[43].mxu1  ;;  %v1924_v33 = vadd.f32 %v9326_v18, %v10889_v5  ;;  %v2037_v37 = vadd.f32 %v9350_v50, %v10889_v5  ;;  %v3494_v25 = vmax.f32 %v1921_v16, 0.0  ;;  %v3502_v19 = vmax.f32 %v2034_v9, 0.0 }
 0x1f4   : > { %v3492_v3 = vmax.f32 %v1913_v58, 0.0  ;;  %v3500_v14 = vmax.f32 %v2026_v51, 0.0  ;;  %v1916_v45 = vadd.f32 %v1915_v59, %v10897_v11  ;;  %v2029_v10 = vadd.f32 %v2028_v6, %v10897_v11 }
 0x1f5   : > { %v3495_v31 = vmax.f32 %v1924_v33, 0.0  ;;  %v3503_v57 = vmax.f32 %v2037_v37, 0.0  ;;  %v3718_v42 = vmul.f32 %v10927_v24, %v3494_v25  ;;  %v3726_v43 = vmul.f32 %v10927_v24, %v3502_v19 }
 0x1f6   : > { %v3493_v40 = vmax.f32 %v1916_v45, 0.0  ;;  %v3501_v63 = vmax.f32 %v2029_v10, 0.0  ;;  %v3716_v47 = vmul.f32 %v10925_v23, %v3492_v3  ;;  %v3724_v52 = vmul.f32 %v10925_v23, %v3500_v14 }
 0x1f7   : > { %v3719_v50 = vmul.f32 %v10948_v55, %v3495_v31  ;;  %v3727_v58 = vmul.f32 %v10948_v55, %v3503_v57 }
 0x1f8   : > { %v9329_v34 = vpop.f32.mrb[44].mxu0  ;;  %v9353_v17 = vpop.f32.mrb[44].mxu1  ;;  %v3717_v53 = vmul.f32 %v10921_v21, %v3493_v40  ;;  %v3725_v13 = vmul.f32 %v10921_v21, %v3501_v63 }
 0x1f9   : > { %v1928_v7 = vpop.f32.mrb[45].mxu0  ;;  %v2041_v0 = vpop.f32.mrb[45].mxu1  ;;  %v1937_v30 = vadd.f32 %v9329_v34, %v10919_v20  ;;  %v2050_v16 = vadd.f32 %v9353_v17, %v10919_v20 }
 0x1fa   : > { %v1929_v41 = vadd.f32 %v1928_v7, %v10905_v28  ;;  %v2042_v44 = vadd.f32 %v2041_v0, %v10905_v28  ;;  %v9330_v36 = vpop.f32.mrb[46].mxu0  ;;  %v9354_v48 = vpop.f32.mrb[46].mxu1  ;;  %v3958_v51 = vadd.f32 %v3717_v53, %v3716_v47  ;;  %v3971_v59 = vadd.f32 %v3725_v13, %v3724_v52 }
 0x1fb   : > { %v1931_v39 = vpop.f32.mrb[47].mxu0  ;;  %v2044_v35 = vpop.f32.mrb[47].mxu1  ;;  %v1940_v37 = vadd.f32 %v9330_v36, %v10907_v15  ;;  %v2053_v25 = vadd.f32 %v9354_v48, %v10907_v15  ;;  %v3498_v10 = vmax.f32 %v1937_v30, 0.0  ;;  %v3506_v34 = vmax.f32 %v2050_v16, 0.0 }
 0x1fc   : > { %v3496_v9 = vmax.f32 %v1929_v41, 0.0  ;;  %v3504_v18 = vmax.f32 %v2042_v44, 0.0  ;;  %v3959_v19 = vadd.f32 %v3958_v51, %v3718_v42  ;;  %v3972_v3 = vadd.f32 %v3971_v59, %v3726_v43 }
 0x1fd   : > { %v1932_v14 = vadd.f32 %v1931_v39, %v10899_v12  ;;  %v2045_v45 = vadd.f32 %v2044_v35, %v10899_v12  ;;  %v3499_v63 = vmax.f32 %v1940_v37, 0.0  ;;  %v3507_v7 = vmax.f32 %v2053_v25, 0.0 }
 0x1fe   : > { %v3720_v6 = vmul.f32 %v10950_v56, %v3496_v9  ;;  %v3728_v33 = vmul.f32 %v10950_v56, %v3504_v18  ;;  %v3960_v17 = vadd.f32 %v3959_v19, %v3719_v50  ;;  %v3973_v31 = vadd.f32 %v3972_v3, %v3727_v58 }
 0x1ff   : > { %v3497_v57 = vmax.f32 %v1932_v14, 0.0  ;;  %v3505_v40 = vmax.f32 %v2045_v45, 0.0  ;;  %v3722_v42 = vmul.f32 %v10980_v46, %v3498_v10  ;;  %v3730_v43 = vmul.f32 %v10980_v46, %v3506_v34 }
 0x200   : > { %v3961_v0 = vadd.f32 %v3960_v17, %v3720_v6  ;;  %v3974_v41 = vadd.f32 %v3973_v31, %v3728_v33  ;;  %v3723_v52 = vmul.f32 %v10993_v60, %v3499_v63  ;;  %v3731_v53 = vmul.f32 %v10993_v60, %v3507_v7 }
 0x201   : > { %v3721_v44 = vmul.f32 %v10967_v32, %v3497_v57  ;;  %v3729_v36 = vmul.f32 %v10967_v32, %v3505_v40 }
 0x203   : > { %v3962_v48 = vadd.f32 %v3961_v0, %v3721_v44  ;;  %v3975_v47 = vadd.f32 %v3974_v41, %v3729_v36 }
 0x205   : > { %v3963_v13 = vadd.f32 %v3962_v48, %v3722_v42  ;;  %v3976_v39 = vadd.f32 %v3975_v47, %v3730_v43 }
 0x207   : > { %v11405_v35 = vadd.f32 %v3963_v13, %v3723_v52  ;;  %v11407_v30 = vadd.f32 %v3976_v39, %v3731_v53 }
 0x210   : > { %v9373_v16 = vpop.f32.mrb[48].mxu0  ;;  %v9397_v9 = vpop.f32.mrb[48].mxu1 }
 0x211   : > { %v2138_v18 = vpop.f32.mrb[49].mxu0  ;;  %v2251_v50 = vpop.f32.mrb[49].mxu1  ;;  %v2147_v58 = vadd.f32 %v9373_v16, %v10883_v2  ;;  %v2260_v51 = vadd.f32 %v9397_v9, %v10883_v2 }
 0x212   : > { %v9374_v59 = vpop.f32.mrb[50].mxu0  ;;  %v9398_v6 = vpop.f32.mrb[50].mxu1  ;;  %v2139_v33 = vadd.f32 %v2138_v18, %v10887_v4  ;;  %v2252_v37 = vadd.f32 %v2251_v50, %v10887_v4 }
 0x213   : > { %v2141_v25 = vpop.f32.mrb[51].mxu0  ;;  %v2254_v19 = vpop.f32.mrb[51].mxu1  ;;  %v2150_v3 = vadd.f32 %v9374_v59, %v10889_v5  ;;  %v2263_v14 = vadd.f32 %v9398_v6, %v10889_v5  ;;  %v3510_v45 = vmax.f32 %v2147_v58, 0.0  ;;  %v3518_v10 = vmax.f32 %v2260_v51, 0.0 }
 0x214   : > { %v3508_v34 = vmax.f32 %v2139_v33, 0.0  ;;  %v3516_v17 = vmax.f32 %v2252_v37, 0.0  ;;  %v2142_v31 = vadd.f32 %v2141_v25, %v10897_v11  ;;  %v2255_v57 = vadd.f32 %v2254_v19, %v10897_v11 }
 0x215   : > { %v3511_v7 = vmax.f32 %v2150_v3, 0.0  ;;  %v3519_v0 = vmax.f32 %v2263_v14, 0.0  ;;  %v3734_v43 = vmul.f32 %v10927_v24, %v3510_v45  ;;  %v3742_v48 = vmul.f32 %v10927_v24, %v3518_v10 }
 0x216   : > { %v3509_v41 = vmax.f32 %v2142_v31, 0.0  ;;  %v3517_v44 = vmax.f32 %v2255_v57, 0.0  ;;  %v3732_v39 = vmul.f32 %v10925_v23, %v3508_v34  ;;  %v3740_v16 = vmul.f32 %v10925_v23, %v3516_v17 }
 0x217   : > { %v3735_v37 = vmul.f32 %v10948_v55, %v3511_v7  ;;  %v3743_v25 = vmul.f32 %v10948_v55, %v3519_v0 }
 0x218   : > { %v9377_v40 = vpop.f32.mrb[52].mxu0  ;;  %v9401_v63 = vpop.f32.mrb[52].mxu1  ;;  %v3733_v9 = vmul.f32 %v10921_v21, %v3509_v41  ;;  %v3741_v18 = vmul.f32 %v10921_v21, %v3517_v44 }
 0x219   : > { %v2154_v36 = vpop.f32.mrb[53].mxu0  ;;  %v2267_v42 = vpop.f32.mrb[53].mxu1  ;;  %v2163_v51 = vadd.f32 %v9377_v40, %v10919_v20  ;;  %v2276_v59 = vadd.f32 %v9401_v63, %v10919_v20 }
 0x21a   : > { %v2155_v47 = vadd.f32 %v2154_v36, %v10905_v28  ;;  %v2268_v52 = vadd.f32 %v2267_v42, %v10905_v28  ;;  %v9378_v53 = vpop.f32.mrb[54].mxu0  ;;  %v9402_v13 = vpop.f32.mrb[54].mxu1  ;;  %v3984_v19 = vadd.f32 %v3733_v9, %v3732_v39  ;;  %v3997_v3 = vadd.f32 %v3741_v18, %v3740_v16 }
 0x21b   : > { %v2157_v50 = vpop.f32.mrb[55].mxu0  ;;  %v2270_v58 = vpop.f32.mrb[55].mxu1  ;;  %v2166_v10 = vadd.f32 %v9378_v53, %v10907_v15  ;;  %v2279_v34 = vadd.f32 %v9402_v13, %v10907_v15  ;;  %v3514_v63 = vmax.f32 %v2163_v51, 0.0  ;;  %v3522_v7 = vmax.f32 %v2276_v59, 0.0 }
 0x21c   : > { %v3512_v6 = vmax.f32 %v2155_v47, 0.0  ;;  %v3520_v33 = vmax.f32 %v2268_v52, 0.0  ;;  %v3985_v17 = vadd.f32 %v3984_v19, %v3734_v43  ;;  %v3998_v31 = vadd.f32 %v3997_v3, %v3742_v48 }
 0x21d   : > { %v2158_v57 = vadd.f32 %v2157_v50, %v10899_v12  ;;  %v2271_v40 = vadd.f32 %v2270_v58, %v10899_v12  ;;  %v3515_v42 = vmax.f32 %v2166_v10, 0.0  ;;  %v3523_v47 = vmax.f32 %v2279_v34, 0.0 }
 0x21e   : > { %v3736_v14 = vmul.f32 %v10950_v56, %v3512_v6  ;;  %v3744_v45 = vmul.f32 %v10950_v56, %v3520_v33  ;;  %v3986_v41 = vadd.f32 %v3985_v17, %v3735_v37  ;;  %v3999_v0 = vadd.f32 %v3998_v31, %v3743_v25 }
 0x21f   : > { %v3513_v44 = vmax.f32 %v2158_v57, 0.0  ;;  %v3521_v36 = vmax.f32 %v2271_v40, 0.0  ;;  %v3738_v43 = vmul.f32 %v10980_v46, %v3514_v63  ;;  %v3746_v48 = vmul.f32 %v10980_v46, %v3522_v7 }
 0x220   : > { %v3987_v52 = vadd.f32 %v3986_v41, %v3736_v14  ;;  %v4000_v39 = vadd.f32 %v3999_v0, %v3744_v45  ;;  %v3739_v18 = vmul.f32 %v10993_v60, %v3515_v42  ;;  %v3747_v50 = vmul.f32 %v10993_v60, %v3523_v47 }
 0x221   : > { %v3737_v53 = vmul.f32 %v10967_v32, %v3513_v44  ;;  %v3745_v13 = vmul.f32 %v10967_v32, %v3521_v36  ;;  %v3939_v33 = vrot.slane %v11369_v27, 4  ;;  %v3952_v37 = vrot.slane %v11371_v61, 4 }
 0x222   : > { %v3965_v3 = vrot.slane %v11405_v35, 4  ;;  %v3978_v45 = vrot.slane %v11407_v30, 4 }
 0x223   : > { %v3988_v16 = vadd.f32 %v3987_v52, %v3737_v53  ;;  %v4001_v9 = vadd.f32 %v4000_v39, %v3745_v13  ;;  %v3940_v25 = vadd.f32 %v3939_v33, %v11369_v27  ;;  %v3953_v19 = vadd.f32 %v3952_v37, %v11371_v61 }
 0x224   : > { %v3966_v41 = vadd.f32 %v3965_v3, %v11405_v35  ;;  %v3979_v39 = vadd.f32 %v3978_v45, %v11407_v30 }
 0x225   : > { %v3989_v58 = vadd.f32 %v3988_v16, %v3738_v43  ;;  %v4002_v51 = vadd.f32 %v4001_v9, %v3746_v48  ;;  %v3941_v17 = vrot.slane %v3940_v25, 2  ;;  %v3954_v7 = vrot.slane %v3953_v19, 2 }
 0x226   : > { %v3980_v45 = vrot.slane %v3979_v39, 2 }
 0x227   : > { %v3990_v59 = vadd.f32 %v3989_v58, %v3739_v18  ;;  %v4003_v6 = vadd.f32 %v4002_v51, %v3747_v50  ;;  %v11457_v35 = vadd.f32 %v3941_v17, %v3940_v25  ;;  %v11459_v18 = vadd.f32 %v3954_v7, %v3953_v19 }
 0x228   : > { %v3967_v50 = vrot.slane %v3966_v41, 2 }
 0x229   : > { %v3991_v48 = vrot.slane %v3990_v59, 4  ;;  %v4004_v33 = vrot.slane %v4003_v6, 4 }
 0x22b   : > { %v3992_v19 = vadd.f32 %v3991_v48, %v3990_v59 }
 0x230   : > { %v9421_v14 = vpop.f32.mrb[56].mxu0 }
 0x231   : > { %v9445_v10 = vpop.f32.mrb[56].mxu1  ;;  %v2364_v34 = vpop.f32.mrb[57].mxu0  ;;  %v2373_v31 = vadd.f32 %v9421_v14, %v10883_v2 }
 0x232   : > { %v2365_v57 = vadd.f32 %v2364_v34, %v10887_v4  ;;  %v2477_v40 = vpop.f32.mrb[57].mxu1  ;;  %v9422_v63 = vpop.f32.mrb[58].mxu0  ;;  %v2486_v27 = vadd.f32 %v9445_v10, %v10883_v2 }
 0x233   : > { %v2478_v61 = vadd.f32 %v2477_v40, %v10887_v4  ;;  %v9446_v0 = vpop.f32.mrb[58].mxu1  ;;  %v2367_v44 = vpop.f32.mrb[59].mxu0  ;;  %v2376_v42 = vadd.f32 %v9422_v63, %v10889_v5  ;;  %v3526_v16 = vmax.f32 %v2373_v31, 0.0 }
 0x234   : > { %v3524_v36 = vmax.f32 %v2365_v57, 0.0  ;;  %v2368_v47 = vadd.f32 %v2367_v44, %v10897_v11  ;;  %v2480_v52 = vpop.f32.mrb[59].mxu1  ;;  %v2489_v13 = vadd.f32 %v9446_v0, %v10889_v5  ;;  %v3534_v58 = vmax.f32 %v2486_v27, 0.0 }
 0x235   : > { %v3532_v53 = vmax.f32 %v2478_v61, 0.0  ;;  %v2481_v43 = vadd.f32 %v2480_v52, %v10897_v11  ;;  %v3527_v3 = vmax.f32 %v2376_v42, 0.0  ;;  %v3750_v57 = vmul.f32 %v10927_v24, %v3526_v16 }
 0x236   : > { %v3525_v9 = vmax.f32 %v2368_v47, 0.0  ;;  %v3748_v37 = vmul.f32 %v10925_v23, %v3524_v36  ;;  %v3535_v25 = vmax.f32 %v2489_v13, 0.0  ;;  %v3968_v61 = vadd.f32 %v3967_v50, %v3966_v41 }
 0x237   : > { %v3533_v51 = vmax.f32 %v2481_v43, 0.0  ;;  %v3756_v10 = vmul.f32 %v10925_v23, %v3532_v53  ;;  %v3758_v0 = vmul.f32 %v10927_v24, %v3534_v58  ;;  %v4005_v52 = vadd.f32 %v4004_v33, %v4003_v6 }
 0x238   : > { %v3749_v30 = vmul.f32 %v10921_v21, %v3525_v9  ;;  %v9425_v14 = vpop.f32.mrb[60].mxu0  ;;  %v3751_v53 = vmul.f32 %v10948_v55, %v3527_v3  ;;  %v3759_v48 = vmul.f32 %v10948_v55, %v3535_v25  ;;  %v3993_v41 = vrot.slane %v3992_v19, 2 }
 0x239   : > { %v3757_v34 = vmul.f32 %v10921_v21, %v3533_v51  ;;  %v9449_v17 = vpop.f32.mrb[60].mxu1  ;;  %v2380_v31 = vpop.f32.mrb[61].mxu0  ;;  %v2389_v9 = vadd.f32 %v9425_v14, %v10919_v20 }
 0x23a   : > { %v4010_v40 = vadd.f32 %v3749_v30, %v3748_v37  ;;  %v2381_v63 = vadd.f32 %v2380_v31, %v10905_v28  ;;  %v2493_v7 = vpop.f32.mrb[61].mxu1  ;;  %v9426_v27 = vpop.f32.mrb[62].mxu0  ;;  %v2502_v50 = vadd.f32 %v9449_v17, %v10919_v20  ;;  %v3956_v31 = vrot.slane %v11459_v18, 1 }
 0x23b   : > { %v4023_v44 = vadd.f32 %v3757_v34, %v3756_v10  ;;  %v2494_v36 = vadd.f32 %v2493_v7, %v10905_v28  ;;  %v9450_v42 = vpop.f32.mrb[62].mxu1  ;;  %v2383_v47 = vpop.f32.mrb[63].mxu0  ;;  %v2392_v33 = vadd.f32 %v9426_v27, %v10907_v15  ;;  %v3943_v10 = vrot.slane %v11457_v35, 1 }
 0x23c   : > { %v4011_v13 = vadd.f32 %v4010_v40, %v3750_v57  ;;  %v3528_v59 = vmax.f32 %v2381_v63, 0.0  ;;  %v2496_v43 = vpop.f32.mrb[63].mxu1  ;;  %v2384_v3 = vadd.f32 %v2383_v47, %v10899_v12  ;;  %v2505_v34 = vadd.f32 %v9450_v42, %v10907_v15 }
 0x23d   : > { %v4024_v16 = vadd.f32 %v4023_v44, %v3758_v0  ;;  %v3536_v51 = vmax.f32 %v2494_v36, 0.0  ;;  %v2497_v14 = vadd.f32 %v2496_v43, %v10899_v12  ;;  %v3530_v17 = vmax.f32 %v2389_v9, 0.0 }
 0x23e   : > { %v3752_v58 = vmul.f32 %v10950_v56, %v3528_v59  ;;  %v4012_v37 = vadd.f32 %v4011_v13, %v3751_v53  ;;  %v3529_v40 = vmax.f32 %v2384_v3, 0.0  ;;  %v3981_v63 = vadd.f32 %v3980_v45, %v3979_v39 }
 0x23f   : > { %v3760_v30 = vmul.f32 %v10950_v56, %v3536_v51  ;;  %v4025_v6 = vadd.f32 %v4024_v16, %v3759_v48  ;;  %v4006_v7 = vrot.slane %v4005_v52, 2  ;;  %v3538_v0 = vmax.f32 %v2502_v50, 0.0 }
 0x240   : > { %v4013_v25 = vadd.f32 %v4012_v37, %v3752_v58  ;;  %v3537_v44 = vmax.f32 %v2497_v14, 0.0  ;;  %v3969_v36 = vrot.slane %v3968_v61, 1  ;;  %v3994_v27 = vadd.f32 %v3993_v41, %v3992_v19 }
 0x241   : > { %v4026_v57 = vadd.f32 %v4025_v6, %v3760_v30  ;;  %v3531_v53 = vmax.f32 %v2392_v33, 0.0  ;;  %v3753_v47 = vmul.f32 %v10967_v32, %v3529_v40  ;;  %v3539_v13 = vmax.f32 %v2505_v34, 0.0 }
 0x242   : > { %v3761_v59 = vmul.f32 %v10967_v32, %v3537_v44  ;;  %v3944_v42 = vadd.f32 %v3943_v10, %v11457_v35  ;;  %v3957_v43 = vadd.f32 %v3956_v31, %v11459_v18  ;;  %v3754_v48 = vmul.f32 %v10980_v46, %v3530_v17 }
 0x243   : > { %v4014_v16 = vadd.f32 %v4013_v25, %v3753_v47  ;;  %v3982_v9 = vrot.slane %v3981_v63, 1  ;;  %v4007_v39 = vadd.f32 %v4006_v7, %v4005_v52  ;;  %v3762_v45 = vmul.f32 %v10980_v46, %v3538_v0 }
 0x244   : > { %v4027_v51 = vadd.f32 %v4026_v57, %v3761_v59  ;;  %v3970_v50 = vadd.f32 %v3969_v36, %v3968_v61  ;;  %v3995_v19 = vrot.slane %v3994_v27, 1  ;;  %v3755_v41 = vmul.f32 %v10993_v60, %v3531_v53 }
 0x245   : > { %v4015_v58 = vadd.f32 %v4014_v16, %v3754_v48  ;;  %v3763_v37 = vmul.f32 %v10993_v60, %v3539_v13  ;;  %v11490_v35 = vadd.f32 %v11272_v1, %v3944_v42  ;;  %v11493_v6 = vadd.f32 %v11272_v1, %v3957_v43 }
 0x246   : > { %v4028_v30 = vadd.f32 %v4027_v51, %v3762_v45  ;;  %v3983_v33 = vadd.f32 %v3982_v9, %v3981_v63  ;;  %v4008_v3 = vrot.slane %v4007_v39, 1  ;;  %v3996_v25 = vadd.f32 %v3995_v19, %v3994_v27 }
 0x247   : > { %v4016_v18 = vadd.f32 %v4015_v58, %v3755_v41  ;;  %v11496_v61 = vadd.f32 %v11272_v1, %v3970_v50  ;;  %v4204_v40 = vsel %vm13595_vm0, %v11493_v6, %v11490_v35 }
 0x248   : > { %v4029_v52 = vadd.f32 %v4028_v30, %v3763_v37  ;;  %v4009_v31 = vadd.f32 %v4008_v3, %v4007_v39  ;;  %v11499_v57 = vadd.f32 %v11272_v1, %v3983_v33  ;;  %v11505_v63 = vadd.f32 %v11272_v1, %v3996_v25 }
 0x249   : > { %v4017_v10 = vrot.slane %v4016_v18, 4  ;;  %v4205_v0 = vsel %vm13592_vm1, %v11496_v61, %v4204_v40 }
 0x24a   : > { %v4030_v34 = vrot.slane %v4029_v52, 4  ;;  %v11512_v48 = vadd.f32 %v11272_v1, %v4009_v31  ;;  %v4206_v16 = vsel %vm13591_vm2, %v11499_v57, %v4205_v0 }
 0x24b   : > { %v4018_v14 = vadd.f32 %v4017_v10, %v4016_v18  ;;  %v4207_v19 = vsel %vm13590_vm3, %v11505_v63, %v4206_v16 }
 0x24c   : > { %v4031_v17 = vadd.f32 %v4030_v34, %v4029_v52  ;;  %v4208_v40 = vsel %vm13589_vm4, %v11512_v48, %v4207_v19 }
 0x24d   : > { %v4019_v7 = vrot.slane %v4018_v14, 2 }
 0x24e   : > { %v4032_v36 = vrot.slane %v4031_v17, 2 }
 0x24f   : > { %v4020_v47 = vadd.f32 %v4019_v7, %v4018_v14 }
 0x250   : > { %v9469_v44 = vpop.f32.mrb[64].mxu0  ;;  %v4033_v18 = vadd.f32 %v4032_v36, %v4031_v17 }
 0x251   : > { %v9493_v27 = vpop.f32.mrb[64].mxu1  ;;  %v2590_v53 = vpop.f32.mrb[65].mxu0  ;;  %v2599_v13 = vadd.f32 %v9469_v44, %v10883_v2  ;;  %v4021_v50 = vrot.slane %v4020_v47, 1 }
 0x252   : > { %v2591_v59 = vadd.f32 %v2590_v53, %v10887_v4  ;;  %v2703_v42 = vpop.f32.mrb[65].mxu1  ;;  %v9470_v43 = vpop.f32.mrb[66].mxu0  ;;  %v2712_v9 = vadd.f32 %v9493_v27, %v10883_v2  ;;  %v4034_v17 = vrot.slane %v4033_v18, 1 }
 0x253   : > { %v2704_v39 = vadd.f32 %v2703_v42, %v10887_v4  ;;  %v9494_v45 = vpop.f32.mrb[66].mxu1  ;;  %v2593_v51 = vpop.f32.mrb[67].mxu0  ;;  %v2602_v58 = vadd.f32 %v9470_v43, %v10889_v5  ;;  %v3542_v10 = vmax.f32 %v2599_v13, 0.0  ;;  %v4022_v31 = vadd.f32 %v4021_v50, %v4020_v47 }
 0x254   : > { %v3540_v41 = vmax.f32 %v2591_v59, 0.0  ;;  %v2594_v37 = vadd.f32 %v2593_v51, %v10897_v11  ;;  %v2706_v30 = vpop.f32.mrb[67].mxu1  ;;  %v2715_v52 = vadd.f32 %v9494_v45, %v10889_v5  ;;  %v3550_v34 = vmax.f32 %v2712_v9, 0.0 }
 0x255   : > { %v3548_v33 = vmax.f32 %v2704_v39, 0.0  ;;  %v2707_v3 = vadd.f32 %v2706_v30, %v10897_v11  ;;  %v3543_v0 = vmax.f32 %v2602_v58, 0.0  ;;  %v11531_v42 = vadd.f32 %v11272_v1, %v4022_v31 }
 0x256   : > { %v3541_v25 = vmax.f32 %v2594_v37, 0.0  ;;  %v3764_v7 = vmul.f32 %v10925_v23, %v3540_v41  ;;  %v3551_v53 = vmax.f32 %v2715_v52, 0.0  ;;  %v3766_v43 = vmul.f32 %v10927_v24, %v3542_v10 }
 0x257   : > { %v3549_v14 = vmax.f32 %v2707_v3, 0.0  ;;  %v3772_v36 = vmul.f32 %v10925_v23, %v3548_v33  ;;  %v4035_v9 = vadd.f32 %v4034_v17, %v4033_v18  ;;  %v3774_v50 = vmul.f32 %v10927_v24, %v3550_v34 }
 0x258   : > { %v3765_v44 = vmul.f32 %v10921_v21, %v3541_v25  ;;  %v9473_v27 = vpop.f32.mrb[68].mxu0  ;;  %v4209_v41 = vsel %vm13588_vm5, %v11531_v42, %v4208_v40  ;;  %v3767_v33 = vmul.f32 %v10948_v55, %v3543_v0  ;;  %v3775_v25 = vmul.f32 %v10948_v55, %v3551_v53 }
 0x259   : > { %v3773_v59 = vmul.f32 %v10921_v21, %v3549_v14  ;;  %v9497_v13 = vpop.f32.mrb[68].mxu1  ;;  %v2606_v47 = vpop.f32.mrb[69].mxu0  ;;  %v11541_v3 = vadd.f32 %v11272_v1, %v4035_v9  ;;  %v2615_v34 = vadd.f32 %v9473_v27, %v10919_v20 }
 0x25a   : > { %v4036_v16 = vadd.f32 %v3765_v44, %v3764_v7  ;;  %v2607_v39 = vadd.f32 %v2606_v47, %v10905_v28  ;;  %v2719_v45 = vpop.f32.mrb[69].mxu1  ;;  %v9474_v51 = vpop.f32.mrb[70].mxu0  ;;  %v2728_v40 = vadd.f32 %v9497_v13, %v10919_v20 }
 0x25b   : > { %v4049_v19 = vadd.f32 %v3773_v59, %v3772_v36  ;;  %v2720_v58 = vadd.f32 %v2719_v45, %v10905_v28  ;;  %v9498_v37 = vpop.f32.mrb[70].mxu1  ;;  %v2609_v30 = vpop.f32.mrb[71].mxu0  ;;  %v4210_v7 = vsel %vm13587_vm6, %v11541_v3, %v4209_v41  ;;  %v2618_v59 = vadd.f32 %v9474_v51, %v10907_v15 }
 0x25c   : > { %v4037_v52 = vadd.f32 %v4036_v16, %v3766_v43  ;;  %v3544_v18 = vmax.f32 %v2607_v39, 0.0  ;;  %v2722_v10 = vpop.f32.mrb[71].mxu1  ;;  %4223 = vmax.xlane.f32.xlu0 %v4210_v7  ;;  %v2731_v53 = vadd.f32 %v9498_v37, %v10907_v15  ;;  %v2610_v27 = vadd.f32 %v2609_v30, %v10899_v12 }
 0x25d   : > { %v4050_v14 = vadd.f32 %v4049_v19, %v3774_v50  ;;  %v3552_v31 = vmax.f32 %v2720_v58, 0.0  ;;  %v2723_v43 = vadd.f32 %v2722_v10, %v10899_v12  ;;  %v3546_v16 = vmax.f32 %v2615_v34, 0.0 }
 0x25e   : > { %v3768_v44 = vmul.f32 %v10950_v56, %v3544_v18  ;;  %v4038_v0 = vadd.f32 %v4037_v52, %v3767_v33  ;;  %v3554_v9 = vmax.f32 %v2728_v40, 0.0  ;;  %v3545_v39 = vmax.f32 %v2610_v27, 0.0 }
 0x25f   : > { %v3776_v17 = vmul.f32 %v10950_v56, %v3552_v31  ;;  %v4051_v36 = vadd.f32 %v4050_v14, %v3775_v25  ;;  %v3553_v45 = vmax.f32 %v2723_v43, 0.0  ;;  %v3547_v50 = vmax.f32 %v2618_v59, 0.0 }
 0x260   : > { %v4039_v47 = vadd.f32 %v4038_v0, %v3768_v44  ;;  %v3555_v19 = vmax.f32 %v2731_v53, 0.0  ;;  %v3769_v41 = vmul.f32 %v10967_v32, %v3545_v39  ;;  %v3770_v51 = vmul.f32 %v10980_v46, %v3546_v16 }
 0x261   : > { %v4052_v13 = vadd.f32 %v4051_v36, %v3776_v17  ;;  %v3777_v58 = vmul.f32 %v10967_v32, %v3553_v45  ;;  %v3778_v33 = vmul.f32 %v10980_v46, %v3554_v9  ;;  %v3771_v30 = vmul.f32 %v10993_v60, %v3547_v50 }
 0x262   : > { %v4040_v37 = vadd.f32 %v4039_v47, %v3769_v41  ;;  %v3779_v18 = vmul.f32 %v10993_v60, %v3555_v19 }
 0x263   : > { %v4053_v52 = vadd.f32 %v4052_v13, %v3777_v58 }
 0x264   : > { %v4041_v10 = vadd.f32 %v4040_v37, %v3770_v51 }
 0x265   : > { %v4054_v25 = vadd.f32 %v4053_v52, %v3778_v33 }
 0x266   : > { %v11560_v14 = vadd.f32 %v4041_v10, %v3771_v30 }
 0x267   : > { %v11562_v34 = vadd.f32 %v4054_v25, %v3779_v18 }
 0x26b   : > { %v11564_v31 = vpop.xlane.xlu1 %4221 }
 0x26c   : > { %v4230_v40 = vrot.slane %v11564_v31, 1  ;;  %v4231_v7 = vrot.slane %v11564_v31, 2  ;;  %v4275_v0 = vsub.f32 %v11279_v62, %v11564_v31  ;;  %v4232_v36 = vrot.slane %v11564_v31, 3 }
 0x26d   : > { %v4233_v59 = vrot.slane %v11564_v31, 4  ;;  %v4234_v62 = vrot.slane %v11564_v31, 5  ;;  %v4236_v25 = vrot.slane %v11564_v31, 7 }
 0x26e   : > { %v4276_v44 = vsub.f32 %v11282_v26, %v4230_v40  ;;  %v4277_v47 = vsub.f32 %v11291_v29, %v4231_v7  ;;  %v4299_v45 = vmul.f32 1.442695, %v4275_v0  ;;  %v4235_v29 = vrot.slane %v11564_v31, 6 }
 0x26f   : > { %v4278_v40 = vsub.f32 %v11297_v38, %v4232_v36  ;;  %v4279_v7 = vsub.f32 %v11309_v54, %v4233_v59 }
 0x270   : > { %v4301_v13 = vmul.f32 1.442695, %v4276_v44  ;;  %v4303_v30 = vmul.f32 1.442695, %v4277_v47  ;;  %v4280_v44 = vsub.f32 %v11323_v22, %v4234_v62 }
 0x271   : > { %v9517_v17 = vpop.f32.mrb[72].mxu0 }
 0x272   : > { %v2825_v53 = vadd.f32 %v9517_v17, %v10883_v2  ;;  %v9541_v27 = vpop.f32.mrb[72].mxu1  ;;  %v2816_v43 = vpop.f32.mrb[73].mxu0  ;;  %10101 = vpow2.f32 %v4301_v13 }
 0x273   : > { %v2938_v16 = vadd.f32 %v9541_v27, %v10883_v2  ;;  %v2817_v9 = vadd.f32 %v2816_v43, %v10887_v4  ;;  %v2929_v26 = vpop.f32.mrb[73].mxu1  ;;  %v9518_v39 = vpop.f32.mrb[74].mxu0  ;;  %10103 = vpow2.f32 %v4299_v45 }
 0x274   : > { %v2930_v50 = vadd.f32 %v2929_v26, %v10887_v4  ;;  %v9542_v19 = vpop.f32.mrb[74].mxu1  ;;  %v2819_v41 = vpop.f32.mrb[75].mxu0  ;;  %v3558_v58 = vmax.f32 %v2825_v53, 0.0  ;;  %v2828_v33 = vadd.f32 %v9518_v39, %v10889_v5  ;;  %v4281_v53 = vsub.f32 %v11340_v49, %v4235_v29 }
 0x275   : > { %v3566_v51 = vmax.f32 %v2938_v16, 0.0  ;;  %v2941_v37 = vadd.f32 %v9542_v19, %v10889_v5  ;;  %v2932_v52 = vpop.f32.mrb[75].mxu1  ;;  %v3556_v18 = vmax.f32 %v2817_v9, 0.0  ;;  %v2820_v17 = vadd.f32 %v2819_v41, %v10897_v11 }
 0x276   : > { %v3564_v10 = vmax.f32 %v2930_v50, 0.0  ;;  %v3559_v0 = vmax.f32 %v2828_v33, 0.0  ;;  %v3782_v27 = vmul.f32 %v10927_v24, %v3558_v58  ;;  %v2933_v31 = vadd.f32 %v2932_v52, %v10897_v11 }
 0x277   : > { %v3790_v47 = vmul.f32 %v10927_v24, %v3566_v51  ;;  %v3567_v43 = vmax.f32 %v2941_v37, 0.0  ;;  %v3780_v38 = vmul.f32 %v10925_v23, %v3556_v18  ;;  %v3557_v36 = vmax.f32 %v2820_v17, 0.0 }
 0x278   : > { %v3788_v54 = vmul.f32 %v10925_v23, %v3564_v10  ;;  %10105 = vpow2.f32 %v4303_v30  ;;  %v3565_v16 = vmax.f32 %v2933_v31, 0.0  ;;  %v3783_v45 = vmul.f32 %v10948_v55, %v3559_v0 }
 0x279   : > { %v9521_v13 = vpop.f32.mrb[76].mxu0  ;;  %v3781_v50 = vmul.f32 %v10921_v21, %v3557_v36  ;;  %v3791_v51 = vmul.f32 %v10948_v55, %v3567_v43  ;;  %v4305_v30 = vmul.f32 1.442695, %v4278_v40  ;;  %v4282_v17 = vsub.f32 %v11343_v8, %v4236_v25 }
 0x27a   : > { %v9545_v22 = vpop.f32.mrb[76].mxu1  ;;  %v2832_v59 = vpop.f32.mrb[77].mxu0  ;;  %v2841_v9 = vadd.f32 %v9521_v13, %v10919_v20  ;;  %v3789_v33 = vmul.f32 %v10921_v21, %v3565_v16  ;;  %v4307_v0 = vmul.f32 1.442695, %v4279_v7 }
 0x27b   : > { %v2954_v49 = vadd.f32 %v9545_v22, %v10919_v20  ;;  %v2833_v26 = vadd.f32 %v2832_v59, %v10905_v28  ;;  %v2945_v39 = vpop.f32.mrb[77].mxu1  ;;  %v9522_v62 = vpop.f32.mrb[78].mxu0  ;;  %v4062_v18 = vadd.f32 %v3781_v50, %v3780_v38  ;;  %10107 = vpow2.f32 %v4305_v30 }
 0x27c   : > { %v2946_v19 = vadd.f32 %v2945_v39, %v10905_v28  ;;  %v2844_v41 = vadd.f32 %v9522_v62, %v10907_v15  ;;  %v9546_v29 = vpop.f32.mrb[78].mxu1  ;;  %v2835_v58 = vpop.f32.mrb[79].mxu0  ;;  %v4075_v31 = vadd.f32 %v3789_v33, %v3788_v54  ;;  %v3562_v13 = vmax.f32 %v2841_v9, 0.0 }
 0x27d   : > { %v3560_v37 = vmax.f32 %v2833_v26, 0.0  ;;  %v2948_v52 = vpop.f32.mrb[79].mxu1  ;;  %v3570_v36 = vmax.f32 %v2954_v49, 0.0  ;;  %v2957_v22 = vadd.f32 %v9546_v29, %v10907_v15  ;;  %v4063_v59 = vadd.f32 %v4062_v18, %v3782_v27  ;;  %v11606_v16 = vpop.eup %10101 }
 0x27e   : > { %v3568_v10 = vmax.f32 %v2946_v19, 0.0  ;;  %v3563_v62 = vmax.f32 %v2844_v41, 0.0  ;;  %v2836_v43 = vadd.f32 %v2835_v58, %v10899_v12  ;;  %v4076_v26 = vadd.f32 %v4075_v31, %v3790_v47  ;;  %v11610_v8 = vpop.eup %10103 }
 0x27f   : > { %v3784_v39 = vmul.f32 %v10950_v56, %v3560_v37  ;;  %v2949_v38 = vadd.f32 %v2948_v52, %v10899_v12  ;;  %v4064_v25 = vadd.f32 %v4063_v59, %v3783_v45  ;;  %10109 = vpow2.f32 %v4307_v0 }
 0x280   : > { %v3792_v40 = vmul.f32 %v10950_v56, %v3568_v10  ;;  %v3561_v7 = vmax.f32 %v2836_v43, 0.0  ;;  %v4309_v54 = vmul.f32 1.442695, %v4280_v44  ;;  %v4077_v27 = vadd.f32 %v4076_v26, %v3791_v51 }
 0x281   : > { %v3569_v9 = vmax.f32 %v2949_v38, 0.0  ;;  %v4311_v49 = vmul.f32 1.442695, %v4281_v53  ;;  %v4313_v50 = vmul.f32 1.442695, %v4282_v17  ;;  %v4065_v41 = vadd.f32 %v4064_v25, %v3784_v39 }
 0x282   : > { %v11612_v19 = vpop.eup %10105  ;;  %v3785_v47 = vmul.f32 %v10967_v32, %v3561_v7  ;;  %10111 = vpow2.f32 %v4309_v54  ;;  %v4371_v29 = vrot.slane %v11606_v16, 7  ;;  %v4078_v58 = vadd.f32 %v4077_v27, %v3792_v40 }
 0x283   : > { %v3571_v33 = vmax.f32 %v2957_v22, 0.0  ;;  %v3793_v37 = vmul.f32 %v10967_v32, %v3569_v9  ;;  %10113 = vpow2.f32 %v4311_v49  ;;  %v3786_v45 = vmul.f32 %v10980_v46, %v3562_v13 }
 0x284   : > { %v4066_v44 = vadd.f32 %v4065_v41, %v3785_v47  ;;  %10115 = vpow2.f32 %v4313_v50  ;;  %v3794_v53 = vmul.f32 %v10980_v46, %v3570_v36  ;;  %v4373_v52 = vrot.slane %v11612_v19, 6 }
 0x285   : > { %v4079_v51 = vadd.f32 %v4078_v58, %v3793_v37  ;;  %v3787_v30 = vmul.f32 %v10993_v60, %v3563_v62  ;;  %v4372_v10 = vsel %vm13595_vm0, %v4371_v29, %v11610_v8  ;;  %v3795_v17 = vmul.f32 %v10993_v60, %v3571_v33  ;;  %v11626_v22 = vpop.eup %10107 }
 0x286   : > { %v4067_v18 = vadd.f32 %v4066_v44, %v3786_v45  ;;  %v4374_v36 = vsel %vm13592_vm1, %v4373_v52, %v4372_v10  ;;  %v4375_v39 = vrot.slane %v11626_v22, 5 }
 0x287   : > { %v4080_v0 = vadd.f32 %v4079_v51, %v3794_v53 }
 0x288   : > { %v11624_v31 = vadd.f32 %v4067_v18, %v3787_v30  ;;  %v4376_v26 = vsel %vm13591_vm2, %v4375_v39, %v4374_v36 }
 0x289   : > { %v11628_v13 = vadd.f32 %v4080_v0, %v3795_v17  ;;  %v11631_v59 = vpop.eup %10109 }
 0x28a   : > { %v4377_v62 = vrot.slane %v11631_v59, 4 }
 0x28c   : > { %v11635_v43 = vpop.eup %10111  ;;  %v4378_v38 = vsel %vm13590_vm3, %v4377_v62, %v4376_v26 }
 0x28d   : > { %v11638_v40 = vpop.eup %10113  ;;  %v4379_v25 = vrot.slane %v11635_v43, 3 }
 0x28e   : > { %13610 = vst [vmem:[#allocation12_spill] sm:$0xff] %v11638_v40  ;;  %v11642_v7 = vpop.eup %10115  ;;  %v4381_v54 = vrot.slane %v11638_v40, 2 }
 0x28f   : > { %13611 = vst [vmem:[#allocation13_spill] sm:$0xff] %v11642_v7  ;;  %v4380_v27 = vsel %vm13589_vm4, %v4379_v25, %v4378_v38  ;;  %v4383_v9 = vrot.slane %v11642_v7, 1 }
 0x290   : > { %v4382_v49 = vsel %vm13588_vm5, %v4381_v54, %v4380_v27 }
 0x291   : > { %v4384_v41 = vsel %vm13587_vm6, %v4383_v9, %v4382_v49 }
 0x292   : > { %v9565_v50 = vpop.f32.mrb[80].mxu0  ;;  %v9589_v47 = vpop.f32.mrb[80].mxu1  ;;  %4416 = vadd.xlane.f32.xlu1 %v4384_v41 }
 0x293   : > { %v3042_v29 = vpop.f32.mrb[81].mxu0  ;;  %v3155_v33 = vpop.f32.mrb[81].mxu1  ;;  %v3051_v51 = vadd.f32 %v9565_v50, %v10883_v2  ;;  %v3164_v52 = vadd.f32 %v9589_v47, %v10883_v2 }
 0x294   : > { %v3043_v58 = vadd.f32 %v3042_v29, %v10887_v4  ;;  %v9566_v37 = vpop.f32.mrb[82].mxu0  ;;  %v3156_v45 = vadd.f32 %v3155_v33, %v10887_v4  ;;  %v9590_v44 = vpop.f32.mrb[82].mxu1 }
 0x295   : > { %v3045_v53 = vpop.f32.mrb[83].mxu0  ;;  %v3158_v30 = vpop.f32.mrb[83].mxu1  ;;  %v3054_v18 = vadd.f32 %v9566_v37, %v10889_v5  ;;  %v3167_v17 = vadd.f32 %v9590_v44, %v10889_v5  ;;  %v3574_v62 = vmax.f32 %v3051_v51, 0.0  ;;  %v3582_v26 = vmax.f32 %v3164_v52, 0.0 }
 0x296   : > { %v3572_v10 = vmax.f32 %v3043_v58, 0.0  ;;  %v3046_v0 = vadd.f32 %v3045_v53, %v10897_v11  ;;  %v3580_v36 = vmax.f32 %v3156_v45, 0.0  ;;  %v3159_v39 = vadd.f32 %v3158_v30, %v10897_v11 }
 0x297   : > { %v3575_v54 = vmax.f32 %v3054_v18, 0.0  ;;  %v3583_v41 = vmax.f32 %v3167_v17, 0.0  ;;  %v3798_v52 = vmul.f32 %v10927_v24, %v3574_v62  ;;  %v3806_v30 = vmul.f32 %v10927_v24, %v3582_v26 }
 0x298   : > { %v3573_v38 = vmax.f32 %v3046_v0, 0.0  ;;  %v3581_v27 = vmax.f32 %v3159_v39, 0.0  ;;  %v3796_v50 = vmul.f32 %v10925_v23, %v3572_v10  ;;  %v3804_v37 = vmul.f32 %v10925_v23, %v3580_v36 }
 0x299   : > { %v3799_v0 = vmul.f32 %v10948_v55, %v3575_v54  ;;  %v3807_v36 = vmul.f32 %v10948_v55, %v3583_v41 }
 0x29a   : > { %v9569_v25 = vpop.f32.mrb[84].mxu0  ;;  %v9593_v9 = vpop.f32.mrb[84].mxu1  ;;  %v3797_v47 = vmul.f32 %v10921_v21, %v3573_v38  ;;  %v3805_v45 = vmul.f32 %v10921_v21, %v3581_v27 }
 0x29b   : > { %v3058_v49 = vpop.f32.mrb[85].mxu0  ;;  %v3171_v58 = vpop.f32.mrb[85].mxu1  ;;  %v3067_v38 = vadd.f32 %v9569_v25, %v10919_v20 }
 0x29c   : > { %v3059_v29 = vadd.f32 %v3058_v49, %v10905_v28  ;;  %v9570_v33 = vpop.f32.mrb[86].mxu0  ;;  %v3172_v44 = vadd.f32 %v3171_v58, %v10905_v28  ;;  %v9594_v53 = vpop.f32.mrb[86].mxu1  ;;  %v4088_v18 = vadd.f32 %v3797_v47, %v3796_v50  ;;  %v4101_v39 = vadd.f32 %v3805_v45, %v3804_v37 }
 0x29d   : > { %v3061_v51 = vpop.f32.mrb[87].mxu0  ;;  %v3174_v17 = vpop.f32.mrb[87].mxu1  ;;  %v3180_v58 = vadd.f32 %v9593_v9, %v10919_v20  ;;  %v3070_v26 = vadd.f32 %v9570_v33, %v10907_v15  ;;  %v3183_v54 = vadd.f32 %v9594_v53, %v10907_v15 }
 0x29e   : > { %v3576_v10 = vmax.f32 %v3059_v29, 0.0  ;;  %v3584_v49 = vmax.f32 %v3172_v44, 0.0  ;;  %v4089_v27 = vadd.f32 %v4088_v18, %v3798_v52  ;;  %v4102_v40 = vadd.f32 %v4101_v39, %v3806_v30 }
 0x29f   : > { %v3062_v50 = vadd.f32 %v3061_v51, %v10899_v12  ;;  %v3175_v25 = vadd.f32 %v3174_v17, %v10899_v12  ;;  %v3578_v29 = vmax.f32 %v3067_v38, 0.0  ;;  %v3586_v45 = vmax.f32 %v3180_v58, 0.0 }
 0x2a0   : > { %v3800_v7 = vmul.f32 %v10950_v56, %v3576_v10  ;;  %v3808_v62 = vmul.f32 %v10950_v56, %v3584_v49  ;;  %v4090_v47 = vadd.f32 %v4089_v27, %v3799_v0  ;;  %v4103_v37 = vadd.f32 %v4102_v40, %v3807_v36 }
 0x2a1   : > { %v3577_v41 = vmax.f32 %v3062_v50, 0.0  ;;  %v3585_v9 = vmax.f32 %v3175_v25, 0.0  ;;  %v3579_v18 = vmax.f32 %v3070_v26, 0.0  ;;  %v3587_v10 = vmax.f32 %v3183_v54, 0.0 }
 0x2a2   : > { %v4091_v44 = vadd.f32 %v4090_v47, %v3800_v7  ;;  %v4104_v52 = vadd.f32 %v4103_v37, %v3808_v62  ;;  %v3802_v51 = vmul.f32 %v10980_v46, %v3578_v29  ;;  %v3810_v53 = vmul.f32 %v10980_v46, %v3586_v45 }
 0x2a3   : > { %v3801_v30 = vmul.f32 %v10967_v32, %v3577_v41  ;;  %v3809_v33 = vmul.f32 %v10967_v32, %v3585_v9  ;;  %v3803_v17 = vmul.f32 %v10993_v60, %v3579_v18  ;;  %v3811_v38 = vmul.f32 %v10993_v60, %v3587_v10 }
 0x2a4   : > { %v4043_v27 = vrot.slane %v11560_v14, 4  ;;  %v4056_v58 = vrot.slane %v11562_v34, 4  ;;  %v4069_v47 = vrot.slane %v11624_v31, 4  ;;  %v4082_v29 = vrot.slane %v11628_v13, 4 }
 0x2a5   : > { %v4092_v0 = vadd.f32 %v4091_v44, %v3801_v30  ;;  %v4105_v39 = vadd.f32 %v4104_v52, %v3809_v33 }
 0x2a6   : > { %v4044_v62 = vadd.f32 %v4043_v27, %v11560_v14  ;;  %v4057_v26 = vadd.f32 %v4056_v58, %v11562_v34 }
 0x2a7   : > { %v4093_v40 = vadd.f32 %v4092_v0, %v3802_v51  ;;  %v4106_v7 = vadd.f32 %v4105_v39, %v3810_v53  ;;  %v4070_v53 = vadd.f32 %v4069_v47, %v11624_v31 }
 0x2a8   : > { %v4045_v9 = vrot.slane %v4044_v62, 2  ;;  %v4058_v52 = vrot.slane %v4057_v26, 2 }
 0x2a9   : > { %v4094_v49 = vadd.f32 %v4093_v40, %v3803_v17  ;;  %v11681_v36 = vadd.f32 %v4106_v7, %v3811_v38  ;;  %v4083_v38 = vadd.f32 %v4082_v29, %v11628_v13 }
 0x2aa   : > { %v11701_v27 = vadd.f32 %v4058_v52, %v4057_v26 }
 0x2b2   : > { %v9613_v50 = vpop.f32.mrb[88].mxu0  ;;  %v9637_v54 = vpop.f32.mrb[88].mxu1 }
 0x2b3   : > { %v3268_v25 = vpop.f32.mrb[89].mxu0  ;;  %v3277_v37 = vadd.f32 %v9613_v50, %v10883_v2  ;;  %v3381_v45 = vpop.f32.mrb[89].mxu1  ;;  %v3390_v18 = vadd.f32 %v9637_v54, %v10883_v2  ;;  %v4095_v54 = vrot.slane %v4094_v49, 4 }
 0x2b4   : > { %v3269_v41 = vadd.f32 %v3268_v25, %v10887_v4  ;;  %v9614_v44 = vpop.f32.mrb[90].mxu0  ;;  %v3382_v14 = vadd.f32 %v3381_v45, %v10887_v4  ;;  %v9638_v34 = vpop.f32.mrb[90].mxu1  ;;  %v11699_v4 = vadd.f32 %v4045_v9, %v4044_v62 }
 0x2b5   : > { %v3271_v30 = vpop.f32.mrb[91].mxu0  ;;  %v3280_v33 = vadd.f32 %v9614_v44, %v10889_v5  ;;  %v3384_v0 = vpop.f32.mrb[91].mxu1  ;;  %v3393_v17 = vadd.f32 %v9638_v34, %v10889_v5  ;;  %v3590_v2 = vmax.f32 %v3277_v37, 0.0  ;;  %v3598_v58 = vmax.f32 %v3390_v18, 0.0 }
 0x2b6   : > { %v3588_v10 = vmax.f32 %v3269_v41, 0.0  ;;  %v3272_v51 = vadd.f32 %v3271_v30, %v10897_v11  ;;  %v3596_v39 = vmax.f32 %v3382_v14, 0.0  ;;  %v3385_v40 = vadd.f32 %v3384_v0, %v10897_v11 }
 0x2b7   : > { %v3591_v41 = vmax.f32 %v3280_v33, 0.0  ;;  %v4071_v5 = vrot.slane %v4070_v53, 2  ;;  %v3599_v45 = vmax.f32 %v3393_v17, 0.0  ;;  %v4084_v37 = vrot.slane %v4083_v38, 2 }
 0x2b8   : > { %v3589_v7 = vmax.f32 %v3272_v51, 0.0  ;;  %v3597_v50 = vmax.f32 %v3385_v40, 0.0  ;;  %v3812_v25 = vmul.f32 %v10925_v23, %v3588_v10  ;;  %v3820_v11 = vmul.f32 %v10925_v23, %v3596_v39 }
 0x2b9   : > { %v3814_v26 = vmul.f32 %v10927_v24, %v3590_v2  ;;  %v4108_v14 = vrot.slane %v11681_v36, 4  ;;  %v3822_v34 = vmul.f32 %v10927_v24, %v3598_v58  ;;  %v3815_v51 = vmul.f32 %v10948_v55, %v3591_v41 }
 0x2ba   : > { %v3813_v31 = vmul.f32 %v10921_v21, %v3589_v7  ;;  %v9617_v47 = vpop.f32.mrb[92].mxu0  ;;  %v3821_v13 = vmul.f32 %v10921_v21, %v3597_v50  ;;  %v9641_v29 = vpop.f32.mrb[92].mxu1  ;;  %v4096_v21 = vadd.f32 %v4095_v54, %v4094_v49  ;;  %v3823_v40 = vmul.f32 %v10948_v55, %v3599_v45 }
 0x2bb   : > { %v3284_v62 = vpop.f32.mrb[93].mxu0  ;;  %v3397_v52 = vpop.f32.mrb[93].mxu1  ;;  %v3293_v7 = vadd.f32 %v9617_v47, %v10919_v20  ;;  %v3406_v24 = vadd.f32 %v9641_v29, %v10919_v20 }
 0x2bc   : > { %v4114_v44 = vadd.f32 %v3813_v31, %v3812_v25  ;;  %v3285_v9 = vadd.f32 %v3284_v62, %v10905_v28  ;;  %v9618_v18 = vpop.f32.mrb[94].mxu0  ;;  %v4127_v30 = vadd.f32 %v3821_v13, %v3820_v11  ;;  %v3398_v23 = vadd.f32 %v3397_v52, %v10905_v28  ;;  %v9642_v10 = vpop.f32.mrb[94].mxu1 }
 0x2bd   : > { %v3287_v33 = vpop.f32.mrb[95].mxu0  ;;  %v3400_v17 = vpop.f32.mrb[95].mxu1  ;;  %v4072_v25 = vadd.f32 %v4071_v5, %v4070_v53  ;;  %v3296_v54 = vadd.f32 %v9618_v18, %v10907_v15  ;;  %v4109_v11 = vadd.f32 %v4108_v14, %v11681_v36  ;;  %v3409_v45 = vadd.f32 %v9642_v10, %v10907_v15 }
 0x2be   : > { %v4115_v0 = vadd.f32 %v4114_v44, %v3814_v26  ;;  %v3592_v39 = vmax.f32 %v3285_v9, 0.0  ;;  %v4128_v2 = vadd.f32 %v4127_v30, %v3822_v34  ;;  %v3600_v50 = vmax.f32 %v3398_v23, 0.0 }
 0x2bf   : > { %v3288_v41 = vadd.f32 %v3287_v33, %v10899_v12  ;;  %v3401_v47 = vadd.f32 %v3400_v17, %v10899_v12  ;;  %v4097_v53 = vrot.slane %v4096_v21, 2  ;;  %v3594_v5 = vmax.f32 %v3293_v7, 0.0 }
 0x2c0   : > { %v3816_v58 = vmul.f32 %v10950_v56, %v3592_v39  ;;  %v4116_v28 = vadd.f32 %v4115_v0, %v3815_v51  ;;  %v3824_v31 = vmul.f32 %v10950_v56, %v3600_v50  ;;  %v4129_v49 = vadd.f32 %v4128_v2, %v3823_v40 }
 0x2c1   : > { %v3593_v13 = vmax.f32 %v3288_v41, 0.0  ;;  %v3602_v29 = vmax.f32 %v3406_v24, 0.0  ;;  %v3601_v62 = vmax.f32 %v3401_v47, 0.0  ;;  %v4047_v56 = vrot.slane %v11699_v4, 1 }
 0x2c2   : > { %v4117_v55 = vadd.f32 %v4116_v28, %v3816_v58  ;;  %v4130_v20 = vadd.f32 %v4129_v49, %v3824_v31  ;;  %v4060_v26 = vrot.slane %v11701_v27, 1  ;;  %v3595_v44 = vmax.f32 %v3296_v54, 0.0 }
 0x2c3   : > { %v3817_v9 = vmul.f32 %v10967_v32, %v3593_v13  ;;  %v4085_v52 = vadd.f32 %v4084_v37, %v4083_v38  ;;  %v4110_v36 = vrot.slane %v4109_v11, 2  ;;  %v3603_v18 = vmax.f32 %v3409_v45, 0.0 }
 0x2c4   : > { %v3825_v15 = vmul.f32 %v10967_v32, %v3601_v62  ;;  %v4073_v14 = vrot.slane %v4072_v25, 1  ;;  %v4098_v12 = vadd.f32 %v4097_v53, %v4096_v21  ;;  %v3818_v34 = vmul.f32 %v10980_v46, %v3594_v5 }
 0x2c5   : > { %v4118_v30 = vadd.f32 %v4117_v55, %v3817_v9  ;;  %v3826_v23 = vmul.f32 %v10980_v46, %v3602_v29  ;;  %v4048_v33 = vadd.f32 %v4047_v56, %v11699_v4  ;;  %v4061_v51 = vadd.f32 %v4060_v26, %v11701_v27 }
 0x2c6   : > { %v4131_v10 = vadd.f32 %v4130_v20, %v3825_v15  ;;  %v3819_v0 = vmul.f32 %v10993_v60, %v3595_v44  ;;  %v4086_v38 = vrot.slane %v4085_v52, 1  ;;  %v4111_v37 = vadd.f32 %v4110_v36, %v4109_v11 }
 0x2c7   : > { %v4119_v39 = vadd.f32 %v4118_v30, %v3818_v34  ;;  %v3827_v17 = vmul.f32 %v10993_v60, %v3603_v18  ;;  %v4074_v40 = vadd.f32 %v4073_v14, %v4072_v25  ;;  %v4099_v21 = vrot.slane %v4098_v12, 1 }
 0x2c8   : > { %v4132_v32 = vadd.f32 %v4131_v10, %v3826_v23  ;;  %v11734_v50 = vadd.f32 %v11272_v1, %v4048_v33  ;;  %v11737_v4 = vadd.f32 %v11272_v1, %v4061_v51  ;;  %v4087_v27 = vadd.f32 %v4086_v38, %v4085_v52 }
 0x2c9   : > { %v4120_v2 = vadd.f32 %v4119_v39, %v3819_v0  ;;  %v4112_v58 = vrot.slane %v4111_v37, 1  ;;  %v4100_v31 = vadd.f32 %v4099_v21, %v4098_v12  ;;  %v11740_v49 = vadd.f32 %v11272_v1, %v4074_v40 }
 0x2ca   : > { %v4133_v7 = vadd.f32 %v4132_v32, %v3827_v17  ;;  %v11743_v11 = vadd.f32 %v11272_v1, %v4087_v27  ;;  %v4211_v55 = vsel %vm13595_vm0, %v11737_v4, %v11734_v50 }
 0x2cb   : > { %v4121_v46 = vrot.slane %v4120_v2, 4  ;;  %v4113_v54 = vadd.f32 %v4112_v58, %v4111_v37  ;;  %v11749_v47 = vadd.f32 %v11272_v1, %v4100_v31  ;;  %v4212_v53 = vsel %vm13592_vm1, %v11740_v49, %v4211_v55 }
 0x2cc   : > { %v4134_v24 = vrot.slane %v4133_v7, 4  ;;  %v4213_v62 = vsel %vm13591_vm2, %v11743_v11, %v4212_v53 }
 0x2cd   : > { %v4122_v28 = vadd.f32 %v4121_v46, %v4120_v2  ;;  %v11754_v29 = vadd.f32 %v11272_v1, %v4113_v54  ;;  %v4214_v26 = vsel %vm13590_vm3, %v11749_v47, %v4213_v62 }
 0x2ce   : > { %v4135_v60 = vadd.f32 %v4134_v24, %v4133_v7 }
 0x2cf   : > { %v4123_v25 = vrot.slane %v4122_v28, 2  ;;  %v4215_v36 = vsel %vm13589_vm4, %v11754_v29, %v4214_v26 }
 0x2d0   : > { %v4136_v41 = vrot.slane %v4135_v60, 2 }
 0x2d1   : > { %v4124_v45 = vadd.f32 %v4123_v25, %v4122_v28 }
 0x2d2   : > { %v4137_v5 = vadd.f32 %v4136_v41, %v4135_v60 }
 0x2d3   : > { %v4125_v20 = vrot.slane %v4124_v45, 1 }
 0x2d4   : > { %v4138_v13 = vrot.slane %v4137_v5, 1 }
 0x2d5   : > { %v4126_v56 = vadd.f32 %v4125_v20, %v4124_v45 }
 0x2d6   : > { %v4139_v44 = vadd.f32 %v4138_v13, %v4137_v5 }
 0x2d7   : > { %v11761_v9 = vadd.f32 %v11272_v1, %v4126_v56 }
 0x2d8   : > { %v11764_v52 = vadd.f32 %v11272_v1, %v4139_v44 }
 0x2d9   : > { %v4216_v18 = vsel %vm13588_vm5, %v11761_v9, %v4215_v36  ;;  %v4884_v36 = vlaneseq }
 0x2da   : > { %v4217_v15 = vsel %vm13587_vm6, %v11764_v52, %v4216_v18 }
 0x2db   : > { %4225 = vmax.xlane.f32.xlu0 %v4217_v15  ;;  %v11812_v18 = vshrl.u32 %v4884_v36, 7 }
 0x2dd   : > { %v11815_v15 = vsub.s32 0, %v11812_v18 }
 0x2e9   : > { %v4224_v14 = vpop.xlane.xlu0 %4223 }
 0x2ea   : > { %v4237_v12 = vrot.slane %v4224_v14, 1  ;;  %v4238_v34 = vrot.slane %v4224_v14, 2  ;;  %v4239_v30 = vrot.slane %v4224_v14, 3  ;;  %v4240_v23 = vrot.slane %v4224_v14, 4 }
 0x2eb   : > { %v4283_v10 = vsub.f32 %v11490_v35, %v4224_v14  ;;  %v4241_v33 = vrot.slane %v4224_v14, 5  ;;  %v4242_v1 = vrot.slane %v4224_v14, 6  ;;  %v4243_v51 = vrot.slane %v4224_v14, 7 }
 0x2ec   : > { %v4284_v0 = vsub.f32 %v11493_v6, %v4237_v12  ;;  %v4285_v39 = vsub.f32 %v11496_v61, %v4238_v34  ;;  %v4286_v38 = vsub.f32 %v11499_v57, %v4239_v30  ;;  %v4287_v37 = vsub.f32 %v11505_v63, %v4240_v23  ;;  %v10163_v34 = vld [vmem:[%s10671_s16] sm:$0xff]  }
 0x2ed   : > { %v4315_v17 = vmul.f32 1.442695, %v4283_v10  ;;  %v4288_v32 = vsub.f32 %v11512_v48, %v4241_v33  ;;  %v4289_v40 = vsub.f32 %v11531_v42, %v4242_v1  ;;  %v4290_v35 = vsub.f32 %v11541_v3, %v4243_v51  ;;  %v10164_v51 = vld [vmem:[%s10671_s16 + $0x8] sm:$0xff]  }
 0x2ee   : > { %v4317_v21 = vmul.f32 1.442695, %v4284_v0  ;;  %v4319_v2 = vmul.f32 1.442695, %v4285_v39  ;;  %v4321_v7 = vmul.f32 1.442695, %v4286_v38  ;;  %v4501_v30 = vunpack.c.h.bf16 %v10163_v34 }
 0x2ef   : > { %10117 = vpow2.f32 %v4315_v17  ;;  %v4323_v46 = vmul.f32 1.442695, %v4287_v37  ;;  %v4325_v6 = vmul.f32 1.442695, %v4288_v32  ;;  %v4327_v61 = vmul.f32 1.442695, %v4289_v40 }
 0x2f0   : > { %10119 = vpow2.f32 %v4317_v21  ;;  %v4329_v57 = vmul.f32 1.442695, %v4290_v35  ;;  %v4500_v23 = vunpack.c.l.bf16 %v10163_v34  ;;  %v4503_v0 = vunpack.c.h.bf16 %v10164_v51  ;;  %v10165_v17 = vld [vmem:[%s10671_s16 + $0x10] sm:$0xff]  }
 0x2f1   : > { %10121 = vpow2.f32 %v4319_v2  ;;  %v4502_v39 = vunpack.c.l.bf16 %v10164_v51  ;;  %v4505_v32 = vunpack.c.h.bf16 %v10165_v17  ;;  %v4504_v40 = vunpack.c.l.bf16 %v10165_v17  ;;  %v10166_v2 = vld [vmem:[%s10671_s16 + $0x18] sm:$0xff]   ;;  %v10172_v17 = vld [vmem:[%s10671_s16 + $0x48] sm:$0xff]  }
 0x2f2   : > { %10123 = vpow2.f32 %v4321_v7  ;;  %v4507_v35 = vunpack.c.h.bf16 %v10166_v2  ;;  %v4506_v7 = vunpack.c.l.bf16 %v10166_v2 }
 0x2f3   : > { %10125 = vpow2.f32 %v4323_v46 }
 0x2f4   : > { %10127 = vpow2.f32 %v4325_v6 }
 0x2f5   : > { %10129 = vpow2.f32 %v4327_v61  ;;  %v10167_v61 = vld [vmem:[%s10671_s16 + $0x20] sm:$0xff]  }
 0x2f6   : > { %10131 = vpow2.f32 %v4329_v57  ;;  %v4509_v57 = vunpack.c.h.bf16 %v10167_v61 }
 0x2f9   : > { %v11780_v63 = vpop.eup %10117 }
 0x2fa   : > { %v11782_v48 = vpop.eup %10119 }
 0x2fb   : > { %v11784_v42 = vpop.eup %10121  ;;  %v4385_v3 = vrot.slane %v11782_v48, 7 }
 0x2fc   : > { %v11787_v27 = vpop.eup %10123  ;;  %v4387_v24 = vrot.slane %v11784_v42, 6 }
 0x2fd   : > { %v11790_v58 = vpop.eup %10125  ;;  %v4386_v28 = vsel %vm13595_vm0, %v4385_v3, %v11780_v63  ;;  %v4389_v31 = vrot.slane %v11787_v27, 5  ;;  %v4508_v3 = vunpack.c.l.bf16 %v10167_v61 }
 0x2fe   : > { %v11795_v60 = vpop.eup %10127  ;;  %v4388_v25 = vsel %vm13592_vm1, %v4387_v24, %v4386_v28  ;;  %v4391_v54 = vrot.slane %v11790_v58, 4  ;;  %vm13594_vm1 = vcmask 1048512  }
 0x2ff   : > { %v11799_v41 = vpop.eup %10129  ;;  %v4390_v55 = vsel %vm13591_vm2, %v4389_v31, %v4388_v25  ;;  %v4393_v45 = vrot.slane %v11795_v60, 3  ;;  %v10168_v31 = vld [vmem:[%s10671_s16 + $0x28] sm:$0xff]   ;;  %vm13593_vm2 = vcmask 982912  }
 0x300   : > { %v11803_v53 = vpop.eup %10131  ;;  %v4392_v5 = vsel %vm13590_vm3, %v4391_v54, %v4390_v55  ;;  %v4395_v20 = vrot.slane %v11799_v41, 2  ;;  %v4511_v25 = vunpack.c.h.bf16 %v10168_v31  ;;  %v4510_v54 = vunpack.c.l.bf16 %v10168_v31  ;;  %v10169_v55 = vld [vmem:[%s10671_s16 + $0x30] sm:$0xff]  }
 0x301   : > { %v4394_v13 = vsel %vm13589_vm4, %v4393_v45, %v4392_v5  ;;  %v4397_v62 = vrot.slane %v11803_v53, 1  ;;  %v4513_v45 = vunpack.c.h.bf16 %v10169_v55  ;;  %vm13598_vm4 = vcmask 851712  }
 0x302   : > { %v4396_v56 = vsel %vm13588_vm5, %v4395_v20, %v4394_v13  ;;  %v4512_v13 = vunpack.c.l.bf16 %v10169_v55  ;;  %v10176_v55 = vld [vmem:[%s10671_s16 + $0x68] sm:$0xff]   ;;  %vm6597_vm5 = vcmask 786112   ;;  %vm6611_vm3 = vcmask 917312  }
 0x303   : > { %v4398_v26 = vsel %vm13587_vm6, %v4397_v62, %v4396_v56  ;;  %v10170_v56 = vld [vmem:[%s10671_s16 + $0x38] sm:$0xff]   ;;  %vm6590_vm6 = vcmask 720512  }
 0x304   : > { %4418 = vadd.xlane.f32.xlu0 %v4398_v26  ;;  %v4515_v26 = vunpack.c.h.bf16 %v10170_v56  ;;  %v4514_v34 = vunpack.c.l.bf16 %v10170_v56 }
 0x31f   : > { %v4417_v44 = vpop.xlane.xlu1 %4416 }
 0x320   : > { %10133 = vrcp.f32 %v4417_v44 }
 0x32a   : > { %v11817_v14 = vpop.eup %10133 }
 0x32b   : > { %v4476_v12 = vmul.f32 %v11817_v14, %v11610_v8  ;;  %v4431_v62 = vrot.slane %v11817_v14, 1 }
 0x32d   : > { %v4887_v10 = vrot.slane %v4476_v12, %v11815_v15 }
 0x32f   : > { %v4981_v33 = vmul.f32 %v4887_v10, %v4501_v30  ;;  %v4980_v1 = vmul.f32 %v4887_v10, %v4500_v23  ;;  %v4983_v38 = vmul.f32 %v4887_v10, %v4503_v0  ;;  %v4982_v37 = vmul.f32 %v4887_v10, %v4502_v39  ;;  %v10171_v23 = vld [vmem:[%s10671_s16 + $0x40] sm:$0xff]  }
 0x330   : > { %v4985_v8 = vmul.f32 %v4887_v10, %v4505_v32  ;;  %v4984_v21 = vmul.f32 %v4887_v10, %v4504_v40  ;;  %v4987_v46 = vmul.f32 %v4887_v10, %v4507_v35  ;;  %v4986_v6 = vmul.f32 %v4887_v10, %v4506_v7 }
 0x331   : > { %5366 = vadd.xlane.f32.xlu1 %v4981_v33  ;;  %5364 = vadd.xlane.f32.xlu0 %v4980_v1  ;;  %v4989_v24 = vmul.f32 %v4887_v10, %v4509_v57  ;;  %v4988_v28 = vmul.f32 %v4887_v10, %v4508_v3  ;;  %v4991_v5 = vmul.f32 %v4887_v10, %v4511_v25  ;;  %v4517_v33 = vunpack.c.h.bf16 %v10171_v23 }
 0x332   : > { %v4990_v20 = vmul.f32 %v4887_v10, %v4510_v54  ;;  %v4993_v44 = vmul.f32 %v4887_v10, %v4513_v45  ;;  %v4992_v12 = vmul.f32 %v4887_v10, %v4512_v13  ;;  %v4477_v30 = vmul.f32 %v11606_v16, %v4431_v62 }
 0x333   : > { %v4995_v1 = vmul.f32 %v4887_v10, %v4515_v26  ;;  %v4994_v51 = vmul.f32 %v4887_v10, %v4514_v34  ;;  %v4516_v39 = vunpack.c.l.bf16 %v10171_v23  ;;  %v4519_v32 = vunpack.c.h.bf16 %v10172_v17 }
 0x334   : > { %v4891_v0 = vrot.slane %v4477_v30, %v11815_v15  ;;  %v4518_v40 = vunpack.c.l.bf16 %v10172_v17  ;;  %v4527_v45 = vunpack.c.h.bf16 %v10176_v55 }
 0x335   : > { %5370 = vadd.xlane.f32.xlu1 %v4983_v38  ;;  %5368 = vadd.xlane.f32.xlu0 %v4982_v37 }
 0x336   : > { %v4997_v38 = vmul.f32 %v4891_v0, %v4517_v33  ;;  %v4996_v37 = vmul.f32 %v4891_v0, %v4516_v39  ;;  %v4999_v16 = vmul.f32 %v4891_v0, %v4519_v32  ;;  %v5007_v62 = vmul.f32 %v4891_v0, %v4527_v45 }
 0x339   : > { %5374 = vadd.xlane.f32.xlu1 %v4985_v8  ;;  %5372 = vadd.xlane.f32.xlu0 %v4984_v21  ;;  %v4998_v8 = vmul.f32 %v4891_v0, %v4518_v40  ;;  %v10173_v21 = vld [vmem:[%s10671_s16 + $0x50] sm:$0xff]  }
 0x33a   : > { %v4521_v2 = vunpack.c.h.bf16 %v10173_v21  ;;  %v4520_v35 = vunpack.c.l.bf16 %v10173_v21 }
 0x33c   : > { %v5001_v10 = vmul.f32 %v4891_v0, %v4521_v2  ;;  %v5000_v7 = vmul.f32 %v4891_v0, %v4520_v35 }
 0x33d   : > { %5378 = vadd.xlane.f32.xlu1 %v4987_v46  ;;  %5376 = vadd.xlane.f32.xlu0 %v4986_v6  ;;  %v10174_v46 = vld [vmem:[%s10671_s16 + $0x58] sm:$0xff]  }
 0x33e   : > { %v4523_v6 = vunpack.c.h.bf16 %v10174_v46  ;;  %v4522_v61 = vunpack.c.l.bf16 %v10174_v46 }
 0x340   : > { %v5003_v57 = vmul.f32 %v4891_v0, %v4523_v6  ;;  %v5002_v3 = vmul.f32 %v4891_v0, %v4522_v61  ;;  %v10182_v61 = vld [vmem:[%s10671_s16 + $0x98] sm:$0xff]  }
 0x341   : > { %5382 = vadd.xlane.f32.xlu1 %v4989_v24  ;;  %5380 = vadd.xlane.f32.xlu0 %v4988_v28  ;;  %v10175_v24 = vld [vmem:[%s10671_s16 + $0x60] sm:$0xff]  }
 0x342   : > { %v4525_v28 = vunpack.c.h.bf16 %v10175_v24  ;;  %v4524_v31 = vunpack.c.l.bf16 %v10175_v24 }
 0x344   : > { %v5005_v25 = vmul.f32 %v4891_v0, %v4525_v28  ;;  %v5004_v54 = vmul.f32 %v4891_v0, %v4524_v31  ;;  %v10183_v31 = vld [vmem:[%s10671_s16 + $0xa0] sm:$0xff]  }
 0x345   : > { %5386 = vadd.xlane.f32.xlu1 %v4991_v5  ;;  %5384 = vadd.xlane.f32.xlu0 %v4990_v20  ;;  %v4526_v5 = vunpack.c.l.bf16 %v10176_v55  ;;  %v10177_v20 = vld [vmem:[%s10671_s16 + $0x70] sm:$0xff]  }
 0x346   : > { %v4529_v13 = vunpack.c.h.bf16 %v10177_v20  ;;  %v4528_v26 = vunpack.c.l.bf16 %v10177_v20 }
 0x347   : > { %v5006_v56 = vmul.f32 %v4891_v0, %v4526_v5  ;;  %v10184_v5 = vld [vmem:[%s10671_s16 + $0xa8] sm:$0xff]  }
 0x348   : > { %v5009_v30 = vmul.f32 %v4891_v0, %v4529_v13  ;;  %v5008_v23 = vmul.f32 %v4891_v0, %v4528_v26  ;;  %v4543_v20 = vunpack.c.h.bf16 %v10184_v5  ;;  %v4542_v13 = vunpack.c.l.bf16 %v10184_v5 }
 0x349   : > { %5390 = vadd.xlane.f32.xlu1 %v4993_v44  ;;  %5388 = vadd.xlane.f32.xlu0 %v4992_v12  ;;  %v4432_v44 = vrot.slane %v11817_v14, 2  ;;  %v10178_v12 = vld [vmem:[%s10671_s16 + $0x78] sm:$0xff]  }
 0x34a   : > { %v4531_v34 = vunpack.c.h.bf16 %v10178_v12  ;;  %v4530_v33 = vunpack.c.l.bf16 %v10178_v12 }
 0x34d   : > { %5394 = vadd.xlane.f32.xlu1 %v4995_v1  ;;  %5392 = vadd.xlane.f32.xlu0 %v4994_v51  ;;  %v4478_v1 = vmul.f32 %v11612_v19, %v4432_v44  ;;  %v10179_v51 = vld [vmem:[%s10671_s16 + $0x80] sm:$0xff]  }
 0x34e   : > { %v4533_v39 = vunpack.c.h.bf16 %v10179_v51  ;;  %v4532_v32 = vunpack.c.l.bf16 %v10179_v51 }
 0x34f   : > { %v4895_v17 = vrot.slane %v4478_v1, %v11815_v15 }
 0x351   : > { %5398 = vadd.xlane.f32.xlu1 %v4997_v38  ;;  %5396 = vadd.xlane.f32.xlu0 %v4996_v37  ;;  %v5011_v38 = vmul.f32 %v4891_v0, %v4531_v34  ;;  %v5010_v37 = vmul.f32 %v4891_v0, %v4530_v33  ;;  %v5013_v40 = vmul.f32 %v4895_v17, %v4533_v39  ;;  %v4433_v34 = vrot.slane %v11817_v14, 3 }
 0x352   : > { %v5023_v26 = vmul.f32 %v4895_v17, %v4543_v20  ;;  %v5022_v44 = vmul.f32 %v4895_v17, %v4542_v13  ;;  %v10192_v20 = vld [vmem:[%s10671_s16 + $0xe8] sm:$0xff]  }
 0x353   : > { %v4479_v39 = vmul.f32 %v11626_v22, %v4433_v34  ;;  %v4559_v13 = vunpack.c.h.bf16 %v10192_v20 }
 0x355   : > { %5402 = vadd.xlane.f32.xlu1 %v4999_v16  ;;  %5400 = vadd.xlane.f32.xlu0 %v4998_v8  ;;  %v5012_v16 = vmul.f32 %v4895_v17, %v4532_v32  ;;  %v10180_v8 = vld [vmem:[%s10671_s16 + $0x88] sm:$0xff]  }
 0x356   : > { %v4535_v21 = vunpack.c.h.bf16 %v10180_v8  ;;  %v4534_v2 = vunpack.c.l.bf16 %v10180_v8 }
 0x358   : > { %v5015_v19 = vmul.f32 %v4895_v17, %v4535_v21  ;;  %v5014_v35 = vmul.f32 %v4895_v17, %v4534_v2 }
 0x359   : > { %5406 = vadd.xlane.f32.xlu1 %v5001_v10  ;;  %5404 = vadd.xlane.f32.xlu0 %v5000_v7  ;;  %v10181_v10 = vld [vmem:[%s10671_s16 + $0x90] sm:$0xff]  }
 0x35a   : > { %v4537_v7 = vunpack.c.h.bf16 %v10181_v10  ;;  %v4536_v46 = vunpack.c.l.bf16 %v10181_v10 }
 0x35c   : > { %v5017_v0 = vmul.f32 %v4895_v17, %v4537_v7  ;;  %v5016_v6 = vmul.f32 %v4895_v17, %v4536_v46  ;;  %v10189_v46 = vld [vmem:[%s10671_s16 + $0xd0] sm:$0xff]  }
 0x35d   : > { %5410 = vadd.xlane.f32.xlu1 %v5003_v57  ;;  %5408 = vadd.xlane.f32.xlu0 %v5002_v3  ;;  %v4539_v57 = vunpack.c.h.bf16 %v10182_v61  ;;  %v4538_v3 = vunpack.c.l.bf16 %v10182_v61 }
 0x35f   : > { %v5019_v24 = vmul.f32 %v4895_v17, %v4539_v57  ;;  %v5018_v28 = vmul.f32 %v4895_v17, %v4538_v3  ;;  %v10190_v57 = vld [vmem:[%s10671_s16 + $0xd8] sm:$0xff]  }
 0x360   : > { %v4555_v3 = vunpack.c.h.bf16 %v10190_v57 }
 0x361   : > { %5414 = vadd.xlane.f32.xlu1 %v5005_v25  ;;  %5412 = vadd.xlane.f32.xlu0 %v5004_v54  ;;  %v4541_v25 = vunpack.c.h.bf16 %v10183_v31  ;;  %v4540_v54 = vunpack.c.l.bf16 %v10183_v31 }
 0x363   : > { %v5021_v55 = vmul.f32 %v4895_v17, %v4541_v25  ;;  %v5020_v45 = vmul.f32 %v4895_v17, %v4540_v54  ;;  %v10191_v25 = vld [vmem:[%s10671_s16 + $0xe0] sm:$0xff]  }
 0x364   : > { %v4557_v54 = vunpack.c.h.bf16 %v10191_v25 }
 0x365   : > { %5418 = vadd.xlane.f32.xlu1 %v5007_v62  ;;  %5416 = vadd.xlane.f32.xlu0 %v5006_v56  ;;  %v10185_v62 = vld [vmem:[%s10671_s16 + $0xb0] sm:$0xff]  }
 0x366   : > { %v4545_v56 = vunpack.c.h.bf16 %v10185_v62  ;;  %v4544_v12 = vunpack.c.l.bf16 %v10185_v62  ;;  %v4558_v62 = vunpack.c.l.bf16 %v10192_v20 }
 0x368   : > { %v5025_v33 = vmul.f32 %v4895_v17, %v4545_v56  ;;  %v5024_v1 = vmul.f32 %v4895_v17, %v4544_v12  ;;  %v10193_v56 = vld [vmem:[%s10671_s16 + $0xf0] sm:$0xff]  }
 0x369   : > { %5422 = vadd.xlane.f32.xlu1 %v5009_v30  ;;  %5420 = vadd.xlane.f32.xlu0 %v5008_v23  ;;  %v10186_v30 = vld [vmem:[%s10671_s16 + $0xb8] sm:$0xff]   ;;  %v4560_v34 = vunpack.c.l.bf16 %v10193_v56 }
 0x36a   : > { %v4547_v23 = vunpack.c.h.bf16 %v10186_v30  ;;  %v4546_v51 = vunpack.c.l.bf16 %v10186_v30  ;;  %v4434_v30 = vrot.slane %v11817_v14, 4 }
 0x36c   : > { %v5027_v32 = vmul.f32 %v4895_v17, %v4547_v23  ;;  %v10194_v23 = vld [vmem:[%s10671_s16 + $0xf8] sm:$0xff]  }
 0x36d   : > { %5426 = vadd.xlane.f32.xlu1 %v5011_v38  ;;  %5424 = vadd.xlane.f32.xlu0 %v5010_v37  ;;  %v10187_v38 = vld [vmem:[%s10671_s16 + $0xc0] sm:$0xff]  }
 0x36e   : > { %v4549_v37 = vunpack.c.h.bf16 %v10187_v38  ;;  %v4548_v8 = vunpack.c.l.bf16 %v10187_v38  ;;  %v4480_v38 = vmul.f32 %v11631_v59, %v4434_v30 }
 0x371   : > { %5430 = vadd.xlane.f32.xlu1 %v5013_v40  ;;  %5428 = vadd.xlane.f32.xlu0 %v5012_v16  ;;  %v5026_v40 = vmul.f32 %v4895_v17, %v4546_v51  ;;  %v4899_v16 = vrot.slane %v4479_v39, %v11815_v15  ;;  %v4562_v39 = vunpack.c.l.bf16 %v10194_v23 }
 0x373   : > { %v5029_v21 = vmul.f32 %v4899_v16, %v4549_v37  ;;  %v5028_v2 = vmul.f32 %v4899_v16, %v4548_v8  ;;  %v5038_v12 = vmul.f32 %v4899_v16, %v4558_v62  ;;  %v5040_v51 = vmul.f32 %v4899_v16, %v4560_v34  ;;  %v10195_v37 = vld [vmem:[%s10671_s16 + $0x100] sm:$0xff]  }
 0x374   : > { %v5042_v8 = vmul.f32 %v4899_v16, %v4562_v39 }
 0x375   : > { %5434 = vadd.xlane.f32.xlu1 %v5015_v19  ;;  %5432 = vadd.xlane.f32.xlu0 %v5014_v35  ;;  %v10188_v19 = vld [vmem:[%s10671_s16 + $0xc8] sm:$0xff]  }
 0x376   : > { %v4551_v35 = vunpack.c.h.bf16 %v10188_v19  ;;  %v4550_v10 = vunpack.c.l.bf16 %v10188_v19 }
 0x378   : > { %v5031_v22 = vmul.f32 %v4899_v16, %v4551_v35  ;;  %v5030_v7 = vmul.f32 %v4899_v16, %v4550_v10  ;;  %v10196_v10 = vld [vmem:[%s10671_s16 + $0x108] sm:$0xff]  }
 0x379   : > { %5438 = vadd.xlane.f32.xlu1 %v5017_v0  ;;  %5436 = vadd.xlane.f32.xlu0 %v5016_v6  ;;  %v4553_v0 = vunpack.c.h.bf16 %v10189_v46  ;;  %v4552_v6 = vunpack.c.l.bf16 %v10189_v46  ;;  %v4567_v59 = vunpack.c.h.bf16 %v10196_v10 }
 0x37b   : > { %v5033_v17 = vmul.f32 %v4899_v16, %v4553_v0  ;;  %v5032_v61 = vmul.f32 %v4899_v16, %v4552_v6 }
 0x37d   : > { %5442 = vadd.xlane.f32.xlu1 %v5019_v24  ;;  %5440 = vadd.xlane.f32.xlu0 %v5018_v28  ;;  %v4554_v24 = vunpack.c.l.bf16 %v10190_v57  ;;  %v5035_v28 = vmul.f32 %v4899_v16, %v4555_v3  ;;  %v10198_v57 = vld [vmem:[%s10671_s16 + $0x118] sm:$0xff]  }
 0x37e   : > { %v4571_v3 = vunpack.c.h.bf16 %v10198_v57 }
 0x37f   : > { %v5034_v31 = vmul.f32 %v4899_v16, %v4554_v24 }
 0x381   : > { %5446 = vadd.xlane.f32.xlu1 %v5021_v55  ;;  %5444 = vadd.xlane.f32.xlu0 %v5020_v45  ;;  %v4556_v55 = vunpack.c.l.bf16 %v10191_v25  ;;  %v5037_v45 = vmul.f32 %v4899_v16, %v4557_v54 }
 0x383   : > { %v5036_v5 = vmul.f32 %v4899_v16, %v4556_v55  ;;  %v10199_v55 = vld [vmem:[%s10671_s16 + $0x120] sm:$0xff]  }
 0x385   : > { %5450 = vadd.xlane.f32.xlu1 %v5023_v26  ;;  %5448 = vadd.xlane.f32.xlu0 %v5022_v44  ;;  %v4561_v26 = vunpack.c.h.bf16 %v10193_v56  ;;  %v5039_v44 = vmul.f32 %v4899_v16, %v4559_v13 }
 0x389   : > { %5454 = vadd.xlane.f32.xlu1 %v5025_v33  ;;  %5452 = vadd.xlane.f32.xlu0 %v5024_v1  ;;  %v4563_v33 = vunpack.c.h.bf16 %v10194_v23  ;;  %v5041_v1 = vmul.f32 %v4899_v16, %v4561_v26 }
 0x38d   : > { %5458 = vadd.xlane.f32.xlu1 %v5027_v32  ;;  %5456 = vadd.xlane.f32.xlu0 %v5026_v40  ;;  %v4565_v32 = vunpack.c.h.bf16 %v10195_v37  ;;  %v5043_v40 = vmul.f32 %v4899_v16, %v4563_v33 }
 0x391   : > { %5462 = vadd.xlane.f32.xlu1 %v5029_v21  ;;  %5460 = vadd.xlane.f32.xlu0 %v5028_v2  ;;  %v11867_v21 = vrot.slane %v4480_v38, %v11815_v15  ;;  %v4564_v2 = vunpack.c.l.bf16 %v10195_v37 }
 0x393   : > { %v5045_v19 = vmul.f32 %v11867_v21, %v4565_v32  ;;  %v5044_v35 = vmul.f32 %v11867_v21, %v4564_v2  ;;  %v5047_v16 = vmul.f32 %v11867_v21, %v4567_v59 }
 0x395   : > { %5466 = vadd.xlane.f32.xlu1 %v5031_v22  ;;  %5464 = vadd.xlane.f32.xlu0 %v5030_v7  ;;  %v4566_v22 = vunpack.c.l.bf16 %v10196_v10  ;;  %v10197_v7 = vld [vmem:[%s10671_s16 + $0x110] sm:$0xff]  }
 0x396   : > { %v4569_v46 = vunpack.c.h.bf16 %v10197_v7  ;;  %v4568_v6 = vunpack.c.l.bf16 %v10197_v7 }
 0x397   : > { %v5046_v0 = vmul.f32 %v11867_v21, %v4566_v22 }
 0x398   : > { %v5049_v24 = vmul.f32 %v11867_v21, %v4569_v46 }
 0x399   : > { %5470 = vadd.xlane.f32.xlu1 %v5033_v17  ;;  %5468 = vadd.xlane.f32.xlu0 %v5032_v61  ;;  %v11876_v17 = vand.u32 127, %v4884_v36  ;;  %v11878_v61 = vpop.xlane.xlu0 %4225  ;;  %v5051_v36 = vmul.f32 %v11867_v21, %v4571_v3 }
 0x39b   : > { %v6522_v25 = vadd.s32 4294967288, %v11876_v17  ;;  %v6536_v20 = vadd.s32 4294967272, %v11876_v17  ;;  %v11895_v56 = vsub.s32 %v11876_v17, %v11812_v18  ;;  %v6529_v26 = vadd.s32 4294967280, %v11876_v17 }
 0x39c   : > { %v6550_v39 = vadd.s32 4294967256, %v11876_v17 }
 0x39d   : > { %5474 = vadd.xlane.f32.xlu1 %v5035_v28  ;;  %5472 = vadd.xlane.f32.xlu0 %v5034_v31  ;;  %v5048_v28 = vmul.f32 %v11867_v21, %v4568_v6  ;;  %v4570_v31 = vunpack.c.l.bf16 %v10198_v57  ;;  %v11884_v54 = vpop.xlane.xlu0 %4418  ;;  %v11891_v62 = vsub.s32 %v6522_v25, %v11812_v18  ;;  %v11908_v32 = vsub.s32 %v6529_v26, %v11812_v18 }
 0x39f   : > { %v5050_v13 = vmul.f32 %v11867_v21, %v4570_v31 }
 0x3a1   : > { %5478 = vadd.xlane.f32.xlu1 %v5037_v45  ;;  %5476 = vadd.xlane.f32.xlu0 %v5036_v5  ;;  %v4573_v45 = vunpack.c.h.bf16 %v10199_v55  ;;  %v4572_v5 = vunpack.c.l.bf16 %v10199_v55 }
 0x3a3   : > { %v5053_v33 = vmul.f32 %v11867_v21, %v4573_v45 }
 0x3a5   : > { %5482 = vadd.xlane.f32.xlu1 %v5039_v44  ;;  %5480 = vadd.xlane.f32.xlu0 %v5038_v12  ;;  %v10200_v44 = vld [vmem:[%s10671_s16 + $0x128] sm:$0xff]  }
 0x3a6   : > { %v4575_v12 = vunpack.c.h.bf16 %v10200_v44  ;;  %v4574_v34 = vunpack.c.l.bf16 %v10200_v44 }
 0x3a8   : > { %v5055_v10 = vmul.f32 %v11867_v21, %v4575_v12  ;;  %v5054_v46 = vmul.f32 %v11867_v21, %v4574_v34 }
 0x3a9   : > { %5486 = vadd.xlane.f32.xlu1 %v5041_v1  ;;  %5484 = vadd.xlane.f32.xlu0 %v5040_v51  ;;  %v5052_v1 = vmul.f32 %v11867_v21, %v4572_v5  ;;  %v11902_v51 = vsub.s32 %v6536_v20, %v11812_v18 }
 0x3ad   : > { %5490 = vadd.xlane.f32.xlu1 %v5043_v40  ;;  %5488 = vadd.xlane.f32.xlu0 %v5042_v8  ;;  %v6543_v40 = vadd.s32 4294967264, %v11876_v17  ;;  %v10201_v8 = vld [vmem:[%s10671_s16 + $0x130] sm:$0xff]  }
 0x3ae   : > { %v4577_v2 = vunpack.c.h.bf16 %v10201_v8  ;;  %v4576_v59 = vunpack.c.l.bf16 %v10201_v8 }
 0x3af   : > { %v11923_v3 = vsub.s32 %v6543_v40, %v11812_v18 }
 0x3b0   : > { %v5057_v45 = vmul.f32 %v11867_v21, %v4577_v2  ;;  %v5056_v5 = vmul.f32 %v11867_v21, %v4576_v59  ;;  %v6592_v59 = vadd.s32 4294967208, %v11876_v17 }
 0x3b1   : > { %5494 = vadd.xlane.f32.xlu1 %v5045_v19  ;;  %5492 = vadd.xlane.f32.xlu0 %v5044_v35  ;;  %v4435_v19 = vrot.slane %v11817_v14, 5 }
 0x3b5   : > { %5498 = vadd.xlane.f32.xlu1 %v5047_v16  ;;  %5496 = vadd.xlane.f32.xlu0 %v5046_v0  ;;  %v11917_v16 = vsub.s32 %v6550_v39, %v11812_v18  ;;  %v6564_v0 = vadd.s32 4294967240, %v11876_v17 }
 0x3b7   : > { %v11933_v44 = vsub.s32 %v6564_v0, %v11812_v18  ;;  %v6585_v0 = vadd.s32 4294967216, %v11876_v17 }
 0x3b9   : > { %5502 = vadd.xlane.f32.xlu1 %v5049_v24  ;;  %5500 = vadd.xlane.f32.xlu0 %v5048_v28  ;;  %v6557_v24 = vadd.s32 4294967248, %v11876_v17  ;;  %v10202_v28 = vld [vmem:[%s10671_s16 + $0x138] sm:$0xff]  }
 0x3ba   : > { %v4579_v31 = vunpack.c.h.bf16 %v10202_v28  ;;  %v4578_v25 = vunpack.c.l.bf16 %v10202_v28 }
 0x3bc   : > { %v5059_v40 = vmul.f32 %v11867_v21, %v4579_v31  ;;  %v5058_v8 = vmul.f32 %v11867_v21, %v4578_v25  ;;  %v10204_v21 = vld [vmem:[%s10671_s16 + $0x148] sm:$0xff]  }
 0x3bd   : > { %5506 = vadd.xlane.f32.xlu1 %v5051_v36  ;;  %5504 = vadd.xlane.f32.xlu0 %v5050_v13  ;;  %v4481_v36 = vmul.f32 %v11635_v43, %v4435_v19  ;;  %v6578_v43 = vadd.s32 4294967224, %v11876_v17 }
 0x3be   : > { %v5367_v30 = vpop.xlane.xlu1 %5366  ;;  %v5365_v23 = vpop.xlane.xlu0 %5364 }
 0x3bf   : > { %v6526_v38 = vrot.slane %v5367_v30, %v11891_v62  ;;  %v6521_v37 = vrot.slane %v5365_v23, %v11895_v56  ;;  %v11939_v30 = vsub.s32 %v6557_v24, %v11812_v18  ;;  %v6571_v23 = vadd.s32 4294967232, %v11876_v17 }
 0x3c0   : > { %v11944_v39 = vrot.slane %v4481_v36, %v11815_v15 }
 0x3c1   : > { %v6528_v35 = vsel %vm6527_vm7, %v6526_v38, %v6521_v37  ;;  %5510 = vadd.xlane.f32.xlu1 %v5053_v33  ;;  %5508 = vadd.xlane.f32.xlu0 %v5052_v1  ;;  %v10203_v33 = vld [vmem:[%s10671_s16 + $0x140] sm:$0xff]  }
 0x3c2   : > { %v5371_v22 = vpop.xlane.xlu1 %5370  ;;  %v5369_v7 = vpop.xlane.xlu0 %5368  ;;  %v4581_v1 = vunpack.c.h.bf16 %v10203_v33  ;;  %v4580_v38 = vunpack.c.l.bf16 %v10203_v33 }
 0x3c3   : > { %v6540_v6 = vrot.slane %v5371_v22, %v11902_v51  ;;  %v6533_v57 = vrot.slane %v5369_v7, %v11908_v32 }
 0x3c4   : > { %v5061_v28 = vmul.f32 %v11944_v39, %v4581_v1  ;;  %v5060_v31 = vmul.f32 %v11944_v39, %v4580_v38 }
 0x3c5   : > { %v6535_v55 = vsel %vm6534_vm8, %v6533_v57, %v6528_v35  ;;  %5514 = vadd.xlane.f32.xlu1 %v5055_v10  ;;  %5512 = vadd.xlane.f32.xlu0 %v5054_v46  ;;  %v11951_v10 = vsub.s32 %v6578_v43, %v11812_v18  ;;  %v11957_v46 = vsub.s32 %v6571_v23, %v11812_v18  ;;  %v4582_v57 = vunpack.c.l.bf16 %v10204_v21 }
 0x3c6   : > { %v5375_v20 = vpop.xlane.xlu1 %5374  ;;  %v6542_v13 = vsel %vm6541_vm9, %v6540_v6, %v6535_v55  ;;  %v5373_v26 = vpop.xlane.xlu0 %5372  ;;  %v4583_v6 = vunpack.c.h.bf16 %v10204_v21  ;;  %v6599_v43 = vadd.s32 4294967200, %v11876_v17 }
 0x3c7   : > { %v6554_v12 = vrot.slane %v5375_v20, %v11917_v16  ;;  %v6547_v34 = vrot.slane %v5373_v26, %v11923_v3  ;;  %v11972_v26 = vsub.s32 %v6585_v0, %v11812_v18  ;;  %v5062_v38 = vmul.f32 %v11944_v39, %v4582_v57 }
 0x3c8   : > { %v5063_v1 = vmul.f32 %v11944_v39, %v4583_v6  ;;  %v10206_v6 = vld [vmem:[%s10671_s16 + $0x158] sm:$0xff]  }
 0x3c9   : > { %v6549_v37 = vsel %vm6548_vm10, %v6547_v34, %v6542_v13  ;;  %5518 = vadd.xlane.f32.xlu1 %v5057_v45  ;;  %5516 = vadd.xlane.f32.xlu0 %v5056_v5  ;;  %v11966_v45 = vsub.s32 %v6592_v59, %v11812_v18  ;;  %v6606_v5 = vadd.s32 4294967192, %v11876_v17  ;;  %v4587_v57 = vunpack.c.h.bf16 %v10206_v6 }
 0x3ca   : > { %v5379_v2 = vpop.xlane.xlu1 %5378  ;;  %v6556_v19 = vsel %vm6555_vm11, %v6554_v12, %v6549_v37  ;;  %v5377_v35 = vpop.xlane.xlu0 %5376  ;;  %v10205_v12 = vld [vmem:[%s10671_s16 + $0x150] sm:$0xff]  }
 0x3cb   : > { %v6568_v22 = vrot.slane %v5379_v2, %v11933_v44  ;;  %v6561_v7 = vrot.slane %v5377_v35, %v11939_v30  ;;  %v4585_v34 = vunpack.c.h.bf16 %v10205_v12  ;;  %v4584_v23 = vunpack.c.l.bf16 %v10205_v12 }
 0x3cc   : > { %v11981_v2 = vsub.s32 %v6606_v5, %v11812_v18 }
 0x3cd   : > { %v6563_v24 = vsel %vm6562_vm12, %v6561_v7, %v6556_v19  ;;  %5522 = vadd.xlane.f32.xlu1 %v5059_v40  ;;  %5520 = vadd.xlane.f32.xlu0 %v5058_v8  ;;  %v6620_v19 = vadd.s32 4294967176, %v11876_v17  ;;  %v6613_v7 = vadd.s32 4294967184, %v11876_v17  ;;  %v5065_v21 = vmul.f32 %v11944_v39, %v4585_v34 }
 0x3ce   : > { %v5383_v25 = vpop.xlane.xlu1 %5382  ;;  %v6570_v36 = vsel %vm6569_vm13, %v6568_v22, %v6563_v24  ;;  %v5381_v55 = vpop.xlane.xlu0 %5380  ;;  %v11987_v22 = vsub.s32 %v6599_v43, %v11812_v18  ;;  %v4586_v24 = vunpack.c.l.bf16 %v10206_v6  ;;  %v10207_v43 = vld [vmem:[%s10671_s16 + $0x160] sm:$0xff]  }
 0x3cf   : > { %v6582_v20 = vrot.slane %v5383_v25, %v11951_v10  ;;  %v6575_v13 = vrot.slane %v5381_v55, %v11957_v46  ;;  %v11996_v55 = vsub.s32 %v6620_v19, %v11812_v18  ;;  %v4589_v12 = vunpack.c.h.bf16 %v10207_v43 }
 0x3d1   : > { %v6577_v33 = vsel %vm6576_vm14, %v6575_v13, %v6570_v36  ;;  %5526 = vadd.xlane.f32.xlu1 %v5061_v28  ;;  %5524 = vadd.xlane.f32.xlu0 %v5060_v31  ;;  %v5064_v36 = vmul.f32 %v11944_v39, %v4584_v23 }
 0x3d2   : > { %v5387_v37 = vpop.xlane.xlu1 %5386  ;;  %v6584_v40 = vsel %vm6583_vm15, %v6582_v20, %v6577_v33  ;;  %v5385_v8 = vpop.xlane.xlu0 %5384  ;;  %v12001_v20 = vsub.s32 %v6613_v7, %v11812_v18  ;;  %v10208_v7 = vld [vmem:[%s10671_s16 + $0x168] sm:$0xff]  }
 0x3d3   : > { %v6596_v35 = vrot.slane %v5387_v37, %v11966_v45  ;;  %v6589_v59 = vrot.slane %v5385_v8, %v11972_v26 }
 0x3d5   : > { %v6591_v0 = vsel %vm6590_vm6, %v6589_v59, %v6584_v40  ;;  %5530 = vadd.xlane.f32.xlu1 %v5063_v1  ;;  %5528 = vadd.xlane.f32.xlu0 %v5062_v38  ;;  %v5067_v1 = vmul.f32 %v11944_v39, %v4587_v57  ;;  %v4588_v38 = vunpack.c.l.bf16 %v10207_v43  ;;  %v5066_v40 = vmul.f32 %v11944_v39, %v4586_v24 }
 0x3d6   : > { %v5391_v28 = vpop.xlane.xlu1 %5390  ;;  %v6598_v31 = vsel %vm6597_vm5, %v6596_v35, %v6591_v0  ;;  %v5389_v25 = vpop.xlane.xlu0 %5388  ;;  %v4591_v0 = vunpack.c.h.bf16 %v10208_v7  ;;  %v4436_v43 = vrot.slane %v11817_v14, 6 }
 0x3d7   : > { %v6610_v17 = vrot.slane %v5391_v28, %v11981_v2  ;;  %v6603_v5 = vrot.slane %v5389_v25, %v11987_v22  ;;  %v5069_v28 = vmul.f32 %v11944_v39, %v4589_v12  ;;  %v5068_v24 = vmul.f32 %v11944_v39, %v4588_v38 }
 0x3d8   : > { %v5071_v12 = vmul.f32 %v11944_v39, %v4591_v0 }
 0x3d9   : > { %v6605_v13 = vsel %vm13598_vm4, %v6603_v5, %v6598_v31  ;;  %5534 = vadd.xlane.f32.xlu1 %v5065_v21  ;;  %5532 = vadd.xlane.f32.xlu0 %v5064_v36  ;;  %v4590_v21 = vunpack.c.l.bf16 %v10208_v7 }
 0x3da   : > { %v5395_v34 = vpop.xlane.xlu1 %5394  ;;  %v6612_v23 = vsel %vm6611_vm3, %v6610_v17, %v6605_v13  ;;  %v5393_v33 = vpop.xlane.xlu0 %5392  ;;  %v10209_v17 = vld [vmem:[%s10671_s16 + $0x170] sm:$0xff]  }
 0x3db   : > { %v6624_v37 = vrot.slane %v5395_v34, %v11996_v55  ;;  %v6617_v18 = vrot.slane %v5393_v33, %v12001_v20  ;;  %v4593_v5 = vunpack.c.h.bf16 %v10209_v17  ;;  %v4592_v13 = vunpack.c.l.bf16 %v10209_v17 }
 0x3dc   : > { %v5070_v33 = vmul.f32 %v11944_v39, %v4590_v21 }
 0x3dd   : > { %v6619_v8 = vsel %vm13593_vm2, %v6617_v18, %v6612_v23  ;;  %5538 = vadd.xlane.f32.xlu1 %v5067_v1  ;;  %5536 = vadd.xlane.f32.xlu0 %v5066_v40  ;;  %v10210_v40 = vld [vmem:[%s10671_s16 + $0x178] sm:$0xff]   ;;  %v5073_v21 = vmul.f32 %v11944_v39, %v4593_v5 }
 0x3de   : > { %v12012_v19 = vsel %vm13594_vm1, %v6624_v37, %v6619_v8  ;;  %v5399_v35 = vpop.xlane.xlu1 %5398  ;;  %v5397_v59 = vpop.xlane.xlu0 %5396  ;;  %v4595_v8 = vunpack.c.h.bf16 %v10210_v40 }
 0x3df   : > { %v6634_v6 = vrot.slane %v5399_v35, %v11891_v62  ;;  %v6630_v57 = vrot.slane %v5397_v59, %v11895_v56  ;;  %v4594_v35 = vunpack.c.l.bf16 %v10210_v40  ;;  %v13612_v59 = vld [vmem:[#allocation12_spill] sm:$0xff] }
 0x3e0   : > { %v4482_v7 = vmul.f32 %v13612_v59, %v4436_v43 }
 0x3e1   : > { %v6635_v31 = vsel %vm6527_vm7, %v6634_v6, %v6630_v57  ;;  %5542 = vadd.xlane.f32.xlu1 %v5069_v28  ;;  %5540 = vadd.xlane.f32.xlu0 %v5068_v24  ;;  %v5072_v57 = vmul.f32 %v11944_v39, %v4592_v13  ;;  %v5075_v13 = vmul.f32 %v11944_v39, %v4595_v8 }
 0x3e2   : > { %v5403_v25 = vpop.xlane.xlu1 %5402  ;;  %v5401_v36 = vpop.xlane.xlu0 %5400  ;;  %v12038_v43 = vrot.slane %v4482_v7, %v11815_v15 }
 0x3e3   : > { %v6644_v34 = vrot.slane %v5403_v25, %v11902_v51  ;;  %v6639_v23 = vrot.slane %v5401_v36, %v11908_v32  ;;  %v10211_v36 = vld [vmem:[%s10671_s16 + $0x180] sm:$0xff]  }
 0x3e4   : > { %v4597_v17 = vunpack.c.h.bf16 %v10211_v36 }
 0x3e5   : > { %v6640_v1 = vsel %vm6534_vm8, %v6639_v23, %v6635_v31  ;;  %5546 = vadd.xlane.f32.xlu1 %v5071_v12  ;;  %5544 = vadd.xlane.f32.xlu0 %v5070_v33  ;;  %v5074_v12 = vmul.f32 %v11944_v39, %v4594_v35 }
 0x3e6   : > { %v5407_v38 = vpop.xlane.xlu1 %5406  ;;  %v6645_v37 = vsel %vm6541_vm9, %v6644_v34, %v6640_v1  ;;  %v5405_v18 = vpop.xlane.xlu0 %5404  ;;  %v4596_v34 = vunpack.c.l.bf16 %v10211_v36  ;;  %v5077_v8 = vmul.f32 %v12038_v43, %v4597_v17 }
 0x3e7   : > { %v6654_v6 = vrot.slane %v5407_v38, %v11917_v16  ;;  %v6649_v0 = vrot.slane %v5405_v18, %v11923_v3  ;;  %v10212_v18 = vld [vmem:[%s10671_s16 + $0x188] sm:$0xff]  }
 0x3e8   : > { %v4599_v40 = vunpack.c.h.bf16 %v10212_v18  ;;  %v4598_v59 = vunpack.c.l.bf16 %v10212_v18  ;;  %v5076_v39 = vmul.f32 %v12038_v43, %v4596_v34 }
 0x3e9   : > { %v6650_v28 = vsel %vm6548_vm10, %v6649_v0, %v6645_v37  ;;  %5550 = vadd.xlane.f32.xlu1 %v5073_v21  ;;  %5548 = vadd.xlane.f32.xlu0 %v5072_v57 }
 0x3ea   : > { %v5411_v24 = vpop.xlane.xlu1 %5410  ;;  %v6655_v31 = vsel %vm6555_vm11, %v6654_v6, %v6650_v28  ;;  %v5409_v25 = vpop.xlane.xlu0 %5408  ;;  %v10213_v28 = vld [vmem:[%s10671_s16 + $0x190] sm:$0xff]   ;;  %v5079_v17 = vmul.f32 %v12038_v43, %v4599_v40  ;;  %v5078_v34 = vmul.f32 %v12038_v43, %v4598_v59 }
 0x3eb   : > { %v6664_v23 = vrot.slane %v5411_v24, %v11933_v44  ;;  %v6659_v5 = vrot.slane %v5409_v25, %v11939_v30  ;;  %v4601_v24 = vunpack.c.h.bf16 %v10213_v28 }
 0x3ed   : > { %v6660_v33 = vsel %vm6562_vm12, %v6659_v5, %v6655_v31  ;;  %5554 = vadd.xlane.f32.xlu1 %v5075_v13  ;;  %5552 = vadd.xlane.f32.xlu0 %v5074_v12  ;;  %v4600_v31 = vunpack.c.l.bf16 %v10213_v28  ;;  %v5081_v40 = vmul.f32 %v12038_v43, %v4601_v24 }
 0x3ee   : > { %v5415_v1 = vpop.xlane.xlu1 %5414  ;;  %v6665_v38 = vsel %vm6569_vm13, %v6664_v23, %v6660_v33  ;;  %v5413_v37 = vpop.xlane.xlu0 %5412  ;;  %v10214_v33 = vld [vmem:[%s10671_s16 + $0x198] sm:$0xff]  }
 0x3ef   : > { %v6674_v7 = vrot.slane %v5415_v1, %v11951_v10  ;;  %v6669_v6 = vrot.slane %v5413_v37, %v11957_v46  ;;  %v4603_v1 = vunpack.c.h.bf16 %v10214_v33  ;;  %v5080_v59 = vmul.f32 %v12038_v43, %v4600_v31 }
 0x3f1   : > { %v6670_v35 = vsel %vm6576_vm14, %v6669_v6, %v6665_v38  ;;  %5558 = vadd.xlane.f32.xlu1 %v5077_v8  ;;  %5556 = vadd.xlane.f32.xlu0 %v5076_v39  ;;  %v4602_v38 = vunpack.c.l.bf16 %v10214_v33  ;;  %v5083_v24 = vmul.f32 %v12038_v43, %v4603_v1 }
 0x3f2   : > { %v5419_v0 = vpop.xlane.xlu1 %5418  ;;  %v6675_v21 = vsel %vm6583_vm15, %v6674_v7, %v6670_v35  ;;  %v5417_v57 = vpop.xlane.xlu0 %5416  ;;  %v10215_v35 = vld [vmem:[%s10671_s16 + $0x1a0] sm:$0xff]  }
 0x3f3   : > { %v6684_v25 = vrot.slane %v5419_v0, %v11966_v45  ;;  %v6679_v36 = vrot.slane %v5417_v57, %v11972_v26  ;;  %v4605_v0 = vunpack.c.h.bf16 %v10215_v35  ;;  %v5082_v31 = vmul.f32 %v12038_v43, %v4602_v38 }
 0x3f5   : > { %v6680_v23 = vsel %vm6590_vm6, %v6679_v36, %v6675_v21  ;;  %5562 = vadd.xlane.f32.xlu1 %v5079_v17  ;;  %5560 = vadd.xlane.f32.xlu0 %v5078_v34  ;;  %v4604_v21 = vunpack.c.l.bf16 %v10215_v35 }
 0x3f6   : > { %v5423_v5 = vpop.xlane.xlu1 %5422  ;;  %v6685_v13 = vsel %vm6597_vm5, %v6684_v25, %v6680_v23  ;;  %v5421_v12 = vpop.xlane.xlu0 %5420  ;;  %v5085_v23 = vmul.f32 %v12038_v43, %v4605_v0 }
 0x3f7   : > { %v6694_v37 = vrot.slane %v5423_v5, %v11981_v2  ;;  %v6689_v18 = vrot.slane %v5421_v12, %v11987_v22  ;;  %v10216_v5 = vld [vmem:[%s10671_s16 + $0x1a8] sm:$0xff]  }
 0x3f8   : > { %v4606_v12 = vunpack.c.l.bf16 %v10216_v5 }
 0x3f9   : > { %v6690_v7 = vsel %vm13598_vm4, %v6689_v18, %v6685_v13  ;;  %5566 = vadd.xlane.f32.xlu1 %v5081_v40  ;;  %5564 = vadd.xlane.f32.xlu0 %v5080_v59  ;;  %v4607_v13 = vunpack.c.h.bf16 %v10216_v5  ;;  %v4244_v18 = vrot.slane %v11878_v61, 1  ;;  %v13613_v5 = vld [vmem:[#allocation13_spill] sm:$0xff] }
 0x3fa   : > { %v5427_v6 = vpop.xlane.xlu1 %5426  ;;  %v6695_v8 = vsel %vm6611_vm3, %v6694_v37, %v6690_v7  ;;  %v5425_v39 = vpop.xlane.xlu0 %5424  ;;  %v5084_v37 = vmul.f32 %v12038_v43, %v4604_v21 }
 0x3fb   : > { %v6704_v57 = vrot.slane %v5427_v6, %v11996_v55  ;;  %v6699_v28 = vrot.slane %v5425_v39, %v12001_v20  ;;  %v10217_v6 = vld [vmem:[%s10671_s16 + $0x1b0] sm:$0xff]   ;;  %v5087_v21 = vmul.f32 %v12038_v43, %v4607_v13 }
 0x3fc   : > { %v4608_v39 = vunpack.c.l.bf16 %v10217_v6 }
 0x3fd   : > { %v6700_v25 = vsel %vm13593_vm2, %v6699_v28, %v6695_v8  ;;  %5570 = vadd.xlane.f32.xlu1 %v5083_v24  ;;  %5568 = vadd.xlane.f32.xlu0 %v5082_v31  ;;  %v4609_v8 = vunpack.c.h.bf16 %v10217_v6  ;;  %v4245_v28 = vrot.slane %v11878_v61, 2  ;;  %v4292_v24 = vsub.f32 %v11737_v4, %v4244_v18 }
 0x3fe   : > { %v6705_v36 = vsel %vm13594_vm1, %v6704_v57, %v6700_v25  ;;  %v5431_v17 = vpop.xlane.xlu1 %5430  ;;  %v5429_v34 = vpop.xlane.xlu0 %5428  ;;  %v5086_v57 = vmul.f32 %v12038_v43, %v4606_v12  ;;  %v4246_v18 = vrot.slane %v11878_v61, 3 }
 0x3ff   : > { %v12078_v33 = vsel %vm13595_vm0, %v6705_v36, %v12012_v19  ;;  %v6713_v1 = vrot.slane %v5431_v17, %v11891_v62  ;;  %v6709_v38 = vrot.slane %v5429_v34, %v11895_v56  ;;  %v4437_v19 = vrot.slane %v11817_v14, 7  ;;  %v10218_v17 = vld [vmem:[%s10671_s16 + $0x1b8] sm:$0xff]  }
 0x400   : > { %v4611_v34 = vunpack.c.h.bf16 %v10218_v17  ;;  %v5089_v4 = vmul.f32 %v12038_v43, %v4609_v8 }
 0x401   : > { %v6714_v40 = vsel %vm6527_vm7, %v6713_v1, %v6709_v38  ;;  %5574 = vadd.xlane.f32.xlu1 %v5085_v23  ;;  %5572 = vadd.xlane.f32.xlu0 %v5084_v37  ;;  %v4610_v23 = vunpack.c.l.bf16 %v10218_v17  ;;  %v4483_v13 = vmul.f32 %v13613_v5, %v4437_v19  ;;  %v5088_v38 = vmul.f32 %v12038_v43, %v4608_v39  ;;  %v10220_v17 = vld [vmem:[%s10671_s16 + $0x1c8] sm:$0xff]  }
 0x402   : > { %v5435_v59 = vpop.xlane.xlu1 %5434  ;;  %v5433_v7 = vpop.xlane.xlu0 %5432  ;;  %v4293_v37 = vsub.f32 %v11740_v49, %v4245_v28  ;;  %v5091_v8 = vmul.f32 %v12038_v43, %v4611_v34  ;;  %v4615_v34 = vunpack.c.h.bf16 %v10220_v17 }
 0x403   : > { %v6723_v35 = vrot.slane %v5435_v59, %v11902_v51  ;;  %v6718_v0 = vrot.slane %v5433_v7, %v11908_v32  ;;  %v10219_v7 = vld [vmem:[%s10671_s16 + $0x1c0] sm:$0xff]   ;;  %v12108_v39 = vrot.slane %v4483_v13, %v11815_v15 }
 0x404   : > { %v4613_v6 = vunpack.c.h.bf16 %v10219_v7  ;;  %v4612_v49 = vunpack.c.l.bf16 %v10219_v7 }
 0x405   : > { %v6719_v31 = vsel %vm6534_vm8, %v6718_v0, %v6714_v40  ;;  %5578 = vadd.xlane.f32.xlu1 %v5087_v21  ;;  %5576 = vadd.xlane.f32.xlu0 %v5086_v57  ;;  %v4333_v40 = vmul.f32 1.442695, %v4292_v24  ;;  %v4291_v21 = vsub.f32 %v11734_v50, %v11878_v61  ;;  %v5090_v24 = vmul.f32 %v12038_v43, %v4610_v23 }
 0x406   : > { %v5439_v25 = vpop.xlane.xlu1 %5438  ;;  %v6724_v36 = vsel %vm6541_vm9, %v6723_v35, %v6719_v31  ;;  %v5437_v14 = vpop.xlane.xlu0 %5436  ;;  %v4247_v31 = vrot.slane %v11878_v61, 4  ;;  %v5092_v43 = vmul.f32 %v12108_v39, %v4612_v49  ;;  %v4614_v23 = vunpack.c.l.bf16 %v10220_v17 }
 0x407   : > { %v6733_v12 = vrot.slane %v5439_v25, %v11917_v16  ;;  %v6728_v1 = vrot.slane %v5437_v14, %v11923_v3  ;;  %v4335_v25 = vmul.f32 1.442695, %v4293_v37  ;;  %10135 = vpow2.f32 %v4333_v40  ;;  %v10221_v40 = vld [vmem:[%s10671_s16 + $0x1d0] sm:$0xff]  }
 0x408   : > { %v4295_v37 = vsub.f32 %v11749_v47, %v4247_v31  ;;  %v4616_v7 = vunpack.c.l.bf16 %v10221_v40  ;;  %v5094_v49 = vmul.f32 %v12108_v39, %v4614_v23 }
 0x409   : > { %v6729_v59 = vsel %vm6548_vm10, %v6728_v1, %v6724_v36  ;;  %5582 = vadd.xlane.f32.xlu1 %v5089_v4  ;;  %5580 = vadd.xlane.f32.xlu0 %v5088_v38  ;;  %v4294_v36 = vsub.f32 %v11743_v11, %v4246_v18  ;;  %v4248_v1 = vrot.slane %v11878_v61, 5  ;;  %v4331_v11 = vmul.f32 1.442695, %v4291_v21 }
 0x40a   : > { %v5443_v19 = vpop.xlane.xlu1 %5442  ;;  %v6734_v35 = vsel %vm6555_vm11, %v6733_v12, %v6729_v59  ;;  %v5441_v0 = vpop.xlane.xlu0 %5440  ;;  %v5093_v12 = vmul.f32 %v12108_v39, %v4613_v6  ;;  %10137 = vpow2.f32 %v4335_v25  ;;  %v4617_v59 = vunpack.c.h.bf16 %v10221_v40  ;;  %v10222_v25 = vld [vmem:[%s10671_s16 + $0x1d8] sm:$0xff]  }
 0x40b   : > { %v6743_v57 = vrot.slane %v5443_v19, %v11933_v44  ;;  %v6738_v28 = vrot.slane %v5441_v0, %v11939_v30  ;;  %v4337_v6 = vmul.f32 1.442695, %v4294_v36  ;;  %v4249_v21 = vrot.slane %v11878_v61, 6 }
 0x40c   : > { %10139 = vpow2.f32 %v4331_v11  ;;  %v4619_v36 = vunpack.c.h.bf16 %v10222_v25 }
 0x40d   : > { %v6739_v14 = vsel %vm6562_vm12, %v6738_v28, %v6734_v35  ;;  %5586 = vadd.xlane.f32.xlu1 %v5091_v8  ;;  %5584 = vadd.xlane.f32.xlu0 %v5090_v24  ;;  %v5095_v8 = vmul.f32 %v12108_v39, %v4615_v34  ;;  %v4296_v28 = vsub.f32 %v11754_v29, %v4248_v1  ;;  %v4339_v24 = vmul.f32 1.442695, %v4295_v37 }
 0x40e   : > { %v5447_v50 = vpop.xlane.xlu1 %5446  ;;  %v6744_v5 = vsel %vm6569_vm13, %v6743_v57, %v6739_v14  ;;  %v5445_v13 = vpop.xlane.xlu0 %5444  ;;  %v4250_v14 = vrot.slane %v11878_v61, 7  ;;  %10141 = vpow2.f32 %v4337_v6  ;;  %v4297_v29 = vsub.f32 %v11761_v9, %v4249_v21  ;;  %v10223_v61 = vld [vmem:[%s10671_s16 + $0x1e0] sm:$0xff]   ;;  %v10224_v21 = vld [vmem:[%s10671_s16 + $0x1e8] sm:$0xff]  }
 0x40f   : > { %v6753_v4 = vrot.slane %v5447_v50, %v11951_v10  ;;  %v6748_v38 = vrot.slane %v5445_v13, %v11957_v46  ;;  %v4618_v13 = vunpack.c.l.bf16 %v10222_v25  ;;  %v5096_v1 = vmul.f32 %v12108_v39, %v4616_v7 }
 0x410   : > { %v4341_v11 = vmul.f32 1.442695, %v4296_v28  ;;  %10143 = vpow2.f32 %v4339_v24  ;;  %v5099_v37 = vmul.f32 %v12108_v39, %v4619_v36  ;;  %v4620_v9 = vunpack.c.l.bf16 %v10223_v61 }
 0x411   : > { %v6749_v18 = vsel %vm6576_vm14, %v6748_v38, %v6744_v5  ;;  %5590 = vadd.xlane.f32.xlu1 %v5093_v12  ;;  %5588 = vadd.xlane.f32.xlu0 %v5092_v43  ;;  %v5097_v5 = vmul.f32 %v12108_v39, %v4617_v59  ;;  %v12141_v12 = vpop.eup %10135  ;;  %10145 = vrcp.f32 %v11884_v54 }
 0x412   : > { %v5451_v19 = vpop.xlane.xlu1 %5450  ;;  %v6754_v35 = vsel %vm6583_vm15, %v6753_v4, %v6749_v18  ;;  %v5449_v0 = vpop.xlane.xlu0 %5448  ;;  %v4621_v4 = vunpack.c.h.bf16 %v10223_v61  ;;  %v4298_v18 = vsub.f32 %v11764_v52, %v4250_v14  ;;  %10147 = vpow2.f32 %v4341_v11 }
 0x413   : > { %v6763_v47 = vrot.slane %v5451_v19, %v11966_v45  ;;  %v6758_v57 = vrot.slane %v5449_v0, %v11972_v26  ;;  %v4343_v19 = vmul.f32 1.442695, %v4297_v29  ;;  %v4623_v52 = vunpack.c.h.bf16 %v10224_v21 }
 0x414   : > { %v12150_v40 = vpop.eup %10137  ;;  %v4345_v28 = vmul.f32 1.442695, %v4298_v18  ;;  %v5101_v14 = vmul.f32 %v12108_v39, %v4621_v4  ;;  %v5100_v29 = vmul.f32 %v12108_v39, %v4620_v9 }
 0x415   : > { %v6759_v31 = vsel %vm6590_vm6, %v6758_v57, %v6754_v35  ;;  %5594 = vadd.xlane.f32.xlu1 %v5095_v8  ;;  %5592 = vadd.xlane.f32.xlu0 %v5094_v49  ;;  %v4399_v35 = vrot.slane %v12141_v12, 7  ;;  %v5098_v49 = vmul.f32 %v12108_v39, %v4618_v13  ;;  %v4622_v57 = vunpack.c.l.bf16 %v10224_v21 }
 0x416   : > { %v5455_v17 = vpop.xlane.xlu1 %5454  ;;  %v6764_v34 = vsel %vm6597_vm5, %v6763_v47, %v6759_v31  ;;  %v5453_v50 = vpop.xlane.xlu0 %5452  ;;  %v4401_v24 = vrot.slane %v12150_v40, 6  ;;  %10149 = vpow2.f32 %v4343_v19 }
 0x417   : > { %v6773_v43 = vrot.slane %v5455_v17, %v11981_v2  ;;  %v6768_v23 = vrot.slane %v5453_v50, %v11987_v22  ;;  %v12159_v47 = vpop.eup %10139  ;;  %10151 = vpow2.f32 %v4345_v28 }
 0x418   : > { %v4400_v17 = vsel %vm13595_vm0, %v4399_v35, %v12159_v47  ;;  %vm13625_vm0 = vcmask 1043459  }
 0x419   : > { %v6769_v38 = vsel %vm13598_vm4, %v6768_v23, %v6764_v34  ;;  %5598 = vadd.xlane.f32.xlu1 %v5097_v5  ;;  %5596 = vadd.xlane.f32.xlu0 %v5096_v1  ;;  %v12167_v34 = vpop.eup %10141 }
 0x41a   : > { %v5459_v59 = vpop.xlane.xlu1 %5458  ;;  %v6774_v7 = vsel %vm6611_vm3, %v6773_v43, %v6769_v38  ;;  %v5457_v6 = vpop.xlane.xlu0 %5456 }
 0x41b   : > { %v6783_v0 = vrot.slane %v5459_v59, %v11996_v55  ;;  %v6778_v8 = vrot.slane %v5457_v6, %v12001_v20  ;;  %v12178_v1 = vpop.eup %10143  ;;  %v5103_v59 = vmul.f32 %v12108_v39, %v4623_v52 }
 0x41c   : > { %v12186_v6 = vpop.eup %10145  ;;  %v4405_v21 = vrot.slane %v12178_v1, 4 }
 0x41d   : > { %v6779_v54 = vsel %vm13593_vm2, %v6778_v8, %v6774_v7  ;;  %5602 = vadd.xlane.f32.xlu1 %v5099_v37  ;;  %5600 = vadd.xlane.f32.xlu0 %v5098_v49  ;;  %vm13614_vm2 = vcmask 1042434   ;;  %v4403_v37 = vrot.slane %v12167_v34, 5  ;;  %v5102_v7 = vmul.f32 %v12108_v39, %v4622_v57  ;;  %v12189_v35 = vpop.eup %10147  ;;  %v10226_v8 = vld [vmem:[%s10671_s16 + $0x1f8] sm:$0xff]  }
 0x41e   : > { %v6784_v31 = vsel %vm13594_vm1, %v6783_v0, %v6779_v54  ;;  %v5463_v25 = vpop.xlane.xlu1 %5462  ;;  %v5461_v36 = vpop.xlane.xlu0 %5460  ;;  %vm13615_vm1 = vmmov %vm13614_vm2  ;;  %v4627_v49 = vunpack.c.h.bf16 %v10226_v8 }
 0x41f   : > { %v12171_v50 = vsel %vm13614_vm2, %v6784_v31, %v12078_v33  ;;  %v6792_v5 = vrot.slane %v5463_v25, %v11891_v62  ;;  %v6788_v13 = vrot.slane %v5461_v36, %v11895_v56  ;;  %v4402_v23 = vsel %vm13615_vm1, %v4401_v24, %v4400_v17  ;;  %v10225_v33 = vld [vmem:[%s10671_s16 + $0x1f0] sm:$0xff]  }
 0x420   : > { %v4625_v4 = vunpack.c.h.bf16 %v10225_v33  ;;  %v4624_v38 = vunpack.c.l.bf16 %v10225_v33  ;;  %vm13616_vm1 = vcmask 1043459   ;;  %v4626_v31 = vunpack.c.l.bf16 %v10226_v8 }
 0x421   : > { %v6793_v43 = vsel %vm6527_vm7, %v6792_v5, %v6788_v13  ;;  %5606 = vadd.xlane.f32.xlu1 %v5101_v14  ;;  %5604 = vadd.xlane.f32.xlu0 %v5100_v29  ;;  %v4404_v19 = vsel %vm13616_vm1, %v4403_v37, %v4402_v23  ;;  %vm13617_vm2 = vcmask 1044484   ;;  %v4484_v17 = vmul.f32 %v12186_v6, %v11780_v63  ;;  %v12202_v5 = vpop.eup %10149 }
 0x422   : > { %v5467_v11 = vpop.xlane.xlu1 %5466  ;;  %v5465_v61 = vpop.xlane.xlu0 %5464  ;;  %v5105_v57 = vmul.f32 %v12108_v39, %v4625_v4  ;;  %v5104_v24 = vmul.f32 %v12108_v39, %v4624_v38  ;;  %v4406_v14 = vsel %vm13617_vm2, %v4405_v21, %v4404_v19  ;;  %13618 = vst [vmem:[#allocation12_spill] sm:$0xff] %v12202_v5  ;;  %v4407_v13 = vrot.slane %v12189_v35, 3  ;;  %v10227_v38 = vld [vmem:[%s10671_s16 + $0x200] sm:$0xff]  }
 0x423   : > { %v6802_v18 = vrot.slane %v5467_v11, %v11902_v51  ;;  %v6797_v9 = vrot.slane %v5465_v61, %v11908_v32  ;;  %v5106_v33 = vmul.f32 %v12108_v39, %v4626_v31  ;;  %vm13619_vm1 = vcmask 1045509   ;;  %v12211_v37 = vpop.eup %10151 }
 0x424   : > { %v4408_v4 = vsel %vm13619_vm1, %v4407_v13, %v4406_v14  ;;  %v4628_v63 = vunpack.c.l.bf16 %v10227_v38  ;;  %13620 = vst [vmem:[#allocation13_spill] sm:$0xff] %v12211_v37  ;;  %vm13621_vm2 = vcmask 1046534   ;;  %v4411_v21 = vrot.slane %v12211_v37, 1  ;;  %v10257_v37 = vld [vmem:[%s10671_s16 + $0x2f0] sm:$0xff]  }
 0x425   : > { %v6798_v0 = vsel %vm6534_vm8, %v6797_v9, %v6793_v43  ;;  %5610 = vadd.xlane.f32.xlu1 %v5103_v59  ;;  %5608 = vadd.xlane.f32.xlu0 %v5102_v7  ;;  %v5107_v43 = vmul.f32 %v12108_v39, %v4627_v49  ;;  %v4409_v59 = vrot.slane %v12202_v5, 2  ;;  %v12217_v7 = vrot.slane %v4484_v17, %v11815_v15 }
 0x426   : > { %v5471_v54 = vpop.xlane.xlu1 %5470  ;;  %v6803_v28 = vsel %vm6541_vm9, %v6802_v18, %v6798_v0  ;;  %v5469_v52 = vpop.xlane.xlu0 %5468  ;;  %vm13622_vm1 = vcmask 1047559  }
 0x427   : > { %v6812_v25 = vrot.slane %v5471_v54, %v11917_v16  ;;  %v6807_v36 = vrot.slane %v5469_v52, %v11923_v3  ;;  %v4410_v39 = vsel %vm13621_vm2, %v4409_v59, %v4408_v4  ;;  %v4629_v54 = vunpack.c.h.bf16 %v10227_v38 }
 0x428   : > { %vm13623_vm2 = vcmask 982912  }
 0x429   : > { %v6808_v29 = vsel %vm6548_vm10, %v6807_v36, %v6803_v28  ;;  %5614 = vadd.xlane.f32.xlu1 %v5105_v57  ;;  %5612 = vadd.xlane.f32.xlu0 %v5104_v24  ;;  %v5108_v57 = vmul.f32 %v12217_v7, %v4628_v63  ;;  %v10228_v24 = vld [vmem:[%s10671_s16 + $0x208] sm:$0xff]  }
 0x42a   : > { %v5475_v23 = vpop.xlane.xlu1 %5474  ;;  %v6813_v11 = vsel %vm6555_vm11, %v6812_v25, %v6808_v29  ;;  %v5473_v61 = vpop.xlane.xlu0 %5472  ;;  %v4630_v31 = vunpack.c.l.bf16 %v10228_v24  ;;  %v4412_v25 = vsel %vm13622_vm1, %v4411_v21, %v4410_v39  ;;  %v4631_v29 = vunpack.c.h.bf16 %v10228_v24 }
 0x42b   : > { %v6822_v18 = vrot.slane %v5475_v23, %v11933_v44  ;;  %v6817_v9 = vrot.slane %v5473_v61, %v11939_v30  ;;  %vm13624_vm1 = vcmask 1048512  }
 0x42c   : > { %v5110_v4 = vmul.f32 %v12217_v7, %v4630_v31  ;;  %v10231_v31 = vld [vmem:[%s10671_s16 + $0x220] sm:$0xff]  }
 0x42d   : > { %v6818_v19 = vsel %vm6562_vm12, %v6817_v9, %v6813_v11  ;;  %5618 = vadd.xlane.f32.xlu1 %v5107_v43  ;;  %5616 = vadd.xlane.f32.xlu0 %v5106_v33  ;;  %v10229_v43 = vld [vmem:[%s10671_s16 + $0x210] sm:$0xff]   ;;  %v5109_v33 = vmul.f32 %v12217_v7, %v4629_v54 }
 0x42e   : > { %v5479_v0 = vpop.xlane.xlu1 %5478  ;;  %v6823_v8 = vsel %vm6569_vm13, %v6822_v18, %v6818_v19  ;;  %v5477_v49 = vpop.xlane.xlu0 %5476  ;;  %v4632_v23 = vunpack.c.l.bf16 %v10229_v43  ;;  %v4633_v59 = vunpack.c.h.bf16 %v10229_v43  ;;  %v10230_v19 = vld [vmem:[%s10671_s16 + $0x218] sm:$0xff]  }
 0x42f   : > { %v6832_v28 = vrot.slane %v5479_v0, %v11951_v10  ;;  %v6827_v52 = vrot.slane %v5477_v49, %v11957_v46  ;;  %v4634_v39 = vunpack.c.l.bf16 %v10230_v19  ;;  %v5111_v49 = vmul.f32 %v12217_v7, %v4631_v29 }
 0x430   : > { %v5112_v21 = vmul.f32 %v12217_v7, %v4632_v23  ;;  %v4635_v24 = vunpack.c.h.bf16 %v10230_v19 }
 0x431   : > { %v6828_v36 = vsel %vm6576_vm14, %v6827_v52, %v6823_v8  ;;  %4420 = vadd.xlane.f32.xlu1 %v4412_v25  ;;  %5620 = vadd.xlane.f32.xlu0 %v5108_v57  ;;  %v4636_v25 = vunpack.c.l.bf16 %v10231_v31 }
 0x432   : > { %v5483_v14 = vpop.xlane.xlu1 %5482  ;;  %v6833_v17 = vsel %vm6583_vm15, %v6832_v28, %v6828_v36  ;;  %v5481_v13 = vpop.xlane.xlu0 %5480 }
 0x433   : > { %v6842_v11 = vrot.slane %v5483_v14, %v11966_v45  ;;  %v6837_v61 = vrot.slane %v5481_v13, %v11972_v26  ;;  %v5114_v13 = vmul.f32 %v12217_v7, %v4634_v39 }
 0x435   : > { %v6838_v38 = vsel %vm6590_vm6, %v6837_v61, %v6833_v17  ;;  %5622 = vadd.xlane.f32.xlu1 %v5109_v33  ;;  %5624 = vadd.xlane.f32.xlu0 %v5110_v4  ;;  %v5113_v17 = vmul.f32 %v12217_v7, %v4633_v59  ;;  %v5115_v61 = vmul.f32 %v12217_v7, %v4635_v24  ;;  %v4637_v33 = vunpack.c.h.bf16 %v10231_v31  ;;  %v10232_v4 = vld [vmem:[%s10671_s16 + $0x228] sm:$0xff]  }
 0x436   : > { %v5487_v63 = vpop.xlane.xlu1 %5486  ;;  %v6843_v18 = vsel %vm6597_vm5, %v6842_v11, %v6838_v38  ;;  %v5485_v9 = vpop.xlane.xlu0 %5484  ;;  %v4638_v38 = vunpack.c.l.bf16 %v10232_v4  ;;  %v5116_v59 = vmul.f32 %v12217_v7, %v4636_v25 }
 0x437   : > { %v6852_v0 = vrot.slane %v5487_v63, %v11981_v2  ;;  %v6847_v8 = vrot.slane %v5485_v9, %v11987_v22 }
 0x439   : > { %v6848_v54 = vsel %vm13598_vm4, %v6847_v8, %v6843_v18  ;;  %5626 = vadd.xlane.f32.xlu1 %v5111_v49  ;;  %5628 = vadd.xlane.f32.xlu0 %v5112_v21  ;;  %v4639_v8 = vunpack.c.h.bf16 %v10232_v4  ;;  %v10233_v49 = vld [vmem:[%s10671_s16 + $0x230] sm:$0xff]  }
 0x43a   : > { %v5491_v28 = vpop.xlane.xlu1 %5490  ;;  %v6853_v52 = vsel %vm6611_vm3, %v6852_v0, %v6848_v54  ;;  %v5489_v57 = vpop.xlane.xlu0 %5488  ;;  %v4640_v21 = vunpack.c.l.bf16 %v10233_v49  ;;  %v4438_v54 = vrot.slane %v12186_v6, 1 }
 0x43b   : > { %v6862_v36 = vrot.slane %v5491_v28, %v11996_v55  ;;  %v6857_v14 = vrot.slane %v5489_v57, %v12001_v20  ;;  %v5118_v57 = vmul.f32 %v12217_v7, %v4638_v38 }
 0x43d   : > { %v6858_v29 = vsel %vm13623_vm2, %v6857_v14, %v6853_v52  ;;  %5630 = vadd.xlane.f32.xlu1 %v5113_v17  ;;  %5632 = vadd.xlane.f32.xlu0 %v5114_v13  ;;  %v5117_v52 = vmul.f32 %v12217_v7, %v4637_v33  ;;  %v4641_v14 = vunpack.c.h.bf16 %v10233_v49  ;;  %v10234_v17 = vld [vmem:[%s10671_s16 + $0x238] sm:$0xff]  }
 0x43e   : > { %v6863_v43 = vsel %vm13624_vm1, %v6862_v36, %v6858_v29  ;;  %v5495_v23 = vpop.xlane.xlu1 %5494  ;;  %v5493_v11 = vpop.xlane.xlu0 %5492  ;;  %v4642_v13 = vunpack.c.l.bf16 %v10234_v17  ;;  %v4485_v29 = vmul.f32 %v11782_v48, %v4438_v54  ;;  %v4643_v48 = vunpack.c.h.bf16 %v10234_v17 }
 0x43f   : > { %v12255_v63 = vsel %vm13625_vm0, %v6863_v43, %v12171_v50  ;;  %v6871_v18 = vrot.slane %v5495_v23, %v11891_v62  ;;  %v6867_v9 = vrot.slane %v5493_v11, %v11895_v56  ;;  %v5119_v11 = vmul.f32 %v12217_v7, %v4639_v8  ;;  %vm13626_vm0 = vmmov %vm13623_vm2 }
 0x440   : > { %v5122_v8 = vmul.f32 %v12217_v7, %v4642_v13  ;;  %v12283_v49 = vrot.slane %v4485_v29, %v11815_v15  ;;  %vm13627_vm2 = vmmov %vm13624_vm1  ;;  %vm13628_vm1 = vcmask 1044484  }
 0x441   : > { %v6872_v19 = vsel %vm6527_vm7, %v6871_v18, %v6867_v9  ;;  %5634 = vadd.xlane.f32.xlu1 %v5115_v61  ;;  %5636 = vadd.xlane.f32.xlu0 %v5116_v59  ;;  %v5120_v61 = vmul.f32 %v12217_v7, %v4640_v21  ;;  %v5121_v9 = vmul.f32 %v12217_v7, %v4641_v14  ;;  %v10235_v59 = vld [vmem:[%s10671_s16 + $0x240] sm:$0xff]  }
 0x442   : > { %v5499_v39 = vpop.xlane.xlu1 %5498  ;;  %v5497_v0 = vpop.xlane.xlu0 %5496 }
 0x443   : > { %v6881_v50 = vrot.slane %v5499_v39, %v11902_v51  ;;  %v6876_v28 = vrot.slane %v5497_v0, %v11908_v32 }
 0x445   : > { %v6877_v24 = vsel %vm6534_vm8, %v6876_v28, %v6872_v19  ;;  %5638 = vadd.xlane.f32.xlu1 %v5117_v52  ;;  %5640 = vadd.xlane.f32.xlu0 %v5118_v57  ;;  %v4644_v19 = vunpack.c.l.bf16 %v10235_v59  ;;  %v4645_v52 = vunpack.c.h.bf16 %v10235_v59  ;;  %v10236_v57 = vld [vmem:[%s10671_s16 + $0x248] sm:$0xff]  }
 0x446   : > { %v5503_v31 = vpop.xlane.xlu1 %5502  ;;  %v6882_v25 = vsel %vm6541_vm9, %v6881_v50, %v6877_v24  ;;  %v5501_v36 = vpop.xlane.xlu0 %5500  ;;  %v4646_v24 = vunpack.c.l.bf16 %v10236_v57 }
 0x447   : > { %v6891_v43 = vrot.slane %v5503_v31, %v11917_v16  ;;  %v6886_v23 = vrot.slane %v5501_v36, %v11923_v3  ;;  %v5123_v36 = vmul.f32 %v12217_v7, %v4643_v48  ;;  %v5124_v14 = vmul.f32 %v12283_v49, %v4644_v19 }
 0x448   : > { %v5125_v7 = vmul.f32 %v12283_v49, %v4645_v52 }
 0x449   : > { %v6887_v33 = vsel %vm6548_vm10, %v6886_v23, %v6882_v25  ;;  %5642 = vadd.xlane.f32.xlu1 %v5119_v11  ;;  %5644 = vadd.xlane.f32.xlu0 %v5120_v61  ;;  %v4647_v23 = vunpack.c.h.bf16 %v10236_v57  ;;  %v10237_v11 = vld [vmem:[%s10671_s16 + $0x250] sm:$0xff]  }
 0x44a   : > { %v5507_v4 = vpop.xlane.xlu1 %5506  ;;  %v6892_v38 = vsel %vm6555_vm11, %v6891_v43, %v6887_v33  ;;  %v5505_v18 = vpop.xlane.xlu0 %5504  ;;  %v4648_v61 = vunpack.c.l.bf16 %v10237_v11  ;;  %v4649_v19 = vunpack.c.h.bf16 %v10237_v11 }
 0x44b   : > { %v6901_v39 = vrot.slane %v5507_v4, %v11933_v44  ;;  %v6896_v0 = vrot.slane %v5505_v18, %v11939_v30 }
 0x44d   : > { %v6897_v21 = vsel %vm6562_vm12, %v6896_v0, %v6892_v38  ;;  %5646 = vadd.xlane.f32.xlu1 %v5121_v9  ;;  %5648 = vadd.xlane.f32.xlu0 %v5122_v8  ;;  %v5126_v38 = vmul.f32 %v12283_v49, %v4646_v24 }
 0x44e   : > { %v5511_v54 = vpop.xlane.xlu1 %5510  ;;  %v6902_v50 = vsel %vm6569_vm13, %v6901_v39, %v6897_v21  ;;  %v5509_v28 = vpop.xlane.xlu0 %5508  ;;  %v10238_v39 = vld [vmem:[%s10671_s16 + $0x258] sm:$0xff]  }
 0x44f   : > { %v6911_v31 = vrot.slane %v5511_v54, %v11951_v10  ;;  %v6906_v25 = vrot.slane %v5509_v28, %v11957_v46  ;;  %v4650_v0 = vunpack.c.l.bf16 %v10238_v39  ;;  %v5127_v54 = vmul.f32 %v12283_v49, %v4647_v23 }
 0x451   : > { %v6907_v17 = vsel %vm6576_vm14, %v6906_v25, %v6902_v50  ;;  %5650 = vadd.xlane.f32.xlu1 %v5123_v36  ;;  %5652 = vadd.xlane.f32.xlu0 %v5124_v14  ;;  %v5128_v50 = vmul.f32 %v12283_v49, %v4648_v61  ;;  %v10239_v25 = vld [vmem:[%s10671_s16 + $0x260] sm:$0xff]  }
 0x452   : > { %v5515_v13 = vpop.xlane.xlu1 %5514  ;;  %v6912_v29 = vsel %vm6583_vm15, %v6911_v31, %v6907_v17  ;;  %v5513_v43 = vpop.xlane.xlu0 %5512  ;;  %v4651_v31 = vunpack.c.h.bf16 %v10238_v39  ;;  %v4652_v36 = vunpack.c.l.bf16 %v10239_v25 }
 0x453   : > { %v6921_v33 = vrot.slane %v5515_v13, %v11966_v45  ;;  %v6916_v4 = vrot.slane %v5513_v43, %v11972_v26  ;;  %v5129_v13 = vmul.f32 %v12283_v49, %v4649_v19 }
 0x455   : > { %v6917_v18 = vsel %vm6590_vm6, %v6916_v4, %v6912_v29  ;;  %5654 = vadd.xlane.f32.xlu1 %v5125_v7  ;;  %5656 = vadd.xlane.f32.xlu0 %v5126_v38  ;;  %v5130_v29 = vmul.f32 %v12283_v49, %v4650_v0  ;;  %v4653_v4 = vunpack.c.h.bf16 %v10239_v25  ;;  %v10240_v7 = vld [vmem:[%s10671_s16 + $0x268] sm:$0xff]  }
 0x456   : > { %v5519_v9 = vpop.xlane.xlu1 %5518  ;;  %v6922_v48 = vsel %vm6597_vm5, %v6921_v33, %v6917_v18  ;;  %v5517_v59 = vpop.xlane.xlu0 %5516  ;;  %v5131_v33 = vmul.f32 %v12283_v49, %v4651_v31  ;;  %v4654_v38 = vunpack.c.l.bf16 %v10240_v7 }
 0x457   : > { %v6931_v8 = vrot.slane %v5519_v9, %v11981_v2  ;;  %v6926_v21 = vrot.slane %v5517_v59, %v11987_v22  ;;  %v5132_v59 = vmul.f32 %v12283_v49, %v4652_v36 }
 0x459   : > { %v6927_v28 = vsel %vm13598_vm4, %v6926_v21, %v6922_v48  ;;  %5658 = vadd.xlane.f32.xlu1 %v5127_v54  ;;  %5660 = vadd.xlane.f32.xlu0 %v5128_v50  ;;  %v10241_v21 = vld [vmem:[%s10671_s16 + $0x270] sm:$0xff]   ;;  %v4439_v50 = vrot.slane %v12186_v6, 2 }
 0x45a   : > { %v5523_v52 = vpop.xlane.xlu1 %5522  ;;  %v6932_v57 = vsel %vm6611_vm3, %v6931_v8, %v6927_v28  ;;  %v5521_v24 = vpop.xlane.xlu0 %5520  ;;  %v4655_v8 = vunpack.c.h.bf16 %v10240_v7  ;;  %v4656_v54 = vunpack.c.l.bf16 %v10241_v21 }
 0x45b   : > { %v6941_v14 = vrot.slane %v5523_v52, %v11996_v55  ;;  %v6936_v17 = vrot.slane %v5521_v24, %v12001_v20  ;;  %v5133_v52 = vmul.f32 %v12283_v49, %v4653_v4 }
 0x45d   : > { %v6937_v43 = vsel %vm13626_vm0, %v6936_v17, %v6932_v57  ;;  %5662 = vadd.xlane.f32.xlu1 %v5129_v13  ;;  %5664 = vadd.xlane.f32.xlu0 %v5130_v29  ;;  %v5134_v57 = vmul.f32 %v12283_v49, %v4654_v38  ;;  %v10242_v17 = vld [vmem:[%s10671_s16 + $0x278] sm:$0xff]   ;;  %v4486_v29 = vmul.f32 %v11784_v42, %v4439_v50 }
 0x45e   : > { %v6942_v23 = vsel %vm13627_vm2, %v6941_v14, %v6937_v43  ;;  %v5527_v11 = vpop.xlane.xlu1 %5526  ;;  %v5525_v61 = vpop.xlane.xlu0 %5524  ;;  %v4657_v14 = vunpack.c.h.bf16 %v10241_v21  ;;  %v4658_v13 = vunpack.c.l.bf16 %v10242_v17 }
 0x45f   : > { %v12319_v18 = vsel %vm13628_vm1, %v6942_v23, %v12255_v63  ;;  %v6950_v9 = vrot.slane %v5527_v11, %v11891_v62  ;;  %v6946_v48 = vrot.slane %v5525_v61, %v11895_v56  ;;  %v5135_v11 = vmul.f32 %v12283_v49, %v4655_v8 }
 0x460   : > { %v5136_v61 = vmul.f32 %v12283_v49, %v4656_v54  ;;  %v5138_v8 = vmul.f32 %v12283_v49, %v4658_v13  ;;  %vm13629_vm1 = vcmask 1045509  }
 0x461   : > { %v6951_v19 = vsel %vm6527_vm7, %v6950_v9, %v6946_v48  ;;  %5666 = vadd.xlane.f32.xlu1 %v5131_v33  ;;  %5668 = vadd.xlane.f32.xlu0 %v5132_v59  ;;  %v4659_v9 = vunpack.c.h.bf16 %v10242_v17  ;;  %v10243_v48 = vld [vmem:[%s10671_s16 + $0x280] sm:$0xff]   ;;  %v12343_v59 = vrot.slane %v4486_v29, %v11815_v15 }
 0x462   : > { %v5531_v39 = vpop.xlane.xlu1 %5530  ;;  %v5529_v0 = vpop.xlane.xlu0 %5528  ;;  %v4660_v42 = vunpack.c.l.bf16 %v10243_v48 }
 0x463   : > { %v6960_v63 = vrot.slane %v5531_v39, %v11902_v51  ;;  %v6955_v28 = vrot.slane %v5529_v0, %v11908_v32  ;;  %v5137_v0 = vmul.f32 %v12283_v49, %v4657_v14 }
 0x465   : > { %v6956_v24 = vsel %vm6534_vm8, %v6955_v28, %v6951_v19  ;;  %5670 = vadd.xlane.f32.xlu1 %v5133_v52  ;;  %5672 = vadd.xlane.f32.xlu0 %v5134_v57  ;;  %v4661_v28 = vunpack.c.h.bf16 %v10243_v48  ;;  %v10244_v52 = vld [vmem:[%s10671_s16 + $0x288] sm:$0xff]  }
 0x466   : > { %v5535_v31 = vpop.xlane.xlu1 %5534  ;;  %v6961_v25 = vsel %vm6541_vm9, %v6960_v63, %v6956_v24  ;;  %v5533_v36 = vpop.xlane.xlu0 %5532  ;;  %v4662_v57 = vunpack.c.l.bf16 %v10244_v52 }
 0x467   : > { %v6970_v43 = vrot.slane %v5535_v31, %v11917_v16  ;;  %v6965_v23 = vrot.slane %v5533_v36, %v11923_v3  ;;  %v5140_v36 = vmul.f32 %v12343_v59, %v4660_v42 }
 0x469   : > { %v6966_v33 = vsel %vm6548_vm10, %v6965_v23, %v6961_v25  ;;  %5674 = vadd.xlane.f32.xlu1 %v5135_v11  ;;  %5676 = vadd.xlane.f32.xlu0 %v5136_v61  ;;  %v5139_v25 = vmul.f32 %v12283_v49, %v4659_v9  ;;  %v10245_v23 = vld [vmem:[%s10671_s16 + $0x290] sm:$0xff]   ;;  %v5141_v49 = vmul.f32 %v12343_v59, %v4661_v28 }
 0x46a   : > { %v5539_v4 = vpop.xlane.xlu1 %5538  ;;  %v6971_v7 = vsel %vm6555_vm11, %v6970_v43, %v6966_v33  ;;  %v5537_v38 = vpop.xlane.xlu0 %5536  ;;  %v4663_v43 = vunpack.c.h.bf16 %v10244_v52  ;;  %v4664_v11 = vunpack.c.l.bf16 %v10245_v23  ;;  %v4665_v42 = vunpack.c.h.bf16 %v10245_v23 }
 0x46b   : > { %v6980_v19 = vrot.slane %v5539_v4, %v11933_v44  ;;  %v6975_v39 = vrot.slane %v5537_v38, %v11939_v30  ;;  %v5142_v4 = vmul.f32 %v12343_v59, %v4662_v57 }
 0x46d   : > { %v6976_v21 = vsel %vm6562_vm12, %v6975_v39, %v6971_v7  ;;  %5678 = vadd.xlane.f32.xlu1 %v5137_v0  ;;  %5680 = vadd.xlane.f32.xlu0 %v5138_v8 }
 0x46e   : > { %v5543_v54 = vpop.xlane.xlu1 %5542  ;;  %v6981_v50 = vsel %vm6569_vm13, %v6980_v19, %v6976_v21  ;;  %v5541_v63 = vpop.xlane.xlu0 %5540  ;;  %v10246_v19 = vld [vmem:[%s10671_s16 + $0x298] sm:$0xff]   ;;  %v5143_v21 = vmul.f32 %v12343_v59, %v4663_v43 }
 0x46f   : > { %v6990_v24 = vrot.slane %v5543_v54, %v11951_v10  ;;  %v6985_v31 = vrot.slane %v5541_v63, %v11957_v46  ;;  %v4666_v39 = vunpack.c.l.bf16 %v10246_v19  ;;  %v5144_v54 = vmul.f32 %v12343_v59, %v4664_v11 }
 0x470   : > { %v4667_v57 = vunpack.c.h.bf16 %v10246_v19 }
 0x471   : > { %v6986_v14 = vsel %vm6576_vm14, %v6985_v31, %v6981_v50  ;;  %5682 = vadd.xlane.f32.xlu1 %v5139_v25  ;;  %5684 = vadd.xlane.f32.xlu0 %v5140_v36 }
 0x472   : > { %v5547_v17 = vpop.xlane.xlu1 %5546  ;;  %v6991_v13 = vsel %vm6583_vm15, %v6990_v24, %v6986_v14  ;;  %v5545_v29 = vpop.xlane.xlu0 %5544  ;;  %v10247_v24 = vld [vmem:[%s10671_s16 + $0x2a0] sm:$0xff]   ;;  %v5145_v14 = vmul.f32 %v12343_v59, %v4665_v42 }
 0x473   : > { %v7000_v61 = vrot.slane %v5547_v17, %v11966_v45  ;;  %v6995_v33 = vrot.slane %v5545_v29, %v11972_v26  ;;  %v4668_v31 = vunpack.c.l.bf16 %v10247_v24  ;;  %v5146_v17 = vmul.f32 %v12343_v59, %v4666_v39 }
 0x474   : > { %v4669_v11 = vunpack.c.h.bf16 %v10247_v24 }
 0x475   : > { %v6996_v7 = vsel %vm6590_vm6, %v6995_v33, %v6991_v13  ;;  %5686 = vadd.xlane.f32.xlu1 %v5141_v49  ;;  %5688 = vadd.xlane.f32.xlu0 %v5142_v4  ;;  %v5147_v33 = vmul.f32 %v12343_v59, %v4667_v57  ;;  %v5148_v49 = vmul.f32 %v12343_v59, %v4668_v31  ;;  %v10248_v4 = vld [vmem:[%s10671_s16 + $0x2a8] sm:$0xff]  }
 0x476   : > { %v5551_v38 = vpop.xlane.xlu1 %5550  ;;  %v7001_v9 = vsel %vm6597_vm5, %v7000_v61, %v6996_v7  ;;  %v5549_v48 = vpop.xlane.xlu0 %5548  ;;  %v4670_v7 = vunpack.c.l.bf16 %v10248_v4  ;;  %v5149_v42 = vmul.f32 %v12343_v59, %v4669_v11 }
 0x477   : > { %v7010_v0 = vrot.slane %v5551_v38, %v11981_v2  ;;  %v7005_v8 = vrot.slane %v5549_v48, %v11987_v22  ;;  %v4671_v48 = vunpack.c.h.bf16 %v10248_v4 }
 0x478   : > { %v5150_v19 = vmul.f32 %v12343_v59, %v4670_v7  ;;  %v10252_v7 = vld [vmem:[%s10671_s16 + $0x2c8] sm:$0xff]  }
 0x479   : > { %v7006_v50 = vsel %vm13598_vm4, %v7005_v8, %v7001_v9  ;;  %5690 = vadd.xlane.f32.xlu1 %v5143_v21  ;;  %5692 = vadd.xlane.f32.xlu0 %v5144_v54 }
 0x47a   : > { %v5555_v63 = vpop.xlane.xlu1 %5554  ;;  %v7011_v28 = vsel %vm6611_vm3, %v7010_v0, %v7006_v50  ;;  %v5553_v52 = vpop.xlane.xlu0 %5552  ;;  %v4440_v0 = vrot.slane %v12186_v6, 3  ;;  %v5151_v50 = vmul.f32 %v12343_v59, %v4671_v48  ;;  %v4678_v48 = vunpack.c.l.bf16 %v10252_v7 }
 0x47b   : > { %v7020_v25 = vrot.slane %v5555_v63, %v11996_v55  ;;  %v7015_v36 = vrot.slane %v5553_v52, %v12001_v20 }
 0x47c   : > { %v4487_v57 = vmul.f32 %v11787_v27, %v4440_v0  ;;  %v4679_v0 = vunpack.c.h.bf16 %v10252_v7 }
 0x47d   : > { %v7016_v13 = vsel %vm13626_vm0, %v7015_v36, %v7011_v28  ;;  %5694 = vadd.xlane.f32.xlu1 %v5145_v14  ;;  %5696 = vadd.xlane.f32.xlu0 %v5146_v17  ;;  %v10250_v28 = vld [vmem:[%s10671_s16 + $0x2b8] sm:$0xff]   ;;  %v10251_v17 = vld [vmem:[%s10671_s16 + $0x2c0] sm:$0xff]  }
 0x47e   : > { %v7021_v29 = vsel %vm13627_vm2, %v7020_v25, %v7016_v13  ;;  %v12379_v43 = vpop.xlane.xlu1 %5558  ;;  %v12381_v23 = vpop.xlane.xlu0 %5556  ;;  %v4674_v52 = vunpack.c.l.bf16 %v10250_v28  ;;  %v4675_v25 = vunpack.c.h.bf16 %v10250_v28  ;;  %v4676_v13 = vunpack.c.l.bf16 %v10251_v17 }
 0x47f   : > { %v12385_v61 = vsel %vm13629_vm1, %v7021_v29, %v12319_v18  ;;  %v10249_v18 = vld [vmem:[%s10671_s16 + $0x2b0] sm:$0xff]   ;;  %v12414_v29 = vrot.slane %v4487_v57, %v11815_v15  ;;  %v4677_v4 = vunpack.c.h.bf16 %v10251_v17  ;;  %v7025_v7 = vrot.slane %v12381_v23, %v11895_v56  ;;  %vm13630_vm1 = vmmov %vm13626_vm0 }
 0x480   : > { %v4672_v39 = vunpack.c.l.bf16 %v10249_v18  ;;  %v4673_v54 = vunpack.c.h.bf16 %v10249_v18  ;;  %v5154_v14 = vmul.f32 %v12343_v59, %v4674_v52 }
 0x481   : > { %5698 = vadd.xlane.f32.xlu1 %v5147_v33  ;;  %5700 = vadd.xlane.f32.xlu0 %v5148_v49  ;;  %v5155_v33 = vmul.f32 %v12343_v59, %v4675_v25  ;;  %v5156_v49 = vmul.f32 %v12414_v29, %v4676_v13  ;;  %v5157_v18 = vmul.f32 %v12414_v29, %v4677_v4  ;;  %v10254_v25 = vld [vmem:[%s10671_s16 + $0x2d8] sm:$0xff]  }
 0x482   : > { %v12390_v38 = vpop.xlane.xlu1 %5562  ;;  %v12392_v9 = vpop.xlane.xlu0 %5560  ;;  %v5152_v63 = vmul.f32 %v12343_v59, %v4672_v39  ;;  %v5153_v36 = vmul.f32 %v12343_v59, %v4673_v54  ;;  %v5158_v39 = vmul.f32 %v12414_v29, %v4678_v48  ;;  %v10253_v54 = vld [vmem:[%s10671_s16 + $0x2d0] sm:$0xff]   ;;  %v5159_v28 = vmul.f32 %v12414_v29, %v4679_v0 }
 0x483   : > { %v4680_v59 = vunpack.c.l.bf16 %v10253_v54  ;;  %v4681_v57 = vunpack.c.h.bf16 %v10253_v54  ;;  %v4683_v13 = vunpack.c.h.bf16 %v10254_v25  ;;  %v7029_v4 = vrot.slane %v12379_v43, %v11891_v62 }
 0x484   : > { %v7039_v23 = vrot.slane %v12390_v38, %v11902_v51 }
 0x485   : > { %5702 = vadd.xlane.f32.xlu1 %v5149_v42  ;;  %5704 = vadd.xlane.f32.xlu0 %v5150_v19  ;;  %v5160_v52 = vmul.f32 %v12414_v29, %v4680_v59  ;;  %v5161_v48 = vmul.f32 %v12414_v29, %v4681_v57  ;;  %v7030_v43 = vsel %vm6527_vm7, %v7029_v4, %v7025_v7 }
 0x486   : > { %v12398_v8 = vpop.xlane.xlu1 %5566  ;;  %v12400_v21 = vpop.xlane.xlu0 %5564  ;;  %v5163_v57 = vmul.f32 %v12414_v29, %v4683_v13  ;;  %v4688_v13 = vunpack.c.l.bf16 %v10257_v37 }
 0x489   : > { %5706 = vadd.xlane.f32.xlu1 %v5151_v50  ;;  %5708 = vadd.xlane.f32.xlu0 %v5152_v63 }
 0x48a   : > { %v12406_v24 = vpop.xlane.xlu1 %5570  ;;  %v12408_v31 = vpop.xlane.xlu0 %5568 }
 0x48d   : > { %5710 = vadd.xlane.f32.xlu1 %v5153_v36  ;;  %5712 = vadd.xlane.f32.xlu0 %v5154_v14  ;;  %v4682_v36 = vunpack.c.l.bf16 %v10254_v25 }
 0x48e   : > { %v12416_v27 = vpop.xlane.xlu1 %5574  ;;  %v12418_v11 = vpop.xlane.xlu0 %5572 }
 0x491   : > { %5714 = vadd.xlane.f32.xlu1 %v5155_v33  ;;  %5716 = vadd.xlane.f32.xlu0 %v5156_v49  ;;  %v10255_v33 = vld [vmem:[%s10671_s16 + $0x2e0] sm:$0xff]  }
 0x492   : > { %v12423_v42 = vpop.xlane.xlu1 %5578  ;;  %v12425_v19 = vpop.xlane.xlu0 %5576  ;;  %v4684_v49 = vunpack.c.l.bf16 %v10255_v33  ;;  %v4685_v59 = vunpack.c.h.bf16 %v10255_v33 }
 0x494   : > { %v5164_v25 = vmul.f32 %v12414_v29, %v4684_v49  ;;  %v5165_v7 = vmul.f32 %v12414_v29, %v4685_v59  ;;  %v4441_v49 = vrot.slane %v12186_v6, 4  ;;  %v7054_v59 = vrot.slane %v12408_v31, %v11939_v30 }
 0x495   : > { %5718 = vadd.xlane.f32.xlu1 %v5157_v18  ;;  %5720 = vadd.xlane.f32.xlu0 %v5158_v39  ;;  %v5162_v18 = vmul.f32 %v12414_v29, %v4682_v36  ;;  %v7034_v39 = vrot.slane %v12392_v9, %v11908_v32  ;;  %v7044_v9 = vrot.slane %v12400_v21, %v11923_v3 }
 0x496   : > { %v12430_v50 = vpop.xlane.xlu1 %5582  ;;  %v12432_v63 = vpop.xlane.xlu0 %5580  ;;  %v7059_v31 = vrot.slane %v12406_v24, %v11933_v44 }
 0x497   : > { %v7035_v36 = vsel %vm6534_vm8, %v7034_v39, %v7030_v43  ;;  %v7049_v39 = vrot.slane %v12398_v8, %v11917_v16 }
 0x498   : > { %v7040_v21 = vsel %vm6541_vm9, %v7039_v23, %v7035_v36  ;;  %v4689_v36 = vunpack.c.h.bf16 %v10257_v37 }
 0x499   : > { %5722 = vadd.xlane.f32.xlu1 %v5159_v28  ;;  %5724 = vadd.xlane.f32.xlu0 %v5160_v52  ;;  %v10256_v28 = vld [vmem:[%s10671_s16 + $0x2e8] sm:$0xff]   ;;  %v7045_v43 = vsel %vm6548_vm10, %v7044_v9, %v7040_v21  ;;  %v4488_v9 = vmul.f32 %v11790_v58, %v4441_v49 }
 0x49a   : > { %v12437_v14 = vpop.xlane.xlu1 %5586  ;;  %v12439_v17 = vpop.xlane.xlu0 %5584  ;;  %v4686_v52 = vunpack.c.l.bf16 %v10256_v28  ;;  %v4687_v38 = vunpack.c.h.bf16 %v10256_v28 }
 0x49c   : > { %v5167_v23 = vmul.f32 %v12414_v29, %v4687_v38  ;;  %v7064_v38 = vrot.slane %v12418_v11, %v11957_v46  ;;  %v7069_v11 = vrot.slane %v12416_v27, %v11951_v10 }
 0x49d   : > { %5726 = vadd.xlane.f32.xlu1 %v5161_v48  ;;  %5728 = vadd.xlane.f32.xlu0 %v5162_v18 }
 0x49e   : > { %v5591_v0 = vpop.xlane.xlu1 %5590  ;;  %v5589_v54 = vpop.xlane.xlu0 %5588 }
 0x49f   : > { %v7108_v48 = vrot.slane %v5591_v0, %v11891_v62  ;;  %v7104_v33 = vrot.slane %v5589_v54, %v11895_v56  ;;  %v5166_v54 = vmul.f32 %v12414_v29, %v4686_v52 }
 0x4a1   : > { %5730 = vadd.xlane.f32.xlu1 %v5163_v57  ;;  %5732 = vadd.xlane.f32.xlu0 %v5164_v25  ;;  %v7109_v28 = vsel %vm6527_vm7, %v7108_v48, %v7104_v33  ;;  %v7050_v48 = vsel %vm6555_vm11, %v7049_v39, %v7045_v43  ;;  %v5169_v39 = vmul.f32 %v12414_v29, %v4689_v36 }
 0x4a2   : > { %v5595_v18 = vpop.xlane.xlu1 %5594  ;;  %v5593_v4 = vpop.xlane.xlu0 %5592 }
 0x4a3   : > { %v7113_v0 = vrot.slane %v5593_v4, %v11908_v32  ;;  %v7118_v57 = vrot.slane %v5595_v18, %v11902_v51  ;;  %v10258_v4 = vld [vmem:[%s10671_s16 + $0x2f8] sm:$0xff]   ;;  %v5168_v18 = vmul.f32 %v12414_v29, %v4688_v13 }
 0x4a4   : > { %v4690_v52 = vunpack.c.l.bf16 %v10258_v4 }
 0x4a5   : > { %v7114_v25 = vsel %vm6534_vm8, %v7113_v0, %v7109_v28  ;;  %5734 = vadd.xlane.f32.xlu1 %v5165_v7  ;;  %5736 = vadd.xlane.f32.xlu0 %v5166_v54  ;;  %v7055_v7 = vsel %vm6562_vm12, %v7054_v59, %v7050_v48  ;;  %v10259_v0 = vld [vmem:[%s10671_s16 + $0x300] sm:$0xff]   ;;  %v12492_v54 = vrot.slane %v4488_v9, %v11815_v15  ;;  %v10260_v48 = vld [vmem:[%s10671_s16 + $0x308] sm:$0xff]  }
 0x4a6   : > { %v5599_v8 = vpop.xlane.xlu1 %5598  ;;  %v5597_v5 = vpop.xlane.xlu0 %5596  ;;  %v7119_v21 = vsel %vm6541_vm9, %v7118_v57, %v7114_v25  ;;  %v4692_v13 = vunpack.c.l.bf16 %v10259_v0  ;;  %v7060_v43 = vsel %vm6569_vm13, %v7059_v31, %v7055_v7  ;;  %v5170_v28 = vmul.f32 %v12414_v29, %v4690_v52 }
 0x4a7   : > { %v7123_v33 = vrot.slane %v5597_v5, %v11923_v3  ;;  %v7128_v37 = vrot.slane %v5599_v8, %v11917_v16  ;;  %v4691_v5 = vunpack.c.h.bf16 %v10258_v4  ;;  %v7065_v57 = vsel %vm6576_vm14, %v7064_v38, %v7060_v43 }
 0x4a8   : > { %v7074_v25 = vrot.slane %v12425_v19, %v11972_v26  ;;  %v4693_v31 = vunpack.c.h.bf16 %v10259_v0  ;;  %v4694_v52 = vunpack.c.l.bf16 %v10260_v48  ;;  %v7070_v19 = vsel %vm6583_vm15, %v7069_v11, %v7065_v57 }
 0x4a9   : > { %v7124_v58 = vsel %vm6548_vm10, %v7123_v33, %v7119_v21  ;;  %5738 = vadd.xlane.f32.xlu1 %v5167_v23  ;;  %5740 = vadd.xlane.f32.xlu0 %v5168_v18  ;;  %v5171_v9 = vmul.f32 %v12414_v29, %v4691_v5  ;;  %v7079_v33 = vrot.slane %v12423_v42, %v11966_v45  ;;  %v10261_v5 = vld [vmem:[%s10671_s16 + $0x310] sm:$0xff]  }
 0x4aa   : > { %v5603_v24 = vpop.xlane.xlu1 %5602  ;;  %v5601_v49 = vpop.xlane.xlu0 %5600  ;;  %v7129_v23 = vsel %vm6555_vm11, %v7128_v37, %v7124_v58  ;;  %v5172_v7 = vmul.f32 %v12492_v54, %v4692_v13  ;;  %v7075_v38 = vsel %vm6590_vm6, %v7074_v25, %v7070_v19  ;;  %v7084_v37 = vrot.slane %v12432_v63, %v11987_v22 }
 0x4ab   : > { %v7133_v59 = vrot.slane %v5601_v49, %v11939_v30  ;;  %v7138_v8 = vrot.slane %v5603_v24, %v11933_v44  ;;  %v5173_v49 = vmul.f32 %v12492_v54, %v4693_v31  ;;  %v4696_v0 = vunpack.c.l.bf16 %v10261_v5 }
 0x4ac   : > { %v7089_v13 = vrot.slane %v12430_v50, %v11981_v2  ;;  %v7080_v63 = vsel %vm6597_vm5, %v7079_v33, %v7075_v38  ;;  %v5174_v43 = vmul.f32 %v12492_v54, %v4694_v52 }
 0x4ad   : > { %v7134_v36 = vsel %vm6562_vm12, %v7133_v59, %v7129_v23  ;;  %5742 = vadd.xlane.f32.xlu1 %v5169_v39  ;;  %5744 = vadd.xlane.f32.xlu0 %v5170_v28  ;;  %v4695_v39 = vunpack.c.h.bf16 %v10260_v48  ;;  %v7085_v59 = vsel %vm13598_vm4, %v7084_v37, %v7080_v63  ;;  %v7094_v28 = vrot.slane %v12439_v17, %v12001_v20 }
 0x4ae   : > { %v5607_v27 = vpop.xlane.xlu1 %5606  ;;  %v5605_v4 = vpop.xlane.xlu0 %5604  ;;  %v7139_v21 = vsel %vm6569_vm13, %v7138_v8, %v7134_v36  ;;  %v7099_v17 = vrot.slane %v12437_v14, %v11996_v55  ;;  %v7090_v31 = vsel %vm6611_vm3, %v7089_v13, %v7085_v59  ;;  %v5176_v52 = vmul.f32 %v12492_v54, %v4696_v0 }
 0x4af   : > { %v7143_v18 = vrot.slane %v5605_v4, %v11957_v46  ;;  %v7148_v29 = vrot.slane %v5607_v27, %v11951_v10  ;;  %v5175_v36 = vmul.f32 %v12492_v54, %v4695_v39  ;;  %v4697_v27 = vunpack.c.h.bf16 %v10261_v5  ;;  %v10262_v4 = vld [vmem:[%s10671_s16 + $0x318] sm:$0xff]  }
 0x4b0   : > { %v7095_v33 = vsel %vm13626_vm0, %v7094_v28, %v7090_v31  ;;  %vm13631_vm0 = vcmask 1046534  }
 0x4b1   : > { %v7144_v58 = vsel %vm6576_vm14, %v7143_v18, %v7139_v21  ;;  %5746 = vadd.xlane.f32.xlu1 %v5171_v9  ;;  %5748 = vadd.xlane.f32.xlu0 %v5172_v7  ;;  %v4698_v9 = vunpack.c.l.bf16 %v10262_v4  ;;  %v5177_v14 = vmul.f32 %v12492_v54, %v4697_v27  ;;  %v10263_v21 = vld [vmem:[%s10671_s16 + $0x320] sm:$0xff]  }
 0x4b2   : > { %v5611_v42 = vpop.xlane.xlu1 %5610  ;;  %v5609_v24 = vpop.xlane.xlu0 %5608  ;;  %v7149_v25 = vsel %vm6583_vm15, %v7148_v29, %v7144_v58  ;;  %v4699_v29 = vunpack.c.h.bf16 %v10262_v4  ;;  %v4700_v58 = vunpack.c.l.bf16 %v10263_v21  ;;  %v4701_v59 = vunpack.c.h.bf16 %v10263_v21  ;;  %v10265_v4 = vld [vmem:[%s10671_s16 + $0x330] sm:$0xff]  }
 0x4b3   : > { %v7153_v11 = vrot.slane %v5609_v24, %v11972_v26  ;;  %v7158_v57 = vrot.slane %v5611_v42, %v11966_v45  ;;  %v7100_v42 = vsel %vm13627_vm2, %v7099_v17, %v7095_v33  ;;  %v5178_v39 = vmul.f32 %v12492_v54, %v4698_v9 }
 0x4b4   : > { %v8449_v13 = vsel %vm13631_vm0, %v7100_v42, %v12385_v61  ;;  %v4704_v9 = vunpack.c.l.bf16 %v10265_v4  ;;  %v4442_v17 = vrot.slane %v12186_v6, 5  ;;  %vm13635_vm0 = vcmask 1048512  }
 0x4b5   : > { %v7154_v8 = vsel %vm6590_vm6, %v7153_v11, %v7149_v25  ;;  %5750 = vadd.xlane.f32.xlu1 %v5173_v49  ;;  %5752 = vadd.xlane.f32.xlu0 %v5174_v43  ;;  %v5180_v25 = vmul.f32 %v12492_v54, %v4700_v58 }
 0x4b6   : > { %v5615_v50 = vpop.xlane.xlu1 %5614  ;;  %v5613_v23 = vpop.xlane.xlu0 %5612  ;;  %v7159_v18 = vsel %vm6597_vm5, %v7158_v57, %v7154_v8  ;;  %v5179_v57 = vmul.f32 %v12492_v54, %v4699_v29  ;;  %v10264_v8 = vld [vmem:[%s10671_s16 + $0x328] sm:$0xff]   ;;  %v4489_v21 = vmul.f32 %v11795_v60, %v4442_v17 }
 0x4b7   : > { %v7163_v48 = vrot.slane %v5613_v23, %v11987_v22  ;;  %v7168_v19 = vrot.slane %v5615_v50, %v11981_v2  ;;  %v4702_v50 = vunpack.c.l.bf16 %v10264_v8  ;;  %v4703_v27 = vunpack.c.h.bf16 %v10264_v8 }
 0x4b9   : > { %v7164_v7 = vsel %vm13598_vm4, %v7163_v48, %v7159_v18  ;;  %5754 = vadd.xlane.f32.xlu1 %v5175_v36  ;;  %5756 = vadd.xlane.f32.xlu0 %v5176_v52  ;;  %vm13632_vm4 = vmmov %vm13627_vm2  ;;  %vm13633_vm2 = vcmask 1047559   ;;  %v5181_v36 = vmul.f32 %v12492_v54, %v4701_v59  ;;  %v5182_v33 = vmul.f32 %v12492_v54, %v4702_v50 }
 0x4ba   : > { %v5619_v38 = vpop.xlane.xlu1 %5618  ;;  %v5617_v37 = vpop.xlane.xlu0 %5616  ;;  %v7169_v5 = vsel %vm6611_vm3, %v7168_v19, %v7164_v7  ;;  %v12582_v59 = vrot.slane %v4489_v21, %v11815_v15 }
 0x4bb   : > { %v7178_v24 = vrot.slane %v5619_v38, %v11996_v55  ;;  %v7173_v49 = vrot.slane %v5617_v37, %v12001_v20  ;;  %v4705_v37 = vunpack.c.h.bf16 %v10265_v4  ;;  %v10268_v4 = vld [vmem:[%s10671_s16 + $0x348] sm:$0xff]  }
 0x4bd   : > { %v7174_v0 = vsel %vm13630_vm1, %v7173_v49, %v7169_v5  ;;  %5758 = vadd.xlane.f32.xlu1 %v5177_v14  ;;  %5760 = vadd.xlane.f32.xlu0 %v5178_v39  ;;  %v10266_v14 = vld [vmem:[%s10671_s16 + $0x338] sm:$0xff]   ;;  %v5184_v49 = vmul.f32 %v12492_v54, %v4704_v9  ;;  %v4710_v9 = vunpack.c.l.bf16 %v10268_v4 }
 0x4be   : > { %v7179_v63 = vsel %vm13632_vm4, %v7178_v24, %v7174_v0  ;;  %v12554_v11 = vpop.xlane.xlu1 %4420  ;;  %v5621_v43 = vpop.xlane.xlu0 %5620  ;;  %v4706_v29 = vunpack.c.l.bf16 %v10266_v14  ;;  %v5183_v24 = vmul.f32 %v12492_v54, %v4703_v27  ;;  %vm13634_vm4 = vcmask 851712  }
 0x4bf   : > { %v8450_v28 = vsel %vm13633_vm2, %v7179_v63, %v8449_v13  ;;  %v7183_v31 = vrot.slane %v5621_v43, %v11895_v56  ;;  %v4707_v63 = vunpack.c.h.bf16 %v10266_v14  ;;  %v10267_v43 = vld [vmem:[%s10671_s16 + $0x340] sm:$0xff]   ;;  %vm13636_vm2 = vmmov %vm13634_vm4  ;;  %10153 = vrcp.f32 %v12554_v11 }
 0x4c0   : > { %8468 = vst [vmem:[%s12560_s13] sm:$0xff] %v8450_v28  ;;  %v4708_v60 = vunpack.c.l.bf16 %v10267_v43  ;;  %v5186_v8 = vmul.f32 %v12492_v54, %v4706_v29  ;;  %v4709_v27 = vunpack.c.h.bf16 %v10267_v43 }
 0x4c1   : > { %5762 = vadd.xlane.f32.xlu1 %v5179_v57  ;;  %5764 = vadd.xlane.f32.xlu0 %v5180_v25  ;;  %v5185_v25 = vmul.f32 %v12492_v54, %v4705_v37  ;;  %v10269_v37 = vld [vmem:[%s10671_s16 + $0x350] sm:$0xff]  }
 0x4c2   : > { %v5623_v61 = vpop.xlane.xlu1 %5622  ;;  %v5625_v23 = vpop.xlane.xlu0 %5624  ;;  %v4712_v14 = vunpack.c.l.bf16 %v10269_v37 }
 0x4c3   : > { %v7187_v48 = vrot.slane %v5623_v61, %v11891_v62  ;;  %v7192_v52 = vrot.slane %v5625_v23, %v11908_v32 }
 0x4c5   : > { %v7188_v19 = vsel %vm6527_vm7, %v7187_v48, %v7183_v31  ;;  %5766 = vadd.xlane.f32.xlu1 %v5181_v36  ;;  %5768 = vadd.xlane.f32.xlu0 %v5182_v33  ;;  %v5187_v48 = vmul.f32 %v12492_v54, %v4707_v63  ;;  %v5189_v54 = vmul.f32 %v12582_v59, %v4709_v27 }
 0x4c6   : > { %v7193_v18 = vsel %vm6534_vm8, %v7192_v52, %v7188_v19  ;;  %v5627_v7 = vpop.xlane.xlu1 %5626  ;;  %v5629_v38 = vpop.xlane.xlu0 %5628  ;;  %v5188_v52 = vmul.f32 %v12582_v59, %v4708_v60 }
 0x4c7   : > { %v7197_v58 = vrot.slane %v5627_v7, %v11902_v51  ;;  %v7202_v42 = vrot.slane %v5629_v38, %v11923_v3  ;;  %v4711_v38 = vunpack.c.h.bf16 %v10268_v4 }
 0x4c9   : > { %v7198_v39 = vsel %vm6541_vm9, %v7197_v58, %v7193_v18  ;;  %5770 = vadd.xlane.f32.xlu1 %v5183_v24  ;;  %5772 = vadd.xlane.f32.xlu0 %v5184_v49  ;;  %v5190_v58 = vmul.f32 %v12582_v59, %v4710_v9  ;;  %v5191_v60 = vmul.f32 %v12582_v59, %v4711_v38 }
 0x4ca   : > { %v7203_v5 = vsel %vm6548_vm10, %v7202_v42, %v7198_v39  ;;  %v5631_v0 = vpop.xlane.xlu1 %5630  ;;  %v5633_v13 = vpop.xlane.xlu0 %5632 }
 0x4cb   : > { %v7207_v28 = vrot.slane %v5631_v0, %v11917_v16  ;;  %v7212_v57 = vrot.slane %v5633_v13, %v11939_v30  ;;  %v10270_v0 = vld [vmem:[%s10671_s16 + $0x358] sm:$0xff]  }
 0x4cc   : > { %v4714_v13 = vunpack.c.l.bf16 %v10270_v0 }
 0x4cd   : > { %v7208_v50 = vsel %vm6555_vm11, %v7207_v28, %v7203_v5  ;;  %5774 = vadd.xlane.f32.xlu1 %v5185_v25  ;;  %5776 = vadd.xlane.f32.xlu0 %v5186_v8  ;;  %v4713_v5 = vunpack.c.h.bf16 %v10269_v37  ;;  %v5192_v28 = vmul.f32 %v12582_v59, %v4712_v14  ;;  %v10272_v37 = vld [vmem:[%s10671_s16 + $0x368] sm:$0xff]  }
 0x4ce   : > { %v7213_v61 = vsel %vm6562_vm12, %v7212_v57, %v7208_v50  ;;  %v5635_v23 = vpop.xlane.xlu1 %5634  ;;  %v5637_v36 = vpop.xlane.xlu0 %5636  ;;  %v4718_v14 = vunpack.c.l.bf16 %v10272_v37 }
 0x4cf   : > { %v7217_v17 = vrot.slane %v5635_v23, %v11933_v44  ;;  %v7222_v31 = vrot.slane %v5637_v36, %v11957_v46  ;;  %v10271_v23 = vld [vmem:[%s10671_s16 + $0x360] sm:$0xff]   ;;  %v5193_v9 = vmul.f32 %v12582_v59, %v4713_v5 }
 0x4d0   : > { %v4716_v36 = vunpack.c.l.bf16 %v10271_v23 }
 0x4d1   : > { %v7218_v33 = vsel %vm6569_vm13, %v7217_v17, %v7213_v61  ;;  %5778 = vadd.xlane.f32.xlu1 %v5187_v48  ;;  %5780 = vadd.xlane.f32.xlu0 %v5188_v52  ;;  %v4715_v61 = vunpack.c.h.bf16 %v10270_v0  ;;  %v5194_v17 = vmul.f32 %v12582_v59, %v4714_v13 }
 0x4d2   : > { %v7223_v19 = vsel %vm6576_vm14, %v7222_v31, %v7218_v33  ;;  %v5639_v18 = vpop.xlane.xlu1 %5638  ;;  %v5641_v7 = vpop.xlane.xlu0 %5640  ;;  %v5196_v38 = vmul.f32 %v12582_v59, %v4716_v36 }
 0x4d3   : > { %v7227_v29 = vrot.slane %v5639_v18, %v11951_v10  ;;  %v7232_v21 = vrot.slane %v5641_v7, %v11972_v26  ;;  %v5195_v7 = vmul.f32 %v12582_v59, %v4715_v61 }
 0x4d5   : > { %v7228_v42 = vsel %vm6583_vm15, %v7227_v29, %v7223_v19  ;;  %5782 = vadd.xlane.f32.xlu1 %v5189_v54  ;;  %5784 = vadd.xlane.f32.xlu0 %v5190_v58  ;;  %v4717_v19 = vunpack.c.h.bf16 %v10271_v23 }
 0x4d6   : > { %v7233_v24 = vsel %vm6590_vm6, %v7232_v21, %v7228_v42  ;;  %v5643_v49 = vpop.xlane.xlu1 %5642  ;;  %v5645_v39 = vpop.xlane.xlu0 %5644  ;;  %v4719_v42 = vunpack.c.h.bf16 %v10272_v37 }
 0x4d7   : > { %v7237_v63 = vrot.slane %v5643_v49, %v11966_v45  ;;  %v7242_v43 = vrot.slane %v5645_v39, %v11987_v22  ;;  %v5197_v58 = vmul.f32 %v12582_v59, %v4717_v19  ;;  %v4443_v39 = vrot.slane %v12186_v6, 6 }
 0x4d9   : > { %v7238_v57 = vsel %vm6597_vm5, %v7237_v63, %v7233_v24  ;;  %5786 = vadd.xlane.f32.xlu1 %v5191_v60  ;;  %5788 = vadd.xlane.f32.xlu0 %v5192_v28  ;;  %v10273_v24 = vld [vmem:[%s10671_s16 + $0x370] sm:$0xff]   ;;  %v5198_v63 = vmul.f32 %v12582_v59, %v4718_v14  ;;  %v4490_v61 = vmul.f32 %v11799_v41, %v4443_v39 }
 0x4da   : > { %v7243_v25 = vsel %vm13634_vm4, %v7242_v43, %v7238_v57  ;;  %v5647_v8 = vpop.xlane.xlu1 %5646  ;;  %v5649_v50 = vpop.xlane.xlu0 %5648  ;;  %v4720_v49 = vunpack.c.l.bf16 %v10273_v24  ;;  %vm13637_vm4 = vmmov %vm13630_vm1 }
 0x4db   : > { %v7247_v27 = vrot.slane %v5647_v8, %v11981_v2  ;;  %v7252_v4 = vrot.slane %v5649_v50, %v12001_v20  ;;  %v10274_v8 = vld [vmem:[%s10671_s16 + $0x378] sm:$0xff]   ;;  %v12644_v19 = vrot.slane %v4490_v61, %v11815_v15 }
 0x4dc   : > { %v4722_v50 = vunpack.c.l.bf16 %v10274_v8 }
 0x4dd   : > { %v7248_v31 = vsel %vm6611_vm3, %v7247_v27, %v7243_v25  ;;  %5790 = vadd.xlane.f32.xlu1 %v5193_v9  ;;  %5792 = vadd.xlane.f32.xlu0 %v5194_v17  ;;  %v4721_v25 = vunpack.c.h.bf16 %v10273_v24  ;;  %v5199_v27 = vmul.f32 %v12582_v59, %v4719_v42  ;;  %v10276_v24 = vld [vmem:[%s10671_s16 + $0x388] sm:$0xff]  }
 0x4de   : > { %v7253_v48 = vsel %vm13630_vm1, %v7252_v4, %v7248_v31  ;;  %v5651_v52 = vpop.xlane.xlu1 %5650  ;;  %v5653_v33 = vpop.xlane.xlu0 %5652  ;;  %v5200_v4 = vmul.f32 %v12582_v59, %v4720_v49  ;;  %v5202_v37 = vmul.f32 %v12582_v59, %v4722_v50  ;;  %v4726_v49 = vunpack.c.l.bf16 %v10276_v24  ;;  %vm13638_vm1 = vmmov %vm13635_vm0 }
 0x4df   : > { %v7257_v18 = vrot.slane %v5651_v52, %v11996_v55  ;;  %v7262_v5 = vrot.slane %v5653_v33, %v11895_v56  ;;  %v4723_v52 = vunpack.c.h.bf16 %v10274_v8  ;;  %v10275_v33 = vld [vmem:[%s10671_s16 + $0x380] sm:$0xff]  }
 0x4e0   : > { %v4724_v41 = vunpack.c.l.bf16 %v10275_v33  ;;  %v4725_v42 = vunpack.c.h.bf16 %v10275_v33 }
 0x4e1   : > { %v12623_v29 = vsel %vm13635_vm0, %v7257_v18, %v7253_v48  ;;  %5794 = vadd.xlane.f32.xlu1 %v5195_v7  ;;  %5796 = vadd.xlane.f32.xlu0 %v5196_v38  ;;  %v5201_v38 = vmul.f32 %v12582_v59, %v4721_v25  ;;  %v10277_v25 = vld [vmem:[%s10671_s16 + $0x390] sm:$0xff]   ;;  %vm13639_vm0 = vcmask 1041409  }
 0x4e2   : > { %v5655_v21 = vpop.xlane.xlu1 %5654  ;;  %v5657_v54 = vpop.xlane.xlu0 %5656  ;;  %v4728_v8 = vunpack.c.l.bf16 %v10277_v25 }
 0x4e3   : > { %v7266_v0 = vrot.slane %v5655_v21, %v11891_v62  ;;  %v7271_v13 = vrot.slane %v5657_v54, %v11908_v32 }
 0x4e5   : > { %v7267_v43 = vsel %vm6527_vm7, %v7266_v0, %v7262_v5  ;;  %5798 = vadd.xlane.f32.xlu1 %v5197_v58  ;;  %5800 = vadd.xlane.f32.xlu0 %v5198_v63  ;;  %v5203_v0 = vmul.f32 %v12582_v59, %v4723_v52  ;;  %v5205_v59 = vmul.f32 %v12644_v19, %v4725_v42 }
 0x4e6   : > { %v7272_v60 = vsel %vm6534_vm8, %v7271_v13, %v7267_v43  ;;  %v5659_v28 = vpop.xlane.xlu1 %5658  ;;  %v5661_v57 = vpop.xlane.xlu0 %5660  ;;  %v5204_v13 = vmul.f32 %v12644_v19, %v4724_v41 }
 0x4e7   : > { %v7276_v23 = vrot.slane %v5659_v28, %v11902_v51  ;;  %v7281_v36 = vrot.slane %v5661_v57, %v11923_v3  ;;  %v4727_v57 = vunpack.c.h.bf16 %v10276_v24 }
 0x4e9   : > { %v7277_v9 = vsel %vm6541_vm9, %v7276_v23, %v7272_v60  ;;  %5802 = vadd.xlane.f32.xlu1 %v5199_v27  ;;  %5804 = vadd.xlane.f32.xlu0 %v5200_v4  ;;  %v5206_v23 = vmul.f32 %v12644_v19, %v4726_v49  ;;  %v5207_v41 = vmul.f32 %v12644_v19, %v4727_v57 }
 0x4ea   : > { %v7282_v17 = vsel %vm6548_vm10, %v7281_v36, %v7277_v9  ;;  %v5663_v31 = vpop.xlane.xlu1 %5662  ;;  %v5665_v48 = vpop.xlane.xlu0 %5664 }
 0x4eb   : > { %v7286_v18 = vrot.slane %v5663_v31, %v11917_v16  ;;  %v7291_v7 = vrot.slane %v5665_v48, %v11939_v30  ;;  %v10278_v31 = vld [vmem:[%s10671_s16 + $0x398] sm:$0xff]  }
 0x4ec   : > { %v4730_v48 = vunpack.c.l.bf16 %v10278_v31 }
 0x4ed   : > { %v7287_v14 = vsel %vm6555_vm11, %v7286_v18, %v7282_v17  ;;  %5806 = vadd.xlane.f32.xlu1 %v5201_v38  ;;  %5808 = vadd.xlane.f32.xlu0 %v5202_v37  ;;  %v4729_v17 = vunpack.c.h.bf16 %v10277_v25  ;;  %v5208_v18 = vmul.f32 %v12644_v19, %v4728_v8  ;;  %v10280_v25 = vld [vmem:[%s10671_s16 + $0x3a8] sm:$0xff]  }
 0x4ee   : > { %v7292_v21 = vsel %vm6562_vm12, %v7291_v7, %v7287_v14  ;;  %v5667_v54 = vpop.xlane.xlu1 %5666  ;;  %v5669_v58 = vpop.xlane.xlu0 %5668  ;;  %v4734_v8 = vunpack.c.l.bf16 %v10280_v25 }
 0x4ef   : > { %v7296_v39 = vrot.slane %v5667_v54, %v11933_v44  ;;  %v7301_v5 = vrot.slane %v5669_v58, %v11957_v46  ;;  %v10279_v54 = vld [vmem:[%s10671_s16 + $0x3a0] sm:$0xff]   ;;  %v5209_v49 = vmul.f32 %v12644_v19, %v4729_v17  ;;  %v4444_v17 = vrot.slane %v12186_v6, 7 }
 0x4f0   : > { %v4732_v58 = vunpack.c.l.bf16 %v10279_v54 }
 0x4f1   : > { %v7297_v63 = vsel %vm6569_vm13, %v7296_v39, %v7292_v21  ;;  %5810 = vadd.xlane.f32.xlu1 %v5203_v0  ;;  %5812 = vadd.xlane.f32.xlu0 %v5204_v13  ;;  %v4731_v21 = vunpack.c.h.bf16 %v10278_v31  ;;  %v5210_v39 = vmul.f32 %v12644_v19, %v4730_v48 }
 0x4f2   : > { %v7302_v43 = vsel %vm6576_vm14, %v7301_v5, %v7297_v63  ;;  %v5671_v60 = vpop.xlane.xlu1 %5670  ;;  %v5673_v28 = vpop.xlane.xlu0 %5672  ;;  %v5212_v57 = vmul.f32 %v12644_v19, %v4732_v58 }
 0x4f3   : > { %v7306_v50 = vrot.slane %v5671_v60, %v11951_v10  ;;  %v7311_v61 = vrot.slane %v5673_v28, %v11972_v26  ;;  %v5211_v28 = vmul.f32 %v12644_v19, %v4731_v21 }
 0x4f5   : > { %v7307_v36 = vsel %vm6583_vm15, %v7306_v50, %v7302_v43  ;;  %5814 = vadd.xlane.f32.xlu1 %v5205_v59  ;;  %5816 = vadd.xlane.f32.xlu0 %v5206_v23  ;;  %v4733_v43 = vunpack.c.h.bf16 %v10279_v54 }
 0x4f6   : > { %v7312_v27 = vsel %vm6590_vm6, %v7311_v61, %v7307_v36  ;;  %v5675_v4 = vpop.xlane.xlu1 %5674  ;;  %v5677_v9 = vpop.xlane.xlu0 %5676  ;;  %v4735_v61 = vunpack.c.h.bf16 %v10280_v25 }
 0x4f7   : > { %v7316_v52 = vrot.slane %v5675_v4, %v11966_v45  ;;  %v7321_v33 = vrot.slane %v5677_v9, %v11987_v22  ;;  %v10281_v4 = vld [vmem:[%s10671_s16 + $0x3b0] sm:$0xff]  }
 0x4f8   : > { %v4736_v9 = vunpack.c.l.bf16 %v10281_v4  ;;  %v5215_v58 = vmul.f32 %v12644_v19, %v4735_v61 }
 0x4f9   : > { %v7317_v7 = vsel %vm6597_vm5, %v7316_v52, %v7312_v27  ;;  %5818 = vadd.xlane.f32.xlu1 %v5207_v41  ;;  %5820 = vadd.xlane.f32.xlu0 %v5208_v18  ;;  %v5213_v27 = vmul.f32 %v12644_v19, %v4733_v43 }
 0x4fa   : > { %v7322_v38 = vsel %vm13636_vm2, %v7321_v33, %v7317_v7  ;;  %v5679_v37 = vpop.xlane.xlu1 %5678  ;;  %v5681_v14 = vpop.xlane.xlu0 %5680  ;;  %v5214_v33 = vmul.f32 %v12644_v19, %v4734_v8 }
 0x4fb   : > { %v7326_v42 = vrot.slane %v5679_v37, %v11981_v2  ;;  %v7331_v24 = vrot.slane %v5681_v14, %v12001_v20  ;;  %v10282_v37 = vld [vmem:[%s10671_s16 + $0x3b8] sm:$0xff]   ;;  %v4491_v14 = vmul.f32 %v11803_v53, %v4444_v17 }
 0x4fc   : > { %v4738_v6 = vunpack.c.l.bf16 %v10282_v37  ;;  %v4739_v53 = vunpack.c.h.bf16 %v10282_v37 }
 0x4fd   : > { %v7327_v5 = vsel %vm6611_vm3, %v7326_v42, %v7322_v38  ;;  %5822 = vadd.xlane.f32.xlu1 %v5209_v49  ;;  %5824 = vadd.xlane.f32.xlu0 %v5210_v39  ;;  %v4737_v38 = vunpack.c.h.bf16 %v10281_v4  ;;  %v5216_v42 = vmul.f32 %v12644_v19, %v4736_v9 }
 0x4fe   : > { %v7332_v0 = vsel %vm13637_vm4, %v7331_v24, %v7327_v5  ;;  %v5683_v13 = vpop.xlane.xlu1 %5682  ;;  %v5685_v63 = vpop.xlane.xlu0 %5684  ;;  %v5219_v17 = vmul.f32 %v12644_v19, %v4739_v53 }
 0x4ff   : > { %v7336_v60 = vrot.slane %v5683_v13, %v11996_v55  ;;  %v7341_v31 = vrot.slane %v5685_v63, %v11895_v56  ;;  %v10283_v13 = vld [vmem:[%s10671_s16 + $0x3c0] sm:$0xff]  }
 0x500   : > { %v4740_v63 = vunpack.c.l.bf16 %v10283_v13 }
 0x501   : > { %v7337_v50 = vsel %vm13638_vm1, %v7336_v60, %v7332_v0  ;;  %5826 = vadd.xlane.f32.xlu1 %v5211_v28  ;;  %5828 = vadd.xlane.f32.xlu0 %v5212_v57  ;;  %v5217_v0 = vmul.f32 %v12644_v19, %v4737_v38  ;;  %v5218_v28 = vmul.f32 %v12644_v19, %v4738_v6 }
 0x502   : > { %v12687_v59 = vsel %vm13639_vm0, %v7337_v50, %v12623_v29  ;;  %v5687_v23 = vpop.xlane.xlu1 %5686  ;;  %v5689_v36 = vpop.xlane.xlu0 %5688  ;;  %v12712_v57 = vrot.slane %v4491_v14, %v11815_v15  ;;  %vm13640_vm0 = vcmask 1042434  }
 0x503   : > { %v7345_v48 = vrot.slane %v5687_v23, %v11891_v62  ;;  %v7350_v52 = vrot.slane %v5689_v36, %v11908_v32  ;;  %v4741_v23 = vunpack.c.h.bf16 %v10283_v13  ;;  %v10284_v36 = vld [vmem:[%s10671_s16 + $0x3c8] sm:$0xff]  }
 0x505   : > { %v7346_v29 = vsel %vm6527_vm7, %v7345_v48, %v7341_v31  ;;  %5830 = vadd.xlane.f32.xlu1 %v5213_v27  ;;  %5832 = vadd.xlane.f32.xlu0 %v5214_v33  ;;  %v4742_v27 = vunpack.c.l.bf16 %v10284_v36  ;;  %v5220_v31 = vmul.f32 %v12712_v57, %v4740_v63  ;;  %v5221_v19 = vmul.f32 %v12712_v57, %v4741_v23 }
 0x506   : > { %v7351_v41 = vsel %vm6534_vm8, %v7350_v52, %v7346_v29  ;;  %v5691_v18 = vpop.xlane.xlu1 %5690  ;;  %v5693_v7 = vpop.xlane.xlu0 %5692 }
 0x507   : > { %v7355_v21 = vrot.slane %v5691_v18, %v11902_v51  ;;  %v7360_v54 = vrot.slane %v5693_v7, %v11923_v3  ;;  %v10285_v18 = vld [vmem:[%s10671_s16 + $0x3d0] sm:$0xff]   ;;  %v5222_v6 = vmul.f32 %v12712_v57, %v4742_v27 }
 0x508   : > { %v4744_v7 = vunpack.c.l.bf16 %v10285_v18 }
 0x509   : > { %v7356_v24 = vsel %vm6541_vm9, %v7355_v21, %v7351_v41  ;;  %5834 = vadd.xlane.f32.xlu1 %v5215_v58  ;;  %5836 = vadd.xlane.f32.xlu0 %v5216_v42  ;;  %v4743_v41 = vunpack.c.h.bf16 %v10284_v36  ;;  %v4745_v42 = vunpack.c.h.bf16 %v10285_v18 }
 0x50a   : > { %v7361_v49 = vsel %vm6548_vm10, %v7360_v54, %v7356_v24  ;;  %v5695_v39 = vpop.xlane.xlu1 %5694  ;;  %v5697_v5 = vpop.xlane.xlu0 %5696  ;;  %v10286_v24 = vld [vmem:[%s10671_s16 + $0x3d8] sm:$0xff]   ;;  %v5224_v53 = vmul.f32 %v12712_v57, %v4744_v7 }
 0x50b   : > { %v7365_v43 = vrot.slane %v5695_v39, %v11917_v16  ;;  %v7370_v60 = vrot.slane %v5697_v5, %v11939_v30  ;;  %v5225_v23 = vmul.f32 %v12712_v57, %v4745_v42 }
 0x50d   : > { %v7366_v25 = vsel %vm6555_vm11, %v7365_v43, %v7361_v49  ;;  %5838 = vadd.xlane.f32.xlu1 %v5217_v0  ;;  %5840 = vadd.xlane.f32.xlu0 %v5218_v28  ;;  %v4746_v49 = vunpack.c.l.bf16 %v10286_v24  ;;  %v5223_v0 = vmul.f32 %v12712_v57, %v4743_v41  ;;  %v4747_v28 = vunpack.c.h.bf16 %v10286_v24  ;;  %v12760_v24 = vpop.eup %10153 }
 0x50e   : > { %v7371_v8 = vsel %vm6562_vm12, %v7370_v60, %v7366_v25  ;;  %v5699_v50 = vpop.xlane.xlu1 %5698  ;;  %v5701_v61 = vpop.xlane.xlu0 %5700  ;;  %v10287_v25 = vld [vmem:[%s10671_s16 + $0x3e0] sm:$0xff]  }
 0x50f   : > { %v7375_v4 = vrot.slane %v5699_v50, %v11933_v44  ;;  %v7380_v9 = vrot.slane %v5701_v61, %v11957_v46  ;;  %v5226_v36 = vmul.f32 %v12712_v57, %v4746_v49 }
 0x511   : > { %v7376_v48 = vsel %vm6569_vm13, %v7375_v4, %v7371_v8  ;;  %5842 = vadd.xlane.f32.xlu1 %v5219_v17  ;;  %5844 = vadd.xlane.f32.xlu0 %v5220_v31  ;;  %v4748_v8 = vunpack.c.l.bf16 %v10287_v25  ;;  %v4749_v17 = vunpack.c.h.bf16 %v10287_v25  ;;  %v4492_v25 = vmul.f32 %v12760_v24, %v12159_v47 }
 0x512   : > { %v7381_v52 = vsel %vm6576_vm14, %v7380_v9, %v7376_v48  ;;  %v5703_v33 = vpop.xlane.xlu1 %5702  ;;  %v5705_v29 = vpop.xlane.xlu0 %5704  ;;  %v5227_v48 = vmul.f32 %v12712_v57, %v4747_v28 }
 0x513   : > { %v7385_v38 = vrot.slane %v5703_v33, %v11951_v10  ;;  %v7390_v37 = vrot.slane %v5705_v29, %v11972_v26  ;;  %v10288_v33 = vld [vmem:[%s10671_s16 + $0x3e8] sm:$0xff]  }
 0x514   : > { %v4750_v29 = vunpack.c.l.bf16 %v10288_v33 }
 0x515   : > { %v7386_v14 = vsel %vm6583_vm15, %v7385_v38, %v7381_v52  ;;  %5846 = vadd.xlane.f32.xlu1 %v5221_v19  ;;  %5848 = vadd.xlane.f32.xlu0 %v5222_v6  ;;  %v5228_v52 = vmul.f32 %v12712_v57, %v4748_v8  ;;  %v4751_v19 = vunpack.c.h.bf16 %v10288_v33  ;;  %v10289_v6 = vld [vmem:[%s10671_s16 + $0x3f0] sm:$0xff]  }
 0x516   : > { %v7391_v21 = vsel %vm6590_vm6, %v7390_v37, %v7386_v14  ;;  %v5707_v54 = vpop.xlane.xlu1 %5706  ;;  %v5709_v58 = vpop.xlane.xlu0 %5708  ;;  %v5229_v37 = vmul.f32 %v12712_v57, %v4749_v17  ;;  %v4752_v14 = vunpack.c.l.bf16 %v10289_v6  ;;  %v5230_v42 = vmul.f32 %v12712_v57, %v4750_v29  ;;  %v10291_v17 = vld [vmem:[%s10671_s16 + $0x400] sm:$0xff]  }
 0x517   : > { %v7395_v39 = vrot.slane %v5707_v54, %v11966_v45  ;;  %v7400_v5 = vrot.slane %v5709_v58, %v11987_v22  ;;  %v4756_v47 = vunpack.c.l.bf16 %v10291_v17 }
 0x518   : > { %v5232_v28 = vmul.f32 %v12712_v57, %v4752_v14 }
 0x519   : > { %v7396_v13 = vsel %vm6597_vm5, %v7395_v39, %v7391_v21  ;;  %5850 = vadd.xlane.f32.xlu1 %v5223_v0  ;;  %5852 = vadd.xlane.f32.xlu0 %v5224_v53  ;;  %v5231_v0 = vmul.f32 %v12712_v57, %v4751_v19  ;;  %v4753_v53 = vunpack.c.h.bf16 %v10289_v6  ;;  %v10292_v6 = vld [vmem:[%s10671_s16 + $0x408] sm:$0xff]  }
 0x51a   : > { %v7401_v63 = vsel %vm13636_vm2, %v7400_v5, %v7396_v13  ;;  %v5711_v43 = vpop.xlane.xlu1 %5710  ;;  %v5713_v60 = vpop.xlane.xlu0 %5712  ;;  %v10290_v13 = vld [vmem:[%s10671_s16 + $0x3f8] sm:$0xff]   ;;  %v4758_v14 = vunpack.c.l.bf16 %v10292_v6 }
 0x51b   : > { %v7405_v50 = vrot.slane %v5711_v43, %v11981_v2  ;;  %v7410_v61 = vrot.slane %v5713_v60, %v12001_v20 }
 0x51d   : > { %v7406_v27 = vsel %vm6611_vm3, %v7405_v50, %v7401_v63  ;;  %5854 = vadd.xlane.f32.xlu1 %v5225_v23  ;;  %5856 = vadd.xlane.f32.xlu0 %v5226_v36  ;;  %v4754_v63 = vunpack.c.l.bf16 %v10290_v13  ;;  %v5233_v36 = vmul.f32 %v12712_v57, %v4753_v53 }
 0x51e   : > { %v7411_v11 = vsel %vm13637_vm4, %v7410_v61, %v7406_v27  ;;  %v5715_v4 = vpop.xlane.xlu1 %5714  ;;  %v5717_v9 = vpop.xlane.xlu0 %5716 }
 0x51f   : > { %v7415_v31 = vrot.slane %v5715_v4, %v11996_v55  ;;  %v7420_v21 = vrot.slane %v5717_v9, %v11895_v56  ;;  %v5234_v27 = vmul.f32 %v12712_v57, %v4754_v63 }
 0x521   : > { %v7416_v41 = vsel %vm13638_vm1, %v7415_v31, %v7411_v11  ;;  %5858 = vadd.xlane.f32.xlu1 %v5227_v48  ;;  %5860 = vadd.xlane.f32.xlu0 %v5228_v52  ;;  %v4755_v11 = vunpack.c.h.bf16 %v10290_v13  ;;  %v12779_v31 = vrot.slane %v4492_v25, %v11815_v15  ;;  %v10294_v25 = vld [vmem:[%s10671_s16 + $0x418] sm:$0xff]  }
 0x522   : > { %v12752_v18 = vsel %vm13640_vm0, %v7416_v41, %v12687_v59  ;;  %v5719_v7 = vpop.xlane.xlu1 %5718  ;;  %v5721_v38 = vpop.xlane.xlu0 %5720  ;;  %vm13641_vm0 = vcmask 1043459  }
 0x523   : > { %v7424_v54 = vrot.slane %v5719_v7, %v11891_v62  ;;  %v7429_v58 = vrot.slane %v5721_v38, %v11908_v32  ;;  %v5235_v41 = vmul.f32 %v12712_v57, %v4755_v11  ;;  %v4757_v7 = vunpack.c.h.bf16 %v10291_v17  ;;  %v10293_v57 = vld [vmem:[%s10671_s16 + $0x410] sm:$0xff]  }
 0x524   : > { %v5236_v19 = vmul.f32 %v12779_v31, %v4756_v47  ;;  %v5238_v53 = vmul.f32 %v12779_v31, %v4758_v14  ;;  %v4763_v17 = vunpack.c.h.bf16 %v10294_v25  ;;  %v10295_v47 = vld [vmem:[%s10671_s16 + $0x420] sm:$0xff]  }
 0x525   : > { %v7425_v59 = vsel %vm6527_vm7, %v7424_v54, %v7420_v21  ;;  %5862 = vadd.xlane.f32.xlu1 %v5229_v37  ;;  %5864 = vadd.xlane.f32.xlu0 %v5230_v42 }
 0x526   : > { %v7430_v49 = vsel %vm6534_vm8, %v7429_v58, %v7425_v59  ;;  %v5723_v39 = vpop.xlane.xlu1 %5722  ;;  %v5725_v5 = vpop.xlane.xlu0 %5724  ;;  %v4759_v59 = vunpack.c.h.bf16 %v10292_v6  ;;  %v4765_v6 = vunpack.c.h.bf16 %v10295_v47 }
 0x527   : > { %v7434_v43 = vrot.slane %v5723_v39, %v11902_v51  ;;  %v7439_v60 = vrot.slane %v5725_v5, %v11923_v3 }
 0x529   : > { %v7435_v8 = vsel %vm6541_vm9, %v7434_v43, %v7430_v49  ;;  %5866 = vadd.xlane.f32.xlu1 %v5231_v0  ;;  %5868 = vadd.xlane.f32.xlu0 %v5232_v28  ;;  %v4760_v49 = vunpack.c.l.bf16 %v10293_v57  ;;  %v5237_v0 = vmul.f32 %v12779_v31, %v4757_v7  ;;  %v4761_v28 = vunpack.c.h.bf16 %v10293_v57 }
 0x52a   : > { %v7440_v50 = vsel %vm6548_vm10, %v7439_v60, %v7435_v8  ;;  %v5727_v61 = vpop.xlane.xlu1 %5726  ;;  %v5729_v23 = vpop.xlane.xlu0 %5728  ;;  %v4762_v8 = vunpack.c.l.bf16 %v10294_v25 }
 0x52b   : > { %v7444_v4 = vrot.slane %v5727_v61, %v11917_v16  ;;  %v7449_v9 = vrot.slane %v5729_v23, %v11939_v30  ;;  %v5239_v23 = vmul.f32 %v12779_v31, %v4759_v59 }
 0x52d   : > { %v7445_v48 = vsel %vm6555_vm11, %v7444_v4, %v7440_v50  ;;  %5870 = vadd.xlane.f32.xlu1 %v5233_v36  ;;  %5872 = vadd.xlane.f32.xlu0 %v5234_v27  ;;  %v5240_v36 = vmul.f32 %v12779_v31, %v4760_v49 }
 0x52e   : > { %v7450_v52 = vsel %vm6562_vm12, %v7449_v9, %v7445_v48  ;;  %v5731_v33 = vpop.xlane.xlu1 %5730  ;;  %v5733_v29 = vpop.xlane.xlu0 %5732  ;;  %v4764_v48 = vunpack.c.l.bf16 %v10295_v47 }
 0x52f   : > { %v7454_v38 = vrot.slane %v5731_v33, %v11933_v44  ;;  %v7459_v37 = vrot.slane %v5733_v29, %v11957_v46  ;;  %v5241_v29 = vmul.f32 %v12779_v31, %v4761_v28 }
 0x531   : > { %v7455_v21 = vsel %vm6569_vm13, %v7454_v38, %v7450_v52  ;;  %5874 = vadd.xlane.f32.xlu1 %v5235_v41  ;;  %5876 = vadd.xlane.f32.xlu0 %v5236_v19  ;;  %v5242_v41 = vmul.f32 %v12779_v31, %v4762_v8 }
 0x532   : > { %v7460_v54 = vsel %vm6576_vm14, %v7459_v37, %v7455_v21  ;;  %v5735_v58 = vpop.xlane.xlu1 %5734  ;;  %v5737_v42 = vpop.xlane.xlu0 %5736  ;;  %v5243_v21 = vmul.f32 %v12779_v31, %v4763_v17 }
 0x533   : > { %v7464_v39 = vrot.slane %v5735_v58, %v11951_v10  ;;  %v7469_v5 = vrot.slane %v5737_v42, %v11972_v26  ;;  %v10296_v58 = vld [vmem:[%s10671_s16 + $0x428] sm:$0xff]  }
 0x534   : > { %v4766_v42 = vunpack.c.l.bf16 %v10296_v58  ;;  %v4767_v57 = vunpack.c.h.bf16 %v10296_v58 }
 0x535   : > { %v7465_v13 = vsel %vm6583_vm15, %v7464_v39, %v7460_v54  ;;  %5878 = vadd.xlane.f32.xlu1 %v5237_v0  ;;  %5880 = vadd.xlane.f32.xlu0 %v5238_v53  ;;  %v5244_v54 = vmul.f32 %v12779_v31, %v4764_v48  ;;  %v5245_v0 = vmul.f32 %v12779_v31, %v4765_v6  ;;  %v10297_v53 = vld [vmem:[%s10671_s16 + $0x430] sm:$0xff]  }
 0x536   : > { %v7470_v63 = vsel %vm6590_vm6, %v7469_v5, %v7465_v13  ;;  %v5739_v43 = vpop.xlane.xlu1 %5738  ;;  %v5741_v60 = vpop.xlane.xlu0 %5740  ;;  %v4768_v13 = vunpack.c.l.bf16 %v10297_v53  ;;  %v5246_v25 = vmul.f32 %v12779_v31, %v4766_v42  ;;  %v5247_v17 = vmul.f32 %v12779_v31, %v4767_v57  ;;  %v10300_v57 = vld [vmem:[%s10671_s16 + $0x448] sm:$0xff]  }
 0x537   : > { %v7474_v50 = vrot.slane %v5739_v43, %v11966_v45  ;;  %v7479_v61 = vrot.slane %v5741_v60, %v11987_v22 }
 0x538   : > { %v5248_v47 = vmul.f32 %v12779_v31, %v4768_v13 }
 0x539   : > { %v7475_v27 = vsel %vm6597_vm5, %v7474_v50, %v7470_v63  ;;  %5882 = vadd.xlane.f32.xlu1 %v5239_v23  ;;  %5884 = vadd.xlane.f32.xlu0 %v5240_v36  ;;  %v4445_v63 = vrot.slane %v12760_v24, 1  ;;  %v4769_v23 = vunpack.c.h.bf16 %v10297_v53  ;;  %v10298_v36 = vld [vmem:[%s10671_s16 + $0x438] sm:$0xff]  }
 0x53a   : > { %v7480_v11 = vsel %vm13636_vm2, %v7479_v61, %v7475_v27  ;;  %v5743_v4 = vpop.xlane.xlu1 %5742  ;;  %v5745_v9 = vpop.xlane.xlu0 %5744  ;;  %v4770_v27 = vunpack.c.l.bf16 %v10298_v36 }
 0x53b   : > { %v7484_v52 = vrot.slane %v5743_v4, %v11981_v2  ;;  %v7489_v33 = vrot.slane %v5745_v9, %v12001_v20 }
 0x53c   : > { %v5250_v6 = vmul.f32 %v12779_v31, %v4770_v27 }
 0x53d   : > { %v7485_v7 = vsel %vm6611_vm3, %v7484_v52, %v7480_v11  ;;  %5886 = vadd.xlane.f32.xlu1 %v5241_v29  ;;  %5888 = vadd.xlane.f32.xlu0 %v5242_v41  ;;  %v4493_v11 = vmul.f32 %v12141_v12, %v4445_v63  ;;  %v5249_v41 = vmul.f32 %v12779_v31, %v4769_v23  ;;  %v4771_v12 = vunpack.c.h.bf16 %v10298_v36 }
 0x53e   : > { %v7490_v38 = vsel %vm13637_vm4, %v7489_v33, %v7485_v7  ;;  %v5747_v37 = vpop.xlane.xlu1 %5746  ;;  %v5749_v19 = vpop.xlane.xlu0 %5748  ;;  %v10299_v7 = vld [vmem:[%s10671_s16 + $0x440] sm:$0xff]  }
 0x53f   : > { %v7494_v14 = vrot.slane %v5747_v37, %v11996_v55  ;;  %v7499_v43 = vrot.slane %v5749_v19, %v11895_v56  ;;  %v5251_v53 = vmul.f32 %v12779_v31, %v4771_v12 }
 0x541   : > { %v7495_v59 = vsel %vm13638_vm1, %v7494_v14, %v7490_v38  ;;  %5890 = vadd.xlane.f32.xlu1 %v5243_v21  ;;  %5892 = vadd.xlane.f32.xlu0 %v5244_v54  ;;  %v4772_v38 = vunpack.c.l.bf16 %v10299_v7  ;;  %v12843_v14 = vrot.slane %v4493_v11, %v11815_v15 }
 0x542   : > { %v12818_v49 = vsel %vm13641_vm0, %v7495_v59, %v12752_v18  ;;  %v5751_v39 = vpop.xlane.xlu1 %5750  ;;  %v5753_v5 = vpop.xlane.xlu0 %5752  ;;  %v4773_v59 = vunpack.c.h.bf16 %v10299_v7  ;;  %vm13642_vm0 = vcmask 1044484  }
 0x543   : > { %v7503_v60 = vrot.slane %v5751_v39, %v11891_v62  ;;  %v7508_v28 = vrot.slane %v5753_v5, %v11908_v32  ;;  %v4774_v39 = vunpack.c.l.bf16 %v10300_v57  ;;  %v5252_v13 = vmul.f32 %v12843_v14, %v4772_v38 }
 0x544   : > { %v5253_v31 = vmul.f32 %v12843_v14, %v4773_v59 }
 0x545   : > { %v7504_v18 = vsel %vm6527_vm7, %v7503_v60, %v7499_v43  ;;  %5894 = vadd.xlane.f32.xlu1 %v5245_v0  ;;  %5896 = vadd.xlane.f32.xlu0 %v5246_v25  ;;  %v4775_v25 = vunpack.c.h.bf16 %v10300_v57  ;;  %v5254_v23 = vmul.f32 %v12843_v14, %v4774_v39 }
 0x546   : > { %v7509_v8 = vsel %vm6534_vm8, %v7508_v28, %v7504_v18  ;;  %v5755_v50 = vpop.xlane.xlu1 %5754  ;;  %v5757_v61 = vpop.xlane.xlu0 %5756  ;;  %v10301_v18 = vld [vmem:[%s10671_s16 + $0x450] sm:$0xff]  }
 0x547   : > { %v7513_v4 = vrot.slane %v5755_v50, %v11902_v51  ;;  %v7518_v9 = vrot.slane %v5757_v61, %v11923_v3 }
 0x549   : > { %v7514_v48 = vsel %vm6541_vm9, %v7513_v4, %v7509_v8  ;;  %5898 = vadd.xlane.f32.xlu1 %v5247_v17  ;;  %5900 = vadd.xlane.f32.xlu0 %v5248_v47  ;;  %v4776_v8 = vunpack.c.l.bf16 %v10301_v18  ;;  %v10302_v17 = vld [vmem:[%s10671_s16 + $0x458] sm:$0xff]  }
 0x54a   : > { %v7519_v52 = vsel %vm6548_vm10, %v7518_v9, %v7514_v48  ;;  %v5759_v33 = vpop.xlane.xlu1 %5758  ;;  %v5761_v29 = vpop.xlane.xlu0 %5760  ;;  %v4777_v9 = vunpack.c.h.bf16 %v10301_v18  ;;  %v4778_v47 = vunpack.c.l.bf16 %v10302_v17 }
 0x54b   : > { %v7523_v37 = vrot.slane %v5759_v33, %v11917_v16  ;;  %v7528_v19 = vrot.slane %v5761_v29, %v11939_v30  ;;  %v5255_v33 = vmul.f32 %v12843_v14, %v4775_v25  ;;  %v5256_v29 = vmul.f32 %v12843_v14, %v4776_v8 }
 0x54d   : > { %v7524_v21 = vsel %vm6555_vm11, %v7523_v37, %v7519_v52  ;;  %5902 = vadd.xlane.f32.xlu1 %v5249_v41  ;;  %5904 = vadd.xlane.f32.xlu0 %v5250_v6  ;;  %v4779_v37 = vunpack.c.h.bf16 %v10302_v17 }
 0x54e   : > { %v7529_v54 = vsel %vm6562_vm12, %v7528_v19, %v7524_v21  ;;  %v5763_v58 = vpop.xlane.xlu1 %5762  ;;  %v5765_v42 = vpop.xlane.xlu0 %5764  ;;  %v10303_v19 = vld [vmem:[%s10671_s16 + $0x460] sm:$0xff]  }
 0x54f   : > { %v7533_v5 = vrot.slane %v5763_v58, %v11933_v44  ;;  %v7538_v0 = vrot.slane %v5765_v42, %v11957_v46  ;;  %v4780_v6 = vunpack.c.l.bf16 %v10303_v19  ;;  %v5257_v58 = vmul.f32 %v12843_v14, %v4777_v9 }
 0x550   : > { %v5258_v42 = vmul.f32 %v12843_v14, %v4778_v47 }
 0x551   : > { %v7534_v63 = vsel %vm6569_vm13, %v7533_v5, %v7529_v54  ;;  %5906 = vadd.xlane.f32.xlu1 %v5251_v53  ;;  %5908 = vadd.xlane.f32.xlu0 %v5252_v13  ;;  %v5259_v13 = vmul.f32 %v12843_v14, %v4779_v37 }
 0x552   : > { %v7539_v43 = vsel %vm6576_vm14, %v7538_v0, %v7534_v63  ;;  %v5767_v60 = vpop.xlane.xlu1 %5766  ;;  %v5769_v28 = vpop.xlane.xlu0 %5768  ;;  %v4781_v0 = vunpack.c.h.bf16 %v10303_v19  ;;  %v5260_v63 = vmul.f32 %v12843_v14, %v4780_v6 }
 0x553   : > { %v7543_v50 = vrot.slane %v5767_v60, %v11951_v10  ;;  %v7548_v61 = vrot.slane %v5769_v28, %v11972_v26 }
 0x555   : > { %v7544_v36 = vsel %vm6583_vm15, %v7543_v50, %v7539_v43  ;;  %5910 = vadd.xlane.f32.xlu1 %v5253_v31  ;;  %5912 = vadd.xlane.f32.xlu0 %v5254_v23  ;;  %v10304_v43 = vld [vmem:[%s10671_s16 + $0x468] sm:$0xff]   ;;  %v10305_v31 = vld [vmem:[%s10671_s16 + $0x470] sm:$0xff]  }
 0x556   : > { %v7549_v27 = vsel %vm6590_vm6, %v7548_v61, %v7544_v36  ;;  %v5771_v11 = vpop.xlane.xlu1 %5770  ;;  %v5773_v4 = vpop.xlane.xlu0 %5772  ;;  %v4782_v60 = vunpack.c.l.bf16 %v10304_v43  ;;  %v4783_v25 = vunpack.c.h.bf16 %v10304_v43  ;;  %v5261_v61 = vmul.f32 %v12843_v14, %v4781_v0 }
 0x557   : > { %v7553_v48 = vrot.slane %v5771_v11, %v11966_v45  ;;  %v7558_v52 = vrot.slane %v5773_v4, %v11987_v22  ;;  %v4784_v23 = vunpack.c.l.bf16 %v10305_v31  ;;  %v4446_v36 = vrot.slane %v12760_v24, 2 }
 0x558   : > { %v5262_v9 = vmul.f32 %v12843_v14, %v4782_v60 }
 0x559   : > { %v7554_v41 = vsel %vm6597_vm5, %v7553_v48, %v7549_v27  ;;  %5914 = vadd.xlane.f32.xlu1 %v5255_v33  ;;  %5916 = vadd.xlane.f32.xlu0 %v5256_v29  ;;  %v10306_v33 = vld [vmem:[%s10671_s16 + $0x478] sm:$0xff]   ;;  %v5264_v37 = vmul.f32 %v12843_v14, %v4784_v23 }
 0x55a   : > { %v7559_v12 = vsel %vm13636_vm2, %v7558_v52, %v7554_v41  ;;  %v5775_v7 = vpop.xlane.xlu1 %5774  ;;  %v5777_v38 = vpop.xlane.xlu0 %5776  ;;  %v4785_v52 = vunpack.c.h.bf16 %v10305_v31  ;;  %v4786_v29 = vunpack.c.l.bf16 %v10306_v33  ;;  %v4494_v41 = vmul.f32 %v12150_v40, %v4446_v36 }
 0x55b   : > { %v7563_v21 = vrot.slane %v5775_v7, %v11981_v2  ;;  %v7568_v54 = vrot.slane %v5777_v38, %v12001_v20  ;;  %v5263_v38 = vmul.f32 %v12843_v14, %v4783_v25 }
 0x55c   : > { %v5266_v0 = vmul.f32 %v12843_v14, %v4786_v29 }
 0x55d   : > { %v7564_v59 = vsel %vm6611_vm3, %v7563_v21, %v7559_v12  ;;  %5918 = vadd.xlane.f32.xlu1 %v5257_v58  ;;  %5920 = vadd.xlane.f32.xlu0 %v5258_v42  ;;  %v4787_v58 = vunpack.c.h.bf16 %v10306_v33  ;;  %v10307_v42 = vld [vmem:[%s10671_s16 + $0x480] sm:$0xff]  }
 0x55e   : > { %v7569_v57 = vsel %vm13637_vm4, %v7568_v54, %v7564_v59  ;;  %v5779_v39 = vpop.xlane.xlu1 %5778  ;;  %v5781_v5 = vpop.xlane.xlu0 %5780  ;;  %v4788_v40 = vunpack.c.l.bf16 %v10307_v42  ;;  %v12903_v59 = vrot.slane %v4494_v41, %v11815_v15  ;;  %v4789_v60 = vunpack.c.h.bf16 %v10307_v42 }
 0x55f   : > { %v7573_v53 = vrot.slane %v5779_v39, %v11996_v55  ;;  %v7578_v27 = vrot.slane %v5781_v5, %v11895_v56  ;;  %v5265_v5 = vmul.f32 %v12843_v14, %v4785_v52 }
 0x560   : > { %v5268_v31 = vmul.f32 %v12903_v59, %v4788_v40 }
 0x561   : > { %v7574_v28 = vsel %vm13638_vm1, %v7573_v53, %v7569_v57  ;;  %5922 = vadd.xlane.f32.xlu1 %v5259_v13  ;;  %5924 = vadd.xlane.f32.xlu0 %v5260_v63 }
 0x562   : > { %v12882_v18 = vsel %vm13642_vm0, %v7574_v28, %v12818_v49  ;;  %v5783_v8 = vpop.xlane.xlu1 %5782  ;;  %v5785_v50 = vpop.xlane.xlu0 %5784  ;;  %v10308_v28 = vld [vmem:[%s10671_s16 + $0x488] sm:$0xff]   ;;  %vm13643_vm0 = vcmask 1045509  }
 0x563   : > { %v7582_v11 = vrot.slane %v5783_v8, %v11891_v62  ;;  %v7587_v4 = vrot.slane %v5785_v50, %v11908_v32  ;;  %v4790_v25 = vunpack.c.l.bf16 %v10308_v28 }
 0x565   : > { %v7583_v49 = vsel %vm6527_vm7, %v7582_v11, %v7578_v27  ;;  %5926 = vadd.xlane.f32.xlu1 %v5261_v61  ;;  %5928 = vadd.xlane.f32.xlu0 %v5262_v9  ;;  %v5267_v61 = vmul.f32 %v12843_v14, %v4787_v58  ;;  %v10309_v9 = vld [vmem:[%s10671_s16 + $0x490] sm:$0xff]   ;;  %v5269_v14 = vmul.f32 %v12903_v59, %v4789_v60 }
 0x566   : > { %v7588_v17 = vsel %vm6534_vm8, %v7587_v4, %v7583_v49  ;;  %v5787_v47 = vpop.xlane.xlu1 %5786  ;;  %v5789_v48 = vpop.xlane.xlu0 %5788  ;;  %v4791_v4 = vunpack.c.h.bf16 %v10308_v28  ;;  %v4792_v49 = vunpack.c.l.bf16 %v10309_v9 }
 0x567   : > { %v7592_v12 = vrot.slane %v5787_v47, %v11902_v51  ;;  %v7597_v7 = vrot.slane %v5789_v48, %v11923_v3  ;;  %v5270_v48 = vmul.f32 %v12903_v59, %v4790_v25 }
 0x569   : > { %v7593_v19 = vsel %vm6541_vm9, %v7592_v12, %v7588_v17  ;;  %5930 = vadd.xlane.f32.xlu1 %v5263_v38  ;;  %5932 = vadd.xlane.f32.xlu0 %v5264_v37  ;;  %v4793_v12 = vunpack.c.h.bf16 %v10309_v9 }
 0x56a   : > { %v7598_v6 = vsel %vm6548_vm10, %v7597_v7, %v7593_v19  ;;  %v5791_v21 = vpop.xlane.xlu1 %5790  ;;  %v5793_v54 = vpop.xlane.xlu0 %5792  ;;  %v10310_v7 = vld [vmem:[%s10671_s16 + $0x498] sm:$0xff]  }
 0x56b   : > { %v7602_v57 = vrot.slane %v5791_v21, %v11917_v16  ;;  %v7607_v39 = vrot.slane %v5793_v54, %v11939_v30  ;;  %v4794_v38 = vunpack.c.l.bf16 %v10310_v7  ;;  %v5272_v21 = vmul.f32 %v12903_v59, %v4792_v49 }
 0x56d   : > { %v7603_v53 = vsel %vm6555_vm11, %v7602_v57, %v7598_v6  ;;  %5934 = vadd.xlane.f32.xlu1 %v5265_v5  ;;  %5936 = vadd.xlane.f32.xlu0 %v5266_v0  ;;  %v5271_v6 = vmul.f32 %v12903_v59, %v4791_v4  ;;  %v4795_v57 = vunpack.c.h.bf16 %v10310_v7  ;;  %v5273_v5 = vmul.f32 %v12903_v59, %v4793_v12  ;;  %v10314_v7 = vld [vmem:[%s10671_s16 + $0x4b8] sm:$0xff]  }
 0x56e   : > { %v7608_v13 = vsel %vm6562_vm12, %v7607_v39, %v7603_v53  ;;  %v5795_v63 = vpop.xlane.xlu1 %5794  ;;  %v5797_v43 = vpop.xlane.xlu0 %5796  ;;  %v5274_v0 = vmul.f32 %v12903_v59, %v4794_v38  ;;  %v10311_v53 = vld [vmem:[%s10671_s16 + $0x4a0] sm:$0xff]   ;;  %v4802_v38 = vunpack.c.l.bf16 %v10314_v7 }
 0x56f   : > { %v7612_v8 = vrot.slane %v5795_v63, %v11933_v44  ;;  %v7617_v50 = vrot.slane %v5797_v43, %v11957_v46  ;;  %v4797_v25 = vunpack.c.h.bf16 %v10311_v53 }
 0x571   : > { %v7613_v23 = vsel %vm6569_vm13, %v7612_v8, %v7608_v13  ;;  %5938 = vadd.xlane.f32.xlu1 %v5267_v61  ;;  %5940 = vadd.xlane.f32.xlu0 %v5268_v31  ;;  %v4796_v13 = vunpack.c.l.bf16 %v10311_v53  ;;  %v10312_v31 = vld [vmem:[%s10671_s16 + $0x4a8] sm:$0xff]  }
 0x572   : > { %v7618_v36 = vsel %vm6576_vm14, %v7617_v50, %v7613_v23  ;;  %v5799_v27 = vpop.xlane.xlu1 %5798  ;;  %v5801_v11 = vpop.xlane.xlu0 %5800  ;;  %v5275_v50 = vmul.f32 %v12903_v59, %v4795_v57  ;;  %v4798_v23 = vunpack.c.l.bf16 %v10312_v31  ;;  %v4799_v49 = vunpack.c.h.bf16 %v10312_v31 }
 0x573   : > { %v7622_v17 = vrot.slane %v5799_v27, %v11951_v10  ;;  %v7627_v47 = vrot.slane %v5801_v11, %v11972_v26  ;;  %v5276_v61 = vmul.f32 %v12903_v59, %v4796_v13  ;;  %v10316_v13 = vld [vmem:[%s10671_s16 + $0x4c8] sm:$0xff]  }
 0x575   : > { %v7623_v52 = vsel %vm6583_vm15, %v7622_v17, %v7618_v36  ;;  %5942 = vadd.xlane.f32.xlu1 %v5269_v14  ;;  %5944 = vadd.xlane.f32.xlu0 %v5270_v48  ;;  %v5277_v17 = vmul.f32 %v12903_v59, %v4797_v25  ;;  %v10313_v14 = vld [vmem:[%s10671_s16 + $0x4b0] sm:$0xff]  }
 0x576   : > { %v7628_v33 = vsel %vm6590_vm6, %v7627_v47, %v7623_v52  ;;  %v5803_v29 = vpop.xlane.xlu1 %5802  ;;  %v5805_v41 = vpop.xlane.xlu0 %5804  ;;  %v5278_v47 = vmul.f32 %v12903_v59, %v4798_v23  ;;  %v4800_v48 = vunpack.c.l.bf16 %v10313_v14  ;;  %v4447_v52 = vrot.slane %v12760_v24, 3 }
 0x577   : > { %v7632_v37 = vrot.slane %v5803_v29, %v11966_v45  ;;  %v7637_v19 = vrot.slane %v5805_v41, %v11987_v22  ;;  %v4801_v29 = vunpack.c.h.bf16 %v10313_v14  ;;  %v5279_v41 = vmul.f32 %v12903_v59, %v4799_v49 }
 0x578   : > { %v5280_v12 = vmul.f32 %v12903_v59, %v4800_v48 }
 0x579   : > { %v7633_v54 = vsel %vm6597_vm5, %v7632_v37, %v7628_v33  ;;  %5946 = vadd.xlane.f32.xlu1 %v5271_v6  ;;  %5948 = vadd.xlane.f32.xlu0 %v5272_v21  ;;  %v4495_v37 = vmul.f32 %v12167_v34, %v4447_v52  ;;  %v4803_v21 = vunpack.c.h.bf16 %v10314_v7 }
 0x57a   : > { %v7638_v58 = vsel %vm13636_vm2, %v7637_v19, %v7633_v54  ;;  %v5807_v42 = vpop.xlane.xlu1 %5806  ;;  %v5809_v40 = vpop.xlane.xlu0 %5808  ;;  %v5281_v54 = vmul.f32 %v12903_v59, %v4801_v29 }
 0x57b   : > { %v7642_v39 = vrot.slane %v5807_v42, %v11981_v2  ;;  %v7647_v63 = vrot.slane %v5809_v40, %v12001_v20  ;;  %v10315_v42 = vld [vmem:[%s10671_s16 + $0x4c0] sm:$0xff]   ;;  %v12974_v57 = vrot.slane %v4495_v37, %v11815_v15 }
 0x57c   : > { %v4804_v40 = vunpack.c.l.bf16 %v10315_v42  ;;  %v4805_v53 = vunpack.c.h.bf16 %v10315_v42 }
 0x57d   : > { %v7643_v43 = vsel %vm6611_vm3, %v7642_v39, %v7638_v58  ;;  %5950 = vadd.xlane.f32.xlu1 %v5273_v5  ;;  %5952 = vadd.xlane.f32.xlu0 %v5274_v0  ;;  %v5282_v58 = vmul.f32 %v12903_v59, %v4802_v38  ;;  %v5283_v5 = vmul.f32 %v12903_v59, %v4803_v21 }
 0x57e   : > { %v5811_v60 = vpop.xlane.xlu1 %5810  ;;  %v12938_v28 = vpop.xlane.xlu0 %5812  ;;  %v7648_v36 = vsel %vm13637_vm4, %v7647_v63, %v7643_v43  ;;  %v5284_v0 = vmul.f32 %v12974_v57, %v4804_v40  ;;  %v4806_v63 = vunpack.c.l.bf16 %v10316_v13  ;;  %v5285_v25 = vmul.f32 %v12974_v57, %v4805_v53  ;;  %v10320_v40 = vld [vmem:[%s10671_s16 + $0x4e8] sm:$0xff]   ;;  %vm13644_vm4 = vmmov %vm13636_vm2 }
 0x57f   : > { %v7652_v8 = vrot.slane %v5811_v60, %v11996_v55 }
 0x581   : > { %v7653_v27 = vsel %vm13638_vm1, %v7652_v8, %v7648_v36  ;;  %5954 = vadd.xlane.f32.xlu1 %v5275_v50  ;;  %5956 = vadd.xlane.f32.xlu0 %v5276_v61  ;;  %v5286_v8 = vmul.f32 %v12974_v57, %v4806_v63  ;;  %v4807_v50 = vunpack.c.h.bf16 %v10316_v13  ;;  %v10317_v61 = vld [vmem:[%s10671_s16 + $0x4d0] sm:$0xff]   ;;  %vm13645_vm1 = vcmask 982912  }
 0x582   : > { %v12948_v11 = vsel %vm13643_vm0, %v7653_v27, %v12882_v18  ;;  %v12950_v4 = vpop.xlane.xlu1 %5814  ;;  %v12952_v9 = vpop.xlane.xlu0 %5816  ;;  %v4808_v31 = vunpack.c.l.bf16 %v10317_v61  ;;  %v4809_v49 = vunpack.c.h.bf16 %v10317_v61  ;;  %vm13646_vm0 = vcmask 1048512  }
 0x583   : > { %v5287_v36 = vmul.f32 %v12974_v57, %v4807_v50  ;;  %v7661_v38 = vrot.slane %v12950_v4, %v11891_v62  ;;  %v7666_v53 = vrot.slane %v12952_v9, %v11908_v32  ;;  %v4815_v4 = vunpack.c.h.bf16 %v10320_v40  ;;  %v10321_v50 = vld [vmem:[%s10671_s16 + $0x4f0] sm:$0xff]  }
 0x584   : > { %v5288_v27 = vmul.f32 %v12974_v57, %v4808_v31  ;;  %v5289_v52 = vmul.f32 %v12974_v57, %v4809_v49  ;;  %v4816_v61 = vunpack.c.l.bf16 %v10321_v50  ;;  %v4448_v31 = vrot.slane %v12760_v24, 4 }
 0x585   : > { %5958 = vadd.xlane.f32.xlu1 %v5277_v17  ;;  %5960 = vadd.xlane.f32.xlu0 %v5278_v47  ;;  %v10318_v17 = vld [vmem:[%s10671_s16 + $0x4d8] sm:$0xff]  }
 0x586   : > { %v12958_v33 = vpop.xlane.xlu1 %5818  ;;  %v12960_v18 = vpop.xlane.xlu0 %5820  ;;  %v4810_v47 = vunpack.c.l.bf16 %v10318_v17 }
 0x587   : > { %v7671_v63 = vrot.slane %v12958_v33, %v11902_v51  ;;  %v7676_v33 = vrot.slane %v12960_v18, %v11923_v3  ;;  %v5296_v18 = vmul.f32 %v12974_v57, %v4816_v61 }
 0x588   : > { %v5290_v29 = vmul.f32 %v12974_v57, %v4810_v47 }
 0x589   : > { %5962 = vadd.xlane.f32.xlu1 %v5279_v41  ;;  %5964 = vadd.xlane.f32.xlu0 %v5280_v12  ;;  %v4811_v41 = vunpack.c.h.bf16 %v10318_v17  ;;  %v10319_v12 = vld [vmem:[%s10671_s16 + $0x4e0] sm:$0xff]  }
 0x58a   : > { %v12966_v19 = vpop.xlane.xlu1 %5822  ;;  %v12968_v6 = vpop.xlane.xlu0 %5824  ;;  %v4812_v7 = vunpack.c.l.bf16 %v10319_v12  ;;  %v4813_v42 = vunpack.c.h.bf16 %v10319_v12 }
 0x58c   : > { %v5293_v9 = vmul.f32 %v12974_v57, %v4813_v42  ;;  %v4496_v42 = vmul.f32 %v12178_v1, %v4448_v31 }
 0x58d   : > { %5966 = vadd.xlane.f32.xlu1 %v5281_v54  ;;  %5968 = vadd.xlane.f32.xlu0 %v5282_v58  ;;  %v5291_v54 = vmul.f32 %v12974_v57, %v4811_v41  ;;  %v5292_v58 = vmul.f32 %v12974_v57, %v4812_v7  ;;  %v4817_v7 = vunpack.c.h.bf16 %v10321_v50 }
 0x58e   : > { %v12976_v34 = vpop.xlane.xlu1 %5826  ;;  %v12978_v39 = vpop.xlane.xlu0 %5828 }
 0x58f   : > { %v5297_v31 = vmul.f32 %v12974_v57, %v4817_v7 }
 0x591   : > { %5970 = vadd.xlane.f32.xlu1 %v5283_v5  ;;  %5972 = vadd.xlane.f32.xlu0 %v5284_v0  ;;  %v4814_v5 = vunpack.c.l.bf16 %v10320_v40  ;;  %v7657_v0 = vrot.slane %v12938_v28, %v11895_v56 }
 0x592   : > { %v12983_v43 = vpop.xlane.xlu1 %5830  ;;  %v12985_v60 = vpop.xlane.xlu0 %5832 }
 0x593   : > { %v7662_v13 = vsel %vm6527_vm7, %v7661_v38, %v7657_v0  ;;  %v10322_v38 = vld [vmem:[%s10671_s16 + $0x4f8] sm:$0xff]   ;;  %v7686_v0 = vrot.slane %v12968_v6, %v11939_v30 }
 0x594   : > { %v7667_v17 = vsel %vm6534_vm8, %v7666_v53, %v7662_v13 }
 0x595   : > { %5974 = vadd.xlane.f32.xlu1 %v5285_v25  ;;  %5976 = vadd.xlane.f32.xlu0 %v5286_v8 }
 0x596   : > { %v12990_v59 = vpop.xlane.xlu1 %5834  ;;  %v12992_v23 = vpop.xlane.xlu0 %5836 }
 0x599   : > { %5978 = vadd.xlane.f32.xlu1 %v5287_v36  ;;  %5980 = vadd.xlane.f32.xlu0 %v5288_v27  ;;  %v5294_v27 = vmul.f32 %v12974_v57, %v4814_v5 }
 0x59a   : > { %v12997_v14 = vpop.xlane.xlu1 %5838  ;;  %v12999_v48 = vpop.xlane.xlu0 %5840 }
 0x59d   : > { %5982 = vadd.xlane.f32.xlu1 %v5289_v52  ;;  %5984 = vadd.xlane.f32.xlu0 %v5290_v29  ;;  %v7672_v52 = vsel %vm6541_vm9, %v7671_v63, %v7667_v17  ;;  %v7681_v29 = vrot.slane %v12966_v19, %v11917_v16 }
 0x59e   : > { %v13006_v37 = vpop.xlane.xlu1 %5842  ;;  %v5845_v21 = vpop.xlane.xlu0 %5844  ;;  %v7677_v19 = vsel %vm6548_vm10, %v7676_v33, %v7672_v52  ;;  %v7701_v33 = vrot.slane %v12983_v43, %v11951_v10  ;;  %v7706_v43 = vrot.slane %v12985_v60, %v11972_v26 }
 0x59f   : > { %v7736_v28 = vrot.slane %v5845_v21, %v11895_v56  ;;  %v4818_v21 = vunpack.c.l.bf16 %v10322_v38  ;;  %v7682_v13 = vsel %vm6555_vm11, %v7681_v29, %v7677_v19 }
 0x5a1   : > { %5986 = vadd.xlane.f32.xlu1 %v5291_v54  ;;  %5988 = vadd.xlane.f32.xlu0 %v5292_v58  ;;  %v5295_v58 = vmul.f32 %v12974_v57, %v4815_v4  ;;  %v7691_v4 = vrot.slane %v12976_v34, %v11933_v44  ;;  %v5298_v6 = vmul.f32 %v12974_v57, %v4818_v21 }
 0x5a2   : > { %v5847_v25 = vpop.xlane.xlu1 %5846  ;;  %v5849_v8 = vpop.xlane.xlu0 %5848  ;;  %v7687_v34 = vsel %vm6562_vm12, %v7686_v0, %v7682_v13 }
 0x5a3   : > { %v7740_v36 = vrot.slane %v5847_v25, %v11891_v62  ;;  %v7745_v49 = vrot.slane %v5849_v8, %v11908_v32  ;;  %v4819_v25 = vunpack.c.h.bf16 %v10322_v38  ;;  %v10323_v8 = vld [vmem:[%s10671_s16 + $0x500] sm:$0xff]   ;;  %v7692_v17 = vsel %vm6569_vm13, %v7691_v4, %v7687_v34  ;;  %v10324_v38 = vld [vmem:[%s10671_s16 + $0x508] sm:$0xff]   ;;  %v10325_v4 = vld [vmem:[%s10671_s16 + $0x510] sm:$0xff]  }
 0x5a4   : > { %v4820_v50 = vunpack.c.l.bf16 %v10323_v8  ;;  %v4821_v29 = vunpack.c.h.bf16 %v10323_v8  ;;  %v4823_v19 = vunpack.c.h.bf16 %v10324_v38  ;;  %v4824_v60 = vunpack.c.l.bf16 %v10325_v4 }
 0x5a5   : > { %v7741_v47 = vsel %vm6527_vm7, %v7740_v36, %v7736_v28  ;;  %5990 = vadd.xlane.f32.xlu1 %v5293_v9  ;;  %5992 = vadd.xlane.f32.xlu0 %v5294_v27  ;;  %v13051_v28 = vrot.slane %v4496_v42, %v11815_v15  ;;  %v7696_v27 = vrot.slane %v12978_v39, %v11957_v46  ;;  %v4822_v39 = vunpack.c.l.bf16 %v10324_v38 }
 0x5a6   : > { %v5851_v41 = vpop.xlane.xlu1 %5850  ;;  %v5853_v12 = vpop.xlane.xlu0 %5852  ;;  %v7746_v40 = vsel %vm6534_vm8, %v7745_v49, %v7741_v47  ;;  %v7711_v42 = vrot.slane %v12990_v59, %v11966_v45  ;;  %v7716_v59 = vrot.slane %v12992_v23, %v11987_v22 }
 0x5a7   : > { %v7750_v54 = vrot.slane %v5851_v41, %v11902_v51  ;;  %v7755_v5 = vrot.slane %v5853_v12, %v11923_v3  ;;  %v5299_v12 = vmul.f32 %v12974_v57, %v4819_v25  ;;  %v5300_v7 = vmul.f32 %v13051_v28, %v4820_v50 }
 0x5a8   : > { %v5302_v13 = vmul.f32 %v13051_v28, %v4822_v39  ;;  %v5303_v34 = vmul.f32 %v13051_v28, %v4823_v19 }
 0x5a9   : > { %v7751_v53 = vsel %vm6541_vm9, %v7750_v54, %v7746_v40  ;;  %5994 = vadd.xlane.f32.xlu1 %v5295_v58  ;;  %5996 = vadd.xlane.f32.xlu0 %v5296_v18  ;;  %v7697_v58 = vsel %vm6576_vm14, %v7696_v27, %v7692_v17  ;;  %v5304_v27 = vmul.f32 %v13051_v28, %v4824_v60 }
 0x5aa   : > { %v5855_v63 = vpop.xlane.xlu1 %5854  ;;  %v5857_v1 = vpop.xlane.xlu0 %5856  ;;  %v7756_v36 = vsel %vm6548_vm10, %v7755_v5, %v7751_v53  ;;  %v7702_v57 = vsel %vm6583_vm15, %v7701_v33, %v7697_v58  ;;  %v5301_v53 = vmul.f32 %v13051_v28, %v4821_v29 }
 0x5ab   : > { %v7760_v61 = vrot.slane %v5855_v63, %v11917_v16  ;;  %v7765_v9 = vrot.slane %v5857_v1, %v11939_v30  ;;  %v7707_v25 = vsel %vm6590_vm6, %v7706_v43, %v7702_v57 }
 0x5ac   : > { %v7712_v50 = vsel %vm6597_vm5, %v7711_v42, %v7707_v25 }
 0x5ad   : > { %v7761_v49 = vsel %vm6555_vm11, %v7760_v61, %v7756_v36  ;;  %5998 = vadd.xlane.f32.xlu1 %v5297_v31  ;;  %6000 = vadd.xlane.f32.xlu0 %v5298_v6  ;;  %v7721_v61 = vrot.slane %v12997_v14, %v11981_v2  ;;  %v4825_v36 = vunpack.c.h.bf16 %v10325_v4  ;;  %v7726_v14 = vrot.slane %v12999_v48, %v12001_v20  ;;  %v10327_v48 = vld [vmem:[%s10671_s16 + $0x520] sm:$0xff]   ;;  %v10328_v4 = vld [vmem:[%s10671_s16 + $0x528] sm:$0xff]  }
 0x5ae   : > { %v5859_v47 = vpop.xlane.xlu1 %5858  ;;  %v5861_v52 = vpop.xlane.xlu0 %5860  ;;  %v7766_v21 = vsel %vm6562_vm12, %v7765_v9, %v7761_v49  ;;  %v10326_v49 = vld [vmem:[%s10671_s16 + $0x518] sm:$0xff]   ;;  %v4828_v58 = vunpack.c.l.bf16 %v10327_v48  ;;  %v4829_v19 = vunpack.c.h.bf16 %v10327_v48  ;;  %v4830_v60 = vunpack.c.l.bf16 %v10328_v4 }
 0x5af   : > { %v7770_v41 = vrot.slane %v5859_v47, %v11933_v44  ;;  %v7775_v54 = vrot.slane %v5861_v52, %v11957_v46  ;;  %v4826_v23 = vunpack.c.l.bf16 %v10326_v49  ;;  %v7717_v47 = vsel %vm13636_vm2, %v7716_v59, %v7712_v50  ;;  %vm13647_vm2 = vmmov %vm13645_vm1 }
 0x5b0   : > { %v7722_v29 = vsel %vm6611_vm3, %v7721_v61, %v7717_v47  ;;  %v4827_v38 = vunpack.c.h.bf16 %v10326_v49  ;;  %v4831_v59 = vunpack.c.h.bf16 %v10328_v4  ;;  %v5310_v49 = vmul.f32 %v13051_v28, %v4830_v60 }
 0x5b1   : > { %v7771_v18 = vsel %vm6569_vm13, %v7770_v41, %v7766_v21  ;;  %6002 = vadd.xlane.f32.xlu1 %v5299_v12  ;;  %6004 = vadd.xlane.f32.xlu0 %v5300_v7  ;;  %v7731_v41 = vrot.slane %v13006_v37, %v11996_v55  ;;  %v5305_v21 = vmul.f32 %v13051_v28, %v4825_v36 }
 0x5b2   : > { %v5863_v40 = vpop.xlane.xlu1 %5862  ;;  %v5865_v5 = vpop.xlane.xlu0 %5864  ;;  %v7776_v63 = vsel %vm6576_vm14, %v7775_v54, %v7771_v18  ;;  %v5306_v54 = vmul.f32 %v13051_v28, %v4826_v23  ;;  %v7727_v57 = vsel %vm13645_vm1, %v7726_v14, %v7722_v29  ;;  %vm13649_vm1 = vmmov %vm13646_vm0 }
 0x5b3   : > { %v7780_v0 = vrot.slane %v5863_v40, %v11951_v10  ;;  %v7785_v1 = vrot.slane %v5865_v5, %v11972_v26  ;;  %v7732_v42 = vsel %vm13646_vm0, %v7731_v41, %v7727_v57  ;;  %vm13650_vm0 = vcmask 1047559  }
 0x5b5   : > { %v7781_v8 = vsel %vm6583_vm15, %v7780_v0, %v7776_v63  ;;  %6006 = vadd.xlane.f32.xlu1 %v5301_v53  ;;  %6008 = vadd.xlane.f32.xlu0 %v5302_v13  ;;  %v5307_v53 = vmul.f32 %v13051_v28, %v4827_v38  ;;  %v5308_v13 = vmul.f32 %v13051_v28, %v4828_v58 }
 0x5b6   : > { %v5867_v31 = vpop.xlane.xlu1 %5866  ;;  %v5869_v6 = vpop.xlane.xlu0 %5868  ;;  %v7786_v17 = vsel %vm6590_vm6, %v7785_v1, %v7781_v8  ;;  %v5311_v38 = vmul.f32 %v13051_v28, %v4831_v59 }
 0x5b7   : > { %v7790_v9 = vrot.slane %v5867_v31, %v11966_v45  ;;  %v7795_v33 = vrot.slane %v5869_v6, %v11987_v22  ;;  %v5309_v31 = vmul.f32 %v13051_v28, %v4829_v19  ;;  %v10329_v6 = vld [vmem:[%s10671_s16 + $0x530] sm:$0xff]  }
 0x5b8   : > { %v4832_v36 = vunpack.c.l.bf16 %v10329_v6  ;;  %v4833_v14 = vunpack.c.h.bf16 %v10329_v6 }
 0x5b9   : > { %v7791_v52 = vsel %vm6597_vm5, %v7790_v9, %v7786_v17  ;;  %6010 = vadd.xlane.f32.xlu1 %v5303_v34  ;;  %6012 = vadd.xlane.f32.xlu0 %v5304_v27  ;;  %v4449_v9 = vrot.slane %v12760_v24, 5 }
 0x5ba   : > { %v5871_v12 = vpop.xlane.xlu1 %5870  ;;  %v5873_v7 = vpop.xlane.xlu0 %5872  ;;  %v7796_v43 = vsel %vm13644_vm4, %v7795_v33, %v7791_v52  ;;  %vm13648_vm4 = vcmask 1046534   ;;  %v10330_v52 = vld [vmem:[%s10671_s16 + $0x538] sm:$0xff]  }
 0x5bb   : > { %v7800_v39 = vrot.slane %v5871_v12, %v11981_v2  ;;  %v7805_v18 = vrot.slane %v5873_v7, %v12001_v20  ;;  %v8456_v1 = vsel %vm13648_vm4, %v7732_v42, %v12948_v11  ;;  %v4834_v29 = vunpack.c.l.bf16 %v10330_v52 }
 0x5bc   : > { %v4497_v41 = vmul.f32 %v12189_v35, %v4449_v9  ;;  %v5313_v35 = vmul.f32 %v13051_v28, %v4833_v14  ;;  %vm13654_vm4 = vcmask 982912  }
 0x5bd   : > { %v7801_v37 = vsel %vm6611_vm3, %v7800_v39, %v7796_v43  ;;  %6014 = vadd.xlane.f32.xlu1 %v5305_v21  ;;  %6016 = vadd.xlane.f32.xlu0 %v5306_v54  ;;  %v5312_v39 = vmul.f32 %v13051_v28, %v4832_v36  ;;  %v4835_v54 = vunpack.c.h.bf16 %v10330_v52  ;;  %v10333_v36 = vld [vmem:[%s10671_s16 + $0x580] sm:$0xff]  }
 0x5be   : > { %v5875_v40 = vpop.xlane.xlu1 %5874  ;;  %v5877_v5 = vpop.xlane.xlu0 %5876  ;;  %v7806_v63 = vsel %vm13647_vm2, %v7805_v18, %v7801_v37  ;;  %v10331_v18 = vld [vmem:[%s10671_s16 + $0x540] sm:$0xff]   ;;  %v4450_v37 = vrot.slane %v12760_v24, 6  ;;  %v13144_v19 = vrot.slane %v4497_v41, %v11815_v15  ;;  %v4852_v9 = vunpack.c.l.bf16 %v10333_v36 }
 0x5bf   : > { %v7810_v0 = vrot.slane %v5875_v40, %v11996_v55  ;;  %v7815_v34 = vrot.slane %v5877_v5, %v11895_v56  ;;  %v4836_v57 = vunpack.c.l.bf16 %v10331_v18  ;;  %v5314_v5 = vmul.f32 %v13051_v28, %v4834_v29 }
 0x5c0   : > { %v4837_v60 = vunpack.c.h.bf16 %v10331_v18  ;;  %vm13653_vm2 = vcmask 851712  }
 0x5c1   : > { %v7811_v25 = vsel %vm13649_vm1, %v7810_v0, %v7806_v63  ;;  %6018 = vadd.xlane.f32.xlu1 %v5307_v53  ;;  %6020 = vadd.xlane.f32.xlu0 %v5308_v13  ;;  %v10332_v63 = vld [vmem:[%s10671_s16 + $0x548] sm:$0xff]  }
 0x5c2   : > { %v8457_v8 = vsel %vm13650_vm0, %v7811_v25, %v8456_v1  ;;  %v5879_v50 = vpop.xlane.xlu1 %5878  ;;  %v5881_v61 = vpop.xlane.xlu0 %5880  ;;  %v4838_v1 = vunpack.c.l.bf16 %v10332_v63  ;;  %v13651_v25 = vld [vmem:[#allocation12_spill] sm:$0xff]  ;;  %vm13655_vm0 = vmmov %vm13653_vm2 }
 0x5c3   : > { %8469 = vst [vmem:[%s12560_s13 + $0x8] sm:$0xff] %v8457_v8  ;;  %v7819_v11 = vrot.slane %v5879_v50, %v11891_v62  ;;  %v7824_v27 = vrot.slane %v5881_v61, %v11908_v32  ;;  %v4498_v59 = vmul.f32 %v13651_v25, %v4450_v37  ;;  %v5315_v61 = vmul.f32 %v13051_v28, %v4835_v54 }
 0x5c4   : > { %v5318_v14 = vmul.f32 %v13144_v19, %v4838_v1 }
 0x5c5   : > { %v7820_v23 = vsel %vm6527_vm7, %v7819_v11, %v7815_v34  ;;  %6022 = vadd.xlane.f32.xlu1 %v5309_v31  ;;  %6024 = vadd.xlane.f32.xlu0 %v5310_v49  ;;  %v5316_v31 = vmul.f32 %v13144_v19, %v4836_v57  ;;  %v13158_v49 = vrot.slane %v4498_v59, %v11815_v15 }
 0x5c6   : > { %v7825_v17 = vsel %vm6534_vm8, %v7824_v27, %v7820_v23  ;;  %v5883_v33 = vpop.xlane.xlu1 %5882  ;;  %v5885_v47 = vpop.xlane.xlu0 %5884  ;;  %v4853_v23 = vunpack.c.h.bf16 %v10333_v36 }
 0x5c7   : > { %v7829_v12 = vrot.slane %v5883_v33, %v11902_v51  ;;  %v7834_v7 = vrot.slane %v5885_v47, %v11923_v3  ;;  %v5317_v47 = vmul.f32 %v13144_v19, %v4837_v60 }
 0x5c9   : > { %v7830_v21 = vsel %vm6541_vm9, %v7829_v12, %v7825_v17  ;;  %6026 = vadd.xlane.f32.xlu1 %v5311_v38  ;;  %6028 = vadd.xlane.f32.xlu0 %v5312_v39  ;;  %v4451_v17 = vrot.slane %v12760_v24, 7  ;;  %v10334_v38 = vld [vmem:[%s10671_s16 + $0x588] sm:$0xff]   ;;  %v13652_v39 = vld [vmem:[#allocation13_spill] sm:$0xff] }
 0x5ca   : > { %v7835_v48 = vsel %vm6548_vm10, %v7834_v7, %v7830_v21  ;;  %v5887_v58 = vpop.xlane.xlu1 %5886  ;;  %v5889_v43 = vpop.xlane.xlu0 %5888  ;;  %v4839_v7 = vunpack.c.h.bf16 %v10332_v63  ;;  %v4854_v24 = vunpack.c.l.bf16 %v10334_v38  ;;  %v4855_v36 = vunpack.c.h.bf16 %v10334_v38 }
 0x5cb   : > { %v7839_v42 = vrot.slane %v5887_v58, %v11917_v16  ;;  %v7844_v40 = vrot.slane %v5889_v43, %v11939_v30  ;;  %v4499_v21 = vmul.f32 %v13652_v39, %v4451_v17  ;;  %v5332_v58 = vmul.f32 %v13158_v49, %v4852_v9 }
 0x5cc   : > { %v5333_v43 = vmul.f32 %v13158_v49, %v4853_v23 }
 0x5cd   : > { %v7840_v0 = vsel %vm6555_vm11, %v7839_v42, %v7835_v48  ;;  %6030 = vadd.xlane.f32.xlu1 %v5313_v35  ;;  %6032 = vadd.xlane.f32.xlu0 %v5314_v5  ;;  %v5319_v42 = vmul.f32 %v13144_v19, %v4839_v7  ;;  %v13181_v60 = vrot.slane %v4499_v21, %v11815_v15  ;;  %v10338_v7 = vld [vmem:[%s10671_s16 + $0x590] sm:$0xff]  }
 0x5ce   : > { %v7845_v53 = vsel %vm6562_vm12, %v7844_v40, %v7840_v0  ;;  %v5891_v13 = vpop.xlane.xlu1 %5890  ;;  %v5893_v4 = vpop.xlane.xlu0 %5892  ;;  %v10335_v40 = vld [vmem:[%s10671_s16 + $0x5c0] sm:$0xff]   ;;  %v4856_v38 = vunpack.c.l.bf16 %v10338_v7 }
 0x5cf   : > { %v7849_v8 = vrot.slane %v5891_v13, %v11933_v44  ;;  %v7854_v50 = vrot.slane %v5893_v4, %v11957_v46  ;;  %v4868_v5 = vunpack.c.l.bf16 %v10335_v40  ;;  %v4869_v0 = vunpack.c.h.bf16 %v10335_v40 }
 0x5d0   : > { %v5334_v4 = vmul.f32 %v13158_v49, %v4854_v24 }
 0x5d1   : > { %v7850_v6 = vsel %vm6569_vm13, %v7849_v8, %v7845_v53  ;;  %6034 = vadd.xlane.f32.xlu1 %v5315_v61  ;;  %6036 = vadd.xlane.f32.xlu0 %v5316_v31  ;;  %v10336_v8 = vld [vmem:[%s10671_s16 + $0x550] sm:$0xff]   ;;  %v5348_v31 = vmul.f32 %v13181_v60, %v4868_v5 }
 0x5d2   : > { %v7855_v34 = vsel %vm6576_vm14, %v7854_v50, %v7850_v6  ;;  %v5895_v11 = vpop.xlane.xlu1 %5894  ;;  %v5897_v27 = vpop.xlane.xlu0 %5896  ;;  %v4840_v50 = vunpack.c.l.bf16 %v10336_v8  ;;  %v5349_v6 = vmul.f32 %v13181_v60, %v4869_v0  ;;  %v4841_v17 = vunpack.c.h.bf16 %v10336_v8 }
 0x5d3   : > { %v7859_v28 = vrot.slane %v5895_v11, %v11951_v10  ;;  %v7864_v33 = vrot.slane %v5897_v27, %v11972_v26  ;;  %v10337_v27 = vld [vmem:[%s10671_s16 + $0x5c8] sm:$0xff]   ;;  %v5336_v0 = vmul.f32 %v13158_v49, %v4856_v38 }
 0x5d4   : > { %v5320_v11 = vmul.f32 %v13144_v19, %v4840_v50  ;;  %v4870_v23 = vunpack.c.l.bf16 %v10337_v27  ;;  %v4871_v24 = vunpack.c.h.bf16 %v10337_v27  ;;  %v10341_v27 = vld [vmem:[%s10671_s16 + $0x598] sm:$0xff]  }
 0x5d5   : > { %v7860_v52 = vsel %vm6583_vm15, %v7859_v28, %v7855_v34  ;;  %6038 = vadd.xlane.f32.xlu1 %v5317_v47  ;;  %6040 = vadd.xlane.f32.xlu0 %v5318_v14  ;;  %v5335_v14 = vmul.f32 %v13158_v49, %v4855_v36 }
 0x5d6   : > { %v7865_v29 = vsel %vm6590_vm6, %v7864_v33, %v7860_v52  ;;  %v5899_v41 = vpop.xlane.xlu1 %5898  ;;  %v5901_v12 = vpop.xlane.xlu0 %5900 }
 0x5d7   : > { %v7869_v54 = vrot.slane %v5899_v41, %v11966_v45  ;;  %v7874_v48 = vrot.slane %v5901_v12, %v11987_v22 }
 0x5d9   : > { %v7870_v35 = vsel %vm6597_vm5, %v7869_v54, %v7865_v29  ;;  %6068 = vadd.xlane.f32.xlu1 %v5332_v58  ;;  %6070 = vadd.xlane.f32.xlu0 %v5333_v43  ;;  %v5350_v54 = vmul.f32 %v13181_v60, %v4870_v23  ;;  %v4858_v23 = vunpack.c.l.bf16 %v10341_v27 }
 0x5da   : > { %v7875_v18 = vsel %vm13653_vm2, %v7874_v48, %v7870_v35  ;;  %v5903_v57 = vpop.xlane.xlu1 %5902  ;;  %v5905_v37 = vpop.xlane.xlu0 %5904  ;;  %v5321_v48 = vmul.f32 %v13144_v19, %v4841_v17  ;;  %vm13656_vm2 = vmmov %vm13654_vm4 }
 0x5db   : > { %v7879_v53 = vrot.slane %v5903_v57, %v11981_v2  ;;  %v7884_v13 = vrot.slane %v5905_v37, %v12001_v20  ;;  %v10339_v57 = vld [vmem:[%s10671_s16 + $0x558] sm:$0xff]  }
 0x5dc   : > { %v4842_v37 = vunpack.c.l.bf16 %v10339_v57  ;;  %v4843_v8 = vunpack.c.h.bf16 %v10339_v57  ;;  %v10343_v57 = vld [vmem:[%s10671_s16 + $0x5d8] sm:$0xff]  }
 0x5dd   : > { %v7880_v63 = vsel %vm6611_vm3, %v7879_v53, %v7875_v18  ;;  %6042 = vadd.xlane.f32.xlu1 %v5319_v42  ;;  %6072 = vadd.xlane.f32.xlu0 %v5334_v4  ;;  %v4857_v42 = vunpack.c.h.bf16 %v10338_v7  ;;  %v5351_v53 = vmul.f32 %v13181_v60, %v4871_v24  ;;  %v10342_v7 = vld [vmem:[%s10671_s16 + $0x560] sm:$0xff]   ;;  %v4859_v24 = vunpack.c.h.bf16 %v10341_v27  ;;  %v10345_v27 = vld [vmem:[%s10671_s16 + $0x568] sm:$0xff]  }
 0x5de   : > { %v7885_v1 = vsel %vm13654_vm4, %v7884_v13, %v7880_v63  ;;  %v5907_v25 = vpop.xlane.xlu1 %5906  ;;  %v5909_v59 = vpop.xlane.xlu0 %5908  ;;  %v4844_v38 = vunpack.c.l.bf16 %v10342_v7  ;;  %vm13657_vm4 = vmmov %vm13649_vm1 }
 0x5df   : > { %v7889_v61 = vrot.slane %v5907_v25, %v11996_v55  ;;  %v7894_v28 = vrot.slane %v5909_v59, %v11895_v56  ;;  %v10340_v25 = vld [vmem:[%s10671_s16 + $0x5d0] sm:$0xff]  }
 0x5e0   : > { %v4872_v59 = vunpack.c.l.bf16 %v10340_v25  ;;  %v4873_v17 = vunpack.c.h.bf16 %v10340_v25  ;;  %v10344_v25 = vld [vmem:[%s10671_s16 + $0x5a0] sm:$0xff]  }
 0x5e1   : > { %v13190_v15 = vsel %vm13649_vm1, %v7889_v61, %v7885_v1  ;;  %6100 = vadd.xlane.f32.xlu1 %v5348_v31  ;;  %6102 = vadd.xlane.f32.xlu0 %v5349_v6  ;;  %v5322_v31 = vmul.f32 %v13144_v19, %v4842_v37  ;;  %v5337_v6 = vmul.f32 %v13158_v49, %v4857_v42  ;;  %v4874_v37 = vunpack.c.l.bf16 %v10343_v57 }
 0x5e2   : > { %v5911_v9 = vpop.xlane.xlu1 %5910  ;;  %v5913_v34 = vpop.xlane.xlu0 %5912  ;;  %v4845_v42 = vunpack.c.h.bf16 %v10342_v7  ;;  %vm13658_vm1 = vcmask 1041409  }
 0x5e3   : > { %v7898_v33 = vrot.slane %v5911_v9, %v11891_v62  ;;  %v7903_v47 = vrot.slane %v5913_v34, %v11908_v32 }
 0x5e5   : > { %v7899_v52 = vsel %vm6527_vm7, %v7898_v33, %v7894_v28  ;;  %6044 = vadd.xlane.f32.xlu1 %v5320_v11  ;;  %6074 = vadd.xlane.f32.xlu0 %v5335_v14  ;;  %v5323_v14 = vmul.f32 %v13144_v19, %v4843_v8 }
 0x5e6   : > { %v7904_v29 = vsel %vm6534_vm8, %v7903_v47, %v7899_v52  ;;  %v5915_v41 = vpop.xlane.xlu1 %5914  ;;  %v5917_v12 = vpop.xlane.xlu0 %5916  ;;  %v5352_v47 = vmul.f32 %v13181_v60, %v4872_v59  ;;  %v4860_v59 = vunpack.c.l.bf16 %v10344_v25 }
 0x5e7   : > { %v7908_v39 = vrot.slane %v5915_v41, %v11902_v51  ;;  %v7913_v21 = vrot.slane %v5917_v12, %v11923_v3 }
 0x5e9   : > { %v7909_v58 = vsel %vm6541_vm9, %v7908_v39, %v7904_v29  ;;  %6104 = vadd.xlane.f32.xlu1 %v5350_v54  ;;  %6046 = vadd.xlane.f32.xlu0 %v5321_v48  ;;  %v5338_v54 = vmul.f32 %v13158_v49, %v4858_v23  ;;  %v5353_v48 = vmul.f32 %v13181_v60, %v4873_v17  ;;  %v4846_v23 = vunpack.c.l.bf16 %v10345_v27 }
 0x5ea   : > { %v7914_v43 = vsel %vm6548_vm10, %v7913_v21, %v7909_v58  ;;  %v5919_v35 = vpop.xlane.xlu1 %5918  ;;  %v5921_v18 = vpop.xlane.xlu0 %5920  ;;  %v4861_v17 = vunpack.c.h.bf16 %v10344_v25 }
 0x5eb   : > { %v7918_v40 = vrot.slane %v5919_v35, %v11917_v16  ;;  %v7923_v5 = vrot.slane %v5921_v18, %v11939_v30 }
 0x5ed   : > { %v7919_v13 = vsel %vm6555_vm11, %v7918_v40, %v7914_v43  ;;  %6076 = vadd.xlane.f32.xlu1 %v5336_v0  ;;  %6106 = vadd.xlane.f32.xlu0 %v5351_v53  ;;  %v5324_v0 = vmul.f32 %v13144_v19, %v4844_v38  ;;  %v5339_v53 = vmul.f32 %v13158_v49, %v4859_v24  ;;  %v4847_v38 = vunpack.c.h.bf16 %v10345_v27  ;;  %v10349_v27 = vld [vmem:[%s10671_s16 + $0x5e8] sm:$0xff]  }
 0x5ee   : > { %v7924_v4 = vsel %vm6562_vm12, %v7923_v5, %v7919_v13  ;;  %v5923_v63 = vpop.xlane.xlu1 %5922  ;;  %v5925_v1 = vpop.xlane.xlu0 %5924 }
 0x5ef   : > { %v7928_v50 = vrot.slane %v5923_v63, %v11933_v44  ;;  %v7933_v61 = vrot.slane %v5925_v1, %v11957_v46 }
 0x5f1   : > { %v7929_v36 = vsel %vm6569_vm13, %v7928_v50, %v7924_v4  ;;  %6048 = vadd.xlane.f32.xlu1 %v5322_v31  ;;  %6078 = vadd.xlane.f32.xlu0 %v5337_v6  ;;  %v5354_v50 = vmul.f32 %v13181_v60, %v4874_v37  ;;  %v4875_v31 = vunpack.c.h.bf16 %v10343_v57 }
 0x5f2   : > { %v7934_v9 = vsel %vm6576_vm14, %v7933_v61, %v7929_v36  ;;  %v5927_v34 = vpop.xlane.xlu1 %5926  ;;  %v5929_v11 = vpop.xlane.xlu0 %5928  ;;  %v5325_v61 = vmul.f32 %v13144_v19, %v4845_v42 }
 0x5f3   : > { %v7938_v28 = vrot.slane %v5927_v34, %v11951_v10  ;;  %v7943_v33 = vrot.slane %v5929_v11, %v11972_v26  ;;  %v5340_v11 = vmul.f32 %v13158_v49, %v4860_v59 }
 0x5f5   : > { %v7939_v52 = vsel %vm6583_vm15, %v7938_v28, %v7934_v9  ;;  %6108 = vadd.xlane.f32.xlu1 %v5352_v47  ;;  %6050 = vadd.xlane.f32.xlu0 %v5323_v14  ;;  %v5355_v14 = vmul.f32 %v13181_v60, %v4875_v31 }
 0x5f6   : > { %v7944_v29 = vsel %vm6590_vm6, %v7943_v33, %v7939_v52  ;;  %v5931_v41 = vpop.xlane.xlu1 %5930  ;;  %v5933_v12 = vpop.xlane.xlu0 %5932 }
 0x5f7   : > { %v7948_v39 = vrot.slane %v5931_v41, %v11966_v45  ;;  %v7953_v21 = vrot.slane %v5933_v12, %v11987_v22  ;;  %v10346_v12 = vld [vmem:[%s10671_s16 + $0x5e0] sm:$0xff]  }
 0x5f8   : > { %v4876_v7 = vunpack.c.l.bf16 %v10346_v12  ;;  %v4877_v37 = vunpack.c.h.bf16 %v10346_v12  ;;  %v10350_v12 = vld [vmem:[%s10671_s16 + $0x5b0] sm:$0xff]  }
 0x5f9   : > { %v7949_v58 = vsel %vm6597_vm5, %v7948_v39, %v7944_v29  ;;  %6080 = vadd.xlane.f32.xlu1 %v5338_v54  ;;  %6110 = vadd.xlane.f32.xlu0 %v5353_v48  ;;  %v5341_v54 = vmul.f32 %v13158_v49, %v4861_v17 }
 0x5fa   : > { %v7954_v43 = vsel %vm13655_vm0, %v7953_v21, %v7949_v58  ;;  %v5935_v35 = vpop.xlane.xlu1 %5934  ;;  %v5937_v18 = vpop.xlane.xlu0 %5936  ;;  %v5326_v21 = vmul.f32 %v13144_v19, %v4846_v23  ;;  %v5357_v31 = vmul.f32 %v13181_v60, %v4877_v37  ;;  %v4878_v23 = vunpack.c.l.bf16 %v10349_v27 }
 0x5fb   : > { %v7958_v40 = vrot.slane %v5935_v35, %v11981_v2  ;;  %v7963_v5 = vrot.slane %v5937_v18, %v12001_v20  ;;  %v10347_v18 = vld [vmem:[%s10671_s16 + $0x5a8] sm:$0xff]   ;;  %v4865_v37 = vunpack.c.h.bf16 %v10350_v12 }
 0x5fc   : > { %v4862_v57 = vunpack.c.l.bf16 %v10347_v18  ;;  %v4863_v59 = vunpack.c.h.bf16 %v10347_v18  ;;  %v10351_v18 = vld [vmem:[%s10671_s16 + $0x578] sm:$0xff]  }
 0x5fd   : > { %v7959_v13 = vsel %vm6611_vm3, %v7958_v40, %v7954_v43  ;;  %6052 = vadd.xlane.f32.xlu1 %v5324_v0  ;;  %6082 = vadd.xlane.f32.xlu0 %v5339_v53  ;;  %v5327_v0 = vmul.f32 %v13144_v19, %v4847_v38  ;;  %v4879_v38 = vunpack.c.h.bf16 %v10349_v27  ;;  %v10353_v27 = vld [vmem:[%s10671_s16 + $0x5b8] sm:$0xff]  }
 0x5fe   : > { %v7964_v4 = vsel %vm13656_vm2, %v7963_v5, %v7959_v13  ;;  %v5939_v63 = vpop.xlane.xlu1 %5938  ;;  %v5941_v1 = vpop.xlane.xlu0 %5940  ;;  %v5356_v5 = vmul.f32 %v13181_v60, %v4876_v7  ;;  %v4864_v7 = vunpack.c.l.bf16 %v10350_v12  ;;  %v10354_v12 = vld [vmem:[%s10671_s16 + $0x5f8] sm:$0xff]  }
 0x5ff   : > { %v7968_v8 = vrot.slane %v5939_v63, %v11996_v55  ;;  %v7973_v28 = vrot.slane %v5941_v1, %v11895_v56  ;;  %v10348_v1 = vld [vmem:[%s10671_s16 + $0x570] sm:$0xff]  }
 0x600   : > { %v4848_v25 = vunpack.c.l.bf16 %v10348_v1  ;;  %v4849_v17 = vunpack.c.h.bf16 %v10348_v1  ;;  %v10352_v1 = vld [vmem:[%s10671_s16 + $0x5f0] sm:$0xff]   ;;  %s8777_s16 = smul.u32 384, %s10543_s3 }
 0x601   : > { %v7969_v6 = vsel %vm13657_vm4, %v7968_v8, %v7964_v4  ;;  %6112 = vadd.xlane.f32.xlu1 %v5354_v50  ;;  %6054 = vadd.xlane.f32.xlu0 %v5325_v61  ;;  %v5342_v61 = vmul.f32 %v13158_v49, %v4862_v57  ;;  %v4850_v57 = vunpack.c.l.bf16 %v10351_v18 }
 0x602   : > { %v13249_v36 = vsel %vm13658_vm1, %v7969_v6, %v13190_v15  ;;  %v5943_v9 = vpop.xlane.xlu1 %5942  ;;  %v5945_v34 = vpop.xlane.xlu0 %5944  ;;  %vm13659_vm1 = vcmask 1042434   ;;  %s13528_s3 = scalar_lea.hbm %s13581_s4, %s8777_s16 }
 0x603   : > { %v7977_v33 = vrot.slane %v5943_v9, %v11891_v62  ;;  %v7982_v47 = vrot.slane %v5945_v34, %v11908_v32 }
 0x605   : > { %v7978_v52 = vsel %vm6527_vm7, %v7977_v33, %v7973_v28  ;;  %6084 = vadd.xlane.f32.xlu1 %v5340_v11  ;;  %6114 = vadd.xlane.f32.xlu0 %v5355_v14  ;;  %v5343_v14 = vmul.f32 %v13158_v49, %v4863_v59 }
 0x606   : > { %v7983_v15 = vsel %vm6534_vm8, %v7982_v47, %v7978_v52  ;;  %v5947_v29 = vpop.xlane.xlu1 %5946  ;;  %v5949_v41 = vpop.xlane.xlu0 %5948  ;;  %v5328_v47 = vmul.f32 %v13144_v19, %v4848_v25  ;;  %v4880_v25 = vunpack.c.l.bf16 %v10352_v1 }
 0x607   : > { %v7987_v24 = vrot.slane %v5947_v29, %v11902_v51  ;;  %v7992_v39 = vrot.slane %v5949_v41, %v11923_v3 }
 0x609   : > { %v7988_v48 = vsel %vm6541_vm9, %v7987_v24, %v7983_v15  ;;  %6056 = vadd.xlane.f32.xlu1 %v5326_v21  ;;  %6086 = vadd.xlane.f32.xlu0 %v5341_v54  ;;  %v5358_v21 = vmul.f32 %v13181_v60, %v4878_v23  ;;  %v5329_v54 = vmul.f32 %v13144_v19, %v4849_v17  ;;  %v4866_v23 = vunpack.c.l.bf16 %v10353_v27 }
 0x60a   : > { %v7993_v58 = vsel %vm6548_vm10, %v7992_v39, %v7988_v48  ;;  %v5951_v43 = vpop.xlane.xlu1 %5950  ;;  %v5953_v35 = vpop.xlane.xlu0 %5952  ;;  %v4881_v17 = vunpack.c.h.bf16 %v10352_v1 }
 0x60b   : > { %v7997_v42 = vrot.slane %v5951_v43, %v11917_v16  ;;  %v8002_v40 = vrot.slane %v5953_v35, %v11939_v30 }
 0x60d   : > { %v7998_v53 = vsel %vm6555_vm11, %v7997_v42, %v7993_v58  ;;  %6116 = vadd.xlane.f32.xlu1 %v5356_v5  ;;  %6058 = vadd.xlane.f32.xlu0 %v5327_v0  ;;  %v5344_v5 = vmul.f32 %v13158_v49, %v4864_v7  ;;  %v5359_v0 = vmul.f32 %v13181_v60, %v4879_v38  ;;  %v4882_v7 = vunpack.c.l.bf16 %v10354_v12 }
 0x60e   : > { %v8003_v13 = vsel %vm6562_vm12, %v8002_v40, %v7998_v53  ;;  %v5955_v4 = vpop.xlane.xlu1 %5954  ;;  %v5957_v63 = vpop.xlane.xlu0 %5956 }
 0x60f   : > { %v8007_v8 = vrot.slane %v5955_v4, %v11933_v44  ;;  %v8012_v50 = vrot.slane %v5957_v63, %v11957_v46 }
 0x611   : > { %v8008_v6 = vsel %vm6569_vm13, %v8007_v8, %v8003_v13  ;;  %6088 = vadd.xlane.f32.xlu1 %v5342_v61  ;;  %6118 = vadd.xlane.f32.xlu0 %v5357_v31  ;;  %v5330_v8 = vmul.f32 %v13144_v19, %v4850_v57  ;;  %v4851_v61 = vunpack.c.h.bf16 %v10351_v18 }
 0x612   : > { %v8013_v9 = vsel %vm6576_vm14, %v8012_v50, %v8008_v6  ;;  %v5959_v34 = vpop.xlane.xlu1 %5958  ;;  %v5961_v11 = vpop.xlane.xlu0 %5960  ;;  %v5345_v50 = vmul.f32 %v13158_v49, %v4865_v37  ;;  %v5362_v37 = vmul.f32 %v13181_v60, %v4882_v7 }
 0x613   : > { %v8017_v28 = vrot.slane %v5959_v34, %v11951_v10  ;;  %v8022_v33 = vrot.slane %v5961_v11, %v11972_v26  ;;  %v5360_v11 = vmul.f32 %v13181_v60, %v4880_v25 }
 0x615   : > { %v8018_v52 = vsel %vm6583_vm15, %v8017_v28, %v8013_v9  ;;  %6060 = vadd.xlane.f32.xlu1 %v5328_v47  ;;  %6090 = vadd.xlane.f32.xlu0 %v5343_v14  ;;  %v5331_v14 = vmul.f32 %v13144_v19, %v4851_v61 }
 0x616   : > { %v8023_v15 = vsel %vm6590_vm6, %v8022_v33, %v8018_v52  ;;  %v5963_v29 = vpop.xlane.xlu1 %5962  ;;  %v5965_v41 = vpop.xlane.xlu0 %5964 }
 0x617   : > { %v8027_v24 = vrot.slane %v5963_v29, %v11966_v45  ;;  %v8032_v39 = vrot.slane %v5965_v41, %v11987_v22  ;;  %v4867_v41 = vunpack.c.h.bf16 %v10353_v27 }
 0x619   : > { %v8028_v48 = vsel %vm6597_vm5, %v8027_v24, %v8023_v15  ;;  %6120 = vadd.xlane.f32.xlu1 %v5358_v21  ;;  %6062 = vadd.xlane.f32.xlu0 %v5329_v54  ;;  %v5361_v21 = vmul.f32 %v13181_v60, %v4881_v17  ;;  %v5347_v57 = vmul.f32 %v13158_v49, %v4867_v41 }
 0x61a   : > { %v8033_v58 = vsel %vm13655_vm0, %v8032_v39, %v8028_v48  ;;  %v5967_v43 = vpop.xlane.xlu1 %5966  ;;  %v5969_v35 = vpop.xlane.xlu0 %5968  ;;  %v5346_v39 = vmul.f32 %v13158_v49, %v4866_v23 }
 0x61b   : > { %v8037_v42 = vrot.slane %v5967_v43, %v11981_v2  ;;  %v8042_v40 = vrot.slane %v5969_v35, %v12001_v20  ;;  %v4883_v43 = vunpack.c.h.bf16 %v10354_v12 }
 0x61d   : > { %v8038_v53 = vsel %vm6611_vm3, %v8037_v42, %v8033_v58  ;;  %6092 = vadd.xlane.f32.xlu1 %v5344_v5  ;;  %6122 = vadd.xlane.f32.xlu0 %v5359_v0 }
 0x61e   : > { %v8043_v13 = vsel %vm13656_vm2, %v8042_v40, %v8038_v53  ;;  %v5971_v4 = vpop.xlane.xlu1 %5970  ;;  %v5973_v63 = vpop.xlane.xlu0 %5972 }
 0x61f   : > { %v8047_v59 = vrot.slane %v5971_v4, %v11996_v55  ;;  %v8052_v28 = vrot.slane %v5973_v63, %v11895_v56  ;;  %v5363_v4 = vmul.f32 %v13181_v60, %v4883_v43 }
 0x621   : > { %v8048_v31 = vsel %vm13657_vm4, %v8047_v59, %v8043_v13  ;;  %6064 = vadd.xlane.f32.xlu1 %v5330_v8  ;;  %6094 = vadd.xlane.f32.xlu0 %v5345_v50 }
 0x622   : > { %v13308_v6 = vsel %vm13659_vm1, %v8048_v31, %v13249_v36  ;;  %v5975_v9 = vpop.xlane.xlu1 %5974  ;;  %v5977_v34 = vpop.xlane.xlu0 %5976  ;;  %vm13660_vm1 = vcmask 1043459  }
 0x623   : > { %v8056_v33 = vrot.slane %v5975_v9, %v11891_v62  ;;  %v8061_v47 = vrot.slane %v5977_v34, %v11908_v32 }
 0x625   : > { %v8057_v52 = vsel %vm6527_vm7, %v8056_v33, %v8052_v28  ;;  %6124 = vadd.xlane.f32.xlu1 %v5360_v11  ;;  %6066 = vadd.xlane.f32.xlu0 %v5331_v14 }
 0x626   : > { %v8062_v36 = vsel %vm6534_vm8, %v8061_v47, %v8057_v52  ;;  %v5979_v15 = vpop.xlane.xlu1 %5978  ;;  %v5981_v29 = vpop.xlane.xlu0 %5980 }
 0x627   : > { %v8066_v38 = vrot.slane %v5979_v15, %v11902_v51  ;;  %v8071_v24 = vrot.slane %v5981_v29, %v11923_v3 }
 0x629   : > { %v8067_v19 = vsel %vm6541_vm9, %v8066_v38, %v8062_v36  ;;  %6096 = vadd.xlane.f32.xlu1 %v5346_v39  ;;  %6126 = vadd.xlane.f32.xlu0 %v5361_v21 }
 0x62a   : > { %v8072_v54 = vsel %vm6548_vm10, %v8071_v24, %v8067_v19  ;;  %v5983_v48 = vpop.xlane.xlu1 %5982  ;;  %v5985_v58 = vpop.xlane.xlu0 %5984 }
 0x62b   : > { %v8076_v35 = vrot.slane %v5983_v48, %v11917_v16  ;;  %v8081_v18 = vrot.slane %v5985_v58, %v11939_v30 }
 0x62d   : > { %v8077_v42 = vsel %vm6555_vm11, %v8076_v35, %v8072_v54  ;;  %6098 = vadd.xlane.f32.xlu1 %v5347_v57  ;;  %6128 = vadd.xlane.f32.xlu0 %v5362_v37 }
 0x62e   : > { %v8082_v40 = vsel %vm6562_vm12, %v8081_v18, %v8077_v42  ;;  %v5987_v5 = vpop.xlane.xlu1 %5986  ;;  %v5989_v0 = vpop.xlane.xlu0 %5988 }
 0x62f   : > { %v8086_v53 = vrot.slane %v5987_v5, %v11933_v44  ;;  %v8091_v13 = vrot.slane %v5989_v0, %v11957_v46 }
 0x631   : > { %v8087_v63 = vsel %vm6569_vm13, %v8086_v53, %v8082_v40  ;;  %6130 = vadd.xlane.f32.xlu1 %v5363_v4 }
 0x632   : > { %v8092_v49 = vsel %vm6576_vm14, %v8091_v13, %v8087_v63  ;;  %v5991_v1 = vpop.xlane.xlu1 %5990  ;;  %v5993_v25 = vpop.xlane.xlu0 %5992 }
 0x633   : > { %v8096_v59 = vrot.slane %v5991_v1, %v11951_v10  ;;  %v8101_v8 = vrot.slane %v5993_v25, %v11972_v26 }
 0x635   : > { %v8097_v50 = vsel %vm6583_vm15, %v8096_v59, %v8092_v49 }
 0x636   : > { %v8102_v61 = vsel %vm6590_vm6, %v8101_v8, %v8097_v50  ;;  %v5995_v31 = vpop.xlane.xlu1 %5994  ;;  %v5997_v9 = vpop.xlane.xlu0 %5996 }
 0x637   : > { %v8106_v34 = vrot.slane %v5995_v31, %v11966_v45  ;;  %v8111_v60 = vrot.slane %v5997_v9, %v11987_v22 }
 0x639   : > { %v8107_v11 = vsel %vm6597_vm5, %v8106_v34, %v8102_v61 }
 0x63a   : > { %v8112_v27 = vsel %vm13655_vm0, %v8111_v60, %v8107_v11  ;;  %v5999_v23 = vpop.xlane.xlu1 %5998  ;;  %v6001_v17 = vpop.xlane.xlu0 %6000 }
 0x63b   : > { %v8116_v28 = vrot.slane %v5999_v23, %v11981_v2  ;;  %v8121_v33 = vrot.slane %v6001_v17, %v12001_v20 }
 0x63d   : > { %v8117_v47 = vsel %vm6611_vm3, %v8116_v28, %v8112_v27 }
 0x63e   : > { %v8122_v14 = vsel %vm13656_vm2, %v8121_v33, %v8117_v47  ;;  %v6003_v52 = vpop.xlane.xlu1 %6002  ;;  %v6005_v36 = vpop.xlane.xlu0 %6004 }
 0x63f   : > { %v8126_v15 = vrot.slane %v6003_v52, %v11996_v55  ;;  %v8131_v38 = vrot.slane %v6005_v36, %v11895_v56 }
 0x641   : > { %v8127_v29 = vsel %vm13657_vm4, %v8126_v15, %v8122_v14 }
 0x642   : > { %v8460_v41 = vsel %vm13660_vm1, %v8127_v29, %v13308_v6  ;;  %v6007_v12 = vpop.xlane.xlu1 %6006  ;;  %v6009_v7 = vpop.xlane.xlu0 %6008  ;;  %vm13661_vm1 = vcmask 1044484  }
 0x643   : > { %v8135_v24 = vrot.slane %v6007_v12, %v11891_v62  ;;  %v8140_v39 = vrot.slane %v6009_v7, %v11908_v32 }
 0x645   : > { %v8136_v21 = vsel %vm6527_vm7, %v8135_v24, %v8131_v38 }
 0x646   : > { %v8141_v19 = vsel %vm6534_vm8, %v8140_v39, %v8136_v21  ;;  %v6011_v54 = vpop.xlane.xlu1 %6010  ;;  %v6013_v48 = vpop.xlane.xlu0 %6012 }
 0x647   : > { %v8145_v58 = vrot.slane %v6011_v54, %v11902_v51  ;;  %v8150_v43 = vrot.slane %v6013_v48, %v11923_v3 }
 0x649   : > { %v8146_v6 = vsel %vm6541_vm9, %v8145_v58, %v8141_v19 }
 0x64a   : > { %v8151_v35 = vsel %vm6548_vm10, %v8150_v43, %v8146_v6  ;;  %v6015_v18 = vpop.xlane.xlu1 %6014  ;;  %v6017_v57 = vpop.xlane.xlu0 %6016 }
 0x64b   : > { %v8155_v37 = vrot.slane %v6015_v18, %v11917_v16  ;;  %v8160_v42 = vrot.slane %v6017_v57, %v11939_v30 }
 0x64d   : > { %v8156_v40 = vsel %vm6555_vm11, %v8155_v37, %v8151_v35 }
 0x64e   : > { %v8161_v5 = vsel %vm6562_vm12, %v8160_v42, %v8156_v40  ;;  %v6019_v0 = vpop.xlane.xlu1 %6018  ;;  %v6021_v53 = vpop.xlane.xlu0 %6020 }
 0x64f   : > { %v8165_v13 = vrot.slane %v6019_v0, %v11933_v44  ;;  %v8170_v4 = vrot.slane %v6021_v53, %v11957_v46 }
 0x651   : > { %v8166_v63 = vsel %vm6569_vm13, %v8165_v13, %v8161_v5 }
 0x652   : > { %v8171_v49 = vsel %vm6576_vm14, %v8170_v4, %v8166_v63  ;;  %v6023_v1 = vpop.xlane.xlu1 %6022  ;;  %v6025_v25 = vpop.xlane.xlu0 %6024 }
 0x653   : > { %v8175_v59 = vrot.slane %v6023_v1, %v11951_v10  ;;  %v8180_v8 = vrot.slane %v6025_v25, %v11972_v26 }
 0x655   : > { %v8176_v50 = vsel %vm6583_vm15, %v8175_v59, %v8171_v49 }
 0x656   : > { %v8181_v61 = vsel %vm6590_vm6, %v8180_v8, %v8176_v50  ;;  %v6027_v31 = vpop.xlane.xlu1 %6026  ;;  %v6029_v9 = vpop.xlane.xlu0 %6028 }
 0x657   : > { %v8185_v34 = vrot.slane %v6027_v31, %v11966_v45  ;;  %v8190_v60 = vrot.slane %v6029_v9, %v11987_v22 }
 0x659   : > { %v8186_v11 = vsel %vm6597_vm5, %v8185_v34, %v8181_v61 }
 0x65a   : > { %v8191_v27 = vsel %vm13655_vm0, %v8190_v60, %v8186_v11  ;;  %v6031_v23 = vpop.xlane.xlu1 %6030  ;;  %v6033_v17 = vpop.xlane.xlu0 %6032 }
 0x65b   : > { %v8195_v28 = vrot.slane %v6031_v23, %v11981_v2  ;;  %v8200_v33 = vrot.slane %v6033_v17, %v12001_v20 }
 0x65d   : > { %v8196_v47 = vsel %vm6611_vm3, %v8195_v28, %v8191_v27 }
 0x65e   : > { %v8201_v14 = vsel %vm13656_vm2, %v8200_v33, %v8196_v47  ;;  %v6035_v52 = vpop.xlane.xlu1 %6034  ;;  %v6037_v36 = vpop.xlane.xlu0 %6036 }
 0x65f   : > { %v8205_v15 = vrot.slane %v6035_v52, %v11996_v55  ;;  %v8210_v24 = vrot.slane %v6037_v36, %v11895_v56 }
 0x661   : > { %v8206_v29 = vsel %vm13657_vm4, %v8205_v15, %v8201_v14 }
 0x662   : > { %v13384_v12 = vsel %vm13661_vm1, %v8206_v29, %v8460_v41  ;;  %v6039_v7 = vpop.xlane.xlu1 %6038  ;;  %v6041_v38 = vpop.xlane.xlu0 %6040 }
 0x663   : > { %v8214_v39 = vrot.slane %v6039_v7, %v11891_v62  ;;  %v8219_v21 = vrot.slane %v6041_v38, %v11908_v32 }
 0x665   : > { %v8215_v19 = vsel %vm6527_vm7, %v8214_v39, %v8210_v24 }
 0x666   : > { %v8220_v54 = vsel %vm6534_vm8, %v8219_v21, %v8215_v19  ;;  %v6069_v48 = vpop.xlane.xlu1 %6068  ;;  %v6071_v58 = vpop.xlane.xlu0 %6070 }
 0x667   : > { %v8289_v43 = vrot.slane %v6069_v48, %v11895_v56  ;;  %v8293_v6 = vrot.slane %v6071_v58, %v11891_v62 }
 0x669   : > { %v8294_v41 = vsel %vm6527_vm7, %v8293_v6, %v8289_v43 }
 0x66a   : > { %v6043_v35 = vpop.xlane.xlu1 %6042  ;;  %v6073_v18 = vpop.xlane.xlu0 %6072 }
 0x66b   : > { %v8224_v57 = vrot.slane %v6043_v35, %v11902_v51  ;;  %v8298_v37 = vrot.slane %v6073_v18, %v11908_v32 }
 0x66d   : > { %v8225_v42 = vsel %vm6541_vm9, %v8224_v57, %v8220_v54  ;;  %v8299_v40 = vsel %vm6534_vm8, %v8298_v37, %v8294_v41 }
 0x66e   : > { %v6101_v5 = vpop.xlane.xlu1 %6100  ;;  %v6103_v0 = vpop.xlane.xlu0 %6102 }
 0x66f   : > { %v8368_v19 = vrot.slane %v6101_v5, %v11895_v56  ;;  %v8372_v6 = vrot.slane %v6103_v0, %v11891_v62 }
 0x672   : > { %v6045_v53 = vpop.xlane.xlu1 %6044  ;;  %v6075_v13 = vpop.xlane.xlu0 %6074 }
 0x673   : > { %v8229_v29 = vrot.slane %v6045_v53, %v11923_v3  ;;  %v8303_v41 = vrot.slane %v6075_v13, %v11902_v51 }
 0x675   : > { %v8230_v54 = vsel %vm6548_vm10, %v8229_v29, %v8225_v42 }
 0x676   : > { %v6105_v4 = vpop.xlane.xlu1 %6104  ;;  %v6047_v63 = vpop.xlane.xlu0 %6046 }
 0x677   : > { %v8234_v24 = vrot.slane %v6047_v63, %v11917_v16  ;;  %v8377_v57 = vrot.slane %v6105_v4, %v11908_v32 }
 0x679   : > { %v8235_v35 = vsel %vm6555_vm11, %v8234_v24, %v8230_v54 }
 0x67a   : > { %v6077_v49 = vpop.xlane.xlu1 %6076  ;;  %v6107_v1 = vpop.xlane.xlu0 %6106 }
 0x67b   : > { %v8308_v42 = vrot.slane %v6077_v49, %v11923_v3  ;;  %v8382_v5 = vrot.slane %v6107_v1, %v11902_v51  ;;  %v8304_v49 = vsel %vm6541_vm9, %v8303_v41, %v8299_v40 }
 0x67e   : > { %v6049_v25 = vpop.xlane.xlu1 %6048  ;;  %v6079_v59 = vpop.xlane.xlu0 %6078 }
 0x67f   : > { %v8239_v39 = vrot.slane %v6049_v25, %v11939_v30  ;;  %v8313_v0 = vrot.slane %v6079_v59, %v11917_v16 }
 0x681   : > { %v8240_v56 = vsel %vm6562_vm12, %v8239_v39, %v8235_v35 }
 0x682   : > { %v6109_v8 = vpop.xlane.xlu1 %6108  ;;  %v6051_v50 = vpop.xlane.xlu0 %6050 }
 0x683   : > { %v8244_v21 = vrot.slane %v6051_v50, %v11933_v44  ;;  %v8387_v13 = vrot.slane %v6109_v8, %v11923_v3  ;;  %v8373_v50 = vsel %vm6527_vm7, %v8372_v6, %v8368_v19  ;;  %vm13662_vm7 = vmmov %vm13655_vm0 }
 0x685   : > { %v8245_v53 = vsel %vm6569_vm13, %v8244_v21, %v8240_v56 }
 0x686   : > { %v13398_v61 = vpop.xlane.xlu1 %6080  ;;  %v13400_v31 = vpop.xlane.xlu0 %6110 }
 0x687   : > { %v8318_v59 = vrot.slane %v13398_v61, %v11939_v30  ;;  %v8392_v21 = vrot.slane %v13400_v31, %v11917_v16 }
 0x68a   : > { %v6053_v9 = vpop.xlane.xlu1 %6052  ;;  %v13402_v34 = vpop.xlane.xlu0 %6082 }
 0x68b   : > { %v8249_v48 = vrot.slane %v6053_v9, %v11957_v46  ;;  %v8378_v9 = vsel %vm6534_vm8, %v8377_v57, %v8373_v50  ;;  %v8323_v40 = vrot.slane %v13402_v34, %v11933_v44  ;;  %vm13663_vm8 = vmmov %vm13656_vm2 }
 0x68d   : > { %v8250_v63 = vsel %vm6576_vm14, %v8249_v48, %v8245_v53 }
 0x68e   : > { %v13404_v60 = vpop.xlane.xlu1 %6112  ;;  %v6055_v11 = vpop.xlane.xlu0 %6054 }
 0x68f   : > { %v8254_v18 = vrot.slane %v6055_v11, %v11951_v10  ;;  %v8309_v11 = vsel %vm6548_vm10, %v8308_v42, %v8304_v49  ;;  %v8397_v6 = vrot.slane %v13404_v60, %v11939_v30 }
 0x691   : > { %v8255_v51 = vsel %vm6583_vm15, %v8254_v18, %v8250_v63 }
 0x692   : > { %v13406_v27 = vpop.xlane.xlu1 %6084  ;;  %v13408_v23 = vpop.xlane.xlu0 %6114 }
 0x693   : > { %v8328_v61 = vrot.slane %v13406_v27, %v11957_v46  ;;  %v8402_v16 = vrot.slane %v13408_v23, %v11933_v44 }
 0x696   : > { %v6057_v17 = vpop.xlane.xlu1 %6056  ;;  %v13410_v28 = vpop.xlane.xlu0 %6086 }
 0x697   : > { %v8259_v37 = vrot.slane %v6057_v17, %v11972_v26  ;;  %v8383_v17 = vsel %vm6541_vm9, %v8382_v5, %v8378_v9  ;;  %v8333_v19 = vrot.slane %v13410_v28, %v11951_v10  ;;  %vm13664_vm9 = vmmov %vm13657_vm4 }
 0x698   : > { %v8388_v29 = vsel %vm6548_vm10, %v8387_v13, %v8383_v17  ;;  %vm13665_vm10 = vcmask 1045509  }
 0x699   : > { %v8260_v3 = vsel %vm6590_vm6, %v8259_v37, %v8255_v51  ;;  %v8393_v44 = vsel %vm6555_vm11, %v8392_v21, %v8388_v29 }
 0x69a   : > { %v13412_v33 = vpop.xlane.xlu1 %6116  ;;  %v6059_v47 = vpop.xlane.xlu0 %6058  ;;  %v8398_v42 = vsel %vm6562_vm12, %v8397_v6, %v8393_v44 }
 0x69b   : > { %v8264_v62 = vrot.slane %v6059_v47, %v11966_v45  ;;  %v8407_v30 = vrot.slane %v13412_v33, %v11957_v46 }
 0x69d   : > { %v8265_v47 = vsel %vm6597_vm5, %v8264_v62, %v8260_v3 }
 0x69e   : > { %v13414_v14 = vpop.xlane.xlu1 %6088  ;;  %v13416_v52 = vpop.xlane.xlu0 %6118 }
 0x69f   : > { %v8338_v27 = vrot.slane %v13414_v14, %v11972_v26 }
 0x6a2   : > { %v6061_v36 = vpop.xlane.xlu1 %6060  ;;  %v13418_v15 = vpop.xlane.xlu0 %6090 }
 0x6a3   : > { %v8269_v32 = vrot.slane %v6061_v36, %v11987_v22  ;;  %v8314_v36 = vsel %vm6555_vm11, %v8313_v0, %v8309_v11  ;;  %v8343_v31 = vrot.slane %v13418_v15, %v11966_v45  ;;  %v8412_v15 = vrot.slane %v13416_v52, %v11951_v10  ;;  %vm13666_vm11 = vmmov %vm13655_vm0 }
 0x6a4   : > { %v8319_v48 = vsel %vm6562_vm12, %v8318_v59, %v8314_v36  ;;  %vm13667_vm12 = vmmov %vm13656_vm2 }
 0x6a5   : > { %v8324_v35 = vsel %vm6569_vm13, %v8323_v40, %v8319_v48 }
 0x6a6   : > { %v13421_v7 = vpop.xlane.xlu1 %6120  ;;  %v6063_v38 = vpop.xlane.xlu0 %6062  ;;  %v8329_v18 = vsel %vm6576_vm14, %v8328_v61, %v8324_v35 }
 0x6a7   : > { %v8274_v1 = vrot.slane %v6063_v38, %v11981_v2  ;;  %v8270_v38 = vsel %vm13662_vm7, %v8269_v32, %v8265_v47  ;;  %v8334_v23 = vsel %vm6583_vm15, %v8333_v19, %v8329_v18  ;;  %v8417_v33 = vrot.slane %v13421_v7, %v11972_v26 }
 0x6a8   : > { %v8339_v46 = vsel %vm6590_vm6, %v8338_v27, %v8334_v23 }
 0x6a9   : > { %v8275_v34 = vsel %vm6611_vm3, %v8274_v1, %v8270_v38  ;;  %v8344_v5 = vsel %vm6597_vm5, %v8343_v31, %v8339_v46 }
 0x6aa   : > { %v13429_v58 = vpop.xlane.xlu1 %6092  ;;  %v13431_v43 = vpop.xlane.xlu0 %6122 }
 0x6ab   : > { %v8348_v60 = vrot.slane %v13429_v58, %v11987_v22  ;;  %v8403_v58 = vsel %vm6569_vm13, %v8402_v16, %v8398_v42  ;;  %v8422_v53 = vrot.slane %v13431_v43, %v11966_v45  ;;  %vm13668_vm13 = vmmov %vm13657_vm4 }
 0x6ac   : > { %v8408_v10 = vsel %vm6576_vm14, %v8407_v30, %v8403_v58  ;;  %vm13669_vm14 = vmmov %vm13655_vm0  ;;  %vm13673_vm0 = vcmask 1047559  }
 0x6ad   : > { %v8349_v52 = vsel %vm13666_vm11, %v8348_v60, %v8344_v5  ;;  %v8413_v26 = vsel %vm6583_vm15, %v8412_v15, %v8408_v10  ;;  %vm13670_vm15 = vcmask 1046534  }
 0x6ae   : > { %v6065_v4 = vpop.xlane.xlu1 %6064  ;;  %v6095_v25 = vpop.xlane.xlu0 %6094 }
 0x6af   : > { %v8279_v8 = vrot.slane %v6065_v4, %v12001_v20  ;;  %v8353_v37 = vrot.slane %v6095_v25, %v11981_v2  ;;  %v8418_v4 = vsel %vm6590_vm6, %v8417_v33, %v8413_v26  ;;  %vm13671_vm6 = vmmov %vm13656_vm2 }
 0x6b1   : > { %v8280_v41 = vsel %vm13663_vm8, %v8279_v8, %v8275_v34  ;;  %v8354_v7 = vsel %vm6611_vm3, %v8353_v37, %v8349_v52 }
 0x6b2   : > { %v6125_v24 = vpop.xlane.xlu1 %6124  ;;  %v6067_v39 = vpop.xlane.xlu0 %6066 }
 0x6b3   : > { %v8284_v54 = vrot.slane %v6067_v39, %v11996_v55  ;;  %v8427_v62 = vrot.slane %v6125_v24, %v11987_v22  ;;  %v8423_v22 = vsel %vm6597_vm5, %v8422_v53, %v8418_v4  ;;  %vm13672_vm5 = vmmov %vm13657_vm4 }
 0x6b5   : > { %v8285_v28 = vsel %vm13664_vm9, %v8284_v54, %v8280_v41  ;;  %v8428_v50 = vsel %vm13669_vm14, %v8427_v62, %v8423_v22 }
 0x6b6   : > { %v8462_v14 = vsel %vm13665_vm10, %v8285_v28, %v13384_v12  ;;  %v6097_v57 = vpop.xlane.xlu1 %6096  ;;  %v6127_v56 = vpop.xlane.xlu0 %6126 }
 0x6b7   : > { %v8358_v12 = vrot.slane %v6097_v57, %v12001_v20  ;;  %v8432_v63 = vrot.slane %v6127_v56, %v11981_v2 }
 0x6b9   : > { %v8359_v45 = vsel %vm13667_vm12, %v8358_v12, %v8354_v7  ;;  %v8433_v51 = vsel %vm6611_vm3, %v8432_v63, %v8428_v50 }
 0x6ba   : > { %v6099_v0 = vpop.xlane.xlu1 %6098  ;;  %v6129_v13 = vpop.xlane.xlu0 %6128 }
 0x6bb   : > { %v8363_v32 = vrot.slane %v6099_v0, %v11996_v55  ;;  %v8437_v43 = vrot.slane %v6129_v13, %v12001_v20 }
 0x6bd   : > { %v8364_v25 = vsel %vm13668_vm13, %v8363_v32, %v8359_v45  ;;  %v8438_v9 = vsel %vm13671_vm6, %v8437_v43, %v8433_v51 }
 0x6be   : > { %v8463_v2 = vsel %vm13670_vm15, %v8364_v25, %v8462_v14  ;;  %v6131_v49 = vpop.xlane.xlu1 %6130 }
 0x6bf   : > { %v8442_v1 = vrot.slane %v6131_v49, %v11996_v55 }
 0x6c1   : > { %v8443_v20 = vsel %vm13672_vm5, %v8442_v1, %v8438_v9 }
 0x6c2   : > { %v8464_v59 = vsel %vm13673_vm0, %v8443_v20, %v8463_v2 }
 0x6c3   : > { %8470 = vst [vmem:[%s12560_s13 + $0x10] sm:$0xff] %v8464_v59 }
 0x6c4   : > { %10426 = shalt.err (!%p10423_p7)
}
 0x6c5   : > { %s10427_s6 = scalar_lea.hbm %s13528_s3, 384  ;;  %s10431_s12 = scalar_lea.hbm %s13581_s4, 768 }
 0x6c6   : > { %p10428_p9 = scmp.ne.s32.totalorder %s13528_s3, %s10427_s6  ;;  %p10432_p5 = scmp.lt.u32.totalorder %s13528_s3, %s13581_s4 }
 0x6c7   : > { %p10433_p13 = scmp.lt.u32.totalorder %s10431_s12, %s10427_s6  ;;  %p10435_p4 = scmp.lt.u32.totalorder %s10427_s6, %s13528_s3 }
 0x6c8   : > { %p10429_p1 = pnand %p10428_p9, %p10616_p12 }
 0x6c9   : > { %p10434_p2 = por %p10433_p13, %p10432_p5 }
 0x6ca   : > { %p10430_p0 = pneg %p10429_p1 }
 0x6cb   : > { %p10436_p6 = por %p10435_p4, %p10434_p2 }
 0x6cd   : > { %p10437_p8 = pnand %p10436_p6, %p10430_p0 }
 0x6cf   : > { %10440 = shalt.err (!%p10437_p8)
}
 0x6d0   : > { %s10492_s24 = smov 128   ;;  %s10493_s13 = smov 8  }
 0x6d1   : > { %9652 = dma.vmem_to_hbm [thread:$0]  (%p10616_p12), %s13531_s14, 384, %s13528_s3, %s8472_s9, %s10492_s24, %s10492_s24, %s10493_s13  }
 0x6d2 PF: > { %s8500_s16 = sand.u32 1, %s10471_s17   ;;  %p13674_p10 = scmp.ne.s32.totalorder %s13600_s23, 0 }
 0x6d3   : > { %p13675_p11 = scmp.ge.s32.totalorder %s10483_s20, 2  ;;  %s8501_s7 = scalar_lea.sflag [#allocation5], %s8500_s16 }
 0x6d5   : > { %p9663_p3 = pnand %p13675_p11, %p13674_p10 }
 0x6d7   : > { %10466 = dma.done.wait (!%p9663_p3), %s8501_s7, 384  }
 0x6d8   : > { %10468 = vsyncadd (!%p9663_p3), %s8501_s7, 4294966912  ;;  %p19_p7 = scmp.ge.s32.totalorder %s10578_s28, 4   ;;  %s13676_s17 = smov %s10475_s18 }
 0x6d9   : > { %s13677_s18 = smov %s10479_s19  ;;  %s13678_s19 = smov %s10612_s21 }
 0x6da   : > { %s13679_s20 = smov %s10578_s28  ;;  %21 = sbr.rel (!%p19_p7) target bundleno = 8 (0x8), region = 85 }
 0x6e1   :  { %8506 = vsyncpa [#allocation4], 1 }
 0x6e2   :  { %8508 = vsyncpa [#allocation4 + $0x1], 1 }
 0x6e3   :  { %8509 = vsyncpa [#allocation7], 1 }
 0x6e4   :  { %8510 = vsyncpa [#allocation5], 1 }
 0x6e5   :  { %8512 = vsyncpa [#allocation5 + $0x1], 1 }

</bundles_post_ra>
